<compile_context>
chip_gen: v6e
topology: v6e:2x2x1
jax: 0.10.0
libtpu: 0.0.40
codegen_flags: <defaults>
</compile_context>

<pallas_src>
import functools
import math

import jax
import jax.numpy as jnp
from jax.experimental import pallas as pl
from jax.experimental.pallas import tpu as pltpu

_INV_SQRT2 = 1.0 / math.sqrt(2.0)


def _gelu_exact(x):
    # PyTorch nn.GELU() default (approximate='none'): x * 0.5 * (1 + erf(x/sqrt(2)))
    return 0.5 * x * (1.0 + jax.lax.erf(x * _INV_SQRT2))


def _nbytes(a):
    return int(a.size) * a.dtype.itemsize


def _full_spec(shape):
    zeros = (0,) * len(shape)
    return pl.BlockSpec(tuple(shape), lambda i, _z=zeros: _z)


# ---------------- Pallas kernels ----------------

def _conv_gelu_kernel(p_ref, w_ref, b_ref, o_ref):
    # o = gelu(patches @ W + b); BN scale already folded into W's columns.
    acc = jnp.dot(p_ref[...], w_ref[...], preferred_element_type=jnp.float32)
    o_ref[...] = _gelu_exact(acc + b_ref[...]).astype(o_ref.dtype)


def _conv_skip_kernel(p_ref, w_ref, b_ref, ws_ref, bs_ref, o_ref, *, c_in):
    # conv path uses the full patch matrix; the 1x1/stride-2 skip path uses the center tap
    # (dh=1,dw=1 -> column block 4 of the dh-major/dw-minor im2col) = columns [4*c_in, 5*c_in).
    # Residual is added AFTER the GELU, matching the module.
    conv = jnp.dot(p_ref[...], w_ref[...], preferred_element_type=jnp.float32)
    conv = _gelu_exact(conv + b_ref[...])
    skip = jnp.dot(p_ref[:, 4 * c_in:5 * c_in], ws_ref[...],
                   preferred_element_type=jnp.float32)
    o_ref[...] = (conv + skip + bs_ref[...]).astype(o_ref.dtype)


def _conv_skip_head_kernel(p_ref, w_ref, b_ref, ws_ref, bs_ref,
                           w1_ref, b1_ref, w2_ref, b2_ref, o_ref, *, c_in, batch):
    # conv3 + skip2 (center tap), GELU before the residual add.
    conv = jnp.dot(p_ref[...], w_ref[...], preferred_element_type=jnp.float32)
    conv = _gelu_exact(conv + b_ref[...])
    skip = jnp.dot(p_ref[:, 4 * c_in:5 * c_in], ws_ref[...],
                   preferred_element_type=jnp.float32)
    # x3 rows are ordered (spatial s = h*4+w, batch b): row = s*batch + b.
    x3 = (conv + skip + bs_ref[...]).astype(w1_ref.dtype)          # (16*batch, 256)

    # AdaptiveAvgPool2d((4,4)) on the 4x4 map is the identity.  The NHWC flatten + fc1 is
    # computed as 16 accumulated dots against the pre-permuted (16, 256, 512) fc1 weight
    # blocks, so the flatten never materializes and the hidden activation stays in VMEM.
    n_spatial = w1_ref.shape[0]
    acc = jnp.zeros((batch, w1_ref.shape[2]), jnp.float32)
    for s in range(n_spatial):
        acc = acc + jnp.dot(x3[s * batch:(s + 1) * batch, :], w1_ref[s],
                            preferred_element_type=jnp.float32)
    h = _gelu_exact(acc + b1_ref[...]).astype(w2_ref.dtype)        # (batch, 512)
    out = jnp.dot(h, w2_ref[...], preferred_element_type=jnp.float32) + b2_ref[...]
    o_ref[...] = out.astype(o_ref.dtype)


# ---------------- pallas_call wrappers (single grid step each) ----------------

_ARB = pltpu.CompilerParams(dimension_semantics=("arbitrary",))


def conv_gelu_call(p, w, b):
    M, K = p.shape
    N = w.shape[1]
    ce = pl.CostEstimate(flops=2 * M * K * N, transcendentals=M * N,
                         bytes_accessed=_nbytes(p) + _nbytes(w) + _nbytes(b) + M * N * 2)
    return pl.pallas_call(
        _conv_gelu_kernel,
        out_shape=jax.ShapeDtypeStruct((M, N), jnp.bfloat16),
        grid=(1,),
        in_specs=[_full_spec(p.shape), _full_spec(w.shape), _full_spec(b.shape)],
        out_specs=_full_spec((M, N)),
        compiler_params=_ARB,
        cost_estimate=ce,
    )(p, w, b)


def conv_skip_call(p, w, b, ws, bs, *, c_in):
    M, K = p.shape
    N = w.shape[1]
    ce = pl.CostEstimate(
        flops=2 * M * K * N + 2 * M * c_in * N, transcendentals=M * N,
        bytes_accessed=_nbytes(p) + _nbytes(w) + _nbytes(b) + _nbytes(ws) + _nbytes(bs) + M * N * 2)
    kernel = functools.partial(_conv_skip_kernel, c_in=c_in)
    return pl.pallas_call(
        kernel,
        out_shape=jax.ShapeDtypeStruct((M, N), jnp.bfloat16),
        grid=(1,),
        in_specs=[_full_spec(p.shape), _full_spec(w.shape), _full_spec(b.shape),
                  _full_spec(ws.shape), _full_spec(bs.shape)],
        out_specs=_full_spec((M, N)),
        compiler_params=_ARB,
        cost_estimate=ce,
    )(p, w, b, ws, bs)


def conv_skip_head_call(p, w, b, ws, bs, w1, b1, w2, b2, *, c_in, batch):
    M, K = p.shape
    N = w.shape[1]
    S, _, NH = w1.shape
    NC = w2.shape[1]
    flops = (2 * M * K * N + 2 * M * c_in * N + 2 * batch * S * N * NH + 2 * batch * NH * NC)
    bytes_acc = sum(_nbytes(a) for a in (p, w, b, ws, bs, w1, b1, w2, b2)) + batch * NC * 4
    ce = pl.CostEstimate(flops=flops, transcendentals=M * N + batch * NH,
                         bytes_accessed=bytes_acc)
    kernel = functools.partial(_conv_skip_head_kernel, c_in=c_in, batch=batch)
    return pl.pallas_call(
        kernel,
        out_shape=jax.ShapeDtypeStruct((batch, NC), jnp.float32),
        grid=(1,),
        in_specs=[_full_spec(p.shape), _full_spec(w.shape), _full_spec(b.shape),
                  _full_spec(ws.shape), _full_spec(bs.shape),
                  _full_spec(w1.shape), _full_spec(b1.shape),
                  _full_spec(w2.shape), _full_spec(b2.shape)],
        out_specs=_full_spec((batch, NC)),
        compiler_params=pltpu.CompilerParams(dimension_semantics=("arbitrary",),
                                             vmem_limit_bytes=32 * 1024 * 1024),
        cost_estimate=ce,
    )(p, w, b, ws, bs, w1, b1, w2, b2)


# ---------------- glue: im2col / layout / BN folding ----------------

def im2col_3x3_s2_p1(x_nhwc, *, row_order="bhw", pad_k_to=None):
    """3x3, stride 2, pad 1 patch extraction.

    Column blocks are ordered dh-major / dw-minor, so block 4 (columns [4C, 5C)) is the
    (dh=1, dw=1) center tap == x[:, ::2, ::2, :], i.e. exactly the 1x1/stride-2 skip input.
    Returns the (rows, 9*C [padded]) patch matrix and (B, Ho, Wo).
    """
    B, H, W, C = x_nhwc.shape
    Ho, Wo = (H - 1) // 2 + 1, (W - 1) // 2 + 1
    xp = jnp.pad(x_nhwc, ((0, 0), (1, 1), (1, 1), (0, 0)))
    cols = [xp[:, dh:dh + 2 * Ho:2, dw:dw + 2 * Wo:2, :]
            for dh in range(3) for dw in range(3)]
    cols = jnp.concatenate(cols, axis=-1)                  # (B, Ho, Wo, 9*C)
    if row_order == "hwb":                                 # rows ordered (h, w, b)
        cols = jnp.transpose(cols, (1, 2, 0, 3))
        mat = cols.reshape(Ho * Wo * B, 9 * C)
    else:                                                  # rows ordered (b, h, w)
        mat = cols.reshape(B * Ho * Wo, 9 * C)
    if pad_k_to is not None and pad_k_to > 9 * C:
        mat = jnp.pad(mat, ((0, 0), (0, pad_k_to - 9 * C)))
    return mat, (B, Ho, Wo)


def conv3x3_weight_to_matrix(w_oihw):
    """PyTorch (Cout, Cin, 3, 3) -> (9*Cin, Cout) matching the im2col column order."""
    return jnp.transpose(w_oihw, (2, 3, 1, 0)).reshape(-1, w_oihw.shape[0])


def fold_bn(conv_bias, gamma, beta, mean, var, eps=1e-5):
    scale = gamma / jnp.sqrt(var + eps)
    bias = (conv_bias - mean) * scale + beta
    return scale, bias


def prepare_params(p, compute_dtype=jnp.bfloat16, eps=1e-5):
    """One-time weight prep (NOT per forward): conv->matrix with BN folded, conv1 K padded
    27->32, 1x1 skips -> (Cin,Cout), fc1 re-blocked to (16,256,512) for the fused head."""
    q = {}
    for name in ("c1", "c2", "c3"):
        w = conv3x3_weight_to_matrix(p[f"{name}_w"])                 # (9*Cin, Cout) f32
        scale, bias = fold_bn(p[f"{name}_b"], p[f"{name}_g"], p[f"{name}_beta"],
                              p[f"{name}_mean"], p[f"{name}_var"], eps)
        w = w * scale[None, :]
        if name == "c1":
            w = jnp.pad(w, ((0, 32 - w.shape[0]), (0, 0)))           # K: 27 -> 32
        q[f"{name}_w"] = w.astype(compute_dtype)
        q[f"{name}_b"] = bias.reshape(1, -1).astype(jnp.float32)
    # 1x1 stride-2 skip convs: (Cout, Cin, 1, 1) -> (Cin, Cout)
    q["s1_w"] = p["s1_w"].reshape(p["s1_w"].shape[0], -1).T.astype(compute_dtype)
    q["s1_b"] = p["s1_b"].reshape(1, -1).astype(jnp.float32)
    q["s2_w"] = p["s2_w"].reshape(p["s2_w"].shape[0], -1).T.astype(compute_dtype)
    q["s2_b"] = p["s2_b"].reshape(1, -1).astype(jnp.float32)
    # fc1 columns (NCHW-flatten order c*16 + h*4 + w) -> (s=h*4+w, c, out) blocks so the
    # fused head consumes the NHWC conv3 tile directly with no runtime flatten/transpose.
    nh = p["fc1_w"].shape[0]
    w1 = p["fc1_w"].reshape(nh, 256, 4, 4).transpose(2, 3, 1, 0).reshape(16, 256, nh)
    q["fc1_w"] = w1.astype(compute_dtype)                            # (16, 256, 512)
    q["fc1_b"] = p["fc1_b"].reshape(1, -1).astype(jnp.float32)
    q["fc2_w"] = p["fc2_w"].T.astype(compute_dtype)                  # (512, num_classes)
    q["fc2_b"] = p["fc2_b"].reshape(1, -1).astype(jnp.float32)
    return q


# ---------------- parameters (deterministic, PyTorch-shaped) ----------------

def make_params(num_classes, key):
    ks = jax.random.split(key, 26)
    p = {}

    def nrm(k, shape, s=0.05):
        return jax.random.normal(k, shape, jnp.float32) * s

    i = 0
    for name, (cin, cout) in [("c1", (3, 64)), ("c2", (64, 128)), ("c3", (128, 256))]:
        p[f"{name}_w"] = nrm(ks[i], (cout, cin, 3, 3))
        p[f"{name}_b"] = nrm(ks[i + 1], (cout,))
        p[f"{name}_g"] = 1.0 + nrm(ks[i + 2], (cout,), 0.02)
        p[f"{name}_beta"] = nrm(ks[i + 3], (cout,), 0.02)
        p[f"{name}_mean"] = nrm(ks[i + 4], (cout,), 0.01)
        p[f"{name}_var"] = 1.0 + jnp.abs(nrm(ks[i + 5], (cout,), 0.01))
        i += 6
    p["s1_w"] = nrm(ks[18], (128, 64, 1, 1));  p["s1_b"] = nrm(ks[19], (128,))
    p["s2_w"] = nrm(ks[20], (256, 128, 1, 1)); p["s2_b"] = nrm(ks[21], (256,))
    p["fc1_w"] = nrm(ks[22], (512, 256 * 4 * 4), 0.02); p["fc1_b"] = nrm(ks[23], (512,))
    p["fc2_w"] = nrm(ks[24], (num_classes, 512), 0.02); p["fc2_b"] = nrm(ks[25], (num_classes,))
    return p


# ---------------- forward (inference semantics) ----------------

def forward(q, x_nchw):
    x = jnp.transpose(x_nchw, (0, 2, 3, 1)).astype(jnp.bfloat16)     # NCHW -> NHWC, bf16

    # conv1: Conv3x3/s2/p1 + BN(folded) + GELU (+ Dropout2d = id in eval), K padded to 32
    p1, (B, H1, W1) = im2col_3x3_s2_p1(x, pad_k_to=32)
    x1 = conv_gelu_call(p1, q["c1_w"], q["c1_b"]).reshape(B, H1, W1, 64)

    # conv2 + skip1 fused; skip input = center tap of the patch matrix (no extra operand)
    p2, (B, H2, W2) = im2col_3x3_s2_p1(x1)
    x2 = conv_skip_call(p2, q["c2_w"], q["c2_b"], q["s1_w"], q["s1_b"], c_in=64)
    x2 = x2.reshape(B, H2, W2, 128)

    # conv3 + skip2 + avgpool(identity on 4x4) + flatten + fc1 + GELU + fc2, one kernel.
    # Patch rows ordered (h, w, b) so the fused head's per-spatial fc1 blocks are contiguous.
    p3, (B, H3, W3) = im2col_3x3_s2_p1(x2, row_order="hwb")
    assert (H3, W3) == (4, 4), "fused head assumes a 4x4 map (32x32 input)"
    # TODO(synk): general AdaptiveAvgPool2d((4,4)) for inputs whose conv3 map is not 4x4.
    return conv_skip_head_call(p3, q["c3_w"], q["c3_b"], q["s2_w"], q["s2_b"],
                               q["fc1_w"], q["fc1_b"], q["fc2_w"], q["fc2_b"],
                               c_in=128, batch=B)


if __name__ == "__main__":
    num_classes = 10
    # dropout=0.1 in the reference module; identity at inference time.
    raw_params = make_params(num_classes, jax.random.PRNGKey(42))
    prep = prepare_params(raw_params)             # one-time weight prep (outside forward)

    x = jax.random.normal(jax.random.PRNGKey(0), (2, 3, 32, 32), jnp.float32)   # NCHW

    logits = jax.jit(forward)(prep, x)
    jax.block_until_ready(logits)
    assert logits.shape == (2, num_classes)
    assert logits.dtype == jnp.float32
    print("KERNEL_OK")
</pallas_src>

<mosaic_0001>
module attributes {stable_mosaic.version = 11 : i64} {
  func.func @_conv_gelu_kernel(%arg0: i32, %arg1: memref<512x32xbf16, #tpu.memory_space<vmem>>, %arg2: memref<32x64xbf16, #tpu.memory_space<vmem>>, %arg3: memref<1x64xf32, #tpu.memory_space<vmem>>, %arg4: memref<512x64xbf16, #tpu.memory_space<vmem>>) attributes {dimension_semantics = [#tpu.dimension_semantics<arbitrary>], iteration_bounds = array<i64: 1>, scalar_prefetch = 0 : i64, scratch_operands = 0 : i64, tpu.core_type = #tpu.core_type<tc>, window_params = [{pipeline_mode = #tpu.pipeline_mode<synchronous>, transform_indices = @transform_0, window_bounds = array<i64: 512, 32>}, {pipeline_mode = #tpu.pipeline_mode<synchronous>, transform_indices = @transform_1, window_bounds = array<i64: 32, 64>}, {pipeline_mode = #tpu.pipeline_mode<synchronous>, transform_indices = @transform_2, window_bounds = array<i64: 1, 64>}, {pipeline_mode = #tpu.pipeline_mode<synchronous>, transform_indices = @transform_3, window_bounds = array<i64: 512, 64>}]} {
    %c0 = arith.constant 0 : index
    %c0_0 = arith.constant 0 : index
    %0 = vector.load %arg1[%c0, %c0_0] : memref<512x32xbf16, #tpu.memory_space<vmem>>, vector<512x32xbf16>
    %c0_1 = arith.constant 0 : index
    %c0_2 = arith.constant 0 : index
    %1 = vector.load %arg2[%c0_1, %c0_2] : memref<32x64xbf16, #tpu.memory_space<vmem>>, vector<32x64xbf16>
    %cst = arith.constant dense<0.000000e+00> : vector<512x64xf32>
    %2 = tpu.matmul %0, %1, %cst {dimension_numbers = #tpu.dot_dimension_numbers<[1], [0], [0], [1], [0, 0, 1, 1], [], []>} : vector<512x32xbf16>, vector<32x64xbf16>, vector<512x64xf32> -> vector<512x64xf32>
    %c0_3 = arith.constant 0 : index
    %c0_4 = arith.constant 0 : index
    %3 = vector.load %arg3[%c0_3, %c0_4] : memref<1x64xf32, #tpu.memory_space<vmem>>, vector<1x64xf32>
    %4 = vector.broadcast %3 : vector<1x64xf32> to vector<512x64xf32>
    %5 = arith.addf %2, %4 : vector<512x64xf32>
    %cst_5 = arith.constant 5.000000e-01 : f32
    %6 = vector.broadcast %cst_5 : f32 to vector<512x64xf32>
    %7 = arith.mulf %6, %5 : vector<512x64xf32>
    %cst_6 = arith.constant 0.707106769 : f32
    %8 = vector.broadcast %cst_6 : f32 to vector<512x64xf32>
    %9 = arith.mulf %5, %8 : vector<512x64xf32>
    %10 = math.erf %9 : vector<512x64xf32>
    %cst_7 = arith.constant 1.000000e+00 : f32
    %11 = vector.broadcast %cst_7 : f32 to vector<512x64xf32>
    %12 = arith.addf %11, %10 : vector<512x64xf32>
    %13 = arith.mulf %7, %12 : vector<512x64xf32>
    %14 = arith.truncf %13 : vector<512x64xf32> to vector<512x64xbf16>
    %c0_8 = arith.constant 0 : index
    %c0_9 = arith.constant 0 : index
    %15 = vector.load %arg4[%c0_8, %c0_9] : memref<512x64xbf16, #tpu.memory_space<vmem>>, vector<512x64xbf16>
    tpu.vector_store %arg4[%c0_8, %c0_9], %14 {strides = array<i32>} : memref<512x64xbf16, #tpu.memory_space<vmem>>, vector<512x64xbf16>,
    return
  }
  func.func @transform_0(%arg0: i32) -> (i32, i32) {
    %c0_i32 = arith.constant 0 : i32
    %c0_i32_0 = arith.constant 0 : i32
    %c0_i32_1 = arith.constant 0 : i32
    return %c0_i32, %c0_i32_0 : i32, i32
  }
  func.func @transform_1(%arg0: i32) -> (i32, i32) {
    %c0_i32 = arith.constant 0 : i32
    %c0_i32_0 = arith.constant 0 : i32
    %c0_i32_1 = arith.constant 0 : i32
    return %c0_i32, %c0_i32_0 : i32, i32
  }
  func.func @transform_2(%arg0: i32) -> (i32, i32) {
    %c0_i32 = arith.constant 0 : i32
    %c0_i32_0 = arith.constant 0 : i32
    %c0_i32_1 = arith.constant 0 : i32
    return %c0_i32, %c0_i32_0 : i32, i32
  }
  func.func @transform_3(%arg0: i32) -> (i32, i32) {
    %c0_i32 = arith.constant 0 : i32
    %c0_i32_0 = arith.constant 0 : i32
    %c0_i32_1 = arith.constant 0 : i32
    return %c0_i32, %c0_i32_0 : i32, i32
  }
}

module attributes {stable_mosaic.version = 11 : i64} {
  func.func @_conv_skip_kernel(%arg0: i32, %arg1: memref<128x576xbf16, #tpu.memory_space<vmem>>, %arg2: memref<576x128xbf16, #tpu.memory_space<vmem>>, %arg3: memref<1x128xf32, #tpu.memory_space<vmem>>, %arg4: memref<64x128xbf16, #tpu.memory_space<vmem>>, %arg5: memref<1x128xf32, #tpu.memory_space<vmem>>, %arg6: memref<128x128xbf16, #tpu.memory_space<vmem>>) attributes {dimension_semantics = [#tpu.dimension_semantics<arbitrary>], iteration_bounds = array<i64: 1>, scalar_prefetch = 0 : i64, scratch_operands = 0 : i64, tpu.core_type = #tpu.core_type<tc>, window_params = [{pipeline_mode = #tpu.pipeline_mode<synchronous>, transform_indices = @transform_0, window_bounds = array<i64: 128, 576>}, {pipeline_mode = #tpu.pipeline_mode<synchronous>, transform_indices = @transform_1, window_bounds = array<i64: 576, 128>}, {pipeline_mode = #tpu.pipeline_mode<synchronous>, transform_indices = @transform_2, window_bounds = array<i64: 1, 128>}, {pipeline_mode = #tpu.pipeline_mode<synchronous>, transform_indices = @transform_3, window_bounds = array<i64: 64, 128>}, {pipeline_mode = #tpu.pipeline_mode<synchronous>, transform_indices = @transform_4, window_bounds = array<i64: 1, 128>}, {pipeline_mode = #tpu.pipeline_mode<synchronous>, transform_indices = @transform_5, window_bounds = array<i64: 128, 128>}]} {
    %c0 = arith.constant 0 : index
    %c0_0 = arith.constant 0 : index
    %0 = vector.load %arg1[%c0, %c0_0] : memref<128x576xbf16, #tpu.memory_space<vmem>>, vector<128x576xbf16>
    %c0_1 = arith.constant 0 : index
    %c0_2 = arith.constant 0 : index
    %1 = vector.load %arg2[%c0_1, %c0_2] : memref<576x128xbf16, #tpu.memory_space<vmem>>, vector<576x128xbf16>
    %cst = arith.constant dense<0.000000e+00> : vector<128x128xf32>
    %2 = tpu.matmul %0, %1, %cst {dimension_numbers = #tpu.dot_dimension_numbers<[1], [0], [0], [1], [0, 0, 1, 1], [], []>} : vector<128x576xbf16>, vector<576x128xbf16>, vector<128x128xf32> -> vector<128x128xf32>
    %c0_3 = arith.constant 0 : index
    %c0_4 = arith.constant 0 : index
    %3 = vector.load %arg3[%c0_3, %c0_4] : memref<1x128xf32, #tpu.memory_space<vmem>>, vector<1x128xf32>
    %4 = vector.broadcast %3 : vector<1x128xf32> to vector<128x128xf32>
    %5 = arith.addf %2, %4 : vector<128x128xf32>
    %cst_5 = arith.constant 5.000000e-01 : f32
    %6 = vector.broadcast %cst_5 : f32 to vector<128x128xf32>
    %7 = arith.mulf %6, %5 : vector<128x128xf32>
    %cst_6 = arith.constant 0.707106769 : f32
    %8 = vector.broadcast %cst_6 : f32 to vector<128x128xf32>
    %9 = arith.mulf %5, %8 : vector<128x128xf32>
    %10 = math.erf %9 : vector<128x128xf32>
    %cst_7 = arith.constant 1.000000e+00 : f32
    %11 = vector.broadcast %cst_7 : f32 to vector<128x128xf32>
    %12 = arith.addf %11, %10 : vector<128x128xf32>
    %13 = arith.mulf %7, %12 : vector<128x128xf32>
    %c0_8 = arith.constant 0 : index
    %c256 = arith.constant 256 : index
    %14 = vector.load %arg1[%c0_8, %c256] : memref<128x576xbf16, #tpu.memory_space<vmem>>, vector<128x64xbf16>
    %c0_9 = arith.constant 0 : index
    %c0_10 = arith.constant 0 : index
    %15 = vector.load %arg4[%c0_9, %c0_10] : memref<64x128xbf16, #tpu.memory_space<vmem>>, vector<64x128xbf16>
    %cst_11 = arith.constant dense<0.000000e+00> : vector<128x128xf32>
    %16 = tpu.matmul %14, %15, %cst_11 {dimension_numbers = #tpu.dot_dimension_numbers<[1], [0], [0], [1], [0, 0, 1, 1], [], []>} : vector<128x64xbf16>, vector<64x128xbf16>, vector<128x128xf32> -> vector<128x128xf32>
    %17 = arith.addf %13, %16 : vector<128x128xf32>
    %c0_12 = arith.constant 0 : index
    %c0_13 = arith.constant 0 : index
    %18 = vector.load %arg5[%c0_12, %c0_13] : memref<1x128xf32, #tpu.memory_space<vmem>>, vector<1x128xf32>
    %19 = vector.broadcast %18 : vector<1x128xf32> to vector<128x128xf32>
    %20 = arith.addf %17, %19 : vector<128x128xf32>
    %21 = arith.truncf %20 : vector<128x128xf32> to vector<128x128xbf16>
    %c0_14 = arith.constant 0 : index
    %c0_15 = arith.constant 0 : index
    %22 = vector.load %arg6[%c0_14, %c0_15] : memref<128x128xbf16, #tpu.memory_space<vmem>>, vector<128x128xbf16>
    tpu.vector_store %arg6[%c0_14, %c0_15], %21 {strides = array<i32>} : memref<128x128xbf16, #tpu.memory_space<vmem>>, vector<128x128xbf16>,
    return
  }
  func.func @transform_0(%arg0: i32) -> (i32, i32) {
    %c0_i32 = arith.constant 0 : i32
    %c0_i32_0 = arith.constant 0 : i32
    %c0_i32_1 = arith.constant 0 : i32
    return %c0_i32, %c0_i32_0 : i32, i32
  }
  func.func @transform_1(%arg0: i32) -> (i32, i32) {
    %c0_i32 = arith.constant 0 : i32
    %c0_i32_0 = arith.constant 0 : i32
    %c0_i32_1 = arith.constant 0 : i32
    return %c0_i32, %c0_i32_0 : i32, i32
  }
  func.func @transform_2(%arg0: i32) -> (i32, i32) {
    %c0_i32 = arith.constant 0 : i32
    %c0_i32_0 = arith.constant 0 : i32
    %c0_i32_1 = arith.constant 0 : i32
    return %c0_i32, %c0_i32_0 : i32, i32
  }
  func.func @transform_3(%arg0: i32) -> (i32, i32) {
    %c0_i32 = arith.constant 0 : i32
    %c0_i32_0 = arith.constant 0 : i32
    %c0_i32_1 = arith.constant 0 : i32
    return %c0_i32, %c0_i32_0 : i32, i32
  }
  func.func @transform_4(%arg0: i32) -> (i32, i32) {
    %c0_i32 = arith.constant 0 : i32
    %c0_i32_0 = arith.constant 0 : i32
    %c0_i32_1 = arith.constant 0 : i32
    return %c0_i32, %c0_i32_0 : i32, i32
  }
  func.func @transform_5(%arg0: i32) -> (i32, i32) {
    %c0_i32 = arith.constant 0 : i32
    %c0_i32_0 = arith.constant 0 : i32
    %c0_i32_1 = arith.constant 0 : i32
    return %c0_i32, %c0_i32_0 : i32, i32
  }
}

module attributes {stable_mosaic.version = 11 : i64} {
  func.func @_conv_skip_head_kernel(%arg0: i32, %arg1: memref<32x1152xbf16, #tpu.memory_space<vmem>>, %arg2: memref<1152x256xbf16, #tpu.memory_space<vmem>>, %arg3: memref<1x256xf32, #tpu.memory_space<vmem>>, %arg4: memref<128x256xbf16, #tpu.memory_space<vmem>>, %arg5: memref<1x256xf32, #tpu.memory_space<vmem>>, %arg6: memref<16x256x512xbf16, #tpu.memory_space<vmem>>, %arg7: memref<1x512xf32, #tpu.memory_space<vmem>>, %arg8: memref<512x10xbf16, #tpu.memory_space<vmem>>, %arg9: memref<1x10xf32, #tpu.memory_space<vmem>>, %arg10: memref<2x10xf32, #tpu.memory_space<vmem>>) attributes {dimension_semantics = [#tpu.dimension_semantics<arbitrary>], iteration_bounds = array<i64: 1>, scalar_prefetch = 0 : i64, scratch_operands = 0 : i64, tpu.core_type = #tpu.core_type<tc>, window_params = [{pipeline_mode = #tpu.pipeline_mode<synchronous>, transform_indices = @transform_0, window_bounds = array<i64: 32, 1152>}, {pipeline_mode = #tpu.pipeline_mode<synchronous>, transform_indices = @transform_1, window_bounds = array<i64: 1152, 256>}, {pipeline_mode = #tpu.pipeline_mode<synchronous>, transform_indices = @transform_2, window_bounds = array<i64: 1, 256>}, {pipeline_mode = #tpu.pipeline_mode<synchronous>, transform_indices = @transform_3, window_bounds = array<i64: 128, 256>}, {pipeline_mode = #tpu.pipeline_mode<synchronous>, transform_indices = @transform_4, window_bounds = array<i64: 1, 256>}, {pipeline_mode = #tpu.pipeline_mode<synchronous>, transform_indices = @transform_5, window_bounds = array<i64: 16, 256, 512>}, {pipeline_mode = #tpu.pipeline_mode<synchronous>, transform_indices = @transform_6, window_bounds = array<i64: 1, 512>}, {pipeline_mode = #tpu.pipeline_mode<synchronous>, transform_indices = @transform_7, window_bounds = array<i64: 512, 10>}, {pipeline_mode = #tpu.pipeline_mode<synchronous>, transform_indices = @transform_8, window_bounds = array<i64: 1, 10>}, {pipeline_mode = #tpu.pipeline_mode<synchronous>, transform_indices = @transform_9, window_bounds = array<i64: 2, 10>}]} {
    %c0 = arith.constant 0 : index
    %c0_0 = arith.constant 0 : index
    %0 = vector.load %arg1[%c0, %c0_0] : memref<32x1152xbf16, #tpu.memory_space<vmem>>, vector<32x1152xbf16>
    %c0_1 = arith.constant 0 : index
    %c0_2 = arith.constant 0 : index
    %1 = vector.load %arg2[%c0_1, %c0_2] : memref<1152x256xbf16, #tpu.memory_space<vmem>>, vector<1152x256xbf16>
    %cst = arith.constant dense<0.000000e+00> : vector<32x256xf32>
    %2 = tpu.matmul %0, %1, %cst {dimension_numbers = #tpu.dot_dimension_numbers<[1], [0], [0], [1], [0, 0, 1, 1], [], []>} : vector<32x1152xbf16>, vector<1152x256xbf16>, vector<32x256xf32> -> vector<32x256xf32>
    %c0_3 = arith.constant 0 : index
    %c0_4 = arith.constant 0 : index
    %3 = vector.load %arg3[%c0_3, %c0_4] : memref<1x256xf32, #tpu.memory_space<vmem>>, vector<1x256xf32>
    %4 = vector.broadcast %3 : vector<1x256xf32> to vector<32x256xf32>
    %5 = arith.addf %2, %4 : vector<32x256xf32>
    %cst_5 = arith.constant 5.000000e-01 : f32
    %6 = vector.broadcast %cst_5 : f32 to vector<32x256xf32>
    %7 = arith.mulf %6, %5 : vector<32x256xf32>
    %cst_6 = arith.constant 0.707106769 : f32
    %8 = vector.broadcast %cst_6 : f32 to vector<32x256xf32>
    %9 = arith.mulf %5, %8 : vector<32x256xf32>
    %10 = math.erf %9 : vector<32x256xf32>
    %cst_7 = arith.constant 1.000000e+00 : f32
    %11 = vector.broadcast %cst_7 : f32 to vector<32x256xf32>
    %12 = arith.addf %11, %10 : vector<32x256xf32>
    %13 = arith.mulf %7, %12 : vector<32x256xf32>
    %c0_8 = arith.constant 0 : index
    %c512 = arith.constant 512 : index
    %14 = vector.load %arg1[%c0_8, %c512] : memref<32x1152xbf16, #tpu.memory_space<vmem>>, vector<32x128xbf16>
    %c0_9 = arith.constant 0 : index
    %c0_10 = arith.constant 0 : index
    %15 = vector.load %arg4[%c0_9, %c0_10] : memref<128x256xbf16, #tpu.memory_space<vmem>>, vector<128x256xbf16>
    %cst_11 = arith.constant dense<0.000000e+00> : vector<32x256xf32>
    %16 = tpu.matmul %14, %15, %cst_11 {dimension_numbers = #tpu.dot_dimension_numbers<[1], [0], [0], [1], [0, 0, 1, 1], [], []>} : vector<32x128xbf16>, vector<128x256xbf16>, vector<32x256xf32> -> vector<32x256xf32>
    %17 = arith.addf %13, %16 : vector<32x256xf32>
    %c0_12 = arith.constant 0 : index
    %c0_13 = arith.constant 0 : index
    %18 = vector.load %arg5[%c0_12, %c0_13] : memref<1x256xf32, #tpu.memory_space<vmem>>, vector<1x256xf32>
    %19 = vector.broadcast %18 : vector<1x256xf32> to vector<32x256xf32>
    %20 = arith.addf %17, %19 : vector<32x256xf32>
    %21 = arith.truncf %20 : vector<32x256xf32> to vector<32x256xbf16>
    %cst_14 = arith.constant 0.000000e+00 : f32
    %22 = vector.broadcast %cst_14 : f32 to vector<2x512xf32>
    %23 = vector.extract_strided_slice %21 {offsets = [0, 0], sizes = [2, 256], strides = [1, 1]} : vector<32x256xbf16> to vector<2x256xbf16>
    %c0_15 = arith.constant 0 : index
    %c0_16 = arith.constant 0 : index
    %c0_17 = arith.constant 0 : index
    %24 = vector.load %arg6[%c0_15, %c0_16, %c0_17] : memref<16x256x512xbf16, #tpu.memory_space<vmem>>, vector<1x256x512xbf16>
    %25 = vector.shape_cast %24 : vector<1x256x512xbf16> to vector<256x512xbf16>
    %cst_18 = arith.constant dense<0.000000e+00> : vector<2x512xf32>
    %26 = tpu.matmul %23, %25, %cst_18 {dimension_numbers = #tpu.dot_dimension_numbers<[1], [0], [0], [1], [0, 0, 1, 1], [], []>} : vector<2x256xbf16>, vector<256x512xbf16>, vector<2x512xf32> -> vector<2x512xf32>
    %27 = arith.addf %22, %26 : vector<2x512xf32>
    %28 = vector.extract_strided_slice %21 {offsets = [2, 0], sizes = [2, 256], strides = [1, 1]} : vector<32x256xbf16> to vector<2x256xbf16>
    %c1 = arith.constant 1 : index
    %c0_19 = arith.constant 0 : index
    %c0_20 = arith.constant 0 : index
    %29 = vector.load %arg6[%c1, %c0_19, %c0_20] : memref<16x256x512xbf16, #tpu.memory_space<vmem>>, vector<1x256x512xbf16>
    %30 = vector.shape_cast %29 : vector<1x256x512xbf16> to vector<256x512xbf16>
    %cst_21 = arith.constant dense<0.000000e+00> : vector<2x512xf32>
    %31 = tpu.matmul %28, %30, %cst_21 {dimension_numbers = #tpu.dot_dimension_numbers<[1], [0], [0], [1], [0, 0, 1, 1], [], []>} : vector<2x256xbf16>, vector<256x512xbf16>, vector<2x512xf32> -> vector<2x512xf32>
    %32 = arith.addf %27, %31 : vector<2x512xf32>
    %33 = vector.extract_strided_slice %21 {offsets = [4, 0], sizes = [2, 256], strides = [1, 1]} : vector<32x256xbf16> to vector<2x256xbf16>
    %c2 = arith.constant 2 : index
    %c0_22 = arith.constant 0 : index
    %c0_23 = arith.constant 0 : index
    %34 = vector.load %arg6[%c2, %c0_22, %c0_23] : memref<16x256x512xbf16, #tpu.memory_space<vmem>>, vector<1x256x512xbf16>
    %35 = vector.shape_cast %34 : vector<1x256x512xbf16> to vector<256x512xbf16>
    %cst_24 = arith.constant dense<0.000000e+00> : vector<2x512xf32>
    %36 = tpu.matmul %33, %35, %cst_24 {dimension_numbers = #tpu.dot_dimension_numbers<[1], [0], [0], [1], [0, 0, 1, 1], [], []>} : vector<2x256xbf16>, vector<256x512xbf16>, vector<2x512xf32> -> vector<2x512xf32>
    %37 = arith.addf %32, %36 : vector<2x512xf32>
    %38 = vector.extract_strided_slice %21 {offsets = [6, 0], sizes = [2, 256], strides = [1, 1]} : vector<32x256xbf16> to vector<2x256xbf16>
    %c3 = arith.constant 3 : index
    %c0_25 = arith.constant 0 : index
    %c0_26 = arith.constant 0 : index
    %39 = vector.load %arg6[%c3, %c0_25, %c0_26] : memref<16x256x512xbf16, #tpu.memory_space<vmem>>, vector<1x256x512xbf16>
    %40 = vector.shape_cast %39 : vector<1x256x512xbf16> to vector<256x512xbf16>
    %cst_27 = arith.constant dense<0.000000e+00> : vector<2x512xf32>
    %41 = tpu.matmul %38, %40, %cst_27 {dimension_numbers = #tpu.dot_dimension_numbers<[1], [0], [0], [1], [0, 0, 1, 1], [], []>} : vector<2x256xbf16>, vector<256x512xbf16>, vector<2x512xf32> -> vector<2x512xf32>
    %42 = arith.addf %37, %41 : vector<2x512xf32>
    %43 = vector.extract_strided_slice %21 {offsets = [8, 0], sizes = [2, 256], strides = [1, 1]} : vector<32x256xbf16> to vector<2x256xbf16>
    %c4 = arith.constant 4 : index
    %c0_28 = arith.constant 0 : index
    %c0_29 = arith.constant 0 : index
    %44 = vector.load %arg6[%c4, %c0_28, %c0_29] : memref<16x256x512xbf16, #tpu.memory_space<vmem>>, vector<1x256x512xbf16>
    %45 = vector.shape_cast %44 : vector<1x256x512xbf16> to vector<256x512xbf16>
    %cst_30 = arith.constant dense<0.000000e+00> : vector<2x512xf32>
    %46 = tpu.matmul %43, %45, %cst_30 {dimension_numbers = #tpu.dot_dimension_numbers<[1], [0], [0], [1], [0, 0, 1, 1], [], []>} : vector<2x256xbf16>, vector<256x512xbf16>, vector<2x512xf32> -> vector<2x512xf32>
    %47 = arith.addf %42, %46 : vector<2x512xf32>
    %48 = vector.extract_strided_slice %21 {offsets = [10, 0], sizes = [2, 256], strides = [1, 1]} : vector<32x256xbf16> to vector<2x256xbf16>
    %c5 = arith.constant 5 : index
    %c0_31 = arith.constant 0 : index
    %c0_32 = arith.constant 0 : index
    %49 = vector.load %arg6[%c5, %c0_31, %c0_32] : memref<16x256x512xbf16, #tpu.memory_space<vmem>>, vector<1x256x512xbf16>
    %50 = vector.shape_cast %49 : vector<1x256x512xbf16> to vector<256x512xbf16>
    %cst_33 = arith.constant dense<0.000000e+00> : vector<2x512xf32>
    %51 = tpu.matmul %48, %50, %cst_33 {dimension_numbers = #tpu.dot_dimension_numbers<[1], [0], [0], [1], [0, 0, 1, 1], [], []>} : vector<2x256xbf16>, vector<256x512xbf16>, vector<2x512xf32> -> vector<2x512xf32>
    %52 = arith.addf %47, %51 : vector<2x512xf32>
    %53 = vector.extract_strided_slice %21 {offsets = [12, 0], sizes = [2, 256], strides = [1, 1]} : vector<32x256xbf16> to vector<2x256xbf16>
    %c6 = arith.constant 6 : index
    %c0_34 = arith.constant 0 : index
    %c0_35 = arith.constant 0 : index
    %54 = vector.load %arg6[%c6, %c0_34, %c0_35] : memref<16x256x512xbf16, #tpu.memory_space<vmem>>, vector<1x256x512xbf16>
    %55 = vector.shape_cast %54 : vector<1x256x512xbf16> to vector<256x512xbf16>
    %cst_36 = arith.constant dense<0.000000e+00> : vector<2x512xf32>
    %56 = tpu.matmul %53, %55, %cst_36 {dimension_numbers = #tpu.dot_dimension_numbers<[1], [0], [0], [1], [0, 0, 1, 1], [], []>} : vector<2x256xbf16>, vector<256x512xbf16>, vector<2x512xf32> -> vector<2x512xf32>
    %57 = arith.addf %52, %56 : vector<2x512xf32>
    %58 = vector.extract_strided_slice %21 {offsets = [14, 0], sizes = [2, 256], strides = [1, 1]} : vector<32x256xbf16> to vector<2x256xbf16>
    %c7 = arith.constant 7 : index
    %c0_37 = arith.constant 0 : index
    %c0_38 = arith.constant 0 : index
    %59 = vector.load %arg6[%c7, %c0_37, %c0_38] : memref<16x256x512xbf16, #tpu.memory_space<vmem>>, vector<1x256x512xbf16>
    %60 = vector.shape_cast %59 : vector<1x256x512xbf16> to vector<256x512xbf16>
    %cst_39 = arith.constant dense<0.000000e+00> : vector<2x512xf32>
    %61 = tpu.matmul %58, %60, %cst_39 {dimension_numbers = #tpu.dot_dimension_numbers<[1], [0], [0], [1], [0, 0, 1, 1], [], []>} : vector<2x256xbf16>, vector<256x512xbf16>, vector<2x512xf32> -> vector<2x512xf32>
    %62 = arith.addf %57, %61 : vector<2x512xf32>
    %63 = vector.extract_strided_slice %21 {offsets = [16, 0], sizes = [2, 256], strides = [1, 1]} : vector<32x256xbf16> to vector<2x256xbf16>
    %c8 = arith.constant 8 : index
    %c0_40 = arith.constant 0 : index
    %c0_41 = arith.constant 0 : index
    %64 = vector.load %arg6[%c8, %c0_40, %c0_41] : memref<16x256x512xbf16, #tpu.memory_space<vmem>>, vector<1x256x512xbf16>
    %65 = vector.shape_cast %64 : vector<1x256x512xbf16> to vector<256x512xbf16>
    %cst_42 = arith.constant dense<0.000000e+00> : vector<2x512xf32>
    %66 = tpu.matmul %63, %65, %cst_42 {dimension_numbers = #tpu.dot_dimension_numbers<[1], [0], [0], [1], [0, 0, 1, 1], [], []>} : vector<2x256xbf16>, vector<256x512xbf16>, vector<2x512xf32> -> vector<2x512xf32>
    %67 = arith.addf %62, %66 : vector<2x512xf32>
    %68 = vector.extract_strided_slice %21 {offsets = [18, 0], sizes = [2, 256], strides = [1, 1]} : vector<32x256xbf16> to vector<2x256xbf16>
    %c9 = arith.constant 9 : index
    %c0_43 = arith.constant 0 : index
    %c0_44 = arith.constant 0 : index
    %69 = vector.load %arg6[%c9, %c0_43, %c0_44] : memref<16x256x512xbf16, #tpu.memory_space<vmem>>, vector<1x256x512xbf16>
    %70 = vector.shape_cast %69 : vector<1x256x512xbf16> to vector<256x512xbf16>
    %cst_45 = arith.constant dense<0.000000e+00> : vector<2x512xf32>
    %71 = tpu.matmul %68, %70, %cst_45 {dimension_numbers = #tpu.dot_dimension_numbers<[1], [0], [0], [1], [0, 0, 1, 1], [], []>} : vector<2x256xbf16>, vector<256x512xbf16>, vector<2x512xf32> -> vector<2x512xf32>
    %72 = arith.addf %67, %71 : vector<2x512xf32>
    %73 = vector.extract_strided_slice %21 {offsets = [20, 0], sizes = [2, 256], strides = [1, 1]} : vector<32x256xbf16> to vector<2x256xbf16>
    %c10 = arith.constant 10 : index
    %c0_46 = arith.constant 0 : index
    %c0_47 = arith.constant 0 : index
    %74 = vector.load %arg6[%c10, %c0_46, %c0_47] : memref<16x256x512xbf16, #tpu.memory_space<vmem>>, vector<1x256x512xbf16>
    %75 = vector.shape_cast %74 : vector<1x256x512xbf16> to vector<256x512xbf16>
    %cst_48 = arith.constant dense<0.000000e+00> : vector<2x512xf32>
    %76 = tpu.matmul %73, %75, %cst_48 {dimension_numbers = #tpu.dot_dimension_numbers<[1], [0], [0], [1], [0, 0, 1, 1], [], []>} : vector<2x256xbf16>, vector<256x512xbf16>, vector<2x512xf32> -> vector<2x512xf32>
    %77 = arith.addf %72, %76 : vector<2x512xf32>
    %78 = vector.extract_strided_slice %21 {offsets = [22, 0], sizes = [2, 256], strides = [1, 1]} : vector<32x256xbf16> to vector<2x256xbf16>
    %c11 = arith.constant 11 : index
    %c0_49 = arith.constant 0 : index
    %c0_50 = arith.constant 0 : index
    %79 = vector.load %arg6[%c11, %c0_49, %c0_50] : memref<16x256x512xbf16, #tpu.memory_space<vmem>>, vector<1x256x512xbf16>
    %80 = vector.shape_cast %79 : vector<1x256x512xbf16> to vector<256x512xbf16>
    %cst_51 = arith.constant dense<0.000000e+00> : vector<2x512xf32>
    %81 = tpu.matmul %78, %80, %cst_51 {dimension_numbers = #tpu.dot_dimension_numbers<[1], [0], [0], [1], [0, 0, 1, 1], [], []>} : vector<2x256xbf16>, vector<256x512xbf16>, vector<2x512xf32> -> vector<2x512xf32>
    %82 = arith.addf %77, %81 : vector<2x512xf32>
    %83 = vector.extract_strided_slice %21 {offsets = [24, 0], sizes = [2, 256], strides = [1, 1]} : vector<32x256xbf16> to vector<2x256xbf16>
    %c12 = arith.constant 12 : index
    %c0_52 = arith.constant 0 : index
    %c0_53 = arith.constant 0 : index
    %84 = vector.load %arg6[%c12, %c0_52, %c0_53] : memref<16x256x512xbf16, #tpu.memory_space<vmem>>, vector<1x256x512xbf16>
    %85 = vector.shape_cast %84 : vector<1x256x512xbf16> to vector<256x512xbf16>
    %cst_54 = arith.constant dense<0.000000e+00> : vector<2x512xf32>
    %86 = tpu.matmul %83, %85, %cst_54 {dimension_numbers = #tpu.dot_dimension_numbers<[1], [0], [0], [1], [0, 0, 1, 1], [], []>} : vector<2x256xbf16>, vector<256x512xbf16>, vector<2x512xf32> -> vector<2x512xf32>
    %87 = arith.addf %82, %86 : vector<2x512xf32>
    %88 = vector.extract_strided_slice %21 {offsets = [26, 0], sizes = [2, 256], strides = [1, 1]} : vector<32x256xbf16> to vector<2x256xbf16>
    %c13 = arith.constant 13 : index
    %c0_55 = arith.constant 0 : index
    %c0_56 = arith.constant 0 : index
    %89 = vector.load %arg6[%c13, %c0_55, %c0_56] : memref<16x256x512xbf16, #tpu.memory_space<vmem>>, vector<1x256x512xbf16>
    %90 = vector.shape_cast %89 : vector<1x256x512xbf16> to vector<256x512xbf16>
    %cst_57 = arith.constant dense<0.000000e+00> : vector<2x512xf32>
    %91 = tpu.matmul %88, %90, %cst_57 {dimension_numbers = #tpu.dot_dimension_numbers<[1], [0], [0], [1], [0, 0, 1, 1], [], []>} : vector<2x256xbf16>, vector<256x512xbf16>, vector<2x512xf32> -> vector<2x512xf32>
    %92 = arith.addf %87, %91 : vector<2x512xf32>
    %93 = vector.extract_strided_slice %21 {offsets = [28, 0], sizes = [2, 256], strides = [1, 1]} : vector<32x256xbf16> to vector<2x256xbf16>
    %c14 = arith.constant 14 : index
    %c0_58 = arith.constant 0 : index
    %c0_59 = arith.constant 0 : index
    %94 = vector.load %arg6[%c14, %c0_58, %c0_59] : memref<16x256x512xbf16, #tpu.memory_space<vmem>>, vector<1x256x512xbf16>
    %95 = vector.shape_cast %94 : vector<1x256x512xbf16> to vector<256x512xbf16>
    %cst_60 = arith.constant dense<0.000000e+00> : vector<2x512xf32>
    %96 = tpu.matmul %93, %95, %cst_60 {dimension_numbers = #tpu.dot_dimension_numbers<[1], [0], [0], [1], [0, 0, 1, 1], [], []>} : vector<2x256xbf16>, vector<256x512xbf16>, vector<2x512xf32> -> vector<2x512xf32>
    %97 = arith.addf %92, %96 : vector<2x512xf32>
    %98 = vector.extract_strided_slice %21 {offsets = [30, 0], sizes = [2, 256], strides = [1, 1]} : vector<32x256xbf16> to vector<2x256xbf16>
    %c15 = arith.constant 15 : index
    %c0_61 = arith.constant 0 : index
    %c0_62 = arith.constant 0 : index
    %99 = vector.load %arg6[%c15, %c0_61, %c0_62] : memref<16x256x512xbf16, #tpu.memory_space<vmem>>, vector<1x256x512xbf16>
    %100 = vector.shape_cast %99 : vector<1x256x512xbf16> to vector<256x512xbf16>
    %cst_63 = arith.constant dense<0.000000e+00> : vector<2x512xf32>
    %101 = tpu.matmul %98, %100, %cst_63 {dimension_numbers = #tpu.dot_dimension_numbers<[1], [0], [0], [1], [0, 0, 1, 1], [], []>} : vector<2x256xbf16>, vector<256x512xbf16>, vector<2x512xf32> -> vector<2x512xf32>
    %102 = arith.addf %97, %101 : vector<2x512xf32>
    %c0_64 = arith.constant 0 : index
    %c0_65 = arith.constant 0 : index
    %103 = vector.load %arg7[%c0_64, %c0_65] : memref<1x512xf32, #tpu.memory_space<vmem>>, vector<1x512xf32>
    %104 = vector.broadcast %103 : vector<1x512xf32> to vector<2x512xf32>
    %105 = arith.addf %102, %104 : vector<2x512xf32>
    %cst_66 = arith.constant 5.000000e-01 : f32
    %106 = vector.broadcast %cst_66 : f32 to vector<2x512xf32>
    %107 = arith.mulf %106, %105 : vector<2x512xf32>
    %cst_67 = arith.constant 0.707106769 : f32
    %108 = vector.broadcast %cst_67 : f32 to vector<2x512xf32>
    %109 = arith.mulf %105, %108 : vector<2x512xf32>
    %110 = math.erf %109 : vector<2x512xf32>
    %cst_68 = arith.constant 1.000000e+00 : f32
    %111 = vector.broadcast %cst_68 : f32 to vector<2x512xf32>
    %112 = arith.addf %111, %110 : vector<2x512xf32>
    %113 = arith.mulf %107, %112 : vector<2x512xf32>
    %114 = arith.truncf %113 : vector<2x512xf32> to vector<2x512xbf16>
    %c0_69 = arith.constant 0 : index
    %c0_70 = arith.constant 0 : index
    %115 = vector.load %arg8[%c0_69, %c0_70] : memref<512x10xbf16, #tpu.memory_space<vmem>>, vector<512x10xbf16>
    %cst_71 = arith.constant dense<0.000000e+00> : vector<2x10xf32>
    %116 = tpu.matmul %114, %115, %cst_71 {dimension_numbers = #tpu.dot_dimension_numbers<[1], [0], [0], [1], [0, 0, 1, 1], [], []>} : vector<2x512xbf16>, vector<512x10xbf16>, vector<2x10xf32> -> vector<2x10xf32>
    %c0_72 = arith.constant 0 : index
    %c0_73 = arith.constant 0 : index
    %117 = vector.load %arg9[%c0_72, %c0_73] : memref<1x10xf32, #tpu.memory_space<vmem>>, vector<1x10xf32>
    %118 = vector.broadcast %117 : vector<1x10xf32> to vector<2x10xf32>
    %119 = arith.addf %116, %118 : vector<2x10xf32>
    %c0_74 = arith.constant 0 : index
    %c0_75 = arith.constant 0 : index
    %120 = vector.load %arg10[%c0_74, %c0_75] : memref<2x10xf32, #tpu.memory_space<vmem>>, vector<2x10xf32>
    tpu.vector_store %arg10[%c0_74, %c0_75], %119 {strides = array<i32>} : memref<2x10xf32, #tpu.memory_space<vmem>>, vector<2x10xf32>,
    return
  }
  func.func @transform_0(%arg0: i32) -> (i32, i32) {
    %c0_i32 = arith.constant 0 : i32
    %c0_i32_0 = arith.constant 0 : i32
    %c0_i32_1 = arith.constant 0 : i32
    return %c0_i32, %c0_i32_0 : i32, i32
  }
  func.func @transform_1(%arg0: i32) -> (i32, i32) {
    %c0_i32 = arith.constant 0 : i32
    %c0_i32_0 = arith.constant 0 : i32
    %c0_i32_1 = arith.constant 0 : i32
    return %c0_i32, %c0_i32_0 : i32, i32
  }
  func.func @transform_2(%arg0: i32) -> (i32, i32) {
    %c0_i32 = arith.constant 0 : i32
    %c0_i32_0 = arith.constant 0 : i32
    %c0_i32_1 = arith.constant 0 : i32
    return %c0_i32, %c0_i32_0 : i32, i32
  }
  func.func @transform_3(%arg0: i32) -> (i32, i32) {
    %c0_i32 = arith.constant 0 : i32
    %c0_i32_0 = arith.constant 0 : i32
    %c0_i32_1 = arith.constant 0 : i32
    return %c0_i32, %c0_i32_0 : i32, i32
  }
  func.func @transform_4(%arg0: i32) -> (i32, i32) {
    %c0_i32 = arith.constant 0 : i32
    %c0_i32_0 = arith.constant 0 : i32
    %c0_i32_1 = arith.constant 0 : i32
    return %c0_i32, %c0_i32_0 : i32, i32
  }
  func.func @transform_5(%arg0: i32) -> (i32, i32, i32) {
    %c0_i32 = arith.constant 0 : i32
    %c0_i32_0 = arith.constant 0 : i32
    %c0_i32_1 = arith.constant 0 : i32
    %c0_i32_2 = arith.constant 0 : i32
    return %c0_i32, %c0_i32_0, %c0_i32_1 : i32, i32, i32
  }
  func.func @transform_6(%arg0: i32) -> (i32, i32) {
    %c0_i32 = arith.constant 0 : i32
    %c0_i32_0 = arith.constant 0 : i32
    %c0_i32_1 = arith.constant 0 : i32
    return %c0_i32, %c0_i32_0 : i32, i32
  }
  func.func @transform_7(%arg0: i32) -> (i32, i32) {
    %c0_i32 = arith.constant 0 : i32
    %c0_i32_0 = arith.constant 0 : i32
    %c0_i32_1 = arith.constant 0 : i32
    return %c0_i32, %c0_i32_0 : i32, i32
  }
  func.func @transform_8(%arg0: i32) -> (i32, i32) {
    %c0_i32 = arith.constant 0 : i32
    %c0_i32_0 = arith.constant 0 : i32
    %c0_i32_1 = arith.constant 0 : i32
    return %c0_i32, %c0_i32_0 : i32, i32
  }
  func.func @transform_9(%arg0: i32) -> (i32, i32) {
    %c0_i32 = arith.constant 0 : i32
    %c0_i32_0 = arith.constant 0 : i32
    %c0_i32_1 = arith.constant 0 : i32
    return %c0_i32, %c0_i32_0 : i32, i32
  }
}

</mosaic_0001>

<bundles_post_ra>
// kernel: forward.3
= control target key start
LH: loop header
LB: loop body
LE: loop exit
PB: predicated region body
PF: predicated region fallthrough
CT: control target
= control target key end

     0   :  { %8 = vsyncpa [#allocation3], 0  ;;  %s2558_s0 = inlined_call_operand.vmem [shape: bf16[512,32], index: 0, kind: input, shape index: {}]   ;;  %s2559_s1 = inlined_call_operand.hbm [shape: bf16[32,64], index: 1, kind: input, shape index: {}]   ;;  %s2560_s2 = inlined_call_operand.hbm [shape: f32[1,64], index: 2, kind: input, shape index: {}]   ;;  %s2561_s3 = inlined_call_operand.vmem [shape: bf16[512,64], index: 3, kind: output, shape index: {}]  }
   0x1   :  { %9 = vsyncpa [#allocation5], 0  ;;  %s1833_s12 = smov [#allocation2]  }
   0x2   :  { %s17_s13 = sshll.u32 %s1833_s12, 4  ;;  %s18_s13 = int_to_ptr.vmem [resolvable:$true] %s17_s13 }
   0x3   :  { %s1797_s14 = scalar_lea.vmem %s18_s13, 256  ;;  %p1802_p1 = scmp.lt.s32.totalorder %s18_s13, %s18_s13 }
   0x4   :  { %p1798_p0 = scmp.ne.s32.totalorder %s18_s13, %s1797_s14  ;;  %p1803_p2 = scmp.lt.s32.totalorder %s1797_s14, %s1797_s14 }
   0x6   :  { %p1804_p3 = por %p1803_p2, %p1802_p1 }
   0x8   :  { %p1805_p4 = pnand %p1804_p3, %p1798_p0 }
   0xa   :  { %1808 = shalt.err (!%p1805_p4)
}
   0xb   :  { %s1834_s15 = smov 64   ;;  %s1835_s16 = smov 4  }
   0xc   :  { %23 = dma.hbm_to_vmem [thread:$0]  %s2559_s1, 256, %s18_s13, [#allocation3], %s1834_s15, %s1834_s15, %s1835_s16  }
   0xd   :  { %s1836_s19 = smov [#allocation4]  }
   0xe   :  { %s30_s20 = sshll.u32 %s1836_s19, 4  ;;  %s31_s20 = int_to_ptr.vmem [resolvable:$true] %s30_s20 }
   0xf   :  { %s1817_s21 = scalar_lea.vmem %s31_s20, 16  ;;  %s1821_s22 = scalar_lea.vmem %s31_s20, 32 }
  0x10   :  { %p1818_p5 = scmp.ne.s32.totalorder %s31_s20, %s1817_s21  ;;  %p1822_p6 = scmp.lt.s32.totalorder %s31_s20, %s31_s20 }
  0x11   :  { %p1823_p7 = scmp.lt.s32.totalorder %s1821_s22, %s1817_s21 }
  0x13   :  { %p1824_p8 = por %p1823_p7, %p1822_p6 }
  0x15   :  { %p1825_p9 = pnand %p1824_p8, %p1818_p5 }
  0x17   :  { %1828 = shalt.err (!%p1825_p9)
}
  0x18   :  { %33 = dma.hbm_to_vmem [thread:$0]  %s2560_s2, 16, %s31_s20, [#allocation5]  }
  0x19   :  { %1829 = dma.done.wait [#allocation3], 256  }
  0x1a   :  { %1830 = vsyncadd [#allocation3], 4294967040 }
  0x1b   :  { %1831 = dma.done.wait [#allocation5], 16  }
  0x1c   :  { %1832 = vsyncadd [#allocation5], 4294967280  ;;  %v1626_v0 = vld [vmem:[#allocation2 + $0x8] sm:$0xff]   ;;  %v1627_v1 = vld [vmem:[#allocation2] sm:$0xff]   ;;  %vm288_vm0 = vcmask 261120   ;;  %vm1250_vm1 = vcmask 519168  }
  0x1d   :  { %1550 = vmatprep.subr.bf16.mxu0 %v1626_v0  ;;  %1618 = vmatprep.subr.bf16.mxu1 %v1626_v0  ;;  %v1628_v2 = vld [vmem:[%s2558_s0] sm:$0xff]   ;;  %v1630_v4 = vld [vmem:[%s2558_s0 + $0x8] sm:$0xff]   ;;  %v1632_v6 = vld [vmem:[%s2558_s0 + $0x10] sm:$0xff]  }
  0x1e   :  { %1551 = vmatpush3.bf16.msra.mxu0 %v1626_v0  ;;  %1620 = vmatpush3.bf16.msra.mxu1 %v1626_v0  ;;  %v1629_v3 = vld [vmem:[%s2558_s0 + $0x80] sm:$0xff]   ;;  %v1631_v5 = vld [vmem:[%s2558_s0 + $0x88] sm:$0xff]   ;;  %v1633_v7 = vld [vmem:[%s2558_s0 + $0x90] sm:$0xff]  }
  0x1f   :  { %1552 = vmatprep.subr.bf16.mxu0 %v1627_v1  ;;  %1619 = vmatprep.subr.bf16.mxu1 %v1627_v1  ;;  %v1634_v8 = vld [vmem:[%s2558_s0 + $0x18] sm:$0xff]   ;;  %v1636_v10 = vld [vmem:[%s2558_s0 + $0x20] sm:$0xff]   ;;  %v1638_v12 = vld [vmem:[%s2558_s0 + $0x28] sm:$0xff]  }
  0x20   :  { %1554 = vmatprep.mubr.msk.bf16.mxu0 %vm288_vm0, %v1628_v2  ;;  %1586 = vmatprep.mubr.msk.bf16.mxu1 %vm288_vm0, %v1629_v3  ;;  %v1635_v9 = vld [vmem:[%s2558_s0 + $0x98] sm:$0xff]   ;;  %v1637_v11 = vld [vmem:[%s2558_s0 + $0xa0] sm:$0xff]   ;;  %v1639_v13 = vld [vmem:[%s2558_s0 + $0xa8] sm:$0xff]  }
  0x21   :  { %v1640_v14 = vld [vmem:[%s2558_s0 + $0x30] sm:$0xff]   ;;  %v1642_v16 = vld [vmem:[%s2558_s0 + $0x38] sm:$0xff]   ;;  %v1644_v18 = vld [vmem:[%s2558_s0 + $0x40] sm:$0xff]  }
  0x22   :  { %1553 = vmatpush3.bf16.msra.mxu0 %v1627_v1  ;;  %1621 = vmatpush3.bf16.msra.mxu1 %v1627_v1  ;;  %v1641_v15 = vld [vmem:[%s2558_s0 + $0xb0] sm:$0xff]   ;;  %v1643_v17 = vld [vmem:[%s2558_s0 + $0xb8] sm:$0xff]   ;;  %v1645_v19 = vld [vmem:[%s2558_s0 + $0xc0] sm:$0xff]  }
  0x23   :  { %v1646_v20 = vld [vmem:[%s2558_s0 + $0x48] sm:$0xff]   ;;  %v1648_v22 = vld [vmem:[%s2558_s0 + $0x50] sm:$0xff]   ;;  %v1650_v24 = vld [vmem:[%s2558_s0 + $0x58] sm:$0xff]  }
  0x24   :  { %v1647_v21 = vld [vmem:[%s2558_s0 + $0xc8] sm:$0xff]   ;;  %v1649_v23 = vld [vmem:[%s2558_s0 + $0xd0] sm:$0xff]   ;;  %v1651_v25 = vld [vmem:[%s2558_s0 + $0xd8] sm:$0xff]  }
  0x25   :  { %1555 = vmatmul.mubr.msk.bf16.vlgmr.msra.gmra.mxu0 %vm288_vm0, %v1630_v4  ;;  %1587 = vmatmul.mubr.msk.bf16.vlgmr.msra.gmra.mxu1 %vm288_vm0, %v1631_v5  ;;  %v1652_v26 = vld [vmem:[%s2558_s0 + $0x60] sm:$0xff]   ;;  %v1654_v28 = vld [vmem:[%s2558_s0 + $0x68] sm:$0xff]   ;;  %v1656_v30 = vld [vmem:[%s2558_s0 + $0x70] sm:$0xff]  }
  0x26   :  { %1558 = vmatprep.mubr.msk.bf16.mxu0 %vm288_vm0, %v1632_v6  ;;  %1590 = vmatprep.mubr.msk.bf16.mxu1 %vm288_vm0, %v1633_v7  ;;  %v1653_v27 = vld [vmem:[%s2558_s0 + $0xe0] sm:$0xff]   ;;  %v1655_v29 = vld [vmem:[%s2558_s0 + $0xe8] sm:$0xff]   ;;  %v1657_v31 = vld [vmem:[%s2558_s0 + $0xf0] sm:$0xff]  }
  0x27   :  { %v1658_v32 = vld [vmem:[%s2558_s0 + $0x78] sm:$0xff]   ;;  %v1991_v34 = vld [vmem:[#allocation4] ss:$0 sm:$0xff] }
  0x28   :  { %v1659_v33 = vld [vmem:[%s2558_s0 + $0xf8] sm:$0xff]  }
  0x2d   :  { %1559 = vmatmul.mubr.msk.bf16.gmra.mxu0 %vm288_vm0, %v1634_v8  ;;  %1591 = vmatmul.mubr.msk.bf16.gmra.mxu1 %vm288_vm0, %v1635_v9 }
  0x2e   :  { %1562 = vmatprep.mubr.msk.bf16.mxu0 %vm288_vm0, %v1636_v10  ;;  %1594 = vmatprep.mubr.msk.bf16.mxu1 %vm288_vm0, %v1637_v11 }
  0x35   :  { %1563 = vmatmul.mubr.msk.bf16.gmra.mxu0 %vm288_vm0, %v1638_v12  ;;  %1595 = vmatmul.mubr.msk.bf16.gmra.mxu1 %vm288_vm0, %v1639_v13 }
  0x36   :  { %1566 = vmatprep.mubr.msk.bf16.mxu0 %vm288_vm0, %v1640_v14  ;;  %1598 = vmatprep.mubr.msk.bf16.mxu1 %vm288_vm0, %v1641_v15 }
  0x3d   :  { %1567 = vmatmul.mubr.msk.bf16.gmra.mxu0 %vm288_vm0, %v1642_v16  ;;  %1599 = vmatmul.mubr.msk.bf16.gmra.mxu1 %vm288_vm0, %v1643_v17 }
  0x3e   :  { %1570 = vmatprep.mubr.msk.bf16.mxu0 %vm288_vm0, %v1644_v18  ;;  %1602 = vmatprep.mubr.msk.bf16.mxu1 %vm288_vm0, %v1645_v19 }
  0x45   :  { %1571 = vmatmul.mubr.msk.bf16.gmra.mxu0 %vm288_vm0, %v1646_v20  ;;  %1603 = vmatmul.mubr.msk.bf16.gmra.mxu1 %vm288_vm0, %v1647_v21 }
  0x46   :  { %1574 = vmatprep.mubr.msk.bf16.mxu0 %vm288_vm0, %v1648_v22  ;;  %1606 = vmatprep.mubr.msk.bf16.mxu1 %vm288_vm0, %v1649_v23 }
  0x4d   :  { %1575 = vmatmul.mubr.msk.bf16.gmra.mxu0 %vm288_vm0, %v1650_v24  ;;  %1607 = vmatmul.mubr.msk.bf16.gmra.mxu1 %vm288_vm0, %v1651_v25 }
  0x4e   :  { %1578 = vmatprep.mubr.msk.bf16.mxu0 %vm288_vm0, %v1652_v26  ;;  %1610 = vmatprep.mubr.msk.bf16.mxu1 %vm288_vm0, %v1653_v27 }
  0x55   :  { %1579 = vmatmul.mubr.msk.bf16.gmra.mxu0 %vm288_vm0, %v1654_v28  ;;  %1611 = vmatmul.mubr.msk.bf16.gmra.mxu1 %vm288_vm0, %v1655_v29 }
  0x56   :  { %1582 = vmatprep.mubr.msk.bf16.mxu0 %vm288_vm0, %v1656_v30  ;;  %1614 = vmatprep.mubr.msk.bf16.mxu1 %vm288_vm0, %v1657_v31 }
  0x5d   :  { %1583 = vmatmul.mubr.msk.bf16.gmra.mxu0 %vm288_vm0, %v1658_v32  ;;  %1615 = vmatmul.mubr.msk.bf16.gmra.mxu1 %vm288_vm0, %v1659_v33 }
  0xe5   :  { %v1556_v35 = vpop.f32.mrf.mxu0  ;;  %v1588_v36 = vpop.f32.mrf.mxu1 }
  0xe6   :  { %v428_v37 = vadd.f32 %v1556_v35, %v1991_v34  ;;  %v556_v38 = vadd.f32 %v1588_v36, %v1991_v34 }
  0xe7   :  { %v419_v39 = vpop.f32.mrf.mxu0  ;;  %v547_v40 = vpop.f32.mrf.mxu1 }
  0xe8   :  { %v740_v41 = vmul.f32 0.70710677, %v428_v37  ;;  %v772_v42 = vmul.f32 0.70710677, %v556_v38  ;;  %v420_v43 = vadd.f32 %v1991_v34, %v419_v39  ;;  %v548_v44 = vadd.f32 %v1991_v34, %v547_v40 }
  0xe9   :  { %v1557_v45 = vpop.f32.mrf.mxu0  ;;  %v1589_v46 = vpop.f32.mrf.mxu1  ;;  %v676_v0 = vmul.f32 0.5, %v428_v37  ;;  %v708_v3 = vmul.f32 0.5, %v556_v38 }
  0xea   :  { %1660 = verf.f32 %v740_v41  ;;  %v431_v47 = vadd.f32 %v1557_v45, %v1991_v34  ;;  %v559_v48 = vadd.f32 %v1589_v46, %v1991_v34  ;;  %v738_v49 = vmul.f32 0.70710677, %v420_v43 }
  0xeb   :  { %1662 = verf.f32 %v772_v42  ;;  %v422_v50 = vpop.f32.mrf.mxu0  ;;  %v550_v51 = vpop.f32.mrf.mxu1  ;;  %v770_v52 = vmul.f32 0.70710677, %v548_v44  ;;  %v674_v11 = vmul.f32 0.5, %v420_v43  ;;  %v2009_v12 = vmul.f32 0.5, %v548_v44 }
  0xec   :  { %v741_v53 = vmul.f32 0.70710677, %v431_v47  ;;  %1664 = verf.f32 %v738_v49  ;;  %v773_v54 = vmul.f32 0.70710677, %v559_v48  ;;  %v423_v55 = vadd.f32 %v1991_v34, %v422_v50 }
  0xed   :  { %v551_v56 = vadd.f32 %v1991_v34, %v550_v51  ;;  %v1560_v57 = vpop.f32.mrf.mxu0  ;;  %v1592_v58 = vpop.f32.mrf.mxu1  ;;  %1666 = verf.f32 %v770_v52  ;;  %v2011_v16 = vmul.f32 0.5, %v431_v47  ;;  %v2013_v17 = vmul.f32 0.5, %v559_v48 }
  0xee   :  { %v444_v59 = vadd.f32 %v1560_v57, %v1991_v34  ;;  %v572_v60 = vadd.f32 %v1592_v58, %v1991_v34  ;;  %1668 = verf.f32 %v741_v53  ;;  %v739_v61 = vmul.f32 0.70710677, %v423_v55 }
  0xef   :  { %v435_v62 = vpop.f32.mrf.mxu0  ;;  %v563_v63 = vpop.f32.mrf.mxu1  ;;  %1670 = verf.f32 %v773_v54  ;;  %v771_v1 = vmul.f32 0.70710677, %v551_v56  ;;  %v2015_v19 = vmul.f32 0.5, %v423_v55  ;;  %v2027_v28 = vmul.f32 0.5, %v551_v56 }
  0xf0   :  { %v744_v2 = vmul.f32 0.70710677, %v444_v59  ;;  %1672 = verf.f32 %v739_v61  ;;  %v776_v4 = vmul.f32 0.70710677, %v572_v60  ;;  %v436_v5 = vadd.f32 %v1991_v34, %v435_v62 }
  0xf1   :  { %v1561_v6 = vpop.f32.mrf.mxu0  ;;  %v1593_v7 = vpop.f32.mrf.mxu1  ;;  %1674 = verf.f32 %v771_v1  ;;  %v564_v8 = vadd.f32 %v1991_v34, %v563_v63  ;;  %v2029_v29 = vmul.f32 0.5, %v444_v59  ;;  %v2034_v36 = vmul.f32 0.5, %v572_v60 }
  0xf2   :  { %v447_v9 = vadd.f32 %v1561_v6, %v1991_v34  ;;  %v2007_v10 = vadd.f32 %v1593_v7, %v1991_v34  ;;  %1676 = verf.f32 %v744_v2  ;;  %v742_v13 = vmul.f32 0.70710677, %v436_v5 }
  0xf3   :  { %v438_v14 = vpop.f32.mrf.mxu0  ;;  %v566_v15 = vpop.f32.mrf.mxu1  ;;  %1678 = verf.f32 %v776_v4  ;;  %v774_v18 = vmul.f32 0.70710677, %v564_v8  ;;  %v2037_v39 = vmul.f32 0.5, %v436_v5  ;;  %v2039_v40 = vmul.f32 0.5, %v564_v8 }
  0xf4   :  { %1680 = verf.f32 %v742_v13  ;;  %v745_v20 = vmul.f32 0.70710677, %v447_v9  ;;  %v777_v21 = vmul.f32 0.70710677, %v2007_v10  ;;  %v2019_v24 = vadd.f32 %v1991_v34, %v438_v14 }
  0xf5   :  { %v1564_v22 = vpop.f32.mrf.mxu0  ;;  %v1596_v23 = vpop.f32.mrf.mxu1  ;;  %1682 = verf.f32 %v774_v18  ;;  %v2022_v25 = vadd.f32 %v1991_v34, %v566_v15  ;;  %v2044_v46 = vmul.f32 0.5, %v447_v9 }
  0xf6   :  { %v2025_v26 = vadd.f32 %v1564_v22, %v1991_v34  ;;  %1684 = verf.f32 %v745_v20  ;;  %v2032_v30 = vadd.f32 %v1596_v23, %v1991_v34  ;;  %v743_v37 = vmul.f32 0.70710677, %v2019_v24 }
  0xf7   :  { %v1661_v27 = vpop.eup %1660  ;;  %v451_v31 = vpop.f32.mrf.mxu0  ;;  %1686 = verf.f32 %v777_v21  ;;  %v775_v41 = vmul.f32 0.70710677, %v2022_v25  ;;  %v679_v21 = vmul.f32 0.5, %v2019_v24 }
  0xf8   :  { %v579_v32 = vpop.f32.mrf.mxu1  ;;  %v1663_v33 = vpop.eup %1662  ;;  %v868_v35 = vadd.f32 1.0, %v1661_v27  ;;  %1688 = verf.f32 %v743_v37  ;;  %v748_v47 = vmul.f32 0.70710677, %v2025_v26  ;;  %v780_v51 = vmul.f32 0.70710677, %v2032_v30 }
  0xf9   :  { %v900_v38 = vadd.f32 1.0, %v1663_v33  ;;  %v1565_v42 = vpop.f32.mrf.mxu0  ;;  %v1665_v44 = vpop.eup %1664  ;;  %1690 = verf.f32 %v775_v41  ;;  %v2053_v57 = vadd.f32 %v1991_v34, %v451_v31  ;;  %v2072_v9 = vadd.f32 %v1991_v34, %v579_v32 }
  0xfa   :  { %v2042_v43 = vpop.f32.mrf.mxu1  ;;  %v932_v45 = vmul.f32 %v868_v35, %v676_v0  ;;  %v1667_v48 = vpop.eup %1666  ;;  %v866_v50 = vadd.f32 1.0, %v1665_v44  ;;  %1692 = verf.f32 %v748_v47  ;;  %v2097_v37 = vadd.f32 %v1565_v42, %v1991_v34 }
  0xfb   :  { %v964_v49 = vmul.f32 %v900_v38, %v708_v3  ;;  %v2048_v52 = vpop.f32.mrf.mxu0  ;;  %v1669_v54 = vpop.eup %1668  ;;  %v898_v56 = vadd.f32 1.0, %v1667_v48  ;;  %1694 = verf.f32 %v780_v51  ;;  %v713_v3 = vmul.f32 0.5, %v2007_v10 }
  0xfc   :  { %v2050_v53 = vpop.f32.mrf.mxu1  ;;  %v1454_v55 = vpack.c.bf16 %v932_v45, %v932_v45  ;;  %v1671_v58 = vpop.eup %1670  ;;  %v930_v60 = vmul.f32 %v866_v50, %v674_v11  ;;  %v869_v61 = vadd.f32 1.0, %v1669_v54  ;;  %v746_v4 = vmul.f32 0.70710677, %v2053_v57 }
  0xfd   :  { %v1486_v59 = vpack.c.bf16 %v964_v49, %v964_v49  ;;  %v2055_v62 = vpop.f32.mrf.mxu0  ;;  %v1673_v0 = vpop.eup %1672  ;;  %v962_v1 = vmul.f32 %v898_v56, %v2009_v12  ;;  %v901_v2 = vadd.f32 1.0, %v1671_v58  ;;  %v778_v32 = vmul.f32 0.70710677, %v2072_v9 }
  0xfe   :  { %v2057_v63 = vpop.f32.mrf.mxu1  ;;  %1253 = vst.msk [vmem:[%s2561_s3 + $0x8] sm:$0xf] %vm1250_vm1, %v1454_v55  ;;  %v1675_v5 = vpop.eup %1674  ;;  %v1452_v6 = vpack.c.bf16 %v930_v60, %v930_v60  ;;  %v933_v7 = vmul.f32 %v869_v61, %v2011_v16  ;;  %v867_v8 = vadd.f32 1.0, %v1673_v0  ;;  %1696 = verf.f32 %v746_v4 }
  0xff   :  { %1285 = vst.msk [vmem:[%s2561_s3 + $0x88] sm:$0xf] %vm1250_vm1, %v1486_v59  ;;  %v2074_v11 = vpop.f32.mrf.mxu0  ;;  %v1677_v12 = vpop.eup %1676  ;;  %v1484_v13 = vpack.c.bf16 %v962_v1, %v962_v1  ;;  %v965_v10 = vmul.f32 %v901_v2, %v2013_v17  ;;  %v899_v14 = vadd.f32 1.0, %v1675_v5  ;;  %1698 = verf.f32 %v778_v32 }
 0x100   :  { %v1679_v15 = vpop.eup %1678  ;;  %1251 = vst.msk [vmem:[%s2561_s3] sm:$0xf] %vm1250_vm1, %v1452_v6  ;;  %v1455_v18 = vpack.c.bf16 %v933_v7, %v933_v7  ;;  %v931_v16 = vmul.f32 %v867_v8, %v2015_v19  ;;  %v872_v20 = vadd.f32 1.0, %v1677_v12  ;;  %v2083_v22 = vpop.f32.mrf.mxu1  ;;  %v711_v49 = vmul.f32 0.5, %v2022_v25 }
 0x101   :  { %v1681_v23 = vpop.eup %1680  ;;  %1283 = vst.msk [vmem:[%s2561_s3 + $0x80] sm:$0xf] %vm1250_vm1, %v1484_v13  ;;  %v1487_v17 = vpack.c.bf16 %v965_v10, %v965_v10  ;;  %v963_v27 = vmul.f32 %v899_v14, %v2027_v28  ;;  %v904_v31 = vadd.f32 1.0, %v1679_v15  ;;  %v2099_v38 = vpop.f32.mrf.mxu0  ;;  %v749_v55 = vmul.f32 0.70710677, %v2097_v37 }
 0x102   :  { %v1683_v33 = vpop.eup %1682  ;;  %1254 = vst.msk [vmem:[%s2561_s3 + $0xc] sm:$0xf] %vm1250_vm1, %v1455_v18  ;;  %v1453_v19 = vpack.c.bf16 %v931_v16, %v931_v16  ;;  %v936_v24 = vmul.f32 %v872_v20, %v2029_v29  ;;  %v870_v35 = vadd.f32 1.0, %v1681_v23  ;;  %v2112_v50 = vpop.f32.mrf.mxu1  ;;  %v2127_v58 = vadd.f32 %v2042_v43, %v1991_v34 }
 0x103   :  { %v1685_v41 = vpop.eup %1684  ;;  %1286 = vst.msk [vmem:[%s2561_s3 + $0x8c] sm:$0xf] %vm1250_vm1, %v1487_v17  ;;  %v1485_v28 = vpack.c.bf16 %v963_v27, %v963_v27  ;;  %v968_v44 = vmul.f32 %v904_v31, %v2034_v36  ;;  %v902_v45 = vadd.f32 1.0, %v1683_v33  ;;  %v2131_v59 = vadd.f32 %v1991_v34, %v2048_v52 }
 0x104   :  { %v1687_v47 = vpop.eup %1686  ;;  %1252 = vst.msk [vmem:[%s2561_s3 + $0x4] sm:$0xf] %vm1250_vm1, %v1453_v19  ;;  %v1458_v29 = vpack.c.bf16 %v936_v24, %v936_v24  ;;  %v934_v42 = vmul.f32 %v870_v35, %v2037_v39  ;;  %v873_v48 = vadd.f32 1.0, %v1685_v41  ;;  %1700 = verf.f32 %v749_v55  ;;  %v2145_v5 = vpop.f32.mrf.mxu1 }
 0x105   :  { %1284 = vst.msk [vmem:[%s2561_s3 + $0x84] sm:$0xf] %vm1250_vm1, %v1485_v28  ;;  %v1490_v36 = vpack.c.bf16 %v968_v44, %v968_v44  ;;  %v966_v51 = vmul.f32 %v902_v45, %v2039_v40  ;;  %v905_v54 = vadd.f32 1.0, %v1687_v47  ;;  %v1689_v56 = vpop.eup %1688  ;;  %v2133_v40 = vpop.f32.mrf.mxu0  ;;  %v684_v2 = vmul.f32 0.5, %v2025_v26 }
 0x106   :  { %1257 = vst.msk [vmem:[%s2561_s3 + $0x18] sm:$0xf] %vm1250_vm1, %v1458_v29  ;;  %v1456_v25 = vpack.c.bf16 %v934_v42, %v934_v42  ;;  %v937_v39 = vmul.f32 %v873_v48, %v2044_v46  ;;  %v1691_v60 = vpop.eup %1690  ;;  %v871_v1 = vadd.f32 1.0, %v1689_v56  ;;  %v781_v4 = vmul.f32 0.70710677, %v2127_v58  ;;  %v1604_v27 = vpop.f32.mrf.mxu1 }
 0x107   :  { %1289 = vst.msk [vmem:[%s2561_s3 + $0x98] sm:$0xf] %vm1250_vm1, %v1490_v36  ;;  %v1488_v61 = vpack.c.bf16 %v966_v51, %v966_v51  ;;  %v969_v0 = vmul.f32 %v905_v54, %v713_v3  ;;  %v1693_v46 = vpop.eup %1692  ;;  %v903_v52 = vadd.f32 1.0, %v1691_v60  ;;  %v716_v12 = vmul.f32 0.5, %v2032_v30  ;;  %v1572_v14 = vpop.f32.mrf.mxu0 }
 0x108   :  { %1255 = vst.msk [vmem:[%s2561_s3 + $0x10] sm:$0xf] %vm1250_vm1, %v1456_v25  ;;  %v1459_v43 = vpack.c.bf16 %v937_v39, %v937_v39  ;;  %v1695_v6 = vpop.eup %1694  ;;  %v935_v7 = vmul.f32 %v871_v1, %v679_v21  ;;  %v876_v8 = vadd.f32 1.0, %v1693_v46  ;;  %1702 = verf.f32 %v781_v4  ;;  %v611_v47 = vpop.f32.mrf.mxu1 }
 0x109   :  { %1287 = vst.msk [vmem:[%s2561_s3 + $0x90] sm:$0xf] %vm1250_vm1, %v1488_v61  ;;  %v1491_v3 = vpack.c.bf16 %v969_v0, %v969_v0  ;;  %v967_v26 = vmul.f32 %v903_v52, %v711_v49  ;;  %v908_v13 = vadd.f32 1.0, %v1695_v6  ;;  %v747_v10 = vmul.f32 0.70710677, %v2131_v59  ;;  %v483_v24 = vpop.f32.mrf.mxu0 }
 0x10a   :  { %1258 = vst.msk [vmem:[%s2561_s3 + $0x1c] sm:$0xf] %vm1250_vm1, %v1459_v43  ;;  %v1457_v15 = vpack.c.bf16 %v935_v7, %v935_v7  ;;  %v940_v18 = vmul.f32 %v876_v8, %v684_v2  ;;  %v583_v30 = vadd.f32 %v1991_v34, %v2050_v53  ;;  %v476_v16 = vadd.f32 %v2055_v62, %v1991_v34 }
 0x10b   :  { %1290 = vst.msk [vmem:[%s2561_s3 + $0x9c] sm:$0xf] %vm1250_vm1, %v1491_v3  ;;  %v1697_v20 = vpop.eup %1696  ;;  %v1489_v21 = vpack.c.bf16 %v967_v26, %v967_v26  ;;  %v972_v23 = vmul.f32 %v908_v13, %v716_v12  ;;  %1704 = verf.f32 %v747_v10  ;;  %v604_v17 = vadd.f32 %v2057_v63, %v1991_v34  ;;  %v1573_v54 = vpop.f32.mrf.mxu0 }
 0x10c   :  { %1256 = vst.msk [vmem:[%s2561_s3 + $0x14] sm:$0xf] %vm1250_vm1, %v1457_v15  ;;  %v1462_v31 = vpack.c.bf16 %v940_v18, %v940_v18  ;;  %v682_v32 = vmul.f32 0.5, %v2053_v57  ;;  %v874_v53 = vadd.f32 1.0, %v1697_v20  ;;  %v779_v33 = vmul.f32 0.70710677, %v583_v30  ;;  %v1699_v28 = vpop.eup %1698 }
 0x10d   :  { %1288 = vst.msk [vmem:[%s2561_s3 + $0x94] sm:$0xf] %vm1250_vm1, %v1489_v21  ;;  %v1494_v62 = vpack.c.bf16 %v972_v23, %v972_v23  ;;  %v714_v19 = vmul.f32 0.5, %v2072_v9  ;;  %v752_v63 = vmul.f32 0.70710677, %v476_v16  ;;  %v468_v41 = vadd.f32 %v1991_v34, %v2074_v11  ;;  %v486_v43 = vpop.f32.mrf.mxu0 }
 0x10e   :  { %1261 = vst.msk [vmem:[%s2561_s3 + $0x28] sm:$0xf] %vm1250_vm1, %v1462_v31  ;;  %v938_v35 = vmul.f32 %v874_v53, %v682_v32  ;;  %1706 = verf.f32 %v779_v33  ;;  %v784_v57 = vmul.f32 0.70710677, %v604_v17  ;;  %v596_v9 = vadd.f32 %v1991_v34, %v2083_v22 }
 0x10f   :  { %1293 = vst.msk [vmem:[%s2561_s3 + $0xa8] sm:$0xf] %vm1250_vm1, %v1494_v62  ;;  %1708 = verf.f32 %v752_v63  ;;  %v479_v44 = vadd.f32 %v2099_v38, %v1991_v34  ;;  %v607_v45 = vadd.f32 %v2112_v50, %v1991_v34  ;;  %v906_v42 = vadd.f32 1.0, %v1699_v28  ;;  %v1576_v18 = vpop.f32.mrf.mxu0 }
 0x110   :  { %v1460_v29 = vpack.c.bf16 %v938_v35, %v938_v35  ;;  %v685_v11 = vmul.f32 0.5, %v2097_v37  ;;  %1710 = verf.f32 %v784_v57  ;;  %v717_v48 = vmul.f32 0.5, %v2127_v58  ;;  %v1605_v58 = vpop.f32.mrf.mxu1 }
 0x111   :  { %v683_v49 = vmul.f32 0.5, %v2131_v59  ;;  %v750_v36 = vmul.f32 0.70710677, %v468_v41  ;;  %v782_v51 = vmul.f32 0.70710677, %v596_v9  ;;  %v970_v22 = vmul.f32 %v906_v42, %v714_v19  ;;  %v1701_v56 = vpop.eup %1700 }
 0x112   :  { %1259 = vst.msk [vmem:[%s2561_s3 + $0x20] sm:$0xf] %vm1250_vm1, %v1460_v29  ;;  %v715_v38 = vmul.f32 0.5, %v583_v30  ;;  %v753_v50 = vmul.f32 0.70710677, %v479_v44  ;;  %v471_v37 = vadd.f32 %v1991_v34, %v2133_v40  ;;  %v599_v25 = vadd.f32 %v1991_v34, %v2145_v5  ;;  %v614_v7 = vpop.f32.mrf.mxu1 }
 0x113   :  { %v785_v55 = vmul.f32 0.70710677, %v607_v45  ;;  %1712 = verf.f32 %v750_v36  ;;  %v2205_v39 = vadd.f32 %v1572_v14, %v1991_v34  ;;  %v1492_v59 = vpack.c.bf16 %v970_v22, %v970_v22 }
 0x114   :  { %v877_v60 = vadd.f32 1.0, %v1701_v56  ;;  %1714 = verf.f32 %v782_v51  ;;  %v2208_v61 = vadd.f32 %v1604_v27, %v1991_v34  ;;  %v688_v0 = vmul.f32 0.5, %v476_v16  ;;  %v1608_v32 = vpop.f32.mrf.mxu1 }
 0x115   :  { %v720_v1 = vmul.f32 0.5, %v604_v17  ;;  %1716 = verf.f32 %v753_v50  ;;  %v751_v46 = vmul.f32 0.70710677, %v471_v37  ;;  %v1703_v52 = vpop.eup %1702  ;;  %1291 = vst.msk [vmem:[%s2561_s3 + $0xa0] sm:$0xf] %vm1250_vm1, %v1492_v59  ;;  %v2214_v2 = vmul.f32 0.5, %v468_v41  ;;  %v499_v41 = vpop.f32.mrf.mxu0 }
 0x116   :  { %v941_v40 = vmul.f32 %v877_v60, %v685_v11  ;;  %1718 = verf.f32 %v785_v55  ;;  %v783_v4 = vmul.f32 0.70710677, %v599_v25  ;;  %v909_v5 = vadd.f32 1.0, %v1703_v52  ;;  %v2257_v11 = vpop.f32.mrf.mxu1 }
 0x117   :  { %v2216_v6 = vmul.f32 0.5, %v596_v9  ;;  %1720 = verf.f32 %v751_v46  ;;  %v756_v3 = vmul.f32 0.70710677, %v2205_v39  ;;  %v788_v26 = vmul.f32 0.70710677, %v2208_v61  ;;  %v2262_v56 = vpop.f32.mrf.mxu0 }
 0x118   :  { %v1705_v8 = vpop.eup %1704  ;;  %v1463_v12 = vpack.c.bf16 %v941_v40, %v941_v40  ;;  %1722 = verf.f32 %v783_v4  ;;  %v484_v13 = vadd.f32 %v1991_v34, %v483_v24  ;;  %v973_v10 = vmul.f32 %v909_v5, %v717_v48  ;;  %v2277_v46 = vpop.f32.mrf.mxu1 }
 0x119   :  { %v875_v14 = vadd.f32 1.0, %v1705_v8  ;;  %1724 = verf.f32 %v756_v3  ;;  %v2222_v15 = vadd.f32 %v1991_v34, %v611_v47  ;;  %v2228_v30 = vmul.f32 0.5, %v479_v44 }
 0x11a   :  { %1262 = vst.msk [vmem:[%s2561_s3 + $0x2c] sm:$0xf] %vm1250_vm1, %v1463_v12  ;;  %1726 = verf.f32 %v788_v26  ;;  %v754_v16 = vmul.f32 0.70710677, %v484_v13  ;;  %v2231_v20 = vadd.f32 %v1573_v54, %v1991_v34  ;;  %v1495_v23 = vpack.c.bf16 %v973_v10, %v973_v10  ;;  %v502_v12 = vpop.f32.mrf.mxu0 }
 0x11b   :  { %v1707_v21 = vpop.eup %1706  ;;  %v939_v17 = vmul.f32 %v875_v14, %v683_v49  ;;  %v2233_v27 = vmul.f32 0.5, %v607_v45  ;;  %v786_v31 = vmul.f32 0.70710677, %v2222_v15  ;;  %v2236_v62 = vmul.f32 0.5, %v471_v37 }
 0x11c   :  { %v1709_v53 = vpop.eup %1708  ;;  %v907_v33 = vadd.f32 1.0, %v1707_v21  ;;  %1728 = verf.f32 %v754_v16  ;;  %v757_v19 = vmul.f32 0.70710677, %v2231_v20  ;;  %1294 = vst.msk [vmem:[%s2561_s3 + $0xac] sm:$0xf] %vm1250_vm1, %v1495_v23  ;;  %v2244_v57 = vadd.f32 %v1605_v58, %v1991_v34 }
 0x11d   :  { %v1711_v63 = vpop.eup %1710  ;;  %v1461_v24 = vpack.c.bf16 %v939_v17, %v939_v17  ;;  %v880_v35 = vadd.f32 1.0, %v1709_v53  ;;  %1730 = verf.f32 %v786_v31  ;;  %v2247_v44 = vadd.f32 %v1991_v34, %v486_v43  ;;  %v2299_v17 = vpop.f32.mrf.mxu1 }
 0x11e   :  { %v971_v28 = vmul.f32 %v907_v33, %v715_v38  ;;  %v912_v9 = vadd.f32 1.0, %v1711_v63  ;;  %1732 = verf.f32 %v757_v19  ;;  %v719_v47 = vmul.f32 0.5, %v599_v25  ;;  %v1580_v63 = vpop.f32.mrf.mxu0 }
 0x11f   :  { %1260 = vst.msk [vmem:[%s2561_s3 + $0x24] sm:$0xf] %vm1250_vm1, %v1461_v24  ;;  %v944_v45 = vmul.f32 %v880_v35, %v688_v0  ;;  %v789_v29 = vmul.f32 0.70710677, %v2244_v57  ;;  %v2255_v42 = vadd.f32 %v1991_v34, %v614_v7  ;;  %v692_v51 = vmul.f32 0.5, %v2205_v39 }
 0x120   :  { %v1713_v48 = vpop.eup %1712  ;;  %v1493_v49 = vpack.c.bf16 %v971_v28, %v971_v28  ;;  %v976_v36 = vmul.f32 %v912_v9, %v720_v1  ;;  %v755_v54 = vmul.f32 0.70710677, %v2247_v44  ;;  %v724_v55 = vmul.f32 0.5, %v2208_v61 }
 0x121   :  { %v1715_v22 = vpop.eup %1714  ;;  %v1466_v38 = vpack.c.bf16 %v944_v45, %v944_v45  ;;  %v878_v50 = vadd.f32 1.0, %v1713_v48  ;;  %1734 = verf.f32 %v789_v29  ;;  %v787_v39 = vmul.f32 0.70710677, %v2255_v42  ;;  %v1612_v48 = vpop.f32.mrf.mxu1 }
 0x122   :  { %v1717_v37 = vpop.eup %1716  ;;  %1292 = vst.msk [vmem:[%s2561_s3 + $0xa4] sm:$0xf] %vm1250_vm1, %v1493_v49  ;;  %v1498_v25 = vpack.c.bf16 %v976_v36, %v976_v36  ;;  %v910_v58 = vadd.f32 1.0, %v1715_v22  ;;  %1736 = verf.f32 %v755_v54  ;;  %v690_v0 = vmul.f32 0.5, %v484_v13 }
 0x123   :  { %v1719_v59 = vpop.eup %1718  ;;  %1265 = vst.msk [vmem:[%s2561_s3 + $0x38] sm:$0xf] %vm1250_vm1, %v1466_v38  ;;  %v942_v60 = vmul.f32 %v878_v50, %v2214_v2  ;;  %v881_v61 = vadd.f32 1.0, %v1717_v37  ;;  %v2275_v1 = vadd.f32 %v1576_v18, %v1991_v34  ;;  %1738 = verf.f32 %v787_v39  ;;  %v515_v38 = vpop.f32.mrf.mxu0 }
 0x124   :  { %v1721_v43 = vpop.eup %1720  ;;  %1297 = vst.msk [vmem:[%s2561_s3 + $0xb8] sm:$0xf] %vm1250_vm1, %v1498_v25  ;;  %v974_v52 = vmul.f32 %v910_v58, %v2216_v6  ;;  %v913_v40 = vadd.f32 1.0, %v1719_v59  ;;  %v2285_v4 = vadd.f32 %v1608_v32, %v1991_v34  ;;  %v2289_v8 = vadd.f32 %v1991_v34, %v499_v41 }
 0x125   :  { %v1723_v2 = vpop.eup %1722  ;;  %v1464_v5 = vpack.c.bf16 %v942_v60, %v942_v60  ;;  %v945_v3 = vmul.f32 %v881_v61, %v2228_v30  ;;  %v879_v7 = vadd.f32 1.0, %v1721_v43  ;;  %v760_v6 = vmul.f32 0.70710677, %v2275_v1  ;;  %v643_v61 = vpop.f32.mrf.mxu1 }
 0x126   :  { %v1725_v26 = vpop.eup %1724  ;;  %v1496_v13 = vpack.c.bf16 %v974_v52, %v974_v52  ;;  %v977_v10 = vmul.f32 %v913_v40, %v2233_v27  ;;  %v911_v14 = vadd.f32 1.0, %v1723_v2  ;;  %v722_v23 = vmul.f32 0.5, %v2222_v15 }
 0x127   :  { %v1727_v18 = vpop.eup %1726  ;;  %1263 = vst.msk [vmem:[%s2561_s3 + $0x30] sm:$0xf] %vm1250_vm1, %v1464_v5  ;;  %v1467_v16 = vpack.c.bf16 %v945_v3, %v945_v3  ;;  %v943_v30 = vmul.f32 %v879_v7, %v2236_v62  ;;  %v884_v21 = vadd.f32 1.0, %v1725_v26  ;;  %1740 = verf.f32 %v760_v6  ;;  %v1581_v7 = vpop.f32.mrf.mxu0 }
 0x128   :  { %1295 = vst.msk [vmem:[%s2561_s3 + $0xb0] sm:$0xf] %vm1250_vm1, %v1496_v13  ;;  %v1499_v27 = vpack.c.bf16 %v977_v10, %v977_v10  ;;  %v975_v31 = vmul.f32 %v911_v14, %v719_v47  ;;  %v916_v32 = vadd.f32 1.0, %v1727_v18  ;;  %v693_v15 = vmul.f32 0.5, %v2231_v20  ;;  %v1613_v14 = vpop.f32.mrf.mxu1 }
 0x129   :  { %v1729_v53 = vpop.eup %1728  ;;  %1266 = vst.msk [vmem:[%s2561_s3 + $0x3c] sm:$0xf] %vm1250_vm1, %v1467_v16  ;;  %v1465_v33 = vpack.c.bf16 %v943_v30, %v943_v30  ;;  %v948_v62 = vmul.f32 %v884_v21, %v692_v51  ;;  %v792_v19 = vmul.f32 0.70710677, %v2285_v4  ;;  %v758_v9 = vmul.f32 0.70710677, %v2289_v8 }
 0x12a   :  { %v1731_v24 = vpop.eup %1730  ;;  %1298 = vst.msk [vmem:[%s2561_s3 + $0xbc] sm:$0xf] %vm1250_vm1, %v1499_v27  ;;  %v1497_v35 = vpack.c.bf16 %v975_v31, %v975_v31  ;;  %v980_v41 = vmul.f32 %v916_v32, %v724_v55  ;;  %v882_v28 = vadd.f32 1.0, %v1729_v53  ;;  %v2322_v29 = vadd.f32 %v1991_v34, %v2257_v11  ;;  %v518_v27 = vpop.f32.mrf.mxu0 }
 0x12b   :  { %v1733_v45 = vpop.eup %1732  ;;  %1264 = vst.msk [vmem:[%s2561_s3 + $0x34] sm:$0xf] %vm1250_vm1, %v1465_v33  ;;  %v1470_v20 = vpack.c.bf16 %v948_v62, %v948_v62  ;;  %v914_v47 = vadd.f32 1.0, %v1731_v24  ;;  %1742 = verf.f32 %v792_v19  ;;  %v2335_v11 = vadd.f32 %v2262_v56, %v1991_v34 }
 0x12c   :  { %1296 = vst.msk [vmem:[%s2561_s3 + $0xb4] sm:$0xf] %vm1250_vm1, %v1497_v35  ;;  %v1502_v49 = vpack.c.bf16 %v980_v41, %v980_v41  ;;  %v946_v36 = vmul.f32 %v882_v28, %v690_v0  ;;  %v885_v51 = vadd.f32 1.0, %v1733_v45  ;;  %1744 = verf.f32 %v758_v9  ;;  %v1584_v45 = vpop.f32.mrf.mxu0 }
 0x12d   :  { %1269 = vst.msk [vmem:[%s2561_s3 + $0x48] sm:$0xf] %vm1250_vm1, %v1470_v20  ;;  %v978_v54 = vmul.f32 %v914_v47, %v722_v23  ;;  %v790_v22 = vmul.f32 0.70710677, %v2322_v29  ;;  %v2343_v25 = vadd.f32 %v2277_v46, %v1991_v34  ;;  %v2346_v58 = vadd.f32 %v1991_v34, %v502_v12 }
 0x12e   :  { %v1735_v50 = vpop.eup %1734  ;;  %1301 = vst.msk [vmem:[%s2561_s3 + $0xc8] sm:$0xf] %vm1250_vm1, %v1502_v49  ;;  %v1468_v55 = vpack.c.bf16 %v946_v36, %v946_v36  ;;  %v949_v37 = vmul.f32 %v885_v51, %v693_v15  ;;  %v725_v56 = vmul.f32 0.5, %v2244_v57  ;;  %v691_v43 = vmul.f32 0.5, %v2247_v44  ;;  %v646_v15 = vpop.f32.mrf.mxu1 }
 0x12f   :  { %v1737_v39 = vpop.eup %1736  ;;  %v1500_v59 = vpack.c.bf16 %v978_v54, %v978_v54  ;;  %v917_v60 = vadd.f32 1.0, %v1735_v50  ;;  %1746 = verf.f32 %v790_v22  ;;  %v761_v52 = vmul.f32 0.70710677, %v2335_v11 }
 0x130   :  { %1267 = vst.msk [vmem:[%s2561_s3 + $0x40] sm:$0xf] %vm1250_vm1, %v1468_v55  ;;  %v1471_v0 = vpack.c.bf16 %v949_v37, %v949_v37  ;;  %v883_v46 = vadd.f32 1.0, %v1737_v39  ;;  %v1739_v40 = vpop.eup %1738  ;;  %v723_v2 = vmul.f32 0.5, %v2255_v42  ;;  %v793_v5 = vmul.f32 0.70710677, %v2343_v25  ;;  %v1616_v54 = vpop.f32.mrf.mxu1 }
 0x131   :  { %1299 = vst.msk [vmem:[%s2561_s3 + $0xc0] sm:$0xf] %vm1250_vm1, %v1500_v59  ;;  %v981_v57 = vmul.f32 %v917_v60, %v725_v56  ;;  %v759_v3 = vmul.f32 0.70710677, %v2346_v58  ;;  %v915_v12 = vadd.f32 1.0, %v1739_v40  ;;  %1748 = verf.f32 %v761_v52  ;;  %v531_v39 = vpop.f32.mrf.mxu0 }
 0x132   :  { %1270 = vst.msk [vmem:[%s2561_s3 + $0x4c] sm:$0xf] %vm1250_vm1, %v1471_v0  ;;  %v947_v44 = vmul.f32 %v883_v46, %v691_v43  ;;  %v2368_v26 = vadd.f32 %v1991_v34, %v2299_v17  ;;  %1750 = verf.f32 %v793_v5  ;;  %v524_v42 = vadd.f32 %v1580_v63, %v1991_v34  ;;  %v659_v40 = vpop.f32.mrf.mxu1 }
 0x133   :  { %v1503_v13 = vpack.c.bf16 %v981_v57, %v981_v57  ;;  %v2372_v10 = vadd.f32 %v1612_v48, %v1991_v34  ;;  %v979_v18 = vmul.f32 %v915_v12, %v723_v2  ;;  %1752 = verf.f32 %v759_v3 }
 0x134   :  { %v1469_v6 = vpack.c.bf16 %v947_v44, %v947_v44  ;;  %v1741_v16 = vpop.eup %1740  ;;  %v696_v30 = vmul.f32 0.5, %v2275_v1  ;;  %v728_v21 = vmul.f32 0.5, %v2285_v4  ;;  %v791_v23 = vmul.f32 0.70710677, %v2368_v26 }
 0x135   :  { %1302 = vst.msk [vmem:[%s2561_s3 + $0xcc] sm:$0xf] %vm1250_vm1, %v1503_v13  ;;  %v764_v17 = vmul.f32 0.70710677, %v524_v42  ;;  %v1501_v31 = vpack.c.bf16 %v979_v18, %v979_v18  ;;  %v888_v32 = vadd.f32 1.0, %v1741_v16  ;;  %v2387_v33 = vadd.f32 %v1991_v34, %v515_v38 }
 0x136   :  { %1268 = vst.msk [vmem:[%s2561_s3 + $0x44] sm:$0xf] %vm1250_vm1, %v1469_v6  ;;  %v796_v53 = vmul.f32 0.70710677, %v2372_v10  ;;  %v694_v1 = vmul.f32 0.5, %v2289_v8  ;;  %1754 = verf.f32 %v791_v23  ;;  %v2391_v4 = vadd.f32 %v1991_v34, %v643_v61 }
 0x137   :  { %v2394_v62 = vadd.f32 %v1581_v7, %v1991_v34  ;;  %1300 = vst.msk [vmem:[%s2561_s3 + $0xc4] sm:$0xf] %vm1250_vm1, %v1501_v31  ;;  %v952_v63 = vmul.f32 %v888_v32, %v696_v30  ;;  %1756 = verf.f32 %v764_v17  ;;  %v762_v24 = vmul.f32 0.70710677, %v2387_v33 }
 0x138   :  { %v1743_v19 = vpop.eup %1742  ;;  %v2402_v8 = vadd.f32 %v1613_v14, %v1991_v34  ;;  %v726_v28 = vmul.f32 0.5, %v2322_v29  ;;  %1758 = verf.f32 %v796_v53  ;;  %v794_v9 = vmul.f32 0.70710677, %v2391_v4 }
 0x139   :  { %v1745_v35 = vpop.eup %1744  ;;  %v920_v41 = vadd.f32 1.0, %v1743_v19  ;;  %v1474_v20 = vpack.c.bf16 %v952_v63, %v952_v63  ;;  %v697_v48 = vmul.f32 0.5, %v2335_v11  ;;  %1760 = verf.f32 %v762_v24 }
 0x13a   :  { %v886_v47 = vadd.f32 1.0, %v1745_v35  ;;  %v729_v36 = vmul.f32 0.5, %v2343_v25  ;;  %1762 = verf.f32 %v794_v9  ;;  %v765_v51 = vmul.f32 0.70710677, %v2394_v62 }
 0x13b   :  { %v984_v49 = vmul.f32 %v920_v41, %v728_v21  ;;  %1273 = vst.msk [vmem:[%s2561_s3 + $0x58] sm:$0xf] %vm1250_vm1, %v1474_v20  ;;  %v797_v38 = vmul.f32 0.70710677, %v2402_v8  ;;  %v2415_v50 = vadd.f32 %v1991_v34, %v518_v27  ;;  %v2418_v11 = vadd.f32 %v1991_v34, %v646_v15  ;;  %v1788_v27 = vld [vmem:[#allocation4] ss:$0 sm:$0xff] }
 0x13c   :  { %v1747_v22 = vpop.eup %1746  ;;  %v950_v29 = vmul.f32 %v886_v47, %v694_v1  ;;  %1764 = verf.f32 %v765_v51  ;;  %v2421_v25 = vadd.f32 %v1584_v45, %v1991_v34  ;;  %v695_v56 = vmul.f32 0.5, %v2346_v58 }
 0x13d   :  { %v1506_v55 = vpack.c.bf16 %v984_v49, %v984_v49  ;;  %v918_v37 = vadd.f32 1.0, %v1747_v22  ;;  %1766 = verf.f32 %v797_v38  ;;  %v763_v60 = vmul.f32 0.70710677, %v2415_v50 }
 0x13e   :  { %v1472_v59 = vpack.c.bf16 %v950_v29, %v950_v29  ;;  %v1749_v61 = vpop.eup %1748  ;;  %v727_v43 = vmul.f32 0.5, %v2368_v26  ;;  %v700_v46 = vmul.f32 0.5, %v524_v42  ;;  %v795_v52 = vmul.f32 0.70710677, %v2418_v11  ;;  %v1585_v26 = vpop.f32.mrf.mxu0 }
 0x13f   :  { %1305 = vst.msk [vmem:[%s2561_s3 + $0xd8] sm:$0xf] %vm1250_vm1, %v1506_v55  ;;  %v982_v0 = vmul.f32 %v918_v37, %v726_v28  ;;  %v1751_v57 = vpop.eup %1750  ;;  %v889_v58 = vadd.f32 1.0, %v1749_v61  ;;  %1768 = verf.f32 %v763_v60  ;;  %v768_v2 = vmul.f32 0.70710677, %v2421_v25 }
 0x140   :  { %1271 = vst.msk [vmem:[%s2561_s3 + $0x50] sm:$0xf] %vm1250_vm1, %v1472_v59  ;;  %v2437_v5 = vadd.f32 %v1616_v54, %v1991_v34  ;;  %v1753_v3 = vpop.eup %1752  ;;  %v921_v44 = vadd.f32 1.0, %v1751_v57  ;;  %1770 = verf.f32 %v795_v52  ;;  %v2440_v12 = vadd.f32 %v1991_v34, %v531_v39  ;;  %v1617_v34 = vpop.f32.mrf.mxu1 }
 0x141   :  { %v1504_v7 = vpack.c.bf16 %v982_v0, %v982_v0  ;;  %v953_v13 = vmul.f32 %v889_v58, %v697_v48  ;;  %v887_v42 = vadd.f32 1.0, %v1753_v3  ;;  %v732_v14 = vmul.f32 0.5, %v2372_v10 }
 0x142   :  { %1772 = verf.f32 %v768_v2  ;;  %v985_v6 = vmul.f32 %v921_v44, %v729_v36  ;;  %v698_v18 = vmul.f32 0.5, %v2387_v33  ;;  %v800_v16 = vmul.f32 0.70710677, %v2437_v5  ;;  %v534_v36 = vpop.f32.mrf.mxu0 }
 0x143   :  { %1303 = vst.msk [vmem:[%s2561_s3 + $0xd0] sm:$0xf] %vm1250_vm1, %v1504_v7  ;;  %v766_v30 = vmul.f32 0.70710677, %v2440_v12  ;;  %v1755_v21 = vpop.eup %1754  ;;  %v1475_v23 = vpack.c.bf16 %v953_v13, %v953_v13  ;;  %v951_v17 = vmul.f32 %v887_v42, %v695_v56  ;;  %v2450_v31 = vadd.f32 %v1788_v27, %v659_v40 }
 0x144   :  { %v2452_v10 = vadd.f32 %v1788_v27, %v1585_v26  ;;  %v1757_v32 = vpop.eup %1756  ;;  %v1507_v53 = vpack.c.bf16 %v985_v6, %v985_v6  ;;  %v919_v1 = vadd.f32 1.0, %v1755_v21  ;;  %v730_v15 = vmul.f32 0.5, %v2391_v4 }
 0x145   :  { %1774 = verf.f32 %v800_v16  ;;  %v1759_v33 = vpop.eup %1758  ;;  %1274 = vst.msk [vmem:[%s2561_s3 + $0x5c] sm:$0xf] %vm1250_vm1, %v1475_v23  ;;  %v1473_v19 = vpack.c.bf16 %v951_v17, %v951_v17  ;;  %v892_v63 = vadd.f32 1.0, %v1757_v32  ;;  %v2459_v24 = vadd.f32 %v1788_v27, %v1617_v34 }
 0x146   :  { %1776 = verf.f32 %v766_v30  ;;  %v1761_v35 = vpop.eup %1760  ;;  %1306 = vst.msk [vmem:[%s2561_s3 + $0xdc] sm:$0xf] %vm1250_vm1, %v1507_v53  ;;  %v983_v41 = vmul.f32 %v919_v1, %v727_v43  ;;  %v924_v4 = vadd.f32 1.0, %v1759_v33  ;;  %v701_v28 = vmul.f32 0.5, %v2394_v62  ;;  %v662_v62 = vpop.f32.mrf.mxu1 }
 0x147   :  { %v798_v9 = vmul.f32 0.70710677, %v2450_v31  ;;  %v1763_v45 = vpop.eup %1762  ;;  %1272 = vst.msk [vmem:[%s2561_s3 + $0x54] sm:$0xf] %vm1250_vm1, %v1473_v19  ;;  %v956_v20 = vmul.f32 %v892_v63, %v700_v46  ;;  %v890_v47 = vadd.f32 1.0, %v1761_v35  ;;  %v733_v48 = vmul.f32 0.5, %v2402_v8 }
 0x148   :  { %v769_v49 = vmul.f32 0.70710677, %v2452_v10  ;;  %v1505_v51 = vpack.c.bf16 %v983_v41, %v983_v41  ;;  %v988_v54 = vmul.f32 %v924_v4, %v732_v14  ;;  %v922_v22 = vadd.f32 1.0, %v1763_v45 }
 0x149   :  { %1778 = verf.f32 %v798_v9  ;;  %v1765_v29 = vpop.eup %1764  ;;  %v1478_v38 = vpack.c.bf16 %v956_v20, %v956_v20  ;;  %v954_v55 = vmul.f32 %v890_v47, %v698_v18  ;;  %v801_v37 = vmul.f32 0.70710677, %v2459_v24 }
 0x14a   :  { %1780 = verf.f32 %v769_v49  ;;  %v1767_v39 = vpop.eup %1766  ;;  %1304 = vst.msk [vmem:[%s2561_s3 + $0xd4] sm:$0xf] %vm1250_vm1, %v1505_v51  ;;  %v1510_v8 = vpack.c.bf16 %v988_v54, %v988_v54  ;;  %v986_v59 = vmul.f32 %v922_v22, %v730_v15  ;;  %v893_v56 = vadd.f32 1.0, %v1765_v29 }
 0x14b   :  { %v2478_v60 = vadd.f32 %v1788_v27, %v534_v36  ;;  %1277 = vst.msk [vmem:[%s2561_s3 + $0x68] sm:$0xf] %vm1250_vm1, %v1478_v38  ;;  %v1476_v61 = vpack.c.bf16 %v954_v55, %v954_v55  ;;  %v925_v0 = vadd.f32 1.0, %v1767_v39  ;;  %1782 = verf.f32 %v801_v37 }
 0x14c   :  { %v2484_v43 = vadd.f32 %v1788_v27, %v662_v62  ;;  %v1769_v46 = vpop.eup %1768  ;;  %1309 = vst.msk [vmem:[%s2561_s3 + $0xe8] sm:$0xf] %vm1250_vm1, %v1510_v8  ;;  %v1508_v52 = vpack.c.bf16 %v986_v59, %v986_v59  ;;  %v957_v40 = vmul.f32 %v893_v56, %v701_v28  ;;  %v699_v57 = vmul.f32 0.5, %v2415_v50 }
 0x14d   :  { %v767_v58 = vmul.f32 0.70710677, %v2478_v60  ;;  %v1771_v2 = vpop.eup %1770  ;;  %1275 = vst.msk [vmem:[%s2561_s3 + $0x60] sm:$0xf] %vm1250_vm1, %v1476_v61  ;;  %v989_v3 = vmul.f32 %v925_v0, %v733_v48  ;;  %v891_v7 = vadd.f32 1.0, %v1769_v46  ;;  %v731_v44 = vmul.f32 0.5, %v2418_v11 }
 0x14e   :  { %v799_v26 = vmul.f32 0.70710677, %v2484_v43  ;;  %1307 = vst.msk [vmem:[%s2561_s3 + $0xe0] sm:$0xf] %vm1250_vm1, %v1508_v52  ;;  %v1479_v50 = vpack.c.bf16 %v957_v40, %v957_v40  ;;  %v923_v42 = vadd.f32 1.0, %v1771_v2  ;;  %v704_v14 = vmul.f32 0.5, %v2421_v25 }
 0x14f   :  { %v1773_v13 = vpop.eup %1772  ;;  %1784 = verf.f32 %v767_v58  ;;  %v1511_v6 = vpack.c.bf16 %v989_v3, %v989_v3  ;;  %v955_v18 = vmul.f32 %v891_v7, %v699_v57  ;;  %v736_v17 = vmul.f32 0.5, %v2437_v5 }
 0x150   :  { %v896_v16 = vadd.f32 1.0, %v1773_v13  ;;  %1786 = verf.f32 %v799_v26  ;;  %1278 = vst.msk [vmem:[%s2561_s3 + $0x6c] sm:$0xf] %vm1250_vm1, %v1479_v50  ;;  %v987_v11 = vmul.f32 %v923_v42, %v731_v44  ;;  %v702_v53 = vmul.f32 0.5, %v2440_v12 }
 0x151   :  { %1310 = vst.msk [vmem:[%s2561_s3 + $0xec] sm:$0xf] %vm1250_vm1, %v1511_v6  ;;  %v1477_v34 = vpack.c.bf16 %v955_v18, %v955_v18  ;;  %v734_v35 = vmul.f32 0.5, %v2450_v31  ;;  %v705_v4 = vmul.f32 0.5, %v2452_v10  ;;  %v737_v31 = vmul.f32 0.5, %v2459_v24 }
 0x152   :  { %v1775_v30 = vpop.eup %1774  ;;  %v960_v21 = vmul.f32 %v896_v16, %v704_v14  ;;  %v1509_v23 = vpack.c.bf16 %v987_v11, %v987_v11  ;;  %v703_v54 = vmul.f32 0.5, %v2478_v60  ;;  %v735_v62 = vmul.f32 0.5, %v2484_v43 }
 0x153   :  { %v1777_v25 = vpop.eup %1776  ;;  %v928_v27 = vadd.f32 1.0, %v1775_v30  ;;  %1276 = vst.msk [vmem:[%s2561_s3 + $0x64] sm:$0xf] %vm1250_vm1, %v1477_v34 }
 0x154   :  { %v1482_v32 = vpack.c.bf16 %v960_v21, %v960_v21  ;;  %v894_v1 = vadd.f32 1.0, %v1777_v25  ;;  %1308 = vst.msk [vmem:[%s2561_s3 + $0xe4] sm:$0xf] %vm1250_vm1, %v1509_v23 }
 0x155   :  { %v992_v15 = vmul.f32 %v928_v27, %v736_v17 }
 0x156   :  { %v1779_v33 = vpop.eup %1778  ;;  %1281 = vst.msk [vmem:[%s2561_s3 + $0x78] sm:$0xf] %vm1250_vm1, %v1482_v32  ;;  %v958_v5 = vmul.f32 %v894_v1, %v702_v53 }
 0x157   :  { %v1781_v19 = vpop.eup %1780  ;;  %v1514_v63 = vpack.c.bf16 %v992_v15, %v992_v15  ;;  %v926_v41 = vadd.f32 1.0, %v1779_v33 }
 0x158   :  { %v1480_v12 = vpack.c.bf16 %v958_v5, %v958_v5  ;;  %v897_v28 = vadd.f32 1.0, %v1781_v19  ;;  %v1783_v9 = vpop.eup %1782 }
 0x159   :  { %1313 = vst.msk [vmem:[%s2561_s3 + $0xf8] sm:$0xf] %vm1250_vm1, %v1514_v63  ;;  %v990_v45 = vmul.f32 %v926_v41, %v734_v35  ;;  %v929_v47 = vadd.f32 1.0, %v1783_v9 }
 0x15a   :  { %1279 = vst.msk [vmem:[%s2561_s3 + $0x70] sm:$0xf] %vm1250_vm1, %v1480_v12  ;;  %v961_v20 = vmul.f32 %v897_v28, %v705_v4 }
 0x15b   :  { %v1512_v48 = vpack.c.bf16 %v990_v45, %v990_v45  ;;  %v993_v36 = vmul.f32 %v929_v47, %v737_v31 }
 0x15c   :  { %v1785_v49 = vpop.eup %1784  ;;  %v1483_v10 = vpack.c.bf16 %v961_v20, %v961_v20 }
 0x15d   :  { %v1787_v51 = vpop.eup %1786  ;;  %1311 = vst.msk [vmem:[%s2561_s3 + $0xf0] sm:$0xf] %vm1250_vm1, %v1512_v48  ;;  %v895_v22 = vadd.f32 1.0, %v1785_v49  ;;  %v1515_v24 = vpack.c.bf16 %v993_v36, %v993_v36 }
 0x15e   :  { %1282 = vst.msk [vmem:[%s2561_s3 + $0x7c] sm:$0xf] %vm1250_vm1, %v1483_v10  ;;  %v927_v29 = vadd.f32 1.0, %v1787_v51 }
 0x15f   :  { %v959_v38 = vmul.f32 %v895_v22, %v703_v54  ;;  %1314 = vst.msk [vmem:[%s2561_s3 + $0xfc] sm:$0xf] %vm1250_vm1, %v1515_v24 }
 0x160   :  { %v991_v55 = vmul.f32 %v927_v29, %v735_v62 }
 0x161   :  { %v1481_v37 = vpack.c.bf16 %v959_v38, %v959_v38 }
 0x162   :  { %v1513_v39 = vpack.c.bf16 %v991_v55, %v991_v55 }
 0x163   :  { %1280 = vst.msk [vmem:[%s2561_s3 + $0x74] sm:$0xf] %vm1250_vm1, %v1481_v37 }
 0x164   :  { %1312 = vst.msk [vmem:[%s2561_s3 + $0xf4] sm:$0xf] %vm1250_vm1, %v1513_v39 }
 0x165   :  { %1319 = vsyncpa [#allocation3], 1 }
 0x166   :  { %1320 = vsyncpa [#allocation5], 1 }

// kernel: forward.4
= control target key start
LH: loop header
LB: loop body
LE: loop exit
PB: predicated region body
PF: predicated region fallthrough
CT: control target
= control target key end

     0   :  { %10 = vsyncpa [#allocation3], 0  ;;  %s2444_s0 = inlined_call_operand.vmem [shape: bf16[128,576], index: 0, kind: input, shape index: {}]   ;;  %s2445_s1 = inlined_call_operand.hbm [shape: bf16[576,128], index: 1, kind: input, shape index: {}]   ;;  %s2446_s2 = inlined_call_operand.hbm [shape: f32[1,128], index: 2, kind: input, shape index: {}]   ;;  %s2447_s3 = inlined_call_operand.hbm [shape: bf16[64,128], index: 3, kind: input, shape index: {}]   ;;  %s2448_s4 = inlined_call_operand.hbm [shape: f32[1,128], index: 4, kind: input, shape index: {}]   ;;  %s2449_s5 = inlined_call_operand.vmem [shape: bf16[128,128], index: 5, kind: output, shape index: {}]  }
   0x1   :  { %11 = vsyncpa [#allocation5], 0 }
   0x2   :  { %12 = vsyncpa [#allocation8], 0  ;;  %s1959_s18 = smov [#allocation4]   ;;  %s1960_s20 = smov [#allocation2]  }
   0x3   :  { %s33_s19 = sshll.u32 %s1959_s18, 4  ;;  %s20_s21 = sshll.u32 %s1960_s20, 4  ;;  %s34_s19 = int_to_ptr.vmem [resolvable:$true] %s33_s19  ;;  %s21_s21 = int_to_ptr.vmem [resolvable:$true] %s20_s21 }
   0x4   :  { %s1881_s22 = scalar_lea.vmem %s34_s19, 16  ;;  %s1885_s23 = scalar_lea.vmem %s34_s19, 32 }
   0x5   :  { %p1882_p0 = scmp.ne.s32.totalorder %s34_s19, %s1881_s22  ;;  %p1886_p1 = scmp.lt.s32.totalorder %s34_s19, %s34_s19 }
   0x6   :  { %p1887_p2 = scmp.lt.s32.totalorder %s1885_s23, %s1881_s22 }
   0x8   :  { %p1888_p3 = por %p1887_p2, %p1886_p1 }
   0xa   :  { %p1889_p4 = pnand %p1888_p3, %p1882_p0 }
   0xc   :  { %1892 = shalt.err (!%p1889_p4)
}
   0xd   :  { %36 = dma.hbm_to_vmem [thread:$0]  %s2446_s2, 16, %s34_s19, [#allocation5]  }
   0xe   :  { %s1901_s26 = scalar_lea.vmem %s21_s21, 4608  ;;  %p1906_p6 = scmp.lt.s32.totalorder %s21_s21, %s21_s21 }
   0xf   :  { %p1902_p5 = scmp.ne.s32.totalorder %s21_s21, %s1901_s26  ;;  %p1907_p7 = scmp.lt.s32.totalorder %s1901_s26, %s1901_s26 }
  0x11   :  { %p1908_p8 = por %p1907_p7, %p1906_p6 }
  0x13   :  { %p1909_p9 = pnand %p1908_p8, %p1902_p5 }
  0x15   :  { %1912 = shalt.err (!%p1909_p9)
}
  0x16   :  { %s1961_s27 = smov 64   ;;  %s1962_s28 = smov 4  }
  0x17   :  { %26 = dma.hbm_to_vmem [thread:$0]  %s2445_s1, 4608, %s21_s21, [#allocation3], %s1961_s27, %s1961_s27, %s1962_s28  }
  0x18   :  { %s1963_s6 = smov [#allocation6]   ;;  %s1964_s8 = smov [#allocation7]  }
  0x19   :  { %s42_s7 = sshll.u32 %s1963_s6, 4  ;;  %s55_s9 = sshll.u32 %s1964_s8, 4  ;;  %s43_s7 = int_to_ptr.vmem [resolvable:$true] %s42_s7  ;;  %s56_s9 = int_to_ptr.vmem [resolvable:$true] %s55_s9 }
  0x1a   :  { %s1921_s2 = scalar_lea.vmem %s43_s7, 512  ;;  %p1926_p11 = scmp.lt.s32.totalorder %s43_s7, %s43_s7 }
  0x1b   :  { %p1922_p10 = scmp.ne.s32.totalorder %s43_s7, %s1921_s2  ;;  %p1927_p12 = scmp.lt.s32.totalorder %s1921_s2, %s1921_s2 }
  0x1d   :  { %p1928_p13 = por %p1927_p12, %p1926_p11 }
  0x1f   :  { %p1929_p0 = pnand %p1928_p13, %p1922_p10 }
  0x21   :  { %1932 = shalt.err (!%p1929_p0)
}
  0x22   :  { %48 = dma.hbm_to_vmem [thread:$0]  %s2447_s3, 512, %s43_s7, [#allocation5], %s1961_s27, %s1961_s27, %s1962_s28  }
  0x23   :  { %s1941_s12 = scalar_lea.vmem %s56_s9, 16  ;;  %s1945_s1 = scalar_lea.vmem %s56_s9, 32 }
  0x24   :  { %p1942_p1 = scmp.ne.s32.totalorder %s56_s9, %s1941_s12  ;;  %p1946_p2 = scmp.lt.s32.totalorder %s56_s9, %s56_s9 }
  0x25   :  { %p1947_p3 = scmp.lt.s32.totalorder %s1945_s1, %s1941_s12 }
  0x27   :  { %p1948_p4 = por %p1947_p3, %p1946_p2 }
  0x29   :  { %p1949_p5 = pnand %p1948_p4, %p1942_p1 }
  0x2b   :  { %1952 = shalt.err (!%p1949_p5)
}
  0x2c   :  { %58 = dma.hbm_to_vmem [thread:$0]  %s2448_s4, 16, %s56_s9, [#allocation8]  }
  0x2d   :  { %1953 = dma.done.wait [#allocation3], 4608  }
  0x2e   :  { %1954 = vsyncadd [#allocation3], 4294962688 }
  0x2f   :  { %1955 = dma.done.wait [#allocation5], 528  }
  0x30   :  { %1956 = vsyncadd [#allocation5], 4294966768 }
  0x31   :  { %1957 = dma.done.wait [#allocation8], 16  }
  0x32   :  { %1958 = vsyncadd [#allocation8], 4294967280  ;;  %v1737_v0 = vld [vmem:[#allocation2 + $0x78] sm:$0xff]   ;;  %v1741_v4 = vld [vmem:[#allocation2 + $0x70] sm:$0xff]   ;;  %vm615_vm0 = vcmask 523264  }
  0x33   :  { %v1738_v1 = vld [vmem:[#allocation2 + $0x38] sm:$0xff]   ;;  %1531 = vmatprep.subr.bf16.mxu0 %v1737_v0  ;;  %v1742_v5 = vld [vmem:[#allocation2 + $0x30] sm:$0xff]   ;;  %v1745_v8 = vld [vmem:[#allocation2 + $0x68] sm:$0xff]  }
  0x34   :  { %v1739_v2 = vld [vmem:[#allocation2 + $0xf8] sm:$0xff]   ;;  %1532 = vmatpush3.bf16.msra.mxu0 %v1738_v1  ;;  %v1743_v6 = vld [vmem:[#allocation2 + $0xf0] sm:$0xff]   ;;  %v1746_v9 = vld [vmem:[#allocation2 + $0x28] sm:$0xff]  }
  0x35   :  { %v1740_v3 = vld [vmem:[#allocation2 + $0xb8] sm:$0xff]   ;;  %1595 = vmatprep.subr.bf16.mxu1 %v1739_v2  ;;  %1533 = vmatprep.subr.bf16.mxu0 %v1741_v4  ;;  %v1744_v7 = vld [vmem:[#allocation2 + $0xb0] sm:$0xff]   ;;  %v1747_v10 = vld [vmem:[#allocation2 + $0xe8] sm:$0xff]  }
  0x36   :  { %1596 = vmatpush3.bf16.msra.mxu1 %v1740_v3  ;;  %v1748_v11 = vld [vmem:[#allocation2 + $0xa8] sm:$0xff]   ;;  %v1749_v12 = vld [vmem:[#allocation2 + $0x60] sm:$0xff]   ;;  %v1753_v16 = vld [vmem:[#allocation2 + $0x58] sm:$0xff]  }
  0x37   :  { %1597 = vmatprep.subr.bf16.mxu1 %v1743_v6  ;;  %v1750_v13 = vld [vmem:[#allocation2 + $0x20] sm:$0xff]   ;;  %v1754_v17 = vld [vmem:[#allocation2 + $0x18] sm:$0xff]   ;;  %v1757_v20 = vld [vmem:[#allocation2 + $0x50] sm:$0xff]  }
  0x38   :  { %1534 = vmatpush3.bf16.msra.mxu0 %v1742_v5  ;;  %v1751_v14 = vld [vmem:[#allocation2 + $0xe0] sm:$0xff]   ;;  %v1755_v18 = vld [vmem:[#allocation2 + $0xd8] sm:$0xff]   ;;  %v1758_v21 = vld [vmem:[#allocation2 + $0x10] sm:$0xff]  }
  0x39   :  { %1535 = vmatprep.subr.bf16.mxu0 %v1745_v8  ;;  %v1752_v15 = vld [vmem:[#allocation2 + $0xa0] sm:$0xff]   ;;  %v1756_v19 = vld [vmem:[#allocation2 + $0x98] sm:$0xff]   ;;  %v1759_v22 = vld [vmem:[#allocation2 + $0xd0] sm:$0xff]  }
  0x3a   :  { %1598 = vmatpush3.bf16.msra.mxu1 %v1744_v7  ;;  %v1760_v23 = vld [vmem:[#allocation2 + $0x90] sm:$0xff]   ;;  %v1761_v24 = vld [vmem:[#allocation2 + $0x48] sm:$0xff]   ;;  %v1765_v28 = vld [vmem:[#allocation2 + $0x40] sm:$0xff]  }
  0x3b   :  { %1599 = vmatprep.subr.bf16.mxu1 %v1747_v10  ;;  %v1762_v25 = vld [vmem:[#allocation2 + $0x8] sm:$0xff]   ;;  %v1766_v29 = vld [vmem:[#allocation2] sm:$0xff]   ;;  %v1772_v34 = vld [vmem:[#allocation2 + $0x118] sm:$0xff]  }
  0x3c   :  { %1536 = vmatpush3.bf16.msra.mxu0 %v1746_v9  ;;  %v1763_v26 = vld [vmem:[#allocation2 + $0xc8] sm:$0xff]   ;;  %v1767_v30 = vld [vmem:[#allocation2 + $0xc0] sm:$0xff]   ;;  %v1785_v41 = vld [vmem:[#allocation2 + $0x110] sm:$0xff]  }
  0x3d   :  { %1537 = vmatprep.subr.bf16.mxu0 %v1749_v12  ;;  %v1764_v27 = vld [vmem:[#allocation2 + $0x88] sm:$0xff]   ;;  %v1768_v31 = vld [vmem:[%s2444_s0] ss:$20 sps:$4 sm:$0xff]   ;;  %v1770_v32 = vld [vmem:[%s2444_s0 + $0x4] ss:$20 sps:$4 sm:$0xff]  }
  0x3e   :  { %1600 = vmatpush3.bf16.msra.mxu1 %v1748_v11  ;;  %v1771_v33 = vld [vmem:[#allocation2 + $0x80] sm:$0xff]   ;;  %672 = vmatprep.mubr.bf16.mxu0 %v1770_v32  ;;  %v1773_v35 = vld [vmem:[%s2444_s0 + $0x8] ss:$20 sps:$4 sm:$0xff]   ;;  %v1788_v48 = vld [vmem:[%s2444_s0 + $0x58] ss:$20 sps:$4 sm:$0xff]  }
  0x3f   :  { %1601 = vmatprep.subr.bf16.mxu1 %v1751_v14  ;;  %v1775_v36 = vld [vmem:[%s2444_s0 + $0xc] ss:$20 sps:$4 sm:$0xff]   ;;  %v1779_v38 = vld [vmem:[%s2444_s0 + $0x34] ss:$20 sps:$4 sm:$0xff]   ;;  %v1781_v42 = vld [vmem:[%s2444_s0 + $0x30] ss:$20 sps:$4 sm:$0xff]  }
  0x40   :  { %1538 = vmatpush3.bf16.msra.mxu0 %v1750_v13  ;;  %v1776_v37 = vld [vmem:[%s2444_s0 + $0x2c] ss:$20 sps:$4 sm:$0xff]   ;;  %769 = vmatprep.mubr.bf16.mxu1 %v1775_v36  ;;  %v1778_v39 = vld [vmem:[%s2444_s0 + $0x28] ss:$20 sps:$4 sm:$0xff]   ;;  %v1784_v45 = vld [vmem:[%s2444_s0 + $0x50] ss:$20 sps:$4 sm:$0xff]  }
  0x41   :  { %1539 = vmatprep.subr.bf16.mxu0 %v1753_v16  ;;  %v1782_v40 = vld [vmem:[%s2444_s0 + $0x54] ss:$20 sps:$4 sm:$0xff]   ;;  %v1789_v43 = vld [vmem:[#allocation6 + $0x18] sm:$0xff]   ;;  %v1809_v0 = vld [vmem:[%s2444_s0 + $0xd0] ss:$20 sps:$4 sm:$0xff]  }
  0x42   :  { %1602 = vmatpush3.bf16.msra.mxu1 %v1752_v15  ;;  %v1786_v44 = vld [vmem:[%s2444_s0 + $0x5c] ss:$20 sps:$4 sm:$0xff]   ;;  %v1799_v46 = vld [vmem:[#allocation2 + $0x108] sm:$0xff]   ;;  %v1793_v50 = vld [vmem:[%s2444_s0 + $0x84] ss:$20 sps:$4 sm:$0xff]  }
  0x43   :  { %1603 = vmatprep.subr.bf16.mxu1 %v1755_v18  ;;  %v1790_v47 = vld [vmem:[%s2444_s0 + $0x7c] ss:$20 sps:$4 sm:$0xff]   ;;  %v1792_v51 = vld [vmem:[%s2444_s0 + $0x78] ss:$20 sps:$4 sm:$0xff]   ;;  %v1813_v52 = vld [vmem:[#allocation2 + $0x100] sm:$0xff]  }
  0x44   :  { %1540 = vmatpush3.bf16.msra.mxu0 %v1754_v17  ;;  %v1803_v49 = vld [vmem:[#allocation6 + $0x10] sm:$0xff]   ;;  %v1817_v54 = vld [vmem:[#allocation6 + $0x8] sm:$0xff]   ;;  %v1826_v58 = vld [vmem:[#allocation6] sm:$0xff]  }
  0x45   :  { %1541 = vmatprep.subr.bf16.mxu0 %v1757_v20  ;;  %v1796_v53 = vld [vmem:[%s2444_s0 + $0xa4] ss:$20 sps:$4 sm:$0xff]   ;;  %v1795_v55 = vld [vmem:[%s2444_s0 + $0x80] ss:$20 sps:$4 sm:$0xff]   ;;  %v1802_v60 = vld [vmem:[%s2444_s0 + $0xa8] ss:$20 sps:$4 sm:$0xff]  }
  0x46   :  { %1604 = vmatpush3.bf16.msra.mxu1 %v1756_v19  ;;  %v1800_v56 = vld [vmem:[%s2444_s0 + $0xac] ss:$20 sps:$4 sm:$0xff]   ;;  %v1807_v61 = vld [vmem:[%s2444_s0 + $0xd4] ss:$20 sps:$4 sm:$0xff]   ;;  %v1814_v1 = vld [vmem:[%s2444_s0 + $0xfc] ss:$20 sps:$4 sm:$0xff]  }
  0x47   :  { %1605 = vmatprep.subr.bf16.mxu1 %v1759_v22  ;;  %v1798_v57 = vld [vmem:[%s2444_s0 + $0xa0] ss:$20 sps:$4 sm:$0xff]   ;;  %v1806_v62 = vld [vmem:[%s2444_s0 + $0xc8] ss:$20 sps:$4 sm:$0xff]   ;;  %v1812_v2 = vld [vmem:[%s2444_s0 + $0xf0] ss:$20 sps:$4 sm:$0xff]  }
  0x48   :  { %1542 = vmatpush3.bf16.msra.mxu0 %v1758_v21  ;;  %v1804_v59 = vld [vmem:[%s2444_s0 + $0xcc] ss:$20 sps:$4 sm:$0xff]   ;;  %v1810_v63 = vld [vmem:[%s2444_s0 + $0xf4] ss:$20 sps:$4 sm:$0xff]   ;;  %v1818_v3 = vld [vmem:[%s2444_s0 + $0x11c] ss:$20 sps:$4 sm:$0xff]  }
  0x49   :  { %1543 = vmatprep.subr.bf16.mxu0 %v1761_v24  ;;  %v1816_v4 = vld [vmem:[%s2444_s0 + $0xf8] ss:$20 sps:$4 sm:$0xff]   ;;  %v1824_v7 = vld [vmem:[%s2444_s0 + $0x10] ss:$20 sps:$4 sm:$0xff]   ;;  %v1823_v8 = vld [vmem:[%s2444_s0 + $0x120] ss:$20 sps:$4 sm:$0xff]  }
  0x4a   :  { %1606 = vmatpush3.bf16.msra.mxu1 %v1760_v23  ;;  %v1821_v5 = vld [vmem:[%s2444_s0 + $0x124] ss:$20 sps:$4 sm:$0xff]   ;;  %v1831_v9 = vld [vmem:[%s2444_s0 + $0x8] ss:$20 sps:$4 sm:$0xff]   ;;  %v1827_v11 = vld [vmem:[%s2444_s0 + $0x60] ss:$20 sps:$4 sm:$0xff]  }
  0x4b   :  { %1607 = vmatprep.subr.bf16.mxu1 %v1763_v26  ;;  %v1820_v6 = vld [vmem:[%s2444_s0 + $0x118] ss:$20 sps:$4 sm:$0xff]   ;;  %v1832_v12 = vld [vmem:[%s2444_s0 + $0x30] ss:$20 sps:$4 sm:$0xff]   ;;  %v1828_v14 = vld [vmem:[%s2444_s0 + $0x88] ss:$20 sps:$4 sm:$0xff]  }
  0x4c   :  { %1544 = vmatpush3.bf16.msra.mxu0 %v1762_v25  ;;  %v1825_v10 = vld [vmem:[%s2444_s0 + $0x38] ss:$20 sps:$4 sm:$0xff]   ;;  %v1829_v15 = vld [vmem:[%s2444_s0 + $0xb0] ss:$20 sps:$4 sm:$0xff]   ;;  %v1836_v16 = vld [vmem:[%s2444_s0 + $0x80] ss:$20 sps:$4 sm:$0xff]  }
  0x4d   :  { %1545 = vmatprep.subr.bf16.mxu0 %v1765_v28  ;;  %v1835_v13 = vld [vmem:[%s2444_s0 + $0x58] ss:$20 sps:$4 sm:$0xff]   ;;  %v1837_v17 = vld [vmem:[%s2444_s0 + $0xa8] ss:$20 sps:$4 sm:$0xff]   ;;  %v1833_v19 = vld [vmem:[%s2444_s0 + $0x100] ss:$20 sps:$4 sm:$0xff]  }
  0x4e   :  { %1608 = vmatpush3.bf16.msra.mxu1 %v1764_v27  ;;  %v1830_v18 = vld [vmem:[%s2444_s0 + $0xd8] ss:$20 sps:$4 sm:$0xff]   ;;  %v1838_v20 = vld [vmem:[%s2444_s0 + $0xd0] ss:$20 sps:$4 sm:$0xff]   ;;  %v1834_v22 = vld [vmem:[%s2444_s0 + $0x128] ss:$20 sps:$4 sm:$0xff]  }
  0x4f   :  { %1609 = vmatprep.subr.bf16.mxu1 %v1767_v30  ;;  %v1839_v21 = vld [vmem:[%s2444_s0 + $0xf8] ss:$20 sps:$4 sm:$0xff]   ;;  %v1840_v23 = vld [vmem:[%s2444_s0 + $0x120] ss:$20 sps:$4 sm:$0xff]  }
  0x50   :  { %1546 = vmatpush3.bf16.msra.mxu0 %v1766_v29 }
  0x51   :  { %1683 = vmatprep.subr.bf16.mxu0 %v1772_v34 }
  0x52   :  { %1610 = vmatpush3.bf16.msra.mxu1 %v1771_v33 }
  0x53   :  { %673 = vmatmul.mubr.bf16.vlgmr.msra.gmra.mxu0 %v1768_v31  ;;  %1707 = vmatprep.subr.bf16.mxu1 %v1789_v43 }
  0x54   :  { %1684 = vmatpush3.bf16.msra.mxu0 %v1772_v34  ;;  %680 = vmatprep.mubr.bf16.mxu0 %v1776_v37 }
  0x55   :  { %770 = vmatmul.mubr.bf16.vlgmr.msra.gmra.mxu1 %v1773_v35  ;;  %1685 = vmatprep.subr.bf16.mxu0 %v1785_v41 }
  0x56   :  { %777 = vmatprep.mubr.bf16.mxu1 %v1779_v38  ;;  %1708 = vmatpush3.bf16.msra.mxu1 %v1789_v43 }
  0x57   :  { %1709 = vmatprep.subr.bf16.mxu1 %v1803_v49 }
  0x58   :  { %1686 = vmatpush3.bf16.msra.mxu0 %v1785_v41 }
  0x59   :  { %1687 = vmatprep.subr.bf16.mxu0 %v1799_v46 }
  0x5a   :  { %1710 = vmatpush3.bf16.msra.mxu1 %v1803_v49 }
  0x5b   :  { %681 = vmatmul.mubr.bf16.gmra.mxu0 %v1778_v39  ;;  %1711 = vmatprep.subr.bf16.mxu1 %v1817_v54 }
  0x5c   :  { %688 = vmatprep.mubr.bf16.mxu0 %v1782_v40  ;;  %1688 = vmatpush3.bf16.msra.mxu0 %v1799_v46 }
  0x5d   :  { %778 = vmatmul.mubr.bf16.gmra.mxu1 %v1781_v42  ;;  %1689 = vmatprep.subr.bf16.mxu0 %v1813_v52 }
  0x5e   :  { %785 = vmatprep.mubr.bf16.mxu1 %v1786_v44  ;;  %1712 = vmatpush3.bf16.msra.mxu1 %v1817_v54 }
  0x5f   :  { %1713 = vmatprep.subr.bf16.mxu1 %v1826_v58 }
  0x60   :  { %1690 = vmatpush3.bf16.msra.mxu0 %v1813_v52 }
  0x62   :  { %1714 = vmatpush3.bf16.msra.mxu1 %v1826_v58 }
  0x63   :  { %689 = vmatmul.mubr.bf16.gmra.mxu0 %v1784_v45 }
  0x64   :  { %696 = vmatprep.mubr.bf16.mxu0 %v1790_v47 }
  0x65   :  { %786 = vmatmul.mubr.bf16.gmra.mxu1 %v1788_v48 }
  0x66   :  { %793 = vmatprep.mubr.bf16.mxu1 %v1793_v50 }
  0x6b   :  { %697 = vmatmul.mubr.bf16.gmra.mxu0 %v1792_v51 }
  0x6c   :  { %704 = vmatprep.mubr.bf16.mxu0 %v1796_v53 }
  0x6d   :  { %794 = vmatmul.mubr.bf16.gmra.mxu1 %v1795_v55 }
  0x6e   :  { %801 = vmatprep.mubr.bf16.mxu1 %v1800_v56 }
  0x73   :  { %705 = vmatmul.mubr.bf16.gmra.mxu0 %v1798_v57 }
  0x74   :  { %712 = vmatprep.mubr.bf16.mxu0 %v1804_v59 }
  0x75   :  { %802 = vmatmul.mubr.bf16.gmra.mxu1 %v1802_v60 }
  0x76   :  { %809 = vmatprep.mubr.bf16.mxu1 %v1807_v61 }
  0x7b   :  { %713 = vmatmul.mubr.bf16.gmra.mxu0 %v1806_v62 }
  0x7c   :  { %720 = vmatprep.mubr.bf16.mxu0 %v1810_v63 }
  0x7d   :  { %810 = vmatmul.mubr.bf16.gmra.mxu1 %v1809_v0 }
  0x7e   :  { %817 = vmatprep.mubr.bf16.mxu1 %v1814_v1 }
  0x83   :  { %721 = vmatmul.mubr.bf16.gmra.mxu0 %v1812_v2 }
  0x84   :  { %728 = vmatprep.mubr.bf16.mxu0 %v1818_v3 }
  0x85   :  { %818 = vmatmul.mubr.bf16.gmra.mxu1 %v1816_v4 }
  0x86   :  { %825 = vmatprep.mubr.bf16.mxu1 %v1821_v5 }
  0x8b   :  { %729 = vmatmul.mubr.bf16.gmra.mxu0 %v1820_v6 }
  0x8c   :  { %1691 = vmatprep.mubr.msk.bf16.mxu0 %vm615_vm0, %v1824_v7 }
  0x8d   :  { %826 = vmatmul.mubr.bf16.gmra.mxu1 %v1823_v8 }
  0x8e   :  { %1715 = vmatprep.mubr.msk.bf16.mxu1 %vm615_vm0, %v1831_v9 }
  0x93   :  { %1692 = vmatmul.mubr.msk.bf16.vlgmr.msra.gmra.mxu0 %vm615_vm0, %v1825_v10 }
  0x94   :  { %1695 = vmatprep.mubr.msk.bf16.mxu0 %vm615_vm0, %v1827_v11 }
  0x95   :  { %1716 = vmatmul.mubr.msk.bf16.vlgmr.msra.gmra.mxu1 %vm615_vm0, %v1832_v12 }
  0x96   :  { %1719 = vmatprep.mubr.msk.bf16.mxu1 %vm615_vm0, %v1835_v13 }
  0x9b   :  { %1696 = vmatmul.mubr.msk.bf16.gmra.mxu0 %vm615_vm0, %v1828_v14 }
  0x9c   :  { %1699 = vmatprep.mubr.msk.bf16.mxu0 %vm615_vm0, %v1829_v15 }
  0x9d   :  { %1720 = vmatmul.mubr.msk.bf16.gmra.mxu1 %vm615_vm0, %v1836_v16 }
  0x9e   :  { %1723 = vmatprep.mubr.msk.bf16.mxu1 %vm615_vm0, %v1837_v17 }
  0xa3   :  { %1700 = vmatmul.mubr.msk.bf16.gmra.mxu0 %vm615_vm0, %v1830_v18 }
  0xa4   :  { %1703 = vmatprep.mubr.msk.bf16.mxu0 %vm615_vm0, %v1833_v19  ;;  %v2237_v19 = vld [vmem:[#allocation4] ss:$0 sm:$0xff] }
  0xa5   :  { %1724 = vmatmul.mubr.msk.bf16.gmra.mxu1 %vm615_vm0, %v1838_v20 }
  0xa6   :  { %1727 = vmatprep.mubr.msk.bf16.mxu1 %vm615_vm0, %v1839_v21 }
  0xab   :  { %1704 = vmatmul.mubr.msk.bf16.gmra.mxu0 %vm615_vm0, %v1834_v22 }
  0xad   :  { %1728 = vmatmul.mubr.msk.bf16.gmra.mxu1 %vm615_vm0, %v1840_v23 }
 0x113   :  { %v1547_v24 = vpop.f32.mrf.mxu0 }
 0x115   :  { %v1548_v25 = vpop.f32.mrf.mxu0  ;;  %v2167_v26 = vpop.f32.mrf.mxu1 }
 0x116   :  { %v1549_v17 = vadd.f32 %v1548_v25, %v1547_v24 }
 0x117   :  { %v1550_v27 = vpop.f32.mrf.mxu0  ;;  %v2169_v28 = vpop.f32.mrf.mxu1 }
 0x118   :  { %v1613_v24 = vadd.f32 %v2169_v28, %v2167_v26 }
 0x119   :  { %v1551_v29 = vpop.f32.mrf.mxu0  ;;  %v2171_v30 = vpop.f32.mrf.mxu1 }
 0x11b   :  { %v1553_v31 = vpop.f32.mrf.mxu0  ;;  %v2173_v32 = vpop.f32.mrf.mxu1 }
 0x11d   :  { %v1554_v33 = vpop.f32.mrf.mxu0  ;;  %v1617_v34 = vpop.f32.mrf.mxu1 }
 0x11e   :  { %v1555_v14 = vadd.f32 %v1554_v33, %v1553_v31  ;;  %v675_v31 = vadd.f32 %v1549_v17, %v2237_v19 }
 0x11f   :  { %v1556_v35 = vpop.f32.mrf.mxu0  ;;  %v1618_v36 = vpop.f32.mrf.mxu1 }
 0x120   :  { %v683_v22 = vadd.f32 %v1555_v14, %v2237_v19  ;;  %v1619_v23 = vadd.f32 %v1618_v36, %v1617_v34 }
 0x121   :  { %v1557_v37 = vpop.f32.mrf.mxu0  ;;  %v1620_v38 = vpop.f32.mrf.mxu1 }
 0x122   :  { %v1558_v20 = vadd.f32 %v1557_v37, %v1556_v35  ;;  %v780_v34 = vadd.f32 %v1619_v23, %v683_v22 }
 0x123   :  { %v2175_v39 = vpop.f32.mrf.mxu0  ;;  %v1621_v40 = vpop.f32.mrf.mxu1 }
 0x124   :  { %v686_v33 = vadd.f32 %v1558_v20, %v2237_v19  ;;  %v1622_v35 = vadd.f32 %v1621_v40, %v1620_v38  ;;  %v772_v38 = vadd.f32 %v1613_v24, %v675_v31 }
 0x125   :  { %v1560_v41 = vpop.f32.mrf.mxu0  ;;  %v2177_v42 = vpop.f32.mrf.mxu1 }
 0x126   :  { %v1561_v36 = vadd.f32 %v1560_v41, %v2175_v39 }
 0x127   :  { %v1562_v43 = vpop.f32.mrf.mxu0  ;;  %v2179_v44 = vpop.f32.mrf.mxu1 }
 0x128   :  { %v1625_v39 = vadd.f32 %v2179_v44, %v2177_v42 }
 0x129   :  { %v1563_v45 = vpop.f32.mrf.mxu0  ;;  %v2181_v46 = vpop.f32.mrf.mxu1 }
 0x12a   :  { %v1564_v26 = vadd.f32 %v1563_v45, %v1562_v43 }
 0x12b   :  { %v1565_v47 = vpop.f32.mrf.mxu0  ;;  %v2183_v48 = vpop.f32.mrf.mxu1 }
 0x12d   :  { %v1566_v49 = vpop.f32.mrf.mxu0  ;;  %v1629_v50 = vpop.f32.mrf.mxu1 }
 0x12f   :  { %v1568_v51 = vpop.f32.mrf.mxu0  ;;  %v1630_v52 = vpop.f32.mrf.mxu1 }
 0x130   :  { %v1631_v22 = vadd.f32 %v1630_v52, %v1629_v50 }
 0x131   :  { %v1569_v53 = vpop.f32.mrf.mxu0  ;;  %v2185_v54 = vpop.f32.mrf.mxu1 }
 0x132   :  { %v1570_v40 = vadd.f32 %v1569_v53, %v1568_v51  ;;  %v694_v51 = vadd.f32 %v1564_v26, %v2237_v19 }
 0x133   :  { %v2187_v55 = vpop.f32.mrf.mxu0  ;;  %v2189_v56 = vpop.f32.mrf.mxu1 }
 0x134   :  { %v702_v31 = vadd.f32 %v1570_v40, %v2237_v19  ;;  %v1634_v42 = vadd.f32 %v2189_v56, %v2185_v54 }
 0x135   :  { %v1572_v57 = vpop.f32.mrf.mxu0  ;;  %v2191_v58 = vpop.f32.mrf.mxu1 }
 0x136   :  { %v1573_v41 = vadd.f32 %v1572_v57, %v2187_v55  ;;  %v799_v26 = vadd.f32 %v1634_v42, %v702_v31 }
 0x137   :  { %v2193_v59 = vpop.f32.mrf.mxu0  ;;  %v2195_v60 = vpop.f32.mrf.mxu1 }
 0x138   :  { %v1637_v54 = vadd.f32 %v2195_v60, %v2191_v58 }
 0x139   :  { %v2197_v61 = vpop.f32.mrf.mxu0  ;;  %v2199_v62 = vpop.f32.mrf.mxu1 }
 0x13b   :  { %v2201_v63 = vpop.f32.mrf.mxu0  ;;  %v2203_v0 = vpop.f32.mrf.mxu1 }
 0x13c   :  { %2450 = vst [vmem:[#allocation12_spill] sm:$0xff] %v2203_v0 }
 0x13d   :  { %v2205_v1 = vpop.f32.mrf.mxu0  ;;  %v2207_v2 = vpop.f32.mrf.mxu1 }
 0x13e   :  { %v1579_v44 = vadd.f32 %v2205_v1, %v2201_v63 }
 0x13f   :  { %v2209_v3 = vpop.f32.mrf.mxu0  ;;  %v2211_v4 = vpop.f32.mrf.mxu1 }
 0x141   :  { %v2213_v5 = vpop.f32.mrf.mxu0  ;;  %v2215_v6 = vpop.f32.mrf.mxu1 }
 0x143   :  { %v2217_v7 = vpop.f32.mrf.mxu0  ;;  %v2219_v8 = vpop.f32.mrf.mxu1 }
 0x145   :  { %v2221_v9 = vpop.f32.mrf.mxu0  ;;  %v2223_v10 = vpop.f32.mrf.mxu1 }
 0x146   :  { %2451 = vst [vmem:[#allocation13_spill] sm:$0xff] %v2223_v10 }
 0x147   :  { %v2225_v11 = vpop.f32.mrf.mxu0  ;;  %v2227_v12 = vpop.f32.mrf.mxu1 }
 0x148   :  { %2452 = vst [vmem:[#allocation14_spill] sm:$0xff] %v2227_v12  ;;  %v1552_v12 = vadd.f32 %v1551_v29, %v1550_v27  ;;  %v1616_v29 = vadd.f32 %v2173_v32, %v2171_v30  ;;  %v691_v32 = vadd.f32 %v1561_v36, %v2237_v19  ;;  %v715_v36 = vadd.f32 %v1579_v44, %v2237_v19 }
 0x149   :  { %v2229_v13 = vpop.f32.mrf.mxu0  ;;  %v2231_v15 = vpop.f32.mrf.mxu1 }
 0x14a   :  { %v678_v27 = vadd.f32 %v1552_v12, %v2237_v19 }
 0x14b   :  { %v2233_v16 = vpop.f32.mrf.mxu0  ;;  %v2235_v18 = vpop.f32.mrf.mxu1 }
 0x14c   :  { %2453 = vst [vmem:[#allocation15_spill] sm:$0xff] %v2235_v18  ;;  %v1567_v18 = vadd.f32 %v1566_v49, %v1565_v47  ;;  %v783_v47 = vadd.f32 %v1622_v35, %v686_v33  ;;  %v775_v45 = vadd.f32 %v1616_v29, %v678_v27  ;;  %v788_v27 = vadd.f32 %v1625_v39, %v691_v32 }
 0x14d   :  { %v2239_v21 = vpop.f32.mrf.mxu0  ;;  %v2242_v10 = vpop.f32.mrf.mxu1  ;;  %v1576_v29 = vadd.f32 %v2197_v61, %v2193_v59  ;;  %v1646_v59 = vadd.f32 %v2219_v8, %v2215_v6  ;;  %v1585_v61 = vadd.f32 %v2221_v9, %v2217_v7 }
 0x14e   :  { %v699_v49 = vadd.f32 %v1567_v18, %v2237_v19  ;;  %v1628_v18 = vadd.f32 %v2183_v48, %v2181_v46  ;;  %v1582_v46 = vadd.f32 %v2213_v5, %v2209_v3  ;;  %v1643_v5 = vadd.f32 %v2211_v4, %v2207_v2 }
 0x14f   :  { %v2244_v0 = vpop.f32.mrf.mxu0  ;;  %v2249_v25 = vpop.f32.mrf.mxu1  ;;  %v1591_v6 = vadd.f32 %v2239_v21, %v2233_v16 }
 0x150   :  { %2454 = vst [vmem:[#allocation16_spill] sm:$0xff] %v2249_v25  ;;  %v796_v33 = vadd.f32 %v1631_v22, %v699_v49  ;;  %v791_v3 = vadd.f32 %v1628_v18, %v694_v51  ;;  %v718_v40 = vadd.f32 %v1582_v46, %v2237_v19  ;;  %v710_v22 = vadd.f32 %v1576_v29, %v2237_v19 }
 0x151   :  { %v2252_v37 = vpop.f32.mrf.mxu0  ;;  %v2254_v14 = vpop.f32.mrf.mxu1  ;;  %v812_v39 = vadd.f32 %v1643_v5, %v715_v36  ;;  %v731_v42 = vadd.f32 %v1591_v6, %v2237_v19 }
 0x152   :  { %v1594_v7 = vadd.f32 %v2252_v37, %v2244_v0  ;;  %v815_v21 = vadd.f32 %v1646_v59, %v718_v40 }
 0x153   :  { %v1693_v17 = vpop.f32.mrf.mxu0  ;;  %v2260_v28 = vpop.f32.mrf.mxu1  ;;  %v2458_v0 = vld [vmem:[#allocation15_spill] sm:$0xff] }
 0x154   :  { %v2262_v25 = vadd.f32 %v1693_v17, %v780_v34  ;;  %v707_v34 = vadd.f32 %v1573_v41, %v2237_v19  ;;  %v723_v41 = vadd.f32 %v1585_v61, %v2237_v19  ;;  %v1652_v37 = vadd.f32 %v2458_v0, %v2231_v15 }
 0x155   :  { %v868_v20 = vpop.f32.mrf.mxu0  ;;  %v2268_v30 = vpop.f32.mrf.mxu1 }
 0x156   :  { %v949_v12 = vmul.f32 0.70710677, %v2262_v25  ;;  %v2266_v23 = vadd.f32 %v868_v20, %v772_v38  ;;  %v1588_v20 = vadd.f32 %v2229_v13, %v2225_v11  ;;  %v804_v49 = vadd.f32 %v1637_v54, %v707_v34 }
 0x157   :  { %v1694_v43 = vpop.f32.mrf.mxu0  ;;  %v2278_v53 = vpop.f32.mrf.mxu1  ;;  %v2459_v44 = vld [vmem:[#allocation16_spill] sm:$0xff]  ;;  %v933_v15 = vmul.f32 0.5, %v2262_v25 }
 0x158   :  { %1841 = verf.f32 %v949_v12  ;;  %v947_v50 = vmul.f32 0.70710677, %v2266_v23  ;;  %v2276_v52 = vadd.f32 %v1694_v43, %v783_v47  ;;  %v2455_v12 = vld [vmem:[#allocation12_spill] sm:$0xff]  ;;  %v2456_v43 = vld [vmem:[#allocation13_spill] sm:$0xff]  ;;  %v726_v51 = vadd.f32 %v1588_v20, %v2237_v19 }
 0x159   :  { %v871_v55 = vpop.f32.mrf.mxu0  ;;  %v2290_v35 = vpop.f32.mrf.mxu1  ;;  %v1640_v32 = vadd.f32 %v2455_v12, %v2199_v62 }
 0x15a   :  { %1843 = verf.f32 %v947_v50  ;;  %v950_v57 = vmul.f32 0.70710677, %v2276_v52  ;;  %v2288_v24 = vadd.f32 %v871_v55, %v775_v45  ;;  %v2457_v45 = vld [vmem:[#allocation14_spill] sm:$0xff]  ;;  %v1655_v55 = vadd.f32 %v2459_v44, %v2242_v10 }
 0x15b   :  { %v1697_v48 = vpop.f32.mrf.mxu0  ;;  %v2300_v1 = vpop.f32.mrf.mxu1  ;;  %v1649_v62 = vadd.f32 %v2457_v45, %v2456_v43  ;;  %v807_v36 = vadd.f32 %v1640_v32, %v710_v22 }
 0x15c   :  { %1845 = verf.f32 %v950_v57  ;;  %v948_v56 = vmul.f32 0.70710677, %v2288_v24  ;;  %v2298_v63 = vadd.f32 %v1697_v48, %v796_v33  ;;  %v734_v57 = vadd.f32 %v1594_v7, %v2237_v19 }
 0x15d   :  { %v884_v17 = vpop.f32.mrf.mxu0  ;;  %v2310_v38 = vpop.f32.mrf.mxu1  ;;  %v1658_v33 = vadd.f32 %v2260_v28, %v2254_v14  ;;  %v820_v5 = vadd.f32 %v1649_v62, %v723_v41 }
 0x15e   :  { %1847 = verf.f32 %v948_v56  ;;  %v953_v58 = vmul.f32 0.70710677, %v2298_v63  ;;  %v2308_v60 = vadd.f32 %v884_v17, %v788_v27  ;;  %v931_v56 = vmul.f32 0.5, %v2266_v23 }
 0x15f   :  { %v1698_v47 = vpop.f32.mrf.mxu0  ;;  %v2329_v9 = vpop.f32.mrf.mxu1  ;;  %v934_v23 = vmul.f32 0.5, %v2276_v52  ;;  %v831_v20 = vadd.f32 %v1658_v33, %v734_v57  ;;  %v937_v32 = vmul.f32 0.5, %v2298_v63 }
 0x160   :  { %1849 = verf.f32 %v953_v58  ;;  %v951_v2 = vmul.f32 0.70710677, %v2308_v60  ;;  %v2320_v4 = vadd.f32 %v1698_v47, %v799_v26  ;;  %v823_v58 = vadd.f32 %v1652_v37, %v726_v51 }
 0x161   :  { %v887_v8 = vpop.f32.mrf.mxu0  ;;  %v2349_v46 = vpop.f32.mrf.mxu1  ;;  %v935_v52 = vmul.f32 0.5, %v2308_v60 }
 0x162   :  { %1851 = verf.f32 %v951_v2  ;;  %v954_v11 = vmul.f32 0.70710677, %v2320_v4  ;;  %v2332_v13 = vadd.f32 %v887_v8, %v791_v3  ;;  %v828_v3 = vadd.f32 %v1655_v55, %v731_v42 }
 0x163   :  { %v1701_v16 = vpop.f32.mrf.mxu0  ;;  %v2359_v40 = vpop.f32.mrf.mxu1  ;;  %v932_v2 = vmul.f32 0.5, %v2288_v24 }
 0x164   :  { %1853 = verf.f32 %v954_v11  ;;  %v952_v50 = vmul.f32 0.70710677, %v2332_v13  ;;  %v2341_v18 = vadd.f32 %v1701_v16, %v812_v39  ;;  %v2369_v11 = vld [vmem:[#allocation7] ss:$0 sm:$0xff] }
 0x165   :  { %v1842_v31 = vpop.eup %1841  ;;  %v900_v34 = vpop.f32.mrf.mxu0 }
 0x166   :  { %1855 = verf.f32 %v952_v50  ;;  %v957_v48 = vmul.f32 0.70710677, %v2341_v18  ;;  %v981_v27 = vadd.f32 1.0, %v1842_v31  ;;  %v2354_v29 = vadd.f32 %v900_v34, %v804_v49  ;;  %v2374_v45 = vpop.f32.mrf.mxu1 }
 0x167   :  { %v1844_v54 = vpop.eup %1843  ;;  %v1702_v10 = vpop.f32.mrf.mxu0 }
 0x168   :  { %1857 = verf.f32 %v957_v48  ;;  %v997_v19 = vmul.f32 %v981_v27, %v933_v15  ;;  %v979_v17 = vadd.f32 1.0, %v1844_v54  ;;  %v2356_v14 = vadd.f32 %v1702_v10, %v815_v21 }
 0x169   :  { %v1846_v28 = vpop.eup %1845  ;;  %v955_v26 = vmul.f32 0.70710677, %v2354_v29  ;;  %v903_v25 = vpop.f32.mrf.mxu0  ;;  %v938_v21 = vmul.f32 0.5, %v2320_v4 }
 0x16a   :  { %v995_v59 = vmul.f32 %v979_v17, %v931_v56  ;;  %v958_v61 = vmul.f32 0.70710677, %v2356_v14  ;;  %v982_v49 = vadd.f32 1.0, %v1846_v28  ;;  %v2364_v22 = vadd.f32 %v903_v25, %v807_v36 }
 0x16b   :  { %v1848_v47 = vpop.eup %1847  ;;  %1859 = verf.f32 %v955_v26  ;;  %v1705_v12 = vpop.f32.mrf.mxu0  ;;  %v1222_v6 = vadd.f32 %v2268_v30, %v997_v19  ;;  %v936_v26 = vmul.f32 0.5, %v2332_v13 }
 0x16c   :  { %1861 = verf.f32 %v958_v61  ;;  %v980_v7 = vadd.f32 1.0, %v1848_v47  ;;  %v998_v39 = vmul.f32 %v982_v49, %v934_v23  ;;  %v956_v41 = vmul.f32 0.70710677, %v2364_v22 }
 0x16d   :  { %v1850_v8 = vpop.eup %1849  ;;  %v2372_v24 = vadd.f32 %v1705_v12, %v828_v3  ;;  %v916_v43 = vpop.f32.mrf.mxu0  ;;  %v1220_v62 = vadd.f32 %v2278_v53, %v995_v59  ;;  %v1245_v50 = vadd.f32 %v2369_v11, %v1222_v6  ;;  %v939_v49 = vmul.f32 0.5, %v2354_v29 }
 0x16e   :  { %v996_v63 = vmul.f32 %v980_v7, %v932_v2  ;;  %v985_v51 = vadd.f32 1.0, %v1850_v8  ;;  %v2377_v30 = vadd.f32 %v916_v43, %v820_v5  ;;  %v1223_v60 = vadd.f32 %v2290_v35, %v998_v39  ;;  %v1189_v35 = vpop.f32.mrf.mxu1 }
 0x16f   :  { %v1852_v16 = vpop.eup %1851  ;;  %1863 = verf.f32 %v956_v41  ;;  %v961_v0 = vmul.f32 0.70710677, %v2372_v24  ;;  %v1706_v37 = vpop.f32.mrf.mxu0  ;;  %v1243_v34 = vadd.f32 %v2369_v11, %v1220_v62  ;;  %v941_v5 = vmul.f32 0.5, %v2341_v18 }
 0x170   :  { %v1221_v31 = vadd.f32 %v2300_v1, %v996_v63  ;;  %v1001_v42 = vmul.f32 %v985_v51, %v937_v32  ;;  %v959_v53 = vmul.f32 0.70710677, %v2377_v30  ;;  %v1246_v55 = vadd.f32 %v2369_v11, %v1223_v60  ;;  %v1726_v3 = vpop.f32.mrf.mxu1 }
 0x171   :  { %v1854_v44 = vpop.eup %1853  ;;  %1865 = verf.f32 %v961_v0  ;;  %v983_v57 = vadd.f32 1.0, %v1852_v16  ;;  %v2386_v33 = vadd.f32 %v1706_v37, %v831_v20  ;;  %v919_v4 = vpop.f32.mrf.mxu0  ;;  %v942_v6 = vmul.f32 0.5, %v2356_v14 }
 0x172   :  { %v1244_v15 = vadd.f32 %v2369_v11, %v1221_v31  ;;  %1867 = verf.f32 %v959_v53  ;;  %v986_v48 = vadd.f32 1.0, %v1854_v44  ;;  %v1492_v1 = vpack.c.bf16 %v1246_v55, %v1245_v50 }
 0x173   :  { %v1856_v27 = vpop.eup %1855  ;;  %v999_v54 = vmul.f32 %v983_v57, %v935_v52  ;;  %v962_v56 = vmul.f32 0.70710677, %v2386_v33  ;;  %v1226_v36 = vadd.f32 %v2310_v38, %v1001_v42  ;;  %v2392_v17 = vadd.f32 %v919_v4, %v823_v58 }
 0x174   :  { %v1487_v10 = vpack.c.bf16 %v1244_v15, %v1243_v34  ;;  %v1002_v19 = vmul.f32 %v986_v48, %v938_v21  ;;  %1524 = vst [vmem:[%s2449_s5 + $0x8] sm:$0xff] %v1492_v1   ;;  %v984_v25 = vadd.f32 1.0, %v1856_v27  ;;  %v945_v60 = vmul.f32 0.5, %v2372_v24 }
 0x175   :  { %v1858_v28 = vpop.eup %1857  ;;  %1869 = verf.f32 %v962_v56  ;;  %v960_v58 = vmul.f32 0.70710677, %v2392_v17  ;;  %v1224_v13 = vadd.f32 %v2329_v9, %v999_v54  ;;  %v1249_v20 = vadd.f32 %v2369_v11, %v1226_v36 }
 0x176   :  { %1488 = vst [vmem:[%s2449_s5] sm:$0xff] %v1487_v10   ;;  %v1227_v38 = vadd.f32 %v2349_v46, %v1002_v19  ;;  %v989_v23 = vadd.f32 1.0, %v1858_v28  ;;  %v1000_v59 = vmul.f32 %v984_v25, %v936_v26  ;;  %v1192_v46 = vpop.f32.mrf.mxu1  ;;  %v943_v57 = vmul.f32 0.5, %v2377_v30 }
 0x177   :  { %1871 = verf.f32 %v960_v58  ;;  %v1247_v9 = vadd.f32 %v2369_v11, %v1224_v13  ;;  %v946_v24 = vmul.f32 0.5, %v2386_v33  ;;  %v944_v30 = vmul.f32 0.5, %v2392_v17 }
 0x178   :  { %v1860_v61 = vpop.eup %1859  ;;  %v1250_v47 = vadd.f32 %v2369_v11, %v1227_v38  ;;  %v1005_v2 = vmul.f32 %v989_v23, %v941_v5  ;;  %v1225_v12 = vadd.f32 %v2359_v40, %v1000_v59  ;;  %v940_v40 = vmul.f32 0.5, %v2364_v22  ;;  %v1729_v14 = vpop.f32.mrf.mxu1 }
 0x179   :  { %v1862_v18 = vpop.eup %1861  ;;  %v987_v32 = vadd.f32 1.0, %v1860_v61 }
 0x17a   :  { %v1502_v7 = vpack.c.bf16 %v1250_v47, %v1249_v20  ;;  %v990_v8 = vadd.f32 1.0, %v1862_v18  ;;  %v1248_v52 = vadd.f32 %v2369_v11, %v1225_v12  ;;  %v1230_v29 = vadd.f32 %v2374_v45, %v1005_v2  ;;  %v1205_v44 = vpop.f32.mrf.mxu1 }
 0x17b   :  { %v1003_v39 = vmul.f32 %v987_v32, %v939_v49 }
 0x17c   :  { %v1864_v41 = vpop.eup %1863  ;;  %1526 = vst [vmem:[%s2449_s5 + $0x18] sm:$0xff] %v1502_v7   ;;  %v1006_v43 = vmul.f32 %v990_v8, %v942_v6  ;;  %v1497_v62 = vpack.c.bf16 %v1248_v52, %v1247_v9  ;;  %v1253_v45 = vadd.f32 %v2369_v11, %v1230_v29  ;;  %v1730_v10 = vpop.f32.mrf.mxu1 }
 0x17d   :  { %v988_v63 = vadd.f32 1.0, %v1864_v41  ;;  %v1228_v0 = vadd.f32 %v1189_v35, %v1003_v39 }
 0x17e   :  { %v1866_v51 = vpop.eup %1865  ;;  %v1231_v16 = vadd.f32 %v1726_v3, %v1006_v43  ;;  %1525 = vst [vmem:[%s2449_s5 + $0x10] sm:$0xff] %v1497_v62   ;;  %v1208_v3 = vpop.f32.mrf.mxu1 }
 0x17f   :  { %v1868_v21 = vpop.eup %1867  ;;  %v1004_v37 = vmul.f32 %v988_v63, %v940_v40  ;;  %v993_v50 = vadd.f32 1.0, %v1866_v51  ;;  %v1251_v34 = vadd.f32 %v2369_v11, %v1228_v0 }
 0x180   :  { %v1254_v31 = vadd.f32 %v2369_v11, %v1231_v16  ;;  %v991_v22 = vadd.f32 1.0, %v1868_v21 }
 0x181   :  { %v1229_v42 = vadd.f32 %v1192_v46, %v1004_v37  ;;  %v1009_v53 = vmul.f32 %v993_v50, %v945_v60 }
 0x182   :  { %v1870_v55 = vpop.eup %1869  ;;  %v1512_v4 = vpack.c.bf16 %v1254_v31, %v1253_v45  ;;  %v1007_v48 = vmul.f32 %v991_v22, %v943_v57 }
 0x183   :  { %v1252_v35 = vadd.f32 %v2369_v11, %v1229_v42  ;;  %v994_v15 = vadd.f32 1.0, %v1870_v55  ;;  %v1234_v54 = vadd.f32 %v1729_v14, %v1009_v53 }
 0x184   :  { %1528 = vst [vmem:[%s2449_s5 + $0x28] sm:$0xff] %v1512_v4   ;;  %v1872_v27 = vpop.eup %1871  ;;  %v1232_v19 = vadd.f32 %v1205_v44, %v1007_v48 }
 0x185   :  { %v1507_v1 = vpack.c.bf16 %v1252_v35, %v1251_v34  ;;  %v1010_v56 = vmul.f32 %v994_v15, %v946_v24  ;;  %v992_v36 = vadd.f32 1.0, %v1872_v27  ;;  %v1257_v26 = vadd.f32 %v2369_v11, %v1234_v54 }
 0x186   :  { %v1255_v58 = vadd.f32 %v2369_v11, %v1232_v19 }
 0x187   :  { %1527 = vst [vmem:[%s2449_s5 + $0x20] sm:$0xff] %v1507_v1   ;;  %v1235_v33 = vadd.f32 %v1730_v10, %v1010_v56  ;;  %v1008_v28 = vmul.f32 %v992_v36, %v944_v30 }
 0x189   :  { %v1258_v25 = vadd.f32 %v2369_v11, %v1235_v33  ;;  %v1233_v5 = vadd.f32 %v1208_v3, %v1008_v28 }
 0x18b   :  { %v1522_v38 = vpack.c.bf16 %v1258_v25, %v1257_v26  ;;  %v1256_v23 = vadd.f32 %v2369_v11, %v1233_v5 }
 0x18d   :  { %1530 = vst [vmem:[%s2449_s5 + $0x38] sm:$0xff] %v1522_v38   ;;  %v1517_v17 = vpack.c.bf16 %v1256_v23, %v1255_v58 }
 0x18f   :  { %1529 = vst [vmem:[%s2449_s5 + $0x30] sm:$0xff] %v1517_v17  }
 0x190   :  { %1343 = vsyncpa [#allocation3], 1 }
 0x191   :  { %1344 = vsyncpa [#allocation5], 1 }
 0x192   :  { %1345 = vsyncpa [#allocation8], 1 }

// kernel: forward.5
= control target key start
LH: loop header
LB: loop body
LE: loop exit
PB: predicated region body
PF: predicated region fallthrough
CT: control target
= control target key end

     0   :  { %14 = vsyncpa [#allocation3], 0  ;;  %s17250_s0 = inlined_call_operand.vmem [shape: bf16[32,1152], index: 0, kind: input, shape index: {}]   ;;  %s17251_s1 = inlined_call_operand.hbm [shape: bf16[1152,256], index: 1, kind: input, shape index: {}]   ;;  %s17252_s2 = inlined_call_operand.vmem [shape: f32[1,256], index: 2, kind: input, shape index: {}]   ;;  %s17253_s3 = inlined_call_operand.vmem [shape: bf16[128,256], index: 3, kind: input, shape index: {}]   ;;  %s17254_s4 = inlined_call_operand.vmem [shape: f32[1,256], index: 4, kind: input, shape index: {}]   ;;  %s17255_s5 = inlined_call_operand.vmem [shape: bf16[16,256,512], index: 5, kind: input, shape index: {}]   ;;  %s17256_s6 = inlined_call_operand.vmem [shape: f32[1,512], index: 6, kind: input, shape index: {}]   ;;  %s17257_s7 = inlined_call_operand.vmem [shape: bf16[512,10], index: 7, kind: input, shape index: {}]   ;;  %s17258_s8 = inlined_call_operand.vmem [shape: f32[1,10], index: 8, kind: input, shape index: {}]   ;;  %s17259_s9 = inlined_call_operand.hbm [shape: f32[2,10], index: 9, kind: output, shape index: {}]  }
   0x1   :  { %15 = vsyncpa [#allocation4], 0  ;;  %s13685_s30 = smov [#allocation2]  }
   0x2   :  { %s23_s10 = sshll.u32 %s13685_s30, 4  ;;  %s24_s10 = int_to_ptr.vmem [resolvable:$true] %s23_s10 }
   0x3   :  { %s13649_s11 = scalar_lea.vmem %s24_s10, 18432  ;;  %p13654_p1 = scmp.lt.s32.totalorder %s24_s10, %s24_s10 }
   0x4   :  { %p13650_p0 = scmp.ne.s32.totalorder %s24_s10, %s13649_s11  ;;  %p13655_p2 = scmp.lt.s32.totalorder %s13649_s11, %s13649_s11 }
   0x6   :  { %p13656_p3 = por %p13655_p2, %p13654_p1 }
   0x8   :  { %p13657_p4 = pnand %p13656_p3, %p13650_p0 }
   0xa   :  { %13660 = shalt.err (!%p13657_p4)
}
   0xb   :  { %s13686_s12 = smov 128   ;;  %s13687_s13 = smov 8  }
   0xc   :  { %29 = dma.hbm_to_vmem [thread:$0]  %s17251_s1, 18432, %s24_s10, [#allocation3], %s13686_s12, %s13686_s12, %s13687_s13  }
   0xd   :  { %13681 = dma.done.wait [#allocation3], 18432  }
   0xe   :  { %13682 = vsyncadd [#allocation3], 4294948864  ;;  %v11781_v0 = vld [vmem:[#allocation2 + $0x74] ss:$8 sps:$4 sm:$0xff]   ;;  %v11783_v1 = vld [vmem:[#allocation2 + $0x70] ss:$8 sps:$4 sm:$0xff]  }
   0xf   :  { %1036 = vmatprep.subr.bf16.mxu0 %v11781_v0  ;;  %v11784_v2 = vld [vmem:[#allocation2 + $0x174] ss:$8 sps:$4 sm:$0xff]   ;;  %v11786_v3 = vld [vmem:[#allocation2 + $0x170] ss:$8 sps:$4 sm:$0xff]   ;;  %v11787_v4 = vld [vmem:[#allocation2 + $0x64] ss:$8 sps:$4 sm:$0xff]  }
  0x10   :  { %1037 = vmatpush1.bf16.msra.mxu0 %v11783_v1  ;;  %v11789_v5 = vld [vmem:[#allocation2 + $0x60] ss:$8 sps:$4 sm:$0xff]   ;;  %1089 = vmatprep.subr.bf16.mxu1 %v11784_v2  ;;  %v11790_v6 = vld [vmem:[#allocation2 + $0x164] ss:$8 sps:$4 sm:$0xff]   ;;  %v11793_v8 = vld [vmem:[#allocation2 + $0x54] ss:$8 sps:$4 sm:$0xff]  }
  0x11   :  { %1090 = vmatpush1.bf16.msra.mxu1 %v11786_v3  ;;  %1038 = vmatprep.subr.bf16.mxu0 %v11787_v4  ;;  %v11792_v7 = vld [vmem:[#allocation2 + $0x160] ss:$8 sps:$4 sm:$0xff]   ;;  %v11795_v9 = vld [vmem:[#allocation2 + $0x50] ss:$8 sps:$4 sm:$0xff]   ;;  %v11796_v10 = vld [vmem:[#allocation2 + $0x154] ss:$8 sps:$4 sm:$0xff]  }
  0x12   :  { %1091 = vmatprep.subr.bf16.mxu1 %v11790_v6  ;;  %v11799_v11 = vld [vmem:[#allocation2 + $0x44] ss:$8 sps:$4 sm:$0xff]   ;;  %v11798_v12 = vld [vmem:[#allocation2 + $0x150] ss:$8 sps:$4 sm:$0xff]   ;;  %v11801_v14 = vld [vmem:[#allocation2 + $0x40] ss:$8 sps:$4 sm:$0xff]  }
  0x13   :  { %v11802_v13 = vld [vmem:[#allocation2 + $0x144] ss:$8 sps:$4 sm:$0xff]   ;;  %v11805_v15 = vld [vmem:[#allocation2 + $0x34] ss:$8 sps:$4 sm:$0xff]   ;;  %v11804_v16 = vld [vmem:[#allocation2 + $0x140] ss:$8 sps:$4 sm:$0xff]  }
  0x14   :  { %1039 = vmatpush1.bf16.msra.mxu0 %v11789_v5  ;;  %v11808_v17 = vld [vmem:[#allocation2 + $0x134] ss:$8 sps:$4 sm:$0xff]   ;;  %v11807_v18 = vld [vmem:[#allocation2 + $0x30] ss:$8 sps:$4 sm:$0xff]   ;;  %v11811_v19 = vld [vmem:[#allocation2 + $0x24] ss:$8 sps:$4 sm:$0xff]  }
  0x15   :  { %1040 = vmatprep.subr.bf16.mxu0 %v11793_v8  ;;  %1092 = vmatpush1.bf16.msra.mxu1 %v11792_v7  ;;  %v11810_v20 = vld [vmem:[#allocation2 + $0x130] ss:$8 sps:$4 sm:$0xff]   ;;  %v11814_v21 = vld [vmem:[#allocation2 + $0x124] ss:$8 sps:$4 sm:$0xff]   ;;  %v11813_v22 = vld [vmem:[#allocation2 + $0x20] ss:$8 sps:$4 sm:$0xff]  }
  0x16   :  { %1093 = vmatprep.subr.bf16.mxu1 %v11796_v10  ;;  %v11817_v23 = vld [vmem:[#allocation2 + $0x14] ss:$8 sps:$4 sm:$0xff]   ;;  %v11816_v24 = vld [vmem:[#allocation2 + $0x120] ss:$8 sps:$4 sm:$0xff]   ;;  %v11819_v26 = vld [vmem:[#allocation2 + $0x10] ss:$8 sps:$4 sm:$0xff]  }
  0x17   :  { %v11820_v25 = vld [vmem:[#allocation2 + $0x114] ss:$8 sps:$4 sm:$0xff]   ;;  %v11823_v27 = vld [vmem:[#allocation2 + $0x4] ss:$8 sps:$4 sm:$0xff]   ;;  %v11822_v28 = vld [vmem:[#allocation2 + $0x110] ss:$8 sps:$4 sm:$0xff]  }
  0x18   :  { %1041 = vmatpush1.bf16.msra.mxu0 %v11795_v9  ;;  %v11826_v29 = vld [vmem:[#allocation2 + $0x104] ss:$8 sps:$4 sm:$0xff]   ;;  %v11825_v30 = vld [vmem:[#allocation2] ss:$8 sps:$4 sm:$0xff]   ;;  %v11829_v31 = vld [vmem:[#allocation2 + $0xf4] ss:$8 sps:$4 sm:$0xff]  }
  0x19   :  { %1042 = vmatprep.subr.bf16.mxu0 %v11799_v11  ;;  %1094 = vmatpush1.bf16.msra.mxu1 %v11798_v12  ;;  %v11828_v32 = vld [vmem:[#allocation2 + $0x100] ss:$8 sps:$4 sm:$0xff]   ;;  %v11832_v33 = vld [vmem:[#allocation2 + $0x1f4] ss:$8 sps:$4 sm:$0xff]   ;;  %v11831_v34 = vld [vmem:[#allocation2 + $0xf0] ss:$8 sps:$4 sm:$0xff]  }
  0x1a   :  { %1095 = vmatprep.subr.bf16.mxu1 %v11802_v13  ;;  %v11835_v35 = vld [vmem:[#allocation2 + $0xe4] ss:$8 sps:$4 sm:$0xff]   ;;  %v11834_v36 = vld [vmem:[#allocation2 + $0x1f0] ss:$8 sps:$4 sm:$0xff]   ;;  %v11837_v38 = vld [vmem:[#allocation2 + $0xe0] ss:$8 sps:$4 sm:$0xff]  }
  0x1b   :  { %v11838_v37 = vld [vmem:[#allocation2 + $0x1e4] ss:$8 sps:$4 sm:$0xff]   ;;  %v11841_v39 = vld [vmem:[#allocation2 + $0xd4] ss:$8 sps:$4 sm:$0xff]   ;;  %v11840_v40 = vld [vmem:[#allocation2 + $0x1e0] ss:$8 sps:$4 sm:$0xff]  }
  0x1c   :  { %1043 = vmatpush1.bf16.msra.mxu0 %v11801_v14  ;;  %v11844_v41 = vld [vmem:[#allocation2 + $0x1d4] ss:$8 sps:$4 sm:$0xff]   ;;  %v11843_v42 = vld [vmem:[#allocation2 + $0xd0] ss:$8 sps:$4 sm:$0xff]   ;;  %v11847_v43 = vld [vmem:[#allocation2 + $0xc4] ss:$8 sps:$4 sm:$0xff]  }
  0x1d   :  { %1044 = vmatprep.subr.bf16.mxu0 %v11805_v15  ;;  %1096 = vmatpush1.bf16.msra.mxu1 %v11804_v16  ;;  %v11846_v44 = vld [vmem:[#allocation2 + $0x1d0] ss:$8 sps:$4 sm:$0xff]   ;;  %v11850_v45 = vld [vmem:[#allocation2 + $0x1c4] ss:$8 sps:$4 sm:$0xff]   ;;  %v11849_v46 = vld [vmem:[#allocation2 + $0xc0] ss:$8 sps:$4 sm:$0xff]  }
  0x1e   :  { %1097 = vmatprep.subr.bf16.mxu1 %v11808_v17  ;;  %v11878_v47 = vld [vmem:[%s17250_s0 + $0x4] ss:$36 sps:$4 sm:$0xff]   ;;  %v11853_v48 = vld [vmem:[#allocation2 + $0xb4] ss:$8 sps:$4 sm:$0xff]   ;;  %v11885_v51 = vld [vmem:[%s17250_s0 + $0xc] ss:$36 sps:$4 sm:$0xff]  }
  0x1f   :  { %v11852_v49 = vld [vmem:[#allocation2 + $0x1c0] ss:$8 sps:$4 sm:$0xff]   ;;  %1068 = vmatprep.mubr.bf16.mxu0 %v11878_v47  ;;  %v11856_v50 = vld [vmem:[#allocation2 + $0x1b4] ss:$8 sps:$4 sm:$0xff]   ;;  %v11855_v52 = vld [vmem:[#allocation2 + $0xb0] ss:$8 sps:$4 sm:$0xff]   ;;  %1121 = vmatprep.mubr.bf16.mxu1 %v11885_v51 }
  0x20   :  { %1045 = vmatpush1.bf16.msra.mxu0 %v11807_v18  ;;  %v11859_v53 = vld [vmem:[#allocation2 + $0xa4] ss:$8 sps:$4 sm:$0xff]   ;;  %v11858_v54 = vld [vmem:[#allocation2 + $0x1b0] ss:$8 sps:$4 sm:$0xff]   ;;  %v11861_v56 = vld [vmem:[#allocation2 + $0xa0] ss:$8 sps:$4 sm:$0xff]  }
  0x21   :  { %1046 = vmatprep.subr.bf16.mxu0 %v11811_v19  ;;  %1098 = vmatpush1.bf16.msra.mxu1 %v11810_v20  ;;  %v11862_v55 = vld [vmem:[#allocation2 + $0x1a4] ss:$8 sps:$4 sm:$0xff]   ;;  %v11865_v57 = vld [vmem:[#allocation2 + $0x94] ss:$8 sps:$4 sm:$0xff]   ;;  %v11864_v58 = vld [vmem:[#allocation2 + $0x1a0] ss:$8 sps:$4 sm:$0xff]  }
  0x22   :  { %1099 = vmatprep.subr.bf16.mxu1 %v11814_v21  ;;  %v11868_v59 = vld [vmem:[#allocation2 + $0x194] ss:$8 sps:$4 sm:$0xff]   ;;  %v11867_v60 = vld [vmem:[#allocation2 + $0x90] ss:$8 sps:$4 sm:$0xff]   ;;  %v11871_v61 = vld [vmem:[#allocation2 + $0x84] ss:$8 sps:$4 sm:$0xff]  }
  0x23   :  { %v11870_v62 = vld [vmem:[#allocation2 + $0x190] ss:$8 sps:$4 sm:$0xff]   ;;  %v11874_v63 = vld [vmem:[#allocation2 + $0x184] ss:$8 sps:$4 sm:$0xff]   ;;  %v11873_v0 = vld [vmem:[#allocation2 + $0x80] ss:$8 sps:$4 sm:$0xff]  }
  0x24   :  { %1047 = vmatpush1.bf16.msra.mxu0 %v11813_v22  ;;  %v11882_v1 = vld [vmem:[#allocation2 + $0x274] ss:$8 sps:$4 sm:$0xff]   ;;  %v11879_v2 = vld [vmem:[#allocation2 + $0x180] ss:$8 sps:$4 sm:$0xff]   ;;  %v11880_v5 = vld [vmem:[#allocation2 + $0x270] ss:$8 sps:$4 sm:$0xff]  }
  0x25   :  { %1048 = vmatprep.subr.bf16.mxu0 %v11817_v23  ;;  %1100 = vmatpush1.bf16.msra.mxu1 %v11816_v24  ;;  %v11876_v3 = vld [vmem:[%s17250_s0] ss:$36 sps:$4 sm:$0xff]   ;;  %v11888_v4 = vld [vmem:[#allocation2 + $0x374] ss:$8 sps:$4 sm:$0xff]   ;;  %v11883_v6 = vld [vmem:[%s17250_s0 + $0x8] ss:$36 sps:$4 sm:$0xff]  }
  0x26   :  { %1101 = vmatprep.subr.bf16.mxu1 %v11820_v25  ;;  %v11891_v7 = vld [vmem:[#allocation2 + $0x264] ss:$8 sps:$4 sm:$0xff]   ;;  %v11886_v8 = vld [vmem:[#allocation2 + $0x370] ss:$8 sps:$4 sm:$0xff]   ;;  %v11889_v10 = vld [vmem:[#allocation2 + $0x260] ss:$8 sps:$4 sm:$0xff]  }
  0x27   :  { %v11894_v9 = vld [vmem:[#allocation2 + $0x364] ss:$8 sps:$4 sm:$0xff]   ;;  %v11897_v11 = vld [vmem:[#allocation2 + $0x254] ss:$8 sps:$4 sm:$0xff]   ;;  %v11892_v12 = vld [vmem:[#allocation2 + $0x360] ss:$8 sps:$4 sm:$0xff]  }
  0x28   :  { %1049 = vmatpush1.bf16.msra.mxu0 %v11819_v26  ;;  %v11900_v13 = vld [vmem:[#allocation2 + $0x354] ss:$8 sps:$4 sm:$0xff]   ;;  %v11895_v14 = vld [vmem:[#allocation2 + $0x250] ss:$8 sps:$4 sm:$0xff]   ;;  %v11903_v15 = vld [vmem:[#allocation2 + $0x244] ss:$8 sps:$4 sm:$0xff]  }
  0x29   :  { %1050 = vmatprep.subr.bf16.mxu0 %v11823_v27  ;;  %1102 = vmatpush1.bf16.msra.mxu1 %v11822_v28  ;;  %v11898_v16 = vld [vmem:[#allocation2 + $0x350] ss:$8 sps:$4 sm:$0xff]   ;;  %v11906_v17 = vld [vmem:[#allocation2 + $0x344] ss:$8 sps:$4 sm:$0xff]   ;;  %v11901_v18 = vld [vmem:[#allocation2 + $0x240] ss:$8 sps:$4 sm:$0xff]  }
  0x2a   :  { %1103 = vmatprep.subr.bf16.mxu1 %v11826_v29  ;;  %v11909_v19 = vld [vmem:[#allocation2 + $0x234] ss:$8 sps:$4 sm:$0xff]   ;;  %v11904_v20 = vld [vmem:[#allocation2 + $0x340] ss:$8 sps:$4 sm:$0xff]   ;;  %v11907_v21 = vld [vmem:[#allocation2 + $0x230] ss:$8 sps:$4 sm:$0xff]  }
  0x2b   :  { %v11912_v22 = vld [vmem:[#allocation2 + $0x334] ss:$8 sps:$4 sm:$0xff]   ;;  %v11910_v23 = vld [vmem:[#allocation2 + $0x330] ss:$8 sps:$4 sm:$0xff]   ;;  %v11915_v25 = vld [vmem:[#allocation2 + $0x224] ss:$8 sps:$4 sm:$0xff]  }
  0x2c   :  { %1051 = vmatpush1.bf16.msra.mxu0 %v11825_v30  ;;  %v11958_v24 = vld [vmem:[%s17250_s0 + $0x4c] ss:$36 sps:$4 sm:$0xff]   ;;  %v11964_v28 = vld [vmem:[%s17250_s0 + $0x54] ss:$36 sps:$4 sm:$0xff]   ;;  %v11913_v29 = vld [vmem:[#allocation2 + $0x220] ss:$8 sps:$4 sm:$0xff]  }
  0x2d   :  { %1052 = vmatprep.subr.bf16.mxu0 %v11829_v31  ;;  %1104 = vmatpush1.bf16.msra.mxu1 %v11828_v32  ;;  %v11918_v26 = vld [vmem:[#allocation2 + $0x324] ss:$8 sps:$4 sm:$0xff]   ;;  %v11969_v30 = vld [vmem:[%s17250_s0 + $0x50] ss:$36 sps:$4 sm:$0xff]   ;;  %v11916_v32 = vld [vmem:[#allocation2 + $0x320] ss:$8 sps:$4 sm:$0xff]  }
  0x2e   :  { %1105 = vmatprep.subr.bf16.mxu1 %v11832_v33  ;;  %v11963_v27 = vld [vmem:[%s17250_s0 + $0x48] ss:$36 sps:$4 sm:$0xff]   ;;  %v11921_v31 = vld [vmem:[#allocation2 + $0x214] ss:$8 sps:$4 sm:$0xff]   ;;  %s13689_s15 = smov [#allocation5]   ;;  %vm9518_vm0 = vcmask 74752  }
  0x2f   :  { %v11924_v33 = vld [vmem:[#allocation2 + $0x314] ss:$8 sps:$4 sm:$0xff]   ;;  %v11942_v47 = vld [vmem:[#allocation2 + $0x3e4] ss:$8 sps:$4 sm:$0xff]   ;;  %s9526_s1 = sshll.u32 %s13689_s15, 4  ;;  %s9527_s1 = int_to_ptr.vmem [resolvable:$true] %s9526_s1 }
  0x30   :  { %1053 = vmatpush2.bf16.msra.mxu0 %v11831_v34  ;;  %v11919_v34 = vld [vmem:[#allocation2 + $0x210] ss:$8 sps:$4 sm:$0xff]   ;;  %v11948_v51 = vld [vmem:[#allocation2 + $0x3d4] ss:$8 sps:$4 sm:$0xff]   ;;  %s13661_s16 = scalar_lea.vmem %s9527_s1, 32  ;;  %p13666_p6 = scmp.lt.s32.totalorder %s9527_s1, %s9527_s1 }
  0x31   :  { %1054 = vmatprep.subr.bf16.mxu0 %v11835_v35  ;;  %1106 = vmatpush2.bf16.msra.mxu1 %v11834_v36  ;;  %v11927_v35 = vld [vmem:[#allocation2 + $0x204] ss:$8 sps:$4 sm:$0xff]   ;;  %v11922_v36 = vld [vmem:[#allocation2 + $0x310] ss:$8 sps:$4 sm:$0xff]   ;;  %p13662_p5 = scmp.ne.s32.totalorder %s9527_s1, %s13661_s16  ;;  %p13667_p7 = scmp.lt.s32.totalorder %s13661_s16, %s13661_s16 }
  0x32   :  { %1107 = vmatprep.subr.bf16.mxu1 %v11838_v37  ;;  %v11930_v37 = vld [vmem:[#allocation2 + $0x304] ss:$8 sps:$4 sm:$0xff]  }
  0x33   :  { %p13668_p8 = por %p13667_p7, %p13666_p6 }
  0x34   :  { %1055 = vmatpush2.bf16.msra.mxu0 %v11837_v38  ;;  %v11925_v38 = vld [vmem:[#allocation2 + $0x200] ss:$8 sps:$4 sm:$0xff]  }
  0x35   :  { %1056 = vmatprep.subr.bf16.mxu0 %v11841_v39  ;;  %1108 = vmatpush2.bf16.msra.mxu1 %v11840_v40  ;;  %v11987_v39 = vld [vmem:[%s17250_s0 + $0x14] ss:$36 sps:$4 sm:$0xff]   ;;  %p13669_p9 = pnand %p13668_p8, %p13662_p5 }
  0x36   :  { %1109 = vmatprep.subr.bf16.mxu1 %v11844_v41  ;;  %v11933_v40 = vld [vmem:[#allocation2 + $0x2f4] ss:$8 sps:$4 sm:$0xff]   ;;  %v11928_v41 = vld [vmem:[#allocation2 + $0x300] ss:$8 sps:$4 sm:$0xff]  }
  0x38   :  { %1057 = vmatpush2.bf16.msra.mxu0 %v11843_v42  ;;  %v11936_v42 = vld [vmem:[#allocation2 + $0x3f4] ss:$8 sps:$4 sm:$0xff]  }
  0x39   :  { %1058 = vmatprep.subr.bf16.mxu0 %v11847_v43  ;;  %1110 = vmatpush2.bf16.msra.mxu1 %v11846_v44  ;;  %v11993_v43 = vld [vmem:[%s17250_s0 + $0x1c] ss:$36 sps:$4 sm:$0xff]   ;;  %v11931_v44 = vld [vmem:[#allocation2 + $0x2f0] ss:$8 sps:$4 sm:$0xff]  }
  0x3a   :  { %1111 = vmatprep.subr.bf16.mxu1 %v11850_v45  ;;  %v11939_v45 = vld [vmem:[#allocation2 + $0x2e4] ss:$8 sps:$4 sm:$0xff]  }
  0x3c   :  { %1059 = vmatpush2.bf16.msra.mxu0 %v11849_v46  ;;  %v11934_v46 = vld [vmem:[#allocation2 + $0x3f0] ss:$8 sps:$4 sm:$0xff]  }
  0x3d   :  { %1060 = vmatprep.subr.bf16.mxu0 %v11853_v48  ;;  %1112 = vmatpush2.bf16.msra.mxu1 %v11852_v49  ;;  %v11937_v48 = vld [vmem:[#allocation2 + $0x2e0] ss:$8 sps:$4 sm:$0xff]   ;;  %v11945_v49 = vld [vmem:[#allocation2 + $0x2d4] ss:$8 sps:$4 sm:$0xff]  }
  0x3e   :  { %1113 = vmatprep.subr.bf16.mxu1 %v11856_v50  ;;  %v11940_v50 = vld [vmem:[#allocation2 + $0x3e0] ss:$8 sps:$4 sm:$0xff]  }
  0x40   :  { %1061 = vmatpush2.bf16.msra.mxu0 %v11855_v52  ;;  %v11943_v52 = vld [vmem:[#allocation2 + $0x2d0] ss:$8 sps:$4 sm:$0xff]  }
  0x41   :  { %1062 = vmatprep.subr.bf16.mxu0 %v11859_v53  ;;  %1114 = vmatpush2.bf16.msra.mxu1 %v11858_v54  ;;  %v11951_v53 = vld [vmem:[#allocation2 + $0x2c4] ss:$8 sps:$4 sm:$0xff]   ;;  %v11946_v54 = vld [vmem:[#allocation2 + $0x3d0] ss:$8 sps:$4 sm:$0xff]  }
  0x42   :  { %1115 = vmatprep.subr.bf16.mxu1 %v11862_v55  ;;  %v11954_v55 = vld [vmem:[#allocation2 + $0x3c4] ss:$8 sps:$4 sm:$0xff]  }
  0x44   :  { %1063 = vmatpush2.bf16.msra.mxu0 %v11861_v56  ;;  %v11949_v56 = vld [vmem:[#allocation2 + $0x2c0] ss:$8 sps:$4 sm:$0xff]  }
  0x45   :  { %1064 = vmatprep.subr.bf16.mxu0 %v11865_v57  ;;  %1116 = vmatpush2.bf16.msra.mxu1 %v11864_v58  ;;  %v11957_v57 = vld [vmem:[#allocation2 + $0x2b4] ss:$8 sps:$4 sm:$0xff]   ;;  %v11952_v58 = vld [vmem:[#allocation2 + $0x3c0] ss:$8 sps:$4 sm:$0xff]  }
  0x46   :  { %1117 = vmatprep.subr.bf16.mxu1 %v11868_v59  ;;  %v11962_v59 = vld [vmem:[#allocation2 + $0x3b4] ss:$8 sps:$4 sm:$0xff]  }
  0x48   :  { %1065 = vmatpush2.bf16.msra.mxu0 %v11867_v60  ;;  %v11955_v60 = vld [vmem:[#allocation2 + $0x2b0] ss:$8 sps:$4 sm:$0xff]  }
  0x49   :  { %1066 = vmatprep.subr.bf16.mxu0 %v11871_v61  ;;  %1118 = vmatpush2.bf16.msra.mxu1 %v11870_v62  ;;  %v11968_v61 = vld [vmem:[#allocation2 + $0x2a4] ss:$8 sps:$4 sm:$0xff]   ;;  %v11960_v62 = vld [vmem:[#allocation2 + $0x3b0] ss:$8 sps:$4 sm:$0xff]  }
  0x4a   :  { %1119 = vmatprep.subr.bf16.mxu1 %v11874_v63  ;;  %v11972_v63 = vld [vmem:[#allocation2 + $0x3a4] ss:$8 sps:$4 sm:$0xff]  }
  0x4c   :  { %1067 = vmatpush2.bf16.msra.mxu0 %v11873_v0  ;;  %v11966_v0 = vld [vmem:[#allocation2 + $0x2a0] ss:$8 sps:$4 sm:$0xff]  }
  0x4d   :  { %1142 = vmatprep.subr.bf16.mxu0 %v11882_v1  ;;  %1120 = vmatpush2.bf16.msra.mxu1 %v11879_v2  ;;  %v11975_v1 = vld [vmem:[#allocation2 + $0x294] ss:$8 sps:$4 sm:$0xff]   ;;  %v11970_v2 = vld [vmem:[#allocation2 + $0x3a0] ss:$8 sps:$4 sm:$0xff]  }
  0x4e   :  { %1195 = vmatprep.subr.bf16.mxu1 %v11888_v4  ;;  %v11978_v4 = vld [vmem:[#allocation2 + $0x394] ss:$8 sps:$4 sm:$0xff]  }
  0x4f   :  { %1069 = vmatmul.mubr.bf16.vlgmr.msra.gmra.mxu0 %v11876_v3  ;;  %v11973_v3 = vld [vmem:[#allocation2 + $0x290] ss:$8 sps:$4 sm:$0xff]  }
  0x50   :  { %1143 = vmatpush1.bf16.msra.mxu0 %v11880_v5  ;;  %1122 = vmatmul.mubr.bf16.vlgmr.msra.gmra.mxu1 %v11883_v6  ;;  %v11976_v5 = vld [vmem:[#allocation2 + $0x390] ss:$8 sps:$4 sm:$0xff]   ;;  %v11981_v6 = vld [vmem:[#allocation2 + $0x284] ss:$8 sps:$4 sm:$0xff]  }
  0x51   :  { %1144 = vmatprep.subr.bf16.mxu0 %v11891_v7  ;;  %1196 = vmatpush1.bf16.msra.mxu1 %v11886_v8  ;;  %v11979_v7 = vld [vmem:[#allocation2 + $0x280] ss:$8 sps:$4 sm:$0xff]   ;;  %v11984_v8 = vld [vmem:[#allocation2 + $0x384] ss:$8 sps:$4 sm:$0xff]  }
  0x52   :  { %1197 = vmatprep.subr.bf16.mxu1 %v11894_v9  ;;  %1078 = vmatprep.mubr.bf16.mxu0 %v11958_v24  ;;  %v11990_v9 = vld [vmem:[#allocation2 + $0x474] ss:$8 sps:$4 sm:$0xff]  }
  0x53   :  { %1131 = vmatprep.mubr.bf16.mxu1 %v11964_v28  ;;  %v12026_v24 = vld [vmem:[%s17253_s3 + $0x54] ss:$8 sps:$4 sm:$0xff]   ;;  %v12024_v28 = vld [vmem:[%s17253_s3 + $0x50] ss:$8 sps:$4 sm:$0xff]  }
  0x54   :  { %1145 = vmatpush1.bf16.msra.mxu0 %v11889_v10  ;;  %v11982_v10 = vld [vmem:[#allocation2 + $0x380] ss:$8 sps:$4 sm:$0xff]  }
  0x55   :  { %1146 = vmatprep.subr.bf16.mxu0 %v11897_v11  ;;  %1198 = vmatpush1.bf16.msra.mxu1 %v11892_v12  ;;  %v11985_v11 = vld [vmem:[%s17250_s0 + $0x10] ss:$36 sps:$4 sm:$0xff]  }
  0x56   :  { %1199 = vmatprep.subr.bf16.mxu1 %v11900_v13  ;;  %v12014_v12 = vld [vmem:[%s17253_s3 + $0x74] ss:$8 sps:$4 sm:$0xff]   ;;  %v11988_v13 = vld [vmem:[#allocation2 + $0x470] ss:$8 sps:$4 sm:$0xff]  }
  0x57   :  { %1079 = vmatmul.mubr.bf16.gmra.mxu0 %v11963_v27  ;;  %v12008_v27 = vld [vmem:[#allocation2 + $0x444] ss:$8 sps:$4 sm:$0xff]  }
  0x58   :  { %1147 = vmatpush1.bf16.msra.mxu0 %v11895_v14  ;;  %1132 = vmatmul.mubr.bf16.gmra.mxu1 %v11969_v30  ;;  %v11997_v14 = vld [vmem:[%s17250_s0 + $0x5c] ss:$36 sps:$4 sm:$0xff]  }
  0x59   :  { %1148 = vmatprep.subr.bf16.mxu0 %v11903_v15  ;;  %1200 = vmatpush1.bf16.msra.mxu1 %v11898_v16  ;;  %v11991_v15 = vld [vmem:[%s17250_s0 + $0x18] ss:$36 sps:$4 sm:$0xff]   ;;  %v11996_v16 = vld [vmem:[#allocation2 + $0x464] ss:$8 sps:$4 sm:$0xff]   ;;  %v12006_v30 = vld [vmem:[#allocation2 + $0x440] ss:$8 sps:$4 sm:$0xff]  }
  0x5a   :  { %1201 = vmatprep.subr.bf16.mxu1 %v11906_v17  ;;  %1174 = vmatprep.mubr.bf16.mxu0 %v11987_v39  ;;  %v12003_v17 = vld [vmem:[%s17250_s0 + $0x64] ss:$36 sps:$4 sm:$0xff]  }
  0x5b   :  { %1227 = vmatprep.mubr.bf16.mxu1 %v11993_v43  ;;  %v12015_v39 = vld [vmem:[#allocation2 + $0x420] ss:$8 sps:$4 sm:$0xff]   ;;  %v12021_v43 = vld [vmem:[#allocation2 + $0x410] ss:$8 sps:$4 sm:$0xff]  }
  0x5c   :  { %1149 = vmatpush1.bf16.msra.mxu0 %v11901_v18  ;;  %v12012_v18 = vld [vmem:[%s17253_s3 + $0x70] ss:$8 sps:$4 sm:$0xff]  }
  0x5d   :  { %1150 = vmatprep.subr.bf16.mxu0 %v11909_v19  ;;  %1202 = vmatpush1.bf16.msra.mxu1 %v11904_v20  ;;  %v12020_v19 = vld [vmem:[%s17253_s3 + $0x64] ss:$8 sps:$4 sm:$0xff]   ;;  %v11994_v20 = vld [vmem:[#allocation2 + $0x460] ss:$8 sps:$4 sm:$0xff]  }
  0x5e   :  { %1203 = vmatprep.subr.bf16.mxu1 %v11912_v22  ;;  %v12018_v22 = vld [vmem:[%s17253_s3 + $0x60] ss:$8 sps:$4 sm:$0xff]  }
  0x60   :  { %1151 = vmatpush1.bf16.msra.mxu0 %v11907_v21  ;;  %v12002_v21 = vld [vmem:[#allocation2 + $0x454] ss:$8 sps:$4 sm:$0xff]  }
  0x61   :  { %1152 = vmatprep.subr.bf16.mxu0 %v11915_v25  ;;  %1204 = vmatpush1.bf16.msra.mxu1 %v11910_v23  ;;  %v11999_v23 = vld [vmem:[%s17250_s0 + $0x58] ss:$36 sps:$4 sm:$0xff]  }
  0x62   :  { %1205 = vmatprep.subr.bf16.mxu1 %v11918_v26  ;;  %v12000_v25 = vld [vmem:[#allocation2 + $0x450] ss:$8 sps:$4 sm:$0xff]   ;;  %v12005_v26 = vld [vmem:[%s17250_s0 + $0x60] ss:$36 sps:$4 sm:$0xff]  }
  0x64   :  { %1153 = vmatpush1.bf16.msra.mxu0 %v11913_v29  ;;  %v12032_v29 = vld [vmem:[%s17253_s3 + $0x44] ss:$8 sps:$4 sm:$0xff]  }
  0x65   :  { %1154 = vmatprep.subr.bf16.mxu0 %v11921_v31  ;;  %1206 = vmatpush1.bf16.msra.mxu1 %v11916_v32  ;;  %v12011_v31 = vld [vmem:[#allocation2 + $0x434] ss:$8 sps:$4 sm:$0xff]   ;;  %v12030_v32 = vld [vmem:[%s17253_s3 + $0x40] ss:$8 sps:$4 sm:$0xff]  }
  0x66   :  { %1207 = vmatprep.subr.bf16.mxu1 %v11924_v33  ;;  %v13688_v33 = vmov 0  }
  0x68   :  { %1155 = vmatpush1.bf16.msra.mxu0 %v11919_v34  ;;  %v12036_v34 = vld [vmem:[%s17253_s3 + $0x34] ss:$8 sps:$4 sm:$0xff]  }
  0x69   :  { %1156 = vmatprep.subr.bf16.mxu0 %v11927_v35  ;;  %1208 = vmatpush1.bf16.msra.mxu1 %v11922_v36  ;;  %v12009_v35 = vld [vmem:[#allocation2 + $0x430] ss:$8 sps:$4 sm:$0xff]   ;;  %v12017_v36 = vld [vmem:[#allocation2 + $0x424] ss:$8 sps:$4 sm:$0xff]  }
  0x6a   :  { %1209 = vmatprep.subr.bf16.mxu1 %v11930_v37  ;;  %v12034_v37 = vld [vmem:[%s17253_s3 + $0x30] ss:$8 sps:$4 sm:$0xff]  }
  0x6c   :  { %1157 = vmatpush1.bf16.msra.mxu0 %v11925_v38  ;;  %v12039_v38 = vld [vmem:[%s17253_s3 + $0x24] ss:$8 sps:$4 sm:$0xff]  }
  0x6d   :  { %1158 = vmatprep.subr.bf16.mxu0 %v11933_v40  ;;  %1210 = vmatpush1.bf16.msra.mxu1 %v11928_v41  ;;  %v12023_v40 = vld [vmem:[#allocation2 + $0x414] ss:$8 sps:$4 sm:$0xff]   ;;  %v12037_v41 = vld [vmem:[%s17253_s3 + $0x20] ss:$8 sps:$4 sm:$0xff]  }
  0x6e   :  { %1211 = vmatprep.subr.bf16.mxu1 %v11936_v42  ;;  %v12043_v42 = vld [vmem:[%s17253_s3 + $0x14] ss:$8 sps:$4 sm:$0xff]  }
  0x70   :  { %1159 = vmatpush2.bf16.msra.mxu0 %v11931_v44  ;;  %v12029_v44 = vld [vmem:[#allocation2 + $0x404] ss:$8 sps:$4 sm:$0xff]  }
  0x71   :  { %1160 = vmatprep.subr.bf16.mxu0 %v11939_v45  ;;  %1212 = vmatpush2.bf16.msra.mxu1 %v11934_v46  ;;  %v12041_v45 = vld [vmem:[%s17253_s3 + $0x10] ss:$8 sps:$4 sm:$0xff]   ;;  %v12046_v46 = vld [vmem:[%s17253_s3 + $0x4] ss:$8 sps:$4 sm:$0xff]  }
  0x72   :  { %1213 = vmatprep.subr.bf16.mxu1 %v11942_v47  ;;  %v12027_v47 = vld [vmem:[#allocation2 + $0x400] ss:$8 sps:$4 sm:$0xff]  }
  0x74   :  { %1161 = vmatpush2.bf16.msra.mxu0 %v11937_v48  ;;  %v12044_v48 = vld [vmem:[%s17253_s3] ss:$8 sps:$4 sm:$0xff]  }
  0x75   :  { %1162 = vmatprep.subr.bf16.mxu0 %v11945_v49  ;;  %1214 = vmatpush2.bf16.msra.mxu1 %v11940_v50  ;;  %v12033_v49 = vld [vmem:[%s17250_s0 + $0x20] ss:$36 sps:$4 sm:$0xff]   ;;  %v12047_v50 = vld [vmem:[%s17250_s0 + $0x10] ss:$36 sps:$4 sm:$0xff]  }
  0x76   :  { %1215 = vmatprep.subr.bf16.mxu1 %v11948_v51  ;;  %v12040_v51 = vld [vmem:[%s17250_s0 + $0x68] ss:$36 sps:$4 sm:$0xff]  }
  0x78   :  { %1163 = vmatpush2.bf16.msra.mxu0 %v11943_v52  ;;  %v12048_v52 = vld [vmem:[%s17250_s0 + $0x58] ss:$36 sps:$4 sm:$0xff]  }
  0x79   :  { %1164 = vmatprep.subr.bf16.mxu0 %v11951_v53  ;;  %1216 = vmatpush2.bf16.msra.mxu1 %v11946_v54  ;;  %v12051_v53 = vld [vmem:[%s17255_s5 + $0x2e4] ss:$16 sps:$4 sm:$0xff]   ;;  %v12054_v54 = vld [vmem:[%s17255_s5 + $0x2ec] ss:$16 sps:$4 sm:$0xff]  }
  0x7a   :  { %1217 = vmatprep.subr.bf16.mxu1 %v11954_v55  ;;  %v12049_v55 = vld [vmem:[%s17255_s5 + $0x2e0] ss:$16 sps:$4 sm:$0xff]  }
  0x7c   :  { %1165 = vmatpush2.bf16.msra.mxu0 %v11949_v56  ;;  %v12052_v56 = vld [vmem:[%s17255_s5 + $0x2e8] ss:$16 sps:$4 sm:$0xff]  }
  0x7d   :  { %1166 = vmatprep.subr.bf16.mxu0 %v11957_v57  ;;  %1218 = vmatpush2.bf16.msra.mxu1 %v11952_v58  ;;  %v12057_v57 = vld [vmem:[%s17255_s5 + $0x2c4] ss:$16 sps:$4 sm:$0xff]   ;;  %v12060_v58 = vld [vmem:[%s17255_s5 + $0x2cc] ss:$16 sps:$4 sm:$0xff]  }
  0x7e   :  { %1219 = vmatprep.subr.bf16.mxu1 %v11962_v59  ;;  %v12055_v59 = vld [vmem:[%s17255_s5 + $0x2c0] ss:$16 sps:$4 sm:$0xff]  }
  0x80   :  { %1167 = vmatpush2.bf16.msra.mxu0 %v11955_v60  ;;  %v12058_v60 = vld [vmem:[%s17255_s5 + $0x2c8] ss:$16 sps:$4 sm:$0xff]  }
  0x81   :  { %1168 = vmatprep.subr.bf16.mxu0 %v11968_v61  ;;  %1220 = vmatpush2.bf16.msra.mxu1 %v11960_v62  ;;  %v12063_v61 = vld [vmem:[%s17255_s5 + $0x2a4] ss:$16 sps:$4 sm:$0xff]   ;;  %v12066_v62 = vld [vmem:[%s17255_s5 + $0x2ac] ss:$16 sps:$4 sm:$0xff]  }
  0x82   :  { %1221 = vmatprep.subr.bf16.mxu1 %v11972_v63  ;;  %v12061_v63 = vld [vmem:[%s17255_s5 + $0x2a0] ss:$16 sps:$4 sm:$0xff]  }
  0x84   :  { %1169 = vmatpush2.bf16.msra.mxu0 %v11966_v0  ;;  %v12064_v0 = vld [vmem:[%s17255_s5 + $0x2a8] ss:$16 sps:$4 sm:$0xff]  }
  0x85   :  { %1170 = vmatprep.subr.bf16.mxu0 %v11975_v1  ;;  %1222 = vmatpush2.bf16.msra.mxu1 %v11970_v2  ;;  %v12069_v1 = vld [vmem:[%s17255_s5 + $0x284] ss:$16 sps:$4 sm:$0xff]   ;;  %v12072_v2 = vld [vmem:[%s17255_s5 + $0x28c] ss:$16 sps:$4 sm:$0xff]  }
  0x86   :  { %1223 = vmatprep.subr.bf16.mxu1 %v11978_v4  ;;  %v12070_v4 = vld [vmem:[%s17255_s5 + $0x288] ss:$16 sps:$4 sm:$0xff]  }
  0x88   :  { %1171 = vmatpush2.bf16.msra.mxu0 %v11973_v3  ;;  %v12067_v3 = vld [vmem:[%s17255_s5 + $0x280] ss:$16 sps:$4 sm:$0xff]  }
  0x89   :  { %1172 = vmatprep.subr.bf16.mxu0 %v11981_v6  ;;  %1224 = vmatpush2.bf16.msra.mxu1 %v11976_v5  ;;  %v12075_v5 = vld [vmem:[%s17255_s5 + $0x264] ss:$16 sps:$4 sm:$0xff]   ;;  %v12073_v6 = vld [vmem:[%s17255_s5 + $0x260] ss:$16 sps:$4 sm:$0xff]  }
  0x8a   :  { %1225 = vmatprep.subr.bf16.mxu1 %v11984_v8  ;;  %v12078_v8 = vld [vmem:[%s17255_s5 + $0x26c] ss:$16 sps:$4 sm:$0xff]  }
  0x8c   :  { %1173 = vmatpush2.bf16.msra.mxu0 %v11979_v7  ;;  %v12076_v7 = vld [vmem:[%s17255_s5 + $0x268] ss:$16 sps:$4 sm:$0xff]  }
  0x8d   :  { %1248 = vmatprep.subr.bf16.mxu0 %v11990_v9  ;;  %1226 = vmatpush2.bf16.msra.mxu1 %v11982_v10  ;;  %v12081_v9 = vld [vmem:[%s17255_s5 + $0x244] ss:$16 sps:$4 sm:$0xff]   ;;  %v12084_v10 = vld [vmem:[%s17255_s5 + $0x24c] ss:$16 sps:$4 sm:$0xff]  }
  0x8e   :  { %1453 = vmatprep.subr.bf16.mxu1 %v12014_v12  ;;  %v12082_v12 = vld [vmem:[%s17255_s5 + $0x248] ss:$16 sps:$4 sm:$0xff]  }
  0x8f   :  { %1175 = vmatmul.mubr.bf16.vlgmr.msra.gmra.mxu0 %v11985_v11  ;;  %v12079_v11 = vld [vmem:[%s17255_s5 + $0x240] ss:$16 sps:$4 sm:$0xff]  }
  0x90   :  { %1249 = vmatpush1.bf16.msra.mxu0 %v11988_v13  ;;  %1184 = vmatprep.mubr.bf16.mxu0 %v11997_v14  ;;  %v12087_v13 = vld [vmem:[%s17255_s5 + $0x224] ss:$16 sps:$4 sm:$0xff]   ;;  %v12090_v14 = vld [vmem:[%s17255_s5 + $0x22c] ss:$16 sps:$4 sm:$0xff]  }
  0x91   :  { %1228 = vmatmul.mubr.bf16.vlgmr.msra.gmra.mxu1 %v11991_v15  ;;  %1250 = vmatprep.subr.bf16.mxu0 %v11996_v16  ;;  %v12085_v15 = vld [vmem:[%s17255_s5 + $0x220] ss:$16 sps:$4 sm:$0xff]   ;;  %v12088_v16 = vld [vmem:[%s17255_s5 + $0x228] ss:$16 sps:$4 sm:$0xff]  }
  0x92   :  { %1237 = vmatprep.mubr.bf16.mxu1 %v12003_v17  ;;  %1454 = vmatpush1.bf16.msra.mxu1 %v12012_v18  ;;  %v12093_v17 = vld [vmem:[%s17255_s5 + $0x204] ss:$16 sps:$4 sm:$0xff]   ;;  %v12096_v18 = vld [vmem:[%s17255_s5 + $0x20c] ss:$16 sps:$4 sm:$0xff]  }
  0x93   :  { %1455 = vmatprep.subr.bf16.mxu1 %v12020_v19  ;;  %v12091_v19 = vld [vmem:[%s17255_s5 + $0x200] ss:$16 sps:$4 sm:$0xff]  }
  0x94   :  { %1251 = vmatpush1.bf16.msra.mxu0 %v11994_v20  ;;  %v12094_v20 = vld [vmem:[%s17255_s5 + $0x208] ss:$16 sps:$4 sm:$0xff]  }
  0x95   :  { %1252 = vmatprep.subr.bf16.mxu0 %v12002_v21  ;;  %v12099_v21 = vld [vmem:[%s17255_s5 + $0x3e4] ss:$16 sps:$4 sm:$0xff]  }
  0x96   :  { %1456 = vmatpush1.bf16.msra.mxu1 %v12018_v22  ;;  %v12102_v22 = vld [vmem:[%s17255_s5 + $0x3ec] ss:$16 sps:$4 sm:$0xff]  }
  0x97   :  { %1185 = vmatmul.mubr.bf16.gmra.mxu0 %v11999_v23  ;;  %1457 = vmatprep.subr.bf16.mxu1 %v12026_v24  ;;  %v12097_v23 = vld [vmem:[%s17255_s5 + $0x3e0] ss:$16 sps:$4 sm:$0xff]   ;;  %v12100_v24 = vld [vmem:[%s17255_s5 + $0x3e8] ss:$16 sps:$4 sm:$0xff]  }
  0x98   :  { %1253 = vmatpush1.bf16.msra.mxu0 %v12000_v25  ;;  %1280 = vmatprep.mubr.bf16.mxu0 %v13688_v33  ;;  %v12105_v25 = vld [vmem:[%s17255_s5 + $0x3c4] ss:$16 sps:$4 sm:$0xff]  }
  0x99   :  { %1238 = vmatmul.mubr.bf16.gmra.mxu1 %v12005_v26  ;;  %1254 = vmatprep.subr.bf16.mxu0 %v12008_v27  ;;  %v12108_v26 = vld [vmem:[%s17255_s5 + $0x3cc] ss:$16 sps:$4 sm:$0xff]   ;;  %v12103_v27 = vld [vmem:[%s17255_s5 + $0x3c0] ss:$16 sps:$4 sm:$0xff]  }
  0x9a   :  { %1458 = vmatpush1.bf16.msra.mxu1 %v12024_v28  ;;  %1485 = vmatprep.mubr.bf16.mxu1 %v13688_v33  ;;  %v12106_v28 = vld [vmem:[%s17255_s5 + $0x3c8] ss:$16 sps:$4 sm:$0xff]  }
  0x9b   :  { %1459 = vmatprep.subr.bf16.mxu1 %v12032_v29  ;;  %v12111_v29 = vld [vmem:[%s17255_s5 + $0x3a4] ss:$16 sps:$4 sm:$0xff]  }
  0x9c   :  { %1255 = vmatpush1.bf16.msra.mxu0 %v12006_v30  ;;  %v12114_v30 = vld [vmem:[%s17255_s5 + $0x3ac] ss:$16 sps:$4 sm:$0xff]  }
  0x9d   :  { %1256 = vmatprep.subr.bf16.mxu0 %v12011_v31  ;;  %v12109_v31 = vld [vmem:[%s17255_s5 + $0x3a0] ss:$16 sps:$4 sm:$0xff]  }
  0x9e   :  { %1460 = vmatpush1.bf16.msra.mxu1 %v12030_v32  ;;  %v12112_v32 = vld [vmem:[%s17255_s5 + $0x3a8] ss:$16 sps:$4 sm:$0xff]  }
  0x9f   :  { %1461 = vmatprep.subr.bf16.mxu1 %v12036_v34  ;;  %v12120_v34 = vld [vmem:[%s17255_s5 + $0x38c] ss:$16 sps:$4 sm:$0xff]  }
  0xa0   :  { %1257 = vmatpush1.bf16.msra.mxu0 %v12009_v35  ;;  %v12115_v35 = vld [vmem:[%s17255_s5 + $0x380] ss:$16 sps:$4 sm:$0xff]  }
  0xa1   :  { %1258 = vmatprep.subr.bf16.mxu0 %v12017_v36  ;;  %v12118_v36 = vld [vmem:[%s17255_s5 + $0x388] ss:$16 sps:$4 sm:$0xff]  }
  0xa2   :  { %1462 = vmatpush1.bf16.msra.mxu1 %v12034_v37  ;;  %v12123_v37 = vld [vmem:[%s17255_s5 + $0x364] ss:$16 sps:$4 sm:$0xff]  }
  0xa3   :  { %1463 = vmatprep.subr.bf16.mxu1 %v12039_v38  ;;  %v12126_v38 = vld [vmem:[%s17255_s5 + $0x36c] ss:$16 sps:$4 sm:$0xff]  }
  0xa4   :  { %1259 = vmatpush1.bf16.msra.mxu0 %v12015_v39  ;;  %v12121_v39 = vld [vmem:[%s17255_s5 + $0x360] ss:$16 sps:$4 sm:$0xff]  }
  0xa5   :  { %1260 = vmatprep.subr.bf16.mxu0 %v12023_v40  ;;  %v12124_v40 = vld [vmem:[%s17255_s5 + $0x368] ss:$16 sps:$4 sm:$0xff]  }
  0xa6   :  { %1464 = vmatpush1.bf16.msra.mxu1 %v12037_v41  ;;  %v12129_v41 = vld [vmem:[%s17255_s5 + $0x344] ss:$16 sps:$4 sm:$0xff]  }
  0xa7   :  { %1465 = vmatprep.subr.bf16.mxu1 %v12043_v42  ;;  %v12132_v42 = vld [vmem:[%s17255_s5 + $0x34c] ss:$16 sps:$4 sm:$0xff]  }
  0xa8   :  { %1261 = vmatpush1.bf16.msra.mxu0 %v12021_v43  ;;  %v12127_v43 = vld [vmem:[%s17255_s5 + $0x340] ss:$16 sps:$4 sm:$0xff]  }
  0xa9   :  { %1262 = vmatprep.subr.bf16.mxu0 %v12029_v44  ;;  %v12130_v44 = vld [vmem:[%s17255_s5 + $0x348] ss:$16 sps:$4 sm:$0xff]  }
  0xaa   :  { %1466 = vmatpush1.bf16.msra.mxu1 %v12041_v45  ;;  %v12135_v45 = vld [vmem:[%s17255_s5 + $0x324] ss:$16 sps:$4 sm:$0xff]  }
  0xab   :  { %1467 = vmatprep.subr.bf16.mxu1 %v12046_v46  ;;  %v12138_v46 = vld [vmem:[%s17255_s5 + $0x32c] ss:$16 sps:$4 sm:$0xff]  }
  0xac   :  { %1263 = vmatpush1.bf16.msra.mxu0 %v12027_v47  ;;  %v12133_v47 = vld [vmem:[%s17255_s5 + $0x320] ss:$16 sps:$4 sm:$0xff]  }
  0xad   :  { %1993 = vmatprep.subr.bf16.mxu0 %v12051_v53 }
  0xae   :  { %1468 = vmatpush1.bf16.msra.mxu1 %v12044_v48  ;;  %v12136_v48 = vld [vmem:[%s17255_s5 + $0x328] ss:$16 sps:$4 sm:$0xff]  }
  0xaf   :  { %1281 = vmatmul.mubr.bf16.vlgmr.msra.gmra.mxu0 %v12033_v49  ;;  %2034 = vmatprep.subr.bf16.mxu1 %v12054_v54  ;;  %v12141_v49 = vld [vmem:[%s17255_s5 + $0x304] ss:$16 sps:$4 sm:$0xff]  }
  0xb0   :  { %1290 = vmatprep.mubr.bf16.mxu0 %v13688_v33  ;;  %1994 = vmatpush1.bf16.msra.mxu0 %v12049_v55  ;;  %v12147_v54 = vld [vmem:[%s17255_s5 + $0xe4] ss:$16 sps:$4 sm:$0xff]   ;;  %v12150_v55 = vld [vmem:[%s17255_s5 + $0xec] ss:$16 sps:$4 sm:$0xff]  }
  0xb1   :  { %1486 = vmatmul.mubr.bf16.vlgmr.msra.gmra.mxu1 %v12047_v50  ;;  %1995 = vmatprep.subr.bf16.mxu0 %v12057_v57  ;;  %v12144_v50 = vld [vmem:[%s17255_s5 + $0x30c] ss:$16 sps:$4 sm:$0xff]  }
  0xb2   :  { %1495 = vmatprep.mubr.bf16.mxu1 %v13688_v33  ;;  %2035 = vmatpush1.bf16.msra.mxu1 %v12052_v56  ;;  %v12117_v33 = vld [vmem:[%s17255_s5 + $0x384] ss:$16 sps:$4 sm:$0xff]   ;;  %v214_v56 = vlaneseq }
  0xb3   :  { %2036 = vmatprep.subr.bf16.mxu1 %v12060_v58 }
  0xb4   :  { %1996 = vmatpush1.bf16.msra.mxu0 %v12055_v59  ;;  %v14049_v59 = vshrl.u32 %v214_v56, 7 }
  0xb5   :  { %1997 = vmatprep.subr.bf16.mxu0 %v12063_v61  ;;  %v212_v61 = vld [vmem:[%s17252_s2] sm:$0x3] }
  0xb6   :  { %2037 = vmatpush1.bf16.msra.mxu1 %v12058_v60 }
  0xb7   :  { %1291 = vmatmul.mubr.bf16.gmra.mxu0 %v12040_v51  ;;  %2038 = vmatprep.subr.bf16.mxu1 %v12066_v62  ;;  %v12139_v51 = vld [vmem:[%s17255_s5 + $0x300] ss:$16 sps:$4 sm:$0xff]  }
  0xb8   :  { %1998 = vmatpush1.bf16.msra.mxu0 %v12061_v63  ;;  %v14055_v63 = vsub.s32 0, %v14049_v59 }
  0xb9   :  { %1496 = vmatmul.mubr.bf16.gmra.mxu1 %v12048_v52  ;;  %1999 = vmatprep.subr.bf16.mxu0 %v12069_v1  ;;  %v12142_v52 = vld [vmem:[%s17255_s5 + $0x308] ss:$16 sps:$4 sm:$0xff]   ;;  %v14058_v1 = vsub.s32 1, %v14049_v59 }
  0xba   :  { %2039 = vmatpush1.bf16.msra.mxu1 %v12064_v0 }
  0xbb   :  { %2040 = vmatprep.subr.bf16.mxu1 %v12072_v2 }
  0xbc   :  { %2000 = vmatpush1.bf16.msra.mxu0 %v12067_v3  ;;  %v217_v3 = vrot.slane %v212_v61, %v14055_v63 }
  0xbd   :  { %2001 = vmatprep.subr.bf16.mxu0 %v12075_v5 }
  0xbe   :  { %2041 = vmatpush1.bf16.msra.mxu1 %v12070_v4 }
  0xbf   :  { %2042 = vmatprep.subr.bf16.mxu1 %v12078_v8 }
  0xc0   :  { %2002 = vmatpush1.bf16.msra.mxu0 %v12073_v6  ;;  %v221_v6 = vrot.slane %v212_v61, %v14058_v1 }
  0xc1   :  { %2003 = vmatprep.subr.bf16.mxu0 %v12081_v9 }
  0xc2   :  { %2043 = vmatpush1.bf16.msra.mxu1 %v12076_v7 }
  0xc3   :  { %2044 = vmatprep.subr.bf16.mxu1 %v12084_v10 }
  0xc4   :  { %2004 = vmatpush1.bf16.msra.mxu0 %v12079_v11 }
  0xc5   :  { %2005 = vmatprep.subr.bf16.mxu0 %v12087_v13 }
  0xc6   :  { %2045 = vmatpush1.bf16.msra.mxu1 %v12082_v12 }
  0xc7   :  { %2046 = vmatprep.subr.bf16.mxu1 %v12090_v14 }
  0xc8   :  { %2006 = vmatpush1.bf16.msra.mxu0 %v12085_v15 }
  0xc9   :  { %2007 = vmatprep.subr.bf16.mxu0 %v12093_v17 }
  0xca   :  { %2047 = vmatpush1.bf16.msra.mxu1 %v12088_v16 }
  0xcb   :  { %2048 = vmatprep.subr.bf16.mxu1 %v12096_v18 }
  0xcc   :  { %2008 = vmatpush1.bf16.msra.mxu0 %v12091_v19 }
  0xcd   :  { %2009 = vmatprep.subr.bf16.mxu0 %v12099_v21 }
  0xce   :  { %2049 = vmatpush1.bf16.msra.mxu1 %v12094_v20 }
  0xcf   :  { %2050 = vmatprep.subr.bf16.mxu1 %v12102_v22 }
  0xd0   :  { %2010 = vmatpush2.bf16.msra.mxu0 %v12097_v23 }
  0xd1   :  { %2011 = vmatprep.subr.bf16.mxu0 %v12105_v25 }
  0xd2   :  { %2051 = vmatpush2.bf16.msra.mxu1 %v12100_v24 }
  0xd3   :  { %2052 = vmatprep.subr.bf16.mxu1 %v12108_v26 }
  0xd4   :  { %2012 = vmatpush2.bf16.msra.mxu0 %v12103_v27 }
  0xd5   :  { %2013 = vmatprep.subr.bf16.mxu0 %v12111_v29 }
  0xd6   :  { %2053 = vmatpush2.bf16.msra.mxu1 %v12106_v28 }
  0xd7   :  { %2054 = vmatprep.subr.bf16.mxu1 %v12114_v30 }
  0xd8   :  { %2014 = vmatpush2.bf16.msra.mxu0 %v12109_v31 }
  0xd9   :  { %2015 = vmatprep.subr.bf16.mxu0 %v12117_v33 }
  0xda   :  { %2055 = vmatpush2.bf16.msra.mxu1 %v12112_v32 }
  0xdb   :  { %2056 = vmatprep.subr.bf16.mxu1 %v12120_v34 }
  0xdc   :  { %2016 = vmatpush2.bf16.msra.mxu0 %v12115_v35 }
  0xdd   :  { %2017 = vmatprep.subr.bf16.mxu0 %v12123_v37 }
  0xde   :  { %2057 = vmatpush2.bf16.msra.mxu1 %v12118_v36 }
  0xdf   :  { %2058 = vmatprep.subr.bf16.mxu1 %v12126_v38 }
  0xe0   :  { %2018 = vmatpush2.bf16.msra.mxu0 %v12121_v39 }
  0xe1   :  { %2019 = vmatprep.subr.bf16.mxu0 %v12129_v41 }
  0xe2   :  { %2059 = vmatpush2.bf16.msra.mxu1 %v12124_v40 }
  0xe3   :  { %2060 = vmatprep.subr.bf16.mxu1 %v12132_v42 }
  0xe4   :  { %2020 = vmatpush2.bf16.msra.mxu0 %v12127_v43 }
  0xe5   :  { %2021 = vmatprep.subr.bf16.mxu0 %v12135_v45 }
  0xe6   :  { %2061 = vmatpush2.bf16.msra.mxu1 %v12130_v44 }
  0xe7   :  { %2062 = vmatprep.subr.bf16.mxu1 %v12138_v46 }
  0xe8   :  { %2022 = vmatpush2.bf16.msra.mxu0 %v12133_v47 }
  0xe9   :  { %2023 = vmatprep.subr.bf16.mxu0 %v12141_v49 }
  0xea   :  { %2063 = vmatpush2.bf16.msra.mxu1 %v12136_v48 }
  0xeb   :  { %2064 = vmatprep.subr.bf16.mxu1 %v12144_v50 }
  0xec   :  { %2024 = vmatpush2.bf16.msra.mxu0 %v12139_v51 }
  0xed   :  { %2395 = vmatprep.subr.bf16.mxu0 %v12147_v54 }
  0xee   :  { %2065 = vmatpush2.bf16.msra.mxu1 %v12142_v52 }
  0xef   :  { %2436 = vmatprep.subr.bf16.mxu1 %v12150_v55 }
 0x10f   :  { %v1070_v53 = vpop.f32.mrf.mxu0 }
 0x110   :  { %v1123_v57 = vpop.f32.mrf.mxu1  ;;  %v1071_v46 = vadd.f32 %v1070_v53, %v217_v3 }
 0x111   :  { %v1072_v58 = vpop.f32.mrf.mxu0 }
 0x112   :  { %v1125_v60 = vpop.f32.mrf.mxu1  ;;  %v1073_v47 = vadd.f32 %v1072_v58, %v221_v6  ;;  %v1124_v48 = vadd.f32 %v1123_v57, %v1071_v46 }
 0x113   :  { %v1074_v62 = vpop.f32.mrf.mxu0 }
 0x114   :  { %v1127_v0 = vpop.f32.mrf.mxu1  ;;  %v1075_v49 = vadd.f32 %v1074_v62, %v217_v3  ;;  %v1126_v50 = vadd.f32 %v1125_v60, %v1073_v47 }
 0x115   :  { %v1076_v2 = vpop.f32.mrf.mxu0 }
 0x116   :  { %v1129_v4 = vpop.f32.mrf.mxu1  ;;  %v1077_v51 = vadd.f32 %v1076_v2, %v221_v6  ;;  %v1128_v54 = vadd.f32 %v1127_v0, %v1075_v49 }
 0x117   :  { %v1080_v5 = vpop.f32.mrf.mxu0 }
 0x118   :  { %v1081_v7 = vadd.f32 %v1080_v5, %v217_v3  ;;  %v1133_v9 = vpop.f32.mrf.mxu1  ;;  %v1130_v56 = vadd.f32 %v1129_v4, %v1077_v51 }
 0x119   :  { %v1082_v8 = vpop.f32.mrf.mxu0 }
 0x11a   :  { %v1083_v10 = vadd.f32 %v1082_v8, %v221_v6  ;;  %v1134_v11 = vadd.f32 %v1133_v9, %v1081_v7  ;;  %v1135_v13 = vpop.f32.mrf.mxu1 }
 0x11b   :  { %v1084_v12 = vpop.f32.mrf.mxu0 }
 0x11c   :  { %v1085_v14 = vadd.f32 %v1084_v12, %v217_v3  ;;  %v1136_v15 = vadd.f32 %v1135_v13, %v1083_v10  ;;  %v1137_v17 = vpop.f32.mrf.mxu1 }
 0x11d   :  { %v1086_v16 = vpop.f32.mrf.mxu0 }
 0x11e   :  { %v1087_v18 = vadd.f32 %v1086_v16, %v221_v6  ;;  %v1138_v19 = vadd.f32 %v1137_v17, %v1085_v14  ;;  %v1139_v20 = vpop.f32.mrf.mxu1 }
 0x120   :  { %v1140_v21 = vadd.f32 %v1139_v20, %v1087_v18 }
 0x14f   :  { %v1176_v22 = vpop.f32.mrf.mxu0 }
 0x150   :  { %v1177_v52 = vadd.f32 %v1176_v22, %v1124_v48 }
 0x151   :  { %v1178_v23 = vpop.f32.mrf.mxu0  ;;  %v1229_v24 = vpop.f32.mrf.mxu1 }
 0x152   :  { %v1179_v55 = vadd.f32 %v1178_v23, %v1126_v50  ;;  %v1230_v61 = vadd.f32 %v1229_v24, %v1177_v52 }
 0x153   :  { %v1180_v25 = vpop.f32.mrf.mxu0  ;;  %v1231_v26 = vpop.f32.mrf.mxu1 }
 0x154   :  { %v1181_v5 = vadd.f32 %v1180_v25, %v1128_v54  ;;  %v1232_v8 = vadd.f32 %v1231_v26, %v1179_v55 }
 0x155   :  { %v1182_v27 = vpop.f32.mrf.mxu0  ;;  %v1233_v28 = vpop.f32.mrf.mxu1 }
 0x156   :  { %v1183_v9 = vadd.f32 %v1182_v27, %v1130_v56  ;;  %v1234_v12 = vadd.f32 %v1233_v28, %v1181_v5 }
 0x157   :  { %v1186_v29 = vpop.f32.mrf.mxu0  ;;  %v1235_v30 = vpop.f32.mrf.mxu1 }
 0x158   :  { %v1187_v31 = vadd.f32 %v1186_v29, %v1134_v11  ;;  %v1236_v58 = vadd.f32 %v1235_v30, %v1183_v9 }
 0x159   :  { %v1188_v32 = vpop.f32.mrf.mxu0  ;;  %v1239_v33 = vpop.f32.mrf.mxu1 }
 0x15a   :  { %v1189_v34 = vadd.f32 %v1188_v32, %v1136_v15  ;;  %v1240_v35 = vadd.f32 %v1239_v33, %v1187_v31 }
 0x15b   :  { %v1190_v36 = vpop.f32.mrf.mxu0  ;;  %v1241_v37 = vpop.f32.mrf.mxu1 }
 0x15c   :  { %v1191_v38 = vadd.f32 %v1190_v36, %v1138_v19  ;;  %v1242_v39 = vadd.f32 %v1241_v37, %v1189_v34  ;;  %v1514_v34 = vld [vmem:[%s17254_s4] sm:$0x3] }
 0x15d   :  { %v1192_v40 = vpop.f32.mrf.mxu0  ;;  %v1243_v41 = vpop.f32.mrf.mxu1  ;;  %v1519_v49 = vrot.slane %v1514_v34, %v14055_v63  ;;  %v1523_v50 = vrot.slane %v1514_v34, %v14058_v1 }
 0x15e   :  { %v1193_v42 = vadd.f32 %v1192_v40, %v1140_v21  ;;  %v1244_v43 = vadd.f32 %v1243_v41, %v1191_v38 }
 0x15f   :  { %v1245_v44 = vpop.f32.mrf.mxu1 }
 0x160   :  { %v1246_v45 = vadd.f32 %v1245_v44, %v1193_v42 }
 0x16f   :  { %v1282_v7 = vpop.f32.mrf.mxu0 }
 0x170   :  { %v1283_v10 = vadd.f32 %v1282_v7, %v1230_v61 }
 0x171   :  { %v1284_v11 = vpop.f32.mrf.mxu0  ;;  %v1487_v4 = vpop.f32.mrf.mxu1 }
 0x172   :  { %v1309_v13 = vmul.f32 0.70710677, %v1283_v10  ;;  %v1285_v14 = vadd.f32 %v1284_v11, %v1232_v8  ;;  %v1301_v31 = vmul.f32 0.5, %v1283_v10 }
 0x173   :  { %v1286_v53 = vpop.f32.mrf.mxu0  ;;  %v1489_v20 = vpop.f32.mrf.mxu1 }
 0x174   :  { %13617 = verf.f32 %v1309_v13  ;;  %v1310_v57 = vmul.f32 0.70710677, %v1285_v14  ;;  %v1287_v60 = vadd.f32 %v1286_v53, %v1234_v12  ;;  %v1302_v33 = vmul.f32 0.5, %v1285_v14 }
 0x175   :  { %v1288_v62 = vpop.f32.mrf.mxu0  ;;  %v1491_v26 = vpop.f32.mrf.mxu1 }
 0x176   :  { %13619 = verf.f32 %v1310_v57  ;;  %v1311_v0 = vmul.f32 0.70710677, %v1287_v60  ;;  %v1289_v2 = vadd.f32 %v1288_v62, %v1236_v58 }
 0x177   :  { %v1292_v3 = vpop.f32.mrf.mxu0  ;;  %v1493_v32 = vpop.f32.mrf.mxu1 }
 0x178   :  { %13621 = verf.f32 %v1311_v0  ;;  %v1312_v6 = vmul.f32 0.70710677, %v1289_v2  ;;  %v1293_v15 = vadd.f32 %v1292_v3, %v1240_v35 }
 0x179   :  { %v1294_v16 = vpop.f32.mrf.mxu0  ;;  %v1497_v38 = vpop.f32.mrf.mxu1 }
 0x17a   :  { %13623 = verf.f32 %v1312_v6  ;;  %v1313_v17 = vmul.f32 0.70710677, %v1293_v15  ;;  %v1295_v18 = vadd.f32 %v1294_v16, %v1242_v39  ;;  %v1303_v39 = vmul.f32 0.5, %v1287_v60 }
 0x17b   :  { %v1296_v19 = vpop.f32.mrf.mxu0  ;;  %v1305_v47 = vmul.f32 0.5, %v1293_v15  ;;  %v1499_v51 = vpop.f32.mrf.mxu1 }
 0x17c   :  { %13625 = verf.f32 %v1313_v17  ;;  %v1314_v21 = vmul.f32 0.70710677, %v1295_v18  ;;  %v1297_v22 = vadd.f32 %v1296_v19, %v1244_v43  ;;  %v1304_v43 = vmul.f32 0.5, %v1289_v2  ;;  %v12145_v17 = vld [vmem:[%s17255_s5 + $0xe0] ss:$16 sps:$4 sm:$0xff]  }
 0x17d   :  { %v1298_v23 = vpop.f32.mrf.mxu0  ;;  %v1306_v5 = vmul.f32 0.5, %v1295_v18  ;;  %v1501_v13 = vpop.f32.mrf.mxu1  ;;  %v12148_v18 = vld [vmem:[%s17255_s5 + $0xe8] ss:$16 sps:$4 sm:$0xff]  }
 0x17e   :  { %13627 = verf.f32 %v1314_v21  ;;  %v1315_v24 = vmul.f32 0.70710677, %v1297_v22  ;;  %v1299_v25 = vadd.f32 %v1298_v23, %v1246_v45  ;;  %v1307_v62 = vmul.f32 0.5, %v1297_v22 }
 0x180   :  { %13629 = verf.f32 %v1315_v24  ;;  %v1316_v27 = vmul.f32 0.70710677, %v1299_v25  ;;  %v1308_v0 = vmul.f32 0.5, %v1299_v25 }
 0x181   :  { %v13618_v28 = vpop.eup %13617 }
 0x182   :  { %13631 = verf.f32 %v1316_v27  ;;  %v1325_v29 = vadd.f32 1.0, %v13618_v28  ;;  %v12151_v27 = vld [vmem:[%s17255_s5 + $0xc0] ss:$16 sps:$4 sm:$0xff]   ;;  %v12153_v28 = vld [vmem:[%s17255_s5 + $0xc4] ss:$16 sps:$4 sm:$0xff]  }
 0x183   :  { %v13620_v30 = vpop.eup %13619 }
 0x184   :  { %v1326_v35 = vadd.f32 1.0, %v13620_v30  ;;  %v1333_v37 = vmul.f32 %v1325_v29, %v1301_v31  ;;  %v12156_v29 = vld [vmem:[%s17255_s5 + $0xcc] ss:$16 sps:$4 sm:$0xff]   ;;  %v12154_v31 = vld [vmem:[%s17255_s5 + $0xc8] ss:$16 sps:$4 sm:$0xff]  }
 0x185   :  { %v13622_v36 = vpop.eup %13621 }
 0x186   :  { %v1334_v40 = vmul.f32 %v1326_v35, %v1302_v33  ;;  %v1327_v41 = vadd.f32 1.0, %v13622_v36  ;;  %v1506_v48 = vadd.f32 %v1487_v4, %v1333_v37  ;;  %v12162_v33 = vld [vmem:[%s17255_s5 + $0xac] ss:$16 sps:$4 sm:$0xff]   ;;  %v12157_v37 = vld [vmem:[%s17255_s5 + $0xa0] ss:$16 sps:$4 sm:$0xff]  }
 0x187   :  { %v13624_v42 = vpop.eup %13623 }
 0x188   :  { %v1335_v44 = vmul.f32 %v1327_v41, %v1303_v39  ;;  %v1328_v45 = vadd.f32 1.0, %v13624_v42  ;;  %v1507_v52 = vadd.f32 %v1489_v20, %v1334_v40  ;;  %v1526_v12 = vadd.f32 %v1519_v49, %v1506_v48  ;;  %v1503_v20 = vpop.f32.mrf.mxu1  ;;  %v12165_v39 = vld [vmem:[%s17255_s5 + $0x84] ss:$16 sps:$4 sm:$0xff]   ;;  %v12168_v40 = vld [vmem:[%s17255_s5 + $0x8c] ss:$16 sps:$4 sm:$0xff]  }
 0x189   :  { %v13626_v46 = vpop.eup %13625  ;;  %v12163_v41 = vld [vmem:[%s17255_s5 + $0x80] ss:$16 sps:$4 sm:$0xff]   ;;  %v12166_v42 = vld [vmem:[%s17255_s5 + $0x88] ss:$16 sps:$4 sm:$0xff]   ;;  %v12180_v48 = vld [vmem:[%s17255_s5 + $0x4c] ss:$16 sps:$4 sm:$0xff]  }
 0x18a   :  { %v1508_v54 = vadd.f32 %v1491_v26, %v1335_v44  ;;  %v1336_v55 = vmul.f32 %v1328_v45, %v1304_v43  ;;  %v1329_v56 = vadd.f32 1.0, %v13626_v46  ;;  %v1527_v14 = vadd.f32 %v1523_v50, %v1507_v52  ;;  %v12171_v43 = vld [vmem:[%s17255_s5 + $0x64] ss:$16 sps:$4 sm:$0xff]   ;;  %v12174_v44 = vld [vmem:[%s17255_s5 + $0x6c] ss:$16 sps:$4 sm:$0xff]  }
 0x18b   :  { %v13628_v61 = vpop.eup %13627  ;;  %v12169_v45 = vld [vmem:[%s17255_s5 + $0x60] ss:$16 sps:$4 sm:$0xff]   ;;  %v12172_v46 = vld [vmem:[%s17255_s5 + $0x68] ss:$16 sps:$4 sm:$0xff]   ;;  %v12186_v52 = vld [vmem:[%s17255_s5 + $0x2c] ss:$16 sps:$4 sm:$0xff]  }
 0x18c   :  { %v1528_v7 = vadd.f32 %v1519_v49, %v1508_v54  ;;  %v1509_v8 = vadd.f32 %v1493_v32, %v1336_v55  ;;  %v1337_v9 = vmul.f32 %v1329_v56, %v1305_v47  ;;  %v1330_v10 = vadd.f32 1.0, %v13628_v61  ;;  %v12159_v32 = vld [vmem:[%s17255_s5 + $0xa4] ss:$16 sps:$4 sm:$0xff]   ;;  %v12181_v54 = vld [vmem:[%s17255_s5 + $0x20] ss:$16 sps:$4 sm:$0xff]  }
 0x18d   :  { %v13630_v11 = vpop.eup %13629  ;;  %v12177_v47 = vld [vmem:[%s17255_s5 + $0x44] ss:$16 sps:$4 sm:$0xff]   ;;  %v12184_v55 = vld [vmem:[%s17255_s5 + $0x28] ss:$16 sps:$4 sm:$0xff]   ;;  %v12192_v61 = vld [vmem:[%s17255_s5 + $0xc] ss:$16 sps:$4 sm:$0xff]  }
 0x18e   :  { %v1529_v53 = vadd.f32 %v1523_v50, %v1509_v8  ;;  %v1510_v58 = vadd.f32 %v1497_v38, %v1337_v9  ;;  %v1338_v57 = vmul.f32 %v1330_v10, %v1306_v5  ;;  %v14067_v2 = vpack.c.bf16 %v1528_v7, %v1526_v12  ;;  %v12160_v38 = vld [vmem:[%s17255_s5 + $0xa8] ss:$16 sps:$4 sm:$0xff]   ;;  %v12189_v56 = vld [vmem:[%s17255_s5 + $0x4] ss:$16 sps:$4 sm:$0xff]   ;;  %v12187_v5 = vld [vmem:[%s17255_s5] ss:$16 sps:$4 sm:$0xff]  }
 0x18f   :  { %v13632_v60 = vpop.eup %13631  ;;  %v1331_v3 = vadd.f32 1.0, %v13630_v11  ;;  %v12190_v7 = vld [vmem:[%s17255_s5 + $0x8] ss:$16 sps:$4 sm:$0xff]   ;;  %v12195_v8 = vld [vmem:[%s17255_s5 + $0x1e4] ss:$16 sps:$4 sm:$0xff]  }
 0x190   :  { %v14069_v4 = vpack.c.bf16 %v1529_v53, %v1527_v14  ;;  %v1530_v6 = vadd.f32 %v1519_v49, %v1510_v58  ;;  %v1511_v15 = vadd.f32 %v1499_v51, %v1338_v57  ;;  %v1332_v16 = vadd.f32 1.0, %v13632_v60  ;;  %v12183_v51 = vld [vmem:[%s17255_s5 + $0x24] ss:$16 sps:$4 sm:$0xff]   ;;  %v12198_v9 = vld [vmem:[%s17255_s5 + $0x1ec] ss:$16 sps:$4 sm:$0xff]  }
 0x191   :  { %v1339_v19 = vmul.f32 %v1331_v3, %v1307_v62  ;;  %v1669_v25 = vrot.slane %v14067_v2, 1  ;;  %v12193_v10 = vld [vmem:[%s17255_s5 + $0x1e0] ss:$16 sps:$4 sm:$0xff]   ;;  %v12196_v11 = vld [vmem:[%s17255_s5 + $0x1e8] ss:$16 sps:$4 sm:$0xff]  }
 0x192   :  { %v1531_v21 = vadd.f32 %v1523_v50, %v1511_v15  ;;  %v1340_v22 = vmul.f32 %v1332_v16, %v1308_v0  ;;  %v1670_v23 = vrot.slane %v14069_v4, 1  ;;  %v12201_v12 = vld [vmem:[%s17255_s5 + $0x1c4] ss:$16 sps:$4 sm:$0xff]   ;;  %v12199_v14 = vld [vmem:[%s17255_s5 + $0x1c0] ss:$16 sps:$4 sm:$0xff]  }
 0x193   :  { %v1512_v24 = vadd.f32 %v1501_v13, %v1339_v19  ;;  %v12204_v13 = vld [vmem:[%s17255_s5 + $0x1cc] ss:$16 sps:$4 sm:$0xff]   ;;  %v12202_v53 = vld [vmem:[%s17255_s5 + $0x1c8] ss:$16 sps:$4 sm:$0xff]   ;;  %v12207_v58 = vld [vmem:[%s17255_s5 + $0x1a4] ss:$16 sps:$4 sm:$0xff]  }
 0x194   :  { %v1513_v26 = vadd.f32 %v1503_v20, %v1340_v22  ;;  %2025 = vmatprep.mubr.bf16.mxu0 %v1670_v23  ;;  %2066 = vmatprep.mubr.bf16.mxu1 %v1670_v23  ;;  %v12210_v57 = vld [vmem:[%s17255_s5 + $0x1ac] ss:$16 sps:$4 sm:$0xff]   ;;  %v12205_v60 = vld [vmem:[%s17255_s5 + $0x1a0] ss:$16 sps:$4 sm:$0xff]   ;;  %v12208_v62 = vld [vmem:[%s17255_s5 + $0x1a8] ss:$16 sps:$4 sm:$0xff]  }
 0x195   :  { %v1532_v30 = vadd.f32 %v1519_v49, %v1512_v24  ;;  %2026 = vmatmul.mubr.bf16.vlgmr.msra.gmra.mxu0 %v1669_v25  ;;  %2067 = vmatmul.mubr.bf16.vlgmr.msra.gmra.mxu1 %v1669_v25  ;;  %v12175_v49 = vld [vmem:[%s17255_s5 + $0x40] ss:$16 sps:$4 sm:$0xff]   ;;  %v12213_v0 = vld [vmem:[%s17255_s5 + $0x184] ss:$16 sps:$4 sm:$0xff]   ;;  %v12216_v3 = vld [vmem:[%s17255_s5 + $0x18c] ss:$16 sps:$4 sm:$0xff]  }
 0x196   :  { %v1533_v34 = vadd.f32 %v1523_v50, %v1513_v26  ;;  %2396 = vmatpush1.bf16.msra.mxu0 %v12145_v17  ;;  %2437 = vmatpush1.bf16.msra.mxu1 %v12148_v18  ;;  %v12178_v50 = vld [vmem:[%s17255_s5 + $0x48] ss:$16 sps:$4 sm:$0xff]   ;;  %v12219_v16 = vld [vmem:[%s17255_s5 + $0x164] ss:$16 sps:$4 sm:$0xff]   ;;  %v12222_v17 = vld [vmem:[%s17255_s5 + $0x16c] ss:$16 sps:$4 sm:$0xff]  }
 0x197   :  { %v14097_v35 = vpack.c.bf16 %v1532_v30, %v1530_v6  ;;  %2427 = vmatprep.mubr.bf16.mxu0 %v14069_v4  ;;  %2468 = vmatprep.mubr.bf16.mxu1 %v14069_v4  ;;  %v12211_v6 = vld [vmem:[%s17255_s5 + $0x180] ss:$16 sps:$4 sm:$0xff]   ;;  %v12214_v15 = vld [vmem:[%s17255_s5 + $0x188] ss:$16 sps:$4 sm:$0xff]   ;;  %v12225_v20 = vld [vmem:[%s17255_s5 + $0x144] ss:$16 sps:$4 sm:$0xff]  }
 0x198   :  { %v14101_v36 = vpack.c.bf16 %v1533_v34, %v1531_v21  ;;  %2397 = vmatprep.subr.bf16.mxu0 %v12153_v28  ;;  %2438 = vmatprep.subr.bf16.mxu1 %v12156_v29  ;;  %v12217_v18 = vld [vmem:[%s17255_s5 + $0x160] ss:$16 sps:$4 sm:$0xff]   ;;  %v12220_v19 = vld [vmem:[%s17255_s5 + $0x168] ss:$16 sps:$4 sm:$0xff]   ;;  %v12228_v21 = vld [vmem:[%s17255_s5 + $0x14c] ss:$16 sps:$4 sm:$0xff]  }
 0x199   :  { %v12223_v22 = vld [vmem:[%s17255_s5 + $0x140] ss:$16 sps:$4 sm:$0xff]   ;;  %v12226_v23 = vld [vmem:[%s17255_s5 + $0x148] ss:$16 sps:$4 sm:$0xff]   ;;  %v12231_v24 = vld [vmem:[%s17255_s5 + $0x124] ss:$16 sps:$4 sm:$0xff]  }
 0x19a   :  { %2398 = vmatpush1.bf16.msra.mxu0 %v12151_v27  ;;  %2439 = vmatpush1.bf16.msra.mxu1 %v12154_v31  ;;  %v12234_v25 = vld [vmem:[%s17255_s5 + $0x12c] ss:$16 sps:$4 sm:$0xff]   ;;  %v12229_v26 = vld [vmem:[%s17255_s5 + $0x120] ss:$16 sps:$4 sm:$0xff]   ;;  %v12232_v27 = vld [vmem:[%s17255_s5 + $0x128] ss:$16 sps:$4 sm:$0xff]  }
 0x19b   :  { %2399 = vmatprep.subr.bf16.mxu0 %v12159_v32  ;;  %2440 = vmatprep.subr.bf16.mxu1 %v12162_v33  ;;  %v12237_v28 = vld [vmem:[%s17255_s5 + $0x104] ss:$16 sps:$4 sm:$0xff]   ;;  %v12240_v29 = vld [vmem:[%s17255_s5 + $0x10c] ss:$16 sps:$4 sm:$0xff]   ;;  %v12235_v30 = vld [vmem:[%s17255_s5 + $0x100] ss:$16 sps:$4 sm:$0xff]  }
 0x19c   :  { %v12238_v31 = vld [vmem:[%s17255_s5 + $0x108] ss:$16 sps:$4 sm:$0xff]   ;;  %v12243_v32 = vld [vmem:[%s17255_s5 + $0x4e4] ss:$16 sps:$4 sm:$0xff]   ;;  %v12246_v33 = vld [vmem:[%s17255_s5 + $0x4ec] ss:$16 sps:$4 sm:$0xff]  }
 0x19d   :  { %v12241_v34 = vld [vmem:[%s17255_s5 + $0x4e0] ss:$16 sps:$4 sm:$0xff]  }
 0x19e   :  { %2400 = vmatpush1.bf16.msra.mxu0 %v12157_v37  ;;  %2441 = vmatpush1.bf16.msra.mxu1 %v12160_v38  ;;  %v12244_v37 = vld [vmem:[%s17255_s5 + $0x4e8] ss:$16 sps:$4 sm:$0xff]   ;;  %v12249_v38 = vld [vmem:[%s17255_s5 + $0x4c4] ss:$16 sps:$4 sm:$0xff]  }
 0x19f   :  { %2401 = vmatprep.subr.bf16.mxu0 %v12165_v39  ;;  %2442 = vmatprep.subr.bf16.mxu1 %v12168_v40  ;;  %v12252_v39 = vld [vmem:[%s17255_s5 + $0x4cc] ss:$16 sps:$4 sm:$0xff]   ;;  %v2543_v40 = vrot.slane %v14069_v4, 2 }
 0x1a2   :  { %2402 = vmatpush1.bf16.msra.mxu0 %v12163_v41  ;;  %2443 = vmatpush1.bf16.msra.mxu1 %v12166_v42  ;;  %v12247_v41 = vld [vmem:[%s17255_s5 + $0x4c0] ss:$16 sps:$4 sm:$0xff]   ;;  %v12250_v42 = vld [vmem:[%s17255_s5 + $0x4c8] ss:$16 sps:$4 sm:$0xff]  }
 0x1a3   :  { %2403 = vmatprep.subr.bf16.mxu0 %v12171_v43  ;;  %2444 = vmatprep.subr.bf16.mxu1 %v12174_v44  ;;  %v12255_v43 = vld [vmem:[%s17255_s5 + $0x4a4] ss:$16 sps:$4 sm:$0xff]   ;;  %v12258_v44 = vld [vmem:[%s17255_s5 + $0x4ac] ss:$16 sps:$4 sm:$0xff]  }
 0x1a6   :  { %2404 = vmatpush1.bf16.msra.mxu0 %v12169_v45  ;;  %2445 = vmatpush1.bf16.msra.mxu1 %v12172_v46  ;;  %v12253_v45 = vld [vmem:[%s17255_s5 + $0x4a0] ss:$16 sps:$4 sm:$0xff]   ;;  %v12256_v46 = vld [vmem:[%s17255_s5 + $0x4a8] ss:$16 sps:$4 sm:$0xff]  }
 0x1a7   :  { %2405 = vmatprep.subr.bf16.mxu0 %v12177_v47  ;;  %2446 = vmatprep.subr.bf16.mxu1 %v12180_v48  ;;  %v12261_v47 = vld [vmem:[%s17255_s5 + $0x484] ss:$16 sps:$4 sm:$0xff]   ;;  %v12259_v48 = vld [vmem:[%s17255_s5 + $0x480] ss:$16 sps:$4 sm:$0xff]  }
 0x1aa   :  { %2406 = vmatpush1.bf16.msra.mxu0 %v12175_v49  ;;  %2447 = vmatpush1.bf16.msra.mxu1 %v12178_v50  ;;  %v12264_v49 = vld [vmem:[%s17255_s5 + $0x48c] ss:$16 sps:$4 sm:$0xff]   ;;  %v12262_v50 = vld [vmem:[%s17255_s5 + $0x488] ss:$16 sps:$4 sm:$0xff]  }
 0x1ab   :  { %2407 = vmatprep.subr.bf16.mxu0 %v12183_v51  ;;  %2448 = vmatprep.subr.bf16.mxu1 %v12186_v52  ;;  %v12267_v51 = vld [vmem:[%s17255_s5 + $0x464] ss:$16 sps:$4 sm:$0xff]   ;;  %v12265_v52 = vld [vmem:[%s17255_s5 + $0x460] ss:$16 sps:$4 sm:$0xff]  }
 0x1ae   :  { %2408 = vmatpush1.bf16.msra.mxu0 %v12181_v54  ;;  %2449 = vmatpush1.bf16.msra.mxu1 %v12184_v55  ;;  %v12270_v54 = vld [vmem:[%s17255_s5 + $0x46c] ss:$16 sps:$4 sm:$0xff]   ;;  %v12268_v55 = vld [vmem:[%s17255_s5 + $0x468] ss:$16 sps:$4 sm:$0xff]  }
 0x1af   :  { %2409 = vmatprep.subr.bf16.mxu0 %v12189_v56  ;;  %2450 = vmatprep.subr.bf16.mxu1 %v12192_v61  ;;  %v12273_v56 = vld [vmem:[%s17255_s5 + $0x444] ss:$16 sps:$4 sm:$0xff]   ;;  %v12271_v61 = vld [vmem:[%s17255_s5 + $0x440] ss:$16 sps:$4 sm:$0xff]  }
 0x1b2   :  { %2410 = vmatpush1.bf16.msra.mxu0 %v12187_v5  ;;  %2451 = vmatpush1.bf16.msra.mxu1 %v12190_v7  ;;  %v12276_v5 = vld [vmem:[%s17255_s5 + $0x44c] ss:$16 sps:$4 sm:$0xff]   ;;  %v12274_v7 = vld [vmem:[%s17255_s5 + $0x448] ss:$16 sps:$4 sm:$0xff]  }
 0x1b3   :  { %2411 = vmatprep.subr.bf16.mxu0 %v12195_v8  ;;  %2452 = vmatprep.subr.bf16.mxu1 %v12198_v9  ;;  %v12279_v8 = vld [vmem:[%s17255_s5 + $0x424] ss:$16 sps:$4 sm:$0xff]   ;;  %v12277_v9 = vld [vmem:[%s17255_s5 + $0x420] ss:$16 sps:$4 sm:$0xff]  }
 0x1b6   :  { %2412 = vmatpush2.bf16.msra.mxu0 %v12193_v10  ;;  %2453 = vmatpush2.bf16.msra.mxu1 %v12196_v11  ;;  %v12282_v10 = vld [vmem:[%s17255_s5 + $0x42c] ss:$16 sps:$4 sm:$0xff]   ;;  %v12280_v11 = vld [vmem:[%s17255_s5 + $0x428] ss:$16 sps:$4 sm:$0xff]  }
 0x1b7   :  { %2413 = vmatprep.subr.bf16.mxu0 %v12201_v12  ;;  %2454 = vmatprep.subr.bf16.mxu1 %v12204_v13  ;;  %v12285_v12 = vld [vmem:[%s17255_s5 + $0x404] ss:$16 sps:$4 sm:$0xff]   ;;  %v12283_v13 = vld [vmem:[%s17255_s5 + $0x400] ss:$16 sps:$4 sm:$0xff]  }
 0x1ba   :  { %2414 = vmatpush2.bf16.msra.mxu0 %v12199_v14  ;;  %2455 = vmatpush2.bf16.msra.mxu1 %v12202_v53  ;;  %v12288_v14 = vld [vmem:[%s17255_s5 + $0x40c] ss:$16 sps:$4 sm:$0xff]   ;;  %v12286_v53 = vld [vmem:[%s17255_s5 + $0x408] ss:$16 sps:$4 sm:$0xff]  }
 0x1bb   :  { %2415 = vmatprep.subr.bf16.mxu0 %v12207_v58  ;;  %2456 = vmatprep.subr.bf16.mxu1 %v12210_v57  ;;  %v12291_v58 = vld [vmem:[%s17255_s5 + $0x5e4] ss:$16 sps:$4 sm:$0xff]   ;;  %v12289_v57 = vld [vmem:[%s17255_s5 + $0x5e0] ss:$16 sps:$4 sm:$0xff]  }
 0x1be   :  { %2416 = vmatpush2.bf16.msra.mxu0 %v12205_v60  ;;  %2457 = vmatpush2.bf16.msra.mxu1 %v12208_v62  ;;  %v12294_v60 = vld [vmem:[%s17255_s5 + $0x5ec] ss:$16 sps:$4 sm:$0xff]   ;;  %v12292_v62 = vld [vmem:[%s17255_s5 + $0x5e8] ss:$16 sps:$4 sm:$0xff]  }
 0x1bf   :  { %2417 = vmatprep.subr.bf16.mxu0 %v12213_v0  ;;  %2458 = vmatprep.subr.bf16.mxu1 %v12216_v3  ;;  %v12297_v0 = vld [vmem:[%s17255_s5 + $0x5c4] ss:$16 sps:$4 sm:$0xff]   ;;  %v12295_v3 = vld [vmem:[%s17255_s5 + $0x5c0] ss:$16 sps:$4 sm:$0xff]  }
 0x1c2   :  { %2418 = vmatpush2.bf16.msra.mxu0 %v12211_v6  ;;  %2459 = vmatpush2.bf16.msra.mxu1 %v12214_v15  ;;  %v12300_v6 = vld [vmem:[%s17255_s5 + $0x5cc] ss:$16 sps:$4 sm:$0xff]   ;;  %v12298_v15 = vld [vmem:[%s17255_s5 + $0x5c8] ss:$16 sps:$4 sm:$0xff]  }
 0x1c3   :  { %2419 = vmatprep.subr.bf16.mxu0 %v12219_v16  ;;  %2460 = vmatprep.subr.bf16.mxu1 %v12222_v17  ;;  %v12303_v16 = vld [vmem:[%s17255_s5 + $0x5a4] ss:$16 sps:$4 sm:$0xff]   ;;  %v12301_v17 = vld [vmem:[%s17255_s5 + $0x5a0] ss:$16 sps:$4 sm:$0xff]  }
 0x1c6   :  { %2420 = vmatpush2.bf16.msra.mxu0 %v12217_v18  ;;  %2461 = vmatpush2.bf16.msra.mxu1 %v12220_v19  ;;  %v12306_v18 = vld [vmem:[%s17255_s5 + $0x5ac] ss:$16 sps:$4 sm:$0xff]   ;;  %v12304_v19 = vld [vmem:[%s17255_s5 + $0x5a8] ss:$16 sps:$4 sm:$0xff]  }
 0x1c7   :  { %2421 = vmatprep.subr.bf16.mxu0 %v12225_v20  ;;  %2462 = vmatprep.subr.bf16.mxu1 %v12228_v21  ;;  %v12309_v20 = vld [vmem:[%s17255_s5 + $0x584] ss:$16 sps:$4 sm:$0xff]   ;;  %v12307_v21 = vld [vmem:[%s17255_s5 + $0x580] ss:$16 sps:$4 sm:$0xff]  }
 0x1ca   :  { %2422 = vmatpush2.bf16.msra.mxu0 %v12223_v22  ;;  %2463 = vmatpush2.bf16.msra.mxu1 %v12226_v23  ;;  %v12312_v22 = vld [vmem:[%s17255_s5 + $0x58c] ss:$16 sps:$4 sm:$0xff]   ;;  %v12310_v23 = vld [vmem:[%s17255_s5 + $0x588] ss:$16 sps:$4 sm:$0xff]  }
 0x1cb   :  { %2423 = vmatprep.subr.bf16.mxu0 %v12231_v24  ;;  %2464 = vmatprep.subr.bf16.mxu1 %v12234_v25  ;;  %v12315_v24 = vld [vmem:[%s17255_s5 + $0x564] ss:$16 sps:$4 sm:$0xff]   ;;  %v12313_v25 = vld [vmem:[%s17255_s5 + $0x560] ss:$16 sps:$4 sm:$0xff]  }
 0x1ce   :  { %2424 = vmatpush2.bf16.msra.mxu0 %v12229_v26  ;;  %2465 = vmatpush2.bf16.msra.mxu1 %v12232_v27  ;;  %v12318_v26 = vld [vmem:[%s17255_s5 + $0x56c] ss:$16 sps:$4 sm:$0xff]   ;;  %v12316_v27 = vld [vmem:[%s17255_s5 + $0x568] ss:$16 sps:$4 sm:$0xff]  }
 0x1cf   :  { %2425 = vmatprep.subr.bf16.mxu0 %v12237_v28  ;;  %2466 = vmatprep.subr.bf16.mxu1 %v12240_v29  ;;  %v12321_v28 = vld [vmem:[%s17255_s5 + $0x544] ss:$16 sps:$4 sm:$0xff]   ;;  %v12319_v29 = vld [vmem:[%s17255_s5 + $0x540] ss:$16 sps:$4 sm:$0xff]  }
 0x1d2   :  { %2426 = vmatpush2.bf16.msra.mxu0 %v12235_v30  ;;  %2467 = vmatpush2.bf16.msra.mxu1 %v12238_v31  ;;  %v12324_v30 = vld [vmem:[%s17255_s5 + $0x54c] ss:$16 sps:$4 sm:$0xff]   ;;  %v12322_v31 = vld [vmem:[%s17255_s5 + $0x548] ss:$16 sps:$4 sm:$0xff]  }
 0x1d3   :  { %2866 = vmatprep.subr.bf16.mxu0 %v12243_v32  ;;  %2907 = vmatprep.subr.bf16.mxu1 %v12246_v33  ;;  %v12327_v32 = vld [vmem:[%s17255_s5 + $0x524] ss:$16 sps:$4 sm:$0xff]   ;;  %v12325_v33 = vld [vmem:[%s17255_s5 + $0x520] ss:$16 sps:$4 sm:$0xff]  }
 0x1d5   :  { %2428 = vmatmul.mubr.bf16.vlgmr.msra.gmra.mxu0 %v14067_v2  ;;  %2469 = vmatmul.mubr.bf16.vlgmr.msra.gmra.mxu1 %v14067_v2 }
 0x1d6   :  { %2867 = vmatpush1.bf16.msra.mxu0 %v12241_v34  ;;  %2898 = vmatprep.mubr.bf16.mxu0 %v2543_v40  ;;  %v12330_v34 = vld [vmem:[%s17255_s5 + $0x52c] ss:$16 sps:$4 sm:$0xff]  }
 0x1d7   :  { %2908 = vmatpush1.bf16.msra.mxu1 %v12244_v37  ;;  %2939 = vmatprep.mubr.bf16.mxu1 %v2543_v40  ;;  %v12328_v37 = vld [vmem:[%s17255_s5 + $0x528] ss:$16 sps:$4 sm:$0xff]   ;;  %v12336_v40 = vld [vmem:[%s17255_s5 + $0x50c] ss:$16 sps:$4 sm:$0xff]  }
 0x1d8   :  { %2868 = vmatprep.subr.bf16.mxu0 %v12249_v38  ;;  %2909 = vmatprep.subr.bf16.mxu1 %v12252_v39  ;;  %v12333_v38 = vld [vmem:[%s17255_s5 + $0x504] ss:$16 sps:$4 sm:$0xff]   ;;  %v12331_v39 = vld [vmem:[%s17255_s5 + $0x500] ss:$16 sps:$4 sm:$0xff]  }
 0x1da   :  { %2869 = vmatpush1.bf16.msra.mxu0 %v12247_v41  ;;  %v12334_v41 = vld [vmem:[%s17255_s5 + $0x508] ss:$16 sps:$4 sm:$0xff]  }
 0x1db   :  { %2910 = vmatpush1.bf16.msra.mxu1 %v12250_v42  ;;  %2870 = vmatprep.subr.bf16.mxu0 %v12255_v43  ;;  %v12339_v42 = vld [vmem:[%s17255_s5 + $0x6e4] ss:$16 sps:$4 sm:$0xff]   ;;  %v12342_v43 = vld [vmem:[%s17255_s5 + $0x6ec] ss:$16 sps:$4 sm:$0xff]  }
 0x1dc   :  { %2911 = vmatprep.subr.bf16.mxu1 %v12258_v44  ;;  %v12337_v44 = vld [vmem:[%s17255_s5 + $0x6e0] ss:$16 sps:$4 sm:$0xff]  }
 0x1de   :  { %2871 = vmatpush1.bf16.msra.mxu0 %v12253_v45  ;;  %v12340_v45 = vld [vmem:[%s17255_s5 + $0x6e8] ss:$16 sps:$4 sm:$0xff]  }
 0x1df   :  { %2912 = vmatpush1.bf16.msra.mxu1 %v12256_v46  ;;  %2872 = vmatprep.subr.bf16.mxu0 %v12261_v47  ;;  %v12345_v46 = vld [vmem:[%s17255_s5 + $0x6c4] ss:$16 sps:$4 sm:$0xff]   ;;  %v2542_v47 = vrot.slane %v14067_v2, 2 }
 0x1e0   :  { %2913 = vmatprep.subr.bf16.mxu1 %v12264_v49  ;;  %v3018_v49 = vrot.slane %v14069_v4, 3 }
 0x1e2   :  { %2873 = vmatpush1.bf16.msra.mxu0 %v12259_v48  ;;  %v12343_v48 = vld [vmem:[%s17255_s5 + $0x6c0] ss:$16 sps:$4 sm:$0xff]  }
 0x1e3   :  { %2914 = vmatpush1.bf16.msra.mxu1 %v12262_v50  ;;  %2874 = vmatprep.subr.bf16.mxu0 %v12267_v51  ;;  %v12346_v50 = vld [vmem:[%s17255_s5 + $0x6c8] ss:$16 sps:$4 sm:$0xff]   ;;  %v12348_v51 = vld [vmem:[%s17255_s5 + $0x6cc] ss:$16 sps:$4 sm:$0xff]  }
 0x1e4   :  { %2915 = vmatprep.subr.bf16.mxu1 %v12270_v54  ;;  %v12354_v54 = vld [vmem:[%s17255_s5 + $0x6ac] ss:$16 sps:$4 sm:$0xff]  }
 0x1e6   :  { %2875 = vmatpush1.bf16.msra.mxu0 %v12265_v52  ;;  %v12351_v52 = vld [vmem:[%s17255_s5 + $0x6a4] ss:$16 sps:$4 sm:$0xff]  }
 0x1e7   :  { %2916 = vmatpush1.bf16.msra.mxu1 %v12268_v55  ;;  %2876 = vmatprep.subr.bf16.mxu0 %v12273_v56  ;;  %v12349_v55 = vld [vmem:[%s17255_s5 + $0x6a0] ss:$16 sps:$4 sm:$0xff]   ;;  %v12352_v56 = vld [vmem:[%s17255_s5 + $0x6a8] ss:$16 sps:$4 sm:$0xff]  }
 0x1e8   :  { %2917 = vmatprep.subr.bf16.mxu1 %v12276_v5  ;;  %v12355_v5 = vld [vmem:[%s17255_s5 + $0x680] ss:$16 sps:$4 sm:$0xff]  }
 0x1ea   :  { %2877 = vmatpush1.bf16.msra.mxu0 %v12271_v61  ;;  %v12357_v61 = vld [vmem:[%s17255_s5 + $0x684] ss:$16 sps:$4 sm:$0xff]  }
 0x1eb   :  { %2918 = vmatpush1.bf16.msra.mxu1 %v12274_v7  ;;  %2878 = vmatprep.subr.bf16.mxu0 %v12279_v8  ;;  %v12360_v7 = vld [vmem:[%s17255_s5 + $0x68c] ss:$16 sps:$4 sm:$0xff]   ;;  %v12358_v8 = vld [vmem:[%s17255_s5 + $0x688] ss:$16 sps:$4 sm:$0xff]  }
 0x1ec   :  { %2919 = vmatprep.subr.bf16.mxu1 %v12282_v10  ;;  %v12361_v10 = vld [vmem:[%s17255_s5 + $0x660] ss:$16 sps:$4 sm:$0xff]  }
 0x1ee   :  { %2879 = vmatpush1.bf16.msra.mxu0 %v12277_v9  ;;  %v12363_v9 = vld [vmem:[%s17255_s5 + $0x664] ss:$16 sps:$4 sm:$0xff]  }
 0x1ef   :  { %2920 = vmatpush1.bf16.msra.mxu1 %v12280_v11  ;;  %2880 = vmatprep.subr.bf16.mxu0 %v12285_v12  ;;  %v12366_v11 = vld [vmem:[%s17255_s5 + $0x66c] ss:$16 sps:$4 sm:$0xff]   ;;  %v12364_v12 = vld [vmem:[%s17255_s5 + $0x668] ss:$16 sps:$4 sm:$0xff]  }
 0x1f0   :  { %2921 = vmatprep.subr.bf16.mxu1 %v12288_v14  ;;  %v12367_v14 = vld [vmem:[%s17255_s5 + $0x640] ss:$16 sps:$4 sm:$0xff]  }
 0x1f2   :  { %2881 = vmatpush1.bf16.msra.mxu0 %v12283_v13  ;;  %v12369_v13 = vld [vmem:[%s17255_s5 + $0x644] ss:$16 sps:$4 sm:$0xff]  }
 0x1f3   :  { %2922 = vmatpush1.bf16.msra.mxu1 %v12286_v53  ;;  %2882 = vmatprep.subr.bf16.mxu0 %v12291_v58  ;;  %v12372_v53 = vld [vmem:[%s17255_s5 + $0x64c] ss:$16 sps:$4 sm:$0xff]   ;;  %v12370_v58 = vld [vmem:[%s17255_s5 + $0x648] ss:$16 sps:$4 sm:$0xff]  }
 0x1f4   :  { %2923 = vmatprep.subr.bf16.mxu1 %v12294_v60  ;;  %v12373_v60 = vld [vmem:[%s17255_s5 + $0x620] ss:$16 sps:$4 sm:$0xff]  }
 0x1f6   :  { %2883 = vmatpush2.bf16.msra.mxu0 %v12289_v57  ;;  %v12375_v57 = vld [vmem:[%s17255_s5 + $0x624] ss:$16 sps:$4 sm:$0xff]  }
 0x1f7   :  { %2924 = vmatpush2.bf16.msra.mxu1 %v12292_v62  ;;  %2884 = vmatprep.subr.bf16.mxu0 %v12297_v0  ;;  %v12378_v62 = vld [vmem:[%s17255_s5 + $0x62c] ss:$16 sps:$4 sm:$0xff]   ;;  %v12376_v0 = vld [vmem:[%s17255_s5 + $0x628] ss:$16 sps:$4 sm:$0xff]  }
 0x1f8   :  { %2925 = vmatprep.subr.bf16.mxu1 %v12300_v6  ;;  %v12379_v6 = vld [vmem:[%s17255_s5 + $0x600] ss:$16 sps:$4 sm:$0xff]  }
 0x1fa   :  { %2885 = vmatpush2.bf16.msra.mxu0 %v12295_v3  ;;  %v12381_v3 = vld [vmem:[%s17255_s5 + $0x604] ss:$16 sps:$4 sm:$0xff]  }
 0x1fb   :  { %2926 = vmatpush2.bf16.msra.mxu1 %v12298_v15  ;;  %2886 = vmatprep.subr.bf16.mxu0 %v12303_v16  ;;  %v12384_v15 = vld [vmem:[%s17255_s5 + $0x60c] ss:$16 sps:$4 sm:$0xff]   ;;  %v12382_v16 = vld [vmem:[%s17255_s5 + $0x608] ss:$16 sps:$4 sm:$0xff]  }
 0x1fc   :  { %2927 = vmatprep.subr.bf16.mxu1 %v12306_v18  ;;  %v12385_v18 = vld [vmem:[%s17255_s5 + $0x7e0] ss:$16 sps:$4 sm:$0xff]  }
 0x1fe   :  { %2887 = vmatpush2.bf16.msra.mxu0 %v12301_v17  ;;  %v12387_v17 = vld [vmem:[%s17255_s5 + $0x7e4] ss:$16 sps:$4 sm:$0xff]  }
 0x1ff   :  { %2928 = vmatpush2.bf16.msra.mxu1 %v12304_v19  ;;  %2888 = vmatprep.subr.bf16.mxu0 %v12309_v20  ;;  %v12390_v19 = vld [vmem:[%s17255_s5 + $0x7ec] ss:$16 sps:$4 sm:$0xff]   ;;  %v12388_v20 = vld [vmem:[%s17255_s5 + $0x7e8] ss:$16 sps:$4 sm:$0xff]  }
 0x200   :  { %2929 = vmatprep.subr.bf16.mxu1 %v12312_v22  ;;  %v12391_v22 = vld [vmem:[%s17255_s5 + $0x7c0] ss:$16 sps:$4 sm:$0xff]  }
 0x202   :  { %2889 = vmatpush2.bf16.msra.mxu0 %v12307_v21  ;;  %v12393_v21 = vld [vmem:[%s17255_s5 + $0x7c4] ss:$16 sps:$4 sm:$0xff]  }
 0x203   :  { %2930 = vmatpush2.bf16.msra.mxu1 %v12310_v23  ;;  %2890 = vmatprep.subr.bf16.mxu0 %v12315_v24  ;;  %v12396_v23 = vld [vmem:[%s17255_s5 + $0x7cc] ss:$16 sps:$4 sm:$0xff]   ;;  %v12394_v24 = vld [vmem:[%s17255_s5 + $0x7c8] ss:$16 sps:$4 sm:$0xff]  }
 0x204   :  { %2931 = vmatprep.subr.bf16.mxu1 %v12318_v26  ;;  %v12397_v26 = vld [vmem:[%s17255_s5 + $0x7a0] ss:$16 sps:$4 sm:$0xff]  }
 0x206   :  { %2891 = vmatpush2.bf16.msra.mxu0 %v12313_v25  ;;  %v12399_v25 = vld [vmem:[%s17255_s5 + $0x7a4] ss:$16 sps:$4 sm:$0xff]  }
 0x207   :  { %2932 = vmatpush2.bf16.msra.mxu1 %v12316_v27  ;;  %2892 = vmatprep.subr.bf16.mxu0 %v12321_v28  ;;  %v12402_v27 = vld [vmem:[%s17255_s5 + $0x7ac] ss:$16 sps:$4 sm:$0xff]   ;;  %v12400_v28 = vld [vmem:[%s17255_s5 + $0x7a8] ss:$16 sps:$4 sm:$0xff]  }
 0x208   :  { %2933 = vmatprep.subr.bf16.mxu1 %v12324_v30  ;;  %v12403_v30 = vld [vmem:[%s17255_s5 + $0x780] ss:$16 sps:$4 sm:$0xff]  }
 0x20a   :  { %2893 = vmatpush2.bf16.msra.mxu0 %v12319_v29  ;;  %v12405_v29 = vld [vmem:[%s17255_s5 + $0x784] ss:$16 sps:$4 sm:$0xff]  }
 0x20b   :  { %2934 = vmatpush2.bf16.msra.mxu1 %v12322_v31  ;;  %2894 = vmatprep.subr.bf16.mxu0 %v12327_v32  ;;  %v12408_v31 = vld [vmem:[%s17255_s5 + $0x78c] ss:$16 sps:$4 sm:$0xff]   ;;  %v12406_v32 = vld [vmem:[%s17255_s5 + $0x788] ss:$16 sps:$4 sm:$0xff]  }
 0x20c   :  { %2935 = vmatprep.subr.bf16.mxu1 %v12330_v34  ;;  %v12409_v34 = vld [vmem:[%s17255_s5 + $0x760] ss:$16 sps:$4 sm:$0xff]  }
 0x20e   :  { %2895 = vmatpush2.bf16.msra.mxu0 %v12325_v33  ;;  %v12411_v33 = vld [vmem:[%s17255_s5 + $0x764] ss:$16 sps:$4 sm:$0xff]  }
 0x20f   :  { %2936 = vmatpush2.bf16.msra.mxu1 %v12328_v37  ;;  %2896 = vmatprep.subr.bf16.mxu0 %v12333_v38  ;;  %v12414_v37 = vld [vmem:[%s17255_s5 + $0x76c] ss:$16 sps:$4 sm:$0xff]   ;;  %v12412_v38 = vld [vmem:[%s17255_s5 + $0x768] ss:$16 sps:$4 sm:$0xff]  }
 0x210   :  { %2937 = vmatprep.subr.bf16.mxu1 %v12336_v40  ;;  %v12415_v40 = vld [vmem:[%s17255_s5 + $0x740] ss:$16 sps:$4 sm:$0xff]  }
 0x212   :  { %2897 = vmatpush2.bf16.msra.mxu0 %v12331_v39  ;;  %v12417_v39 = vld [vmem:[%s17255_s5 + $0x744] ss:$16 sps:$4 sm:$0xff]  }
 0x213   :  { %2938 = vmatpush2.bf16.msra.mxu1 %v12334_v41  ;;  %3341 = vmatprep.subr.bf16.mxu0 %v12339_v42  ;;  %v12420_v41 = vld [vmem:[%s17255_s5 + $0x74c] ss:$16 sps:$4 sm:$0xff]   ;;  %v12418_v42 = vld [vmem:[%s17255_s5 + $0x748] ss:$16 sps:$4 sm:$0xff]  }
 0x214   :  { %3382 = vmatprep.subr.bf16.mxu1 %v12342_v43  ;;  %v12423_v43 = vld [vmem:[%s17255_s5 + $0x724] ss:$16 sps:$4 sm:$0xff]  }
 0x215   :  { %2899 = vmatmul.mubr.bf16.vlgmr.msra.gmra.mxu0 %v2542_v47 }
 0x216   :  { %2940 = vmatmul.mubr.bf16.vlgmr.msra.gmra.mxu1 %v2542_v47  ;;  %3342 = vmatpush1.bf16.msra.mxu0 %v12337_v44  ;;  %v12421_v44 = vld [vmem:[%s17255_s5 + $0x720] ss:$16 sps:$4 sm:$0xff]   ;;  %v12429_v47 = vld [vmem:[%s17255_s5 + $0x704] ss:$16 sps:$4 sm:$0xff]  }
 0x217   :  { %3373 = vmatprep.mubr.bf16.mxu0 %v3018_v49  ;;  %3383 = vmatpush1.bf16.msra.mxu1 %v12340_v45  ;;  %v12426_v45 = vld [vmem:[%s17255_s5 + $0x72c] ss:$16 sps:$4 sm:$0xff]  }
 0x218   :  { %3414 = vmatprep.mubr.bf16.mxu1 %v3018_v49  ;;  %3343 = vmatprep.subr.bf16.mxu0 %v12345_v46  ;;  %v12424_v46 = vld [vmem:[%s17255_s5 + $0x728] ss:$16 sps:$4 sm:$0xff]   ;;  %v12432_v49 = vld [vmem:[%s17255_s5 + $0x70c] ss:$16 sps:$4 sm:$0xff]  }
 0x219   :  { %3384 = vmatprep.subr.bf16.mxu1 %v12348_v51  ;;  %v12435_v51 = vld [vmem:[%s17255_s5 + $0x8e4] ss:$16 sps:$4 sm:$0xff]  }
 0x21a   :  { %3344 = vmatpush1.bf16.msra.mxu0 %v12343_v48  ;;  %v12427_v48 = vld [vmem:[%s17255_s5 + $0x700] ss:$16 sps:$4 sm:$0xff]  }
 0x21b   :  { %3385 = vmatpush1.bf16.msra.mxu1 %v12346_v50  ;;  %3345 = vmatprep.subr.bf16.mxu0 %v12351_v52  ;;  %v12430_v50 = vld [vmem:[%s17255_s5 + $0x708] ss:$16 sps:$4 sm:$0xff]   ;;  %v12438_v52 = vld [vmem:[%s17255_s5 + $0x8ec] ss:$16 sps:$4 sm:$0xff]  }
 0x21c   :  { %3386 = vmatprep.subr.bf16.mxu1 %v12354_v54  ;;  %v12433_v54 = vld [vmem:[%s17255_s5 + $0x8e0] ss:$16 sps:$4 sm:$0xff]  }
 0x21e   :  { %3346 = vmatpush1.bf16.msra.mxu0 %v12349_v55  ;;  %v12436_v55 = vld [vmem:[%s17255_s5 + $0x8e8] ss:$16 sps:$4 sm:$0xff]  }
 0x21f   :  { %3387 = vmatpush1.bf16.msra.mxu1 %v12352_v56  ;;  %3347 = vmatprep.subr.bf16.mxu0 %v12357_v61  ;;  %v12441_v56 = vld [vmem:[%s17255_s5 + $0x8c4] ss:$16 sps:$4 sm:$0xff]   ;;  %v3017_v61 = vrot.slane %v14067_v2, 3 }
 0x220   :  { %3388 = vmatprep.subr.bf16.mxu1 %v12360_v7 }
 0x222   :  { %3348 = vmatpush1.bf16.msra.mxu0 %v12355_v5  ;;  %v12444_v5 = vld [vmem:[%s17255_s5 + $0x8cc] ss:$16 sps:$4 sm:$0xff]  }
 0x223   :  { %3389 = vmatpush1.bf16.msra.mxu1 %v12358_v8  ;;  %3349 = vmatprep.subr.bf16.mxu0 %v12363_v9  ;;  %v3493_v9 = vrot.slane %v14069_v4, 4 }
 0x224   :  { %3390 = vmatprep.subr.bf16.mxu1 %v12366_v11  ;;  %v12442_v11 = vld [vmem:[%s17255_s5 + $0x8c8] ss:$16 sps:$4 sm:$0xff]  }
 0x226   :  { %3350 = vmatpush1.bf16.msra.mxu0 %v12361_v10  ;;  %v12439_v10 = vld [vmem:[%s17255_s5 + $0x8c0] ss:$16 sps:$4 sm:$0xff]  }
 0x227   :  { %3391 = vmatpush1.bf16.msra.mxu1 %v12364_v12  ;;  %3351 = vmatprep.subr.bf16.mxu0 %v12369_v13 }
 0x228   :  { %3392 = vmatprep.subr.bf16.mxu1 %v12372_v53  ;;  %v12450_v53 = vld [vmem:[%s17255_s5 + $0x8ac] ss:$16 sps:$4 sm:$0xff]  }
 0x22a   :  { %3352 = vmatpush1.bf16.msra.mxu0 %v12367_v14  ;;  %v12447_v14 = vld [vmem:[%s17255_s5 + $0x8a4] ss:$16 sps:$4 sm:$0xff]  }
 0x22b   :  { %3393 = vmatpush1.bf16.msra.mxu1 %v12370_v58  ;;  %3353 = vmatprep.subr.bf16.mxu0 %v12375_v57 }
 0x22c   :  { %3394 = vmatprep.subr.bf16.mxu1 %v12378_v62  ;;  %v12448_v62 = vld [vmem:[%s17255_s5 + $0x8a8] ss:$16 sps:$4 sm:$0xff]  }
 0x22e   :  { %3354 = vmatpush1.bf16.msra.mxu0 %v12373_v60  ;;  %v12445_v60 = vld [vmem:[%s17255_s5 + $0x8a0] ss:$16 sps:$4 sm:$0xff]  }
 0x22f   :  { %3395 = vmatpush1.bf16.msra.mxu1 %v12376_v0  ;;  %3355 = vmatprep.subr.bf16.mxu0 %v12381_v3 }
 0x230   :  { %3396 = vmatprep.subr.bf16.mxu1 %v12384_v15  ;;  %v12456_v15 = vld [vmem:[%s17255_s5 + $0x88c] ss:$16 sps:$4 sm:$0xff]  }
 0x232   :  { %3356 = vmatpush1.bf16.msra.mxu0 %v12379_v6  ;;  %v12453_v6 = vld [vmem:[%s17255_s5 + $0x884] ss:$16 sps:$4 sm:$0xff]  }
 0x233   :  { %3397 = vmatpush1.bf16.msra.mxu1 %v12382_v16  ;;  %3357 = vmatprep.subr.bf16.mxu0 %v12387_v17  ;;  %v12451_v16 = vld [vmem:[%s17255_s5 + $0x880] ss:$16 sps:$4 sm:$0xff]   ;;  %v12454_v17 = vld [vmem:[%s17255_s5 + $0x888] ss:$16 sps:$4 sm:$0xff]  }
 0x234   :  { %3398 = vmatprep.subr.bf16.mxu1 %v12390_v19  ;;  %v12457_v19 = vld [vmem:[%s17255_s5 + $0x860] ss:$16 sps:$4 sm:$0xff]  }
 0x236   :  { %3358 = vmatpush2.bf16.msra.mxu0 %v12385_v18  ;;  %v12459_v18 = vld [vmem:[%s17255_s5 + $0x864] ss:$16 sps:$4 sm:$0xff]  }
 0x237   :  { %3399 = vmatpush2.bf16.msra.mxu1 %v12388_v20  ;;  %3359 = vmatprep.subr.bf16.mxu0 %v12393_v21  ;;  %v12462_v20 = vld [vmem:[%s17255_s5 + $0x86c] ss:$16 sps:$4 sm:$0xff]   ;;  %v12460_v21 = vld [vmem:[%s17255_s5 + $0x868] ss:$16 sps:$4 sm:$0xff]  }
 0x238   :  { %3400 = vmatprep.subr.bf16.mxu1 %v12396_v23  ;;  %v12463_v23 = vld [vmem:[%s17255_s5 + $0x840] ss:$16 sps:$4 sm:$0xff]  }
 0x23a   :  { %3360 = vmatpush2.bf16.msra.mxu0 %v12391_v22  ;;  %v12465_v22 = vld [vmem:[%s17255_s5 + $0x844] ss:$16 sps:$4 sm:$0xff]  }
 0x23b   :  { %3401 = vmatpush2.bf16.msra.mxu1 %v12394_v24  ;;  %3361 = vmatprep.subr.bf16.mxu0 %v12399_v25  ;;  %v12468_v24 = vld [vmem:[%s17255_s5 + $0x84c] ss:$16 sps:$4 sm:$0xff]   ;;  %v12466_v25 = vld [vmem:[%s17255_s5 + $0x848] ss:$16 sps:$4 sm:$0xff]  }
 0x23c   :  { %3402 = vmatprep.subr.bf16.mxu1 %v12402_v27  ;;  %v12469_v27 = vld [vmem:[%s17255_s5 + $0x820] ss:$16 sps:$4 sm:$0xff]  }
 0x23e   :  { %3362 = vmatpush2.bf16.msra.mxu0 %v12397_v26  ;;  %v12471_v26 = vld [vmem:[%s17255_s5 + $0x824] ss:$16 sps:$4 sm:$0xff]  }
 0x23f   :  { %3403 = vmatpush2.bf16.msra.mxu1 %v12400_v28  ;;  %3363 = vmatprep.subr.bf16.mxu0 %v12405_v29  ;;  %v12474_v28 = vld [vmem:[%s17255_s5 + $0x82c] ss:$16 sps:$4 sm:$0xff]   ;;  %v12472_v29 = vld [vmem:[%s17255_s5 + $0x828] ss:$16 sps:$4 sm:$0xff]  }
 0x240   :  { %3404 = vmatprep.subr.bf16.mxu1 %v12408_v31  ;;  %v12475_v31 = vld [vmem:[%s17255_s5 + $0x800] ss:$16 sps:$4 sm:$0xff]  }
 0x242   :  { %3364 = vmatpush2.bf16.msra.mxu0 %v12403_v30  ;;  %v12477_v30 = vld [vmem:[%s17255_s5 + $0x804] ss:$16 sps:$4 sm:$0xff]  }
 0x243   :  { %3405 = vmatpush2.bf16.msra.mxu1 %v12406_v32  ;;  %3365 = vmatprep.subr.bf16.mxu0 %v12411_v33  ;;  %v12480_v32 = vld [vmem:[%s17255_s5 + $0x80c] ss:$16 sps:$4 sm:$0xff]   ;;  %v12478_v33 = vld [vmem:[%s17255_s5 + $0x808] ss:$16 sps:$4 sm:$0xff]  }
 0x244   :  { %3406 = vmatprep.subr.bf16.mxu1 %v12414_v37  ;;  %v12481_v37 = vld [vmem:[%s17255_s5 + $0x9e0] ss:$16 sps:$4 sm:$0xff]  }
 0x246   :  { %3366 = vmatpush2.bf16.msra.mxu0 %v12409_v34  ;;  %v12483_v34 = vld [vmem:[%s17255_s5 + $0x9e4] ss:$16 sps:$4 sm:$0xff]  }
 0x247   :  { %3407 = vmatpush2.bf16.msra.mxu1 %v12412_v38  ;;  %3367 = vmatprep.subr.bf16.mxu0 %v12417_v39  ;;  %v12486_v38 = vld [vmem:[%s17255_s5 + $0x9ec] ss:$16 sps:$4 sm:$0xff]   ;;  %v12484_v39 = vld [vmem:[%s17255_s5 + $0x9e8] ss:$16 sps:$4 sm:$0xff]  }
 0x248   :  { %3408 = vmatprep.subr.bf16.mxu1 %v12420_v41  ;;  %v12487_v41 = vld [vmem:[%s17255_s5 + $0x9c0] ss:$16 sps:$4 sm:$0xff]  }
 0x24a   :  { %3368 = vmatpush2.bf16.msra.mxu0 %v12415_v40  ;;  %v12489_v40 = vld [vmem:[%s17255_s5 + $0x9c4] ss:$16 sps:$4 sm:$0xff]  }
 0x24b   :  { %3409 = vmatpush2.bf16.msra.mxu1 %v12418_v42  ;;  %3369 = vmatprep.subr.bf16.mxu0 %v12423_v43  ;;  %v12492_v42 = vld [vmem:[%s17255_s5 + $0x9cc] ss:$16 sps:$4 sm:$0xff]   ;;  %v12490_v43 = vld [vmem:[%s17255_s5 + $0x9c8] ss:$16 sps:$4 sm:$0xff]  }
 0x24c   :  { %3410 = vmatprep.subr.bf16.mxu1 %v12426_v45  ;;  %v12493_v45 = vld [vmem:[%s17255_s5 + $0x9a0] ss:$16 sps:$4 sm:$0xff]  }
 0x24e   :  { %3370 = vmatpush2.bf16.msra.mxu0 %v12421_v44  ;;  %v12495_v44 = vld [vmem:[%s17255_s5 + $0x9a4] ss:$16 sps:$4 sm:$0xff]  }
 0x24f   :  { %3411 = vmatpush2.bf16.msra.mxu1 %v12424_v46  ;;  %3371 = vmatprep.subr.bf16.mxu0 %v12429_v47  ;;  %v12498_v46 = vld [vmem:[%s17255_s5 + $0x9ac] ss:$16 sps:$4 sm:$0xff]   ;;  %v12496_v47 = vld [vmem:[%s17255_s5 + $0x9a8] ss:$16 sps:$4 sm:$0xff]  }
 0x250   :  { %3412 = vmatprep.subr.bf16.mxu1 %v12432_v49  ;;  %v12499_v49 = vld [vmem:[%s17255_s5 + $0x980] ss:$16 sps:$4 sm:$0xff]  }
 0x252   :  { %3372 = vmatpush2.bf16.msra.mxu0 %v12427_v48  ;;  %v12501_v48 = vld [vmem:[%s17255_s5 + $0x984] ss:$16 sps:$4 sm:$0xff]  }
 0x253   :  { %3413 = vmatpush2.bf16.msra.mxu1 %v12430_v50  ;;  %3816 = vmatprep.subr.bf16.mxu0 %v12435_v51  ;;  %v12504_v50 = vld [vmem:[%s17255_s5 + $0x98c] ss:$16 sps:$4 sm:$0xff]   ;;  %v12502_v51 = vld [vmem:[%s17255_s5 + $0x988] ss:$16 sps:$4 sm:$0xff]  }
 0x254   :  { %3857 = vmatprep.subr.bf16.mxu1 %v12438_v52  ;;  %v12507_v52 = vld [vmem:[%s17255_s5 + $0x964] ss:$16 sps:$4 sm:$0xff]  }
 0x255   :  { %3374 = vmatmul.mubr.bf16.vlgmr.msra.gmra.mxu0 %v3017_v61  ;;  %v14673_v7 = vpop.f32.mrf.mxu0  ;;  %v14675_v8 = vpop.f32.mrf.mxu1 }
 0x256   :  { %3415 = vmatmul.mubr.bf16.vlgmr.msra.gmra.mxu1 %v3017_v61  ;;  %3817 = vmatpush1.bf16.msra.mxu0 %v12433_v54  ;;  %v12505_v54 = vld [vmem:[%s17255_s5 + $0x960] ss:$16 sps:$4 sm:$0xff]   ;;  %v12513_v61 = vld [vmem:[%s17255_s5 + $0x944] ss:$16 sps:$4 sm:$0xff]  }
 0x257   :  { %3848 = vmatprep.mubr.bf16.mxu0 %v3493_v9  ;;  %3858 = vmatpush1.bf16.msra.mxu1 %v12436_v55  ;;  %v14684_v12 = vpop.f32.mrf.mxu0  ;;  %v14686_v13 = vpop.f32.mrf.mxu1  ;;  %v12510_v55 = vld [vmem:[%s17255_s5 + $0x96c] ss:$16 sps:$4 sm:$0xff]  }
 0x258   :  { %3889 = vmatprep.mubr.bf16.mxu1 %v3493_v9  ;;  %3818 = vmatprep.subr.bf16.mxu0 %v12441_v56  ;;  %v12508_v56 = vld [vmem:[%s17255_s5 + $0x968] ss:$16 sps:$4 sm:$0xff]   ;;  %v12511_v9 = vld [vmem:[%s17255_s5 + $0x940] ss:$16 sps:$4 sm:$0xff]  }
 0x259   :  { %3859 = vmatprep.subr.bf16.mxu1 %v12444_v5  ;;  %v2031_v58 = vpop.f32.mrf.mxu0  ;;  %v2072_v57 = vpop.f32.mrf.mxu1  ;;  %v12516_v5 = vld [vmem:[%s17255_s5 + $0x94c] ss:$16 sps:$4 sm:$0xff]  }
 0x25a   :  { %3819 = vmatpush1.bf16.msra.mxu0 %v12439_v10  ;;  %v12514_v10 = vld [vmem:[%s17255_s5 + $0x948] ss:$16 sps:$4 sm:$0xff]   ;;  %v12525_v57 = vld [vmem:[%s17255_s5 + $0x904] ss:$16 sps:$4 sm:$0xff]  }
 0x25b   :  { %3860 = vmatpush1.bf16.msra.mxu1 %v12442_v11  ;;  %v2032_v0 = vpop.f32.mrf.mxu0  ;;  %v2073_v3 = vpop.f32.mrf.mxu1  ;;  %3820 = vmatprep.subr.bf16.mxu0 %v12447_v14  ;;  %v12519_v11 = vld [vmem:[%s17255_s5 + $0x924] ss:$16 sps:$4 sm:$0xff]   ;;  %v12522_v14 = vld [vmem:[%s17255_s5 + $0x92c] ss:$16 sps:$4 sm:$0xff]   ;;  %v12520_v58 = vld [vmem:[%s17255_s5 + $0x928] ss:$16 sps:$4 sm:$0xff]  }
 0x25c   :  { %3861 = vmatprep.subr.bf16.mxu1 %v12450_v53  ;;  %v12517_v53 = vld [vmem:[%s17255_s5 + $0x920] ss:$16 sps:$4 sm:$0xff]   ;;  %v12526_v0 = vld [vmem:[%s17255_s5 + $0x908] ss:$16 sps:$4 sm:$0xff]   ;;  %v12531_v3 = vld [vmem:[%s17255_s5 + $0xae4] ss:$16 sps:$4 sm:$0xff]  }
 0x25e   :  { %3821 = vmatpush1.bf16.msra.mxu0 %v12445_v60  ;;  %v12528_v60 = vld [vmem:[%s17255_s5 + $0x90c] ss:$16 sps:$4 sm:$0xff]  }
 0x25f   :  { %3862 = vmatpush1.bf16.msra.mxu1 %v12448_v62  ;;  %3822 = vmatprep.subr.bf16.mxu0 %v12453_v6  ;;  %v12523_v62 = vld [vmem:[%s17255_s5 + $0x900] ss:$16 sps:$4 sm:$0xff]   ;;  %v12534_v6 = vld [vmem:[%s17255_s5 + $0xaec] ss:$16 sps:$4 sm:$0xff]  }
 0x260   :  { %3863 = vmatprep.subr.bf16.mxu1 %v12456_v15  ;;  %v12529_v15 = vld [vmem:[%s17255_s5 + $0xae0] ss:$16 sps:$4 sm:$0xff]  }
 0x262   :  { %3823 = vmatpush1.bf16.msra.mxu0 %v12451_v16  ;;  %v3492_v16 = vrot.slane %v14067_v2, 4 }
 0x263   :  { %3864 = vmatpush1.bf16.msra.mxu1 %v12454_v17  ;;  %3824 = vmatprep.subr.bf16.mxu0 %v12459_v18  ;;  %v12532_v17 = vld [vmem:[%s17255_s5 + $0xae8] ss:$16 sps:$4 sm:$0xff]   ;;  %v12537_v18 = vld [vmem:[%s17255_s5 + $0xac4] ss:$16 sps:$4 sm:$0xff]  }
 0x264   :  { %3865 = vmatprep.subr.bf16.mxu1 %v12462_v20 }
 0x266   :  { %3825 = vmatpush1.bf16.msra.mxu0 %v12457_v19 }
 0x267   :  { %3866 = vmatpush1.bf16.msra.mxu1 %v12460_v21  ;;  %3826 = vmatprep.subr.bf16.mxu0 %v12465_v22  ;;  %v3968_v21 = vrot.slane %v14069_v4, 5  ;;  %v12540_v22 = vld [vmem:[%s17255_s5 + $0xacc] ss:$16 sps:$4 sm:$0xff]  }
 0x268   :  { %3867 = vmatprep.subr.bf16.mxu1 %v12468_v24 }
 0x26a   :  { %3827 = vmatpush1.bf16.msra.mxu0 %v12463_v23 }
 0x26b   :  { %3868 = vmatpush1.bf16.msra.mxu1 %v12466_v25  ;;  %3828 = vmatprep.subr.bf16.mxu0 %v12471_v26  ;;  %v12535_v25 = vld [vmem:[%s17255_s5 + $0xac0] ss:$16 sps:$4 sm:$0xff]  }
 0x26c   :  { %3869 = vmatprep.subr.bf16.mxu1 %v12474_v28  ;;  %v12538_v28 = vld [vmem:[%s17255_s5 + $0xac8] ss:$16 sps:$4 sm:$0xff]  }
 0x26e   :  { %3829 = vmatpush1.bf16.msra.mxu0 %v12469_v27 }
 0x26f   :  { %3870 = vmatpush1.bf16.msra.mxu1 %v12472_v29  ;;  %3830 = vmatprep.subr.bf16.mxu0 %v12477_v30  ;;  %v12546_v30 = vld [vmem:[%s17255_s5 + $0xaac] ss:$16 sps:$4 sm:$0xff]  }
 0x270   :  { %3871 = vmatprep.subr.bf16.mxu1 %v12480_v32 }
 0x272   :  { %3831 = vmatpush1.bf16.msra.mxu0 %v12475_v31 }
 0x273   :  { %3872 = vmatpush1.bf16.msra.mxu1 %v12478_v33  ;;  %3832 = vmatprep.subr.bf16.mxu0 %v12483_v34  ;;  %v12541_v33 = vld [vmem:[%s17255_s5 + $0xaa0] ss:$16 sps:$4 sm:$0xff]  }
 0x274   :  { %3873 = vmatprep.subr.bf16.mxu1 %v12486_v38  ;;  %v12552_v38 = vld [vmem:[%s17255_s5 + $0xa8c] ss:$16 sps:$4 sm:$0xff]  }
 0x276   :  { %3833 = vmatpush2.bf16.msra.mxu0 %v12481_v37  ;;  %v12549_v37 = vld [vmem:[%s17255_s5 + $0xa84] ss:$16 sps:$4 sm:$0xff]  }
 0x277   :  { %3874 = vmatpush2.bf16.msra.mxu1 %v12484_v39  ;;  %3834 = vmatprep.subr.bf16.mxu0 %v12489_v40  ;;  %v12547_v39 = vld [vmem:[%s17255_s5 + $0xa80] ss:$16 sps:$4 sm:$0xff]   ;;  %v12550_v40 = vld [vmem:[%s17255_s5 + $0xa88] ss:$16 sps:$4 sm:$0xff]  }
 0x278   :  { %3875 = vmatprep.subr.bf16.mxu1 %v12492_v42  ;;  %v12558_v42 = vld [vmem:[%s17255_s5 + $0xa6c] ss:$16 sps:$4 sm:$0xff]  }
 0x27a   :  { %3835 = vmatpush2.bf16.msra.mxu0 %v12487_v41  ;;  %v12555_v41 = vld [vmem:[%s17255_s5 + $0xa64] ss:$16 sps:$4 sm:$0xff]  }
 0x27b   :  { %3876 = vmatpush2.bf16.msra.mxu1 %v12490_v43  ;;  %3836 = vmatprep.subr.bf16.mxu0 %v12495_v44  ;;  %v12553_v43 = vld [vmem:[%s17255_s5 + $0xa60] ss:$16 sps:$4 sm:$0xff]   ;;  %v12556_v44 = vld [vmem:[%s17255_s5 + $0xa68] ss:$16 sps:$4 sm:$0xff]  }
 0x27c   :  { %3877 = vmatprep.subr.bf16.mxu1 %v12498_v46  ;;  %v12564_v46 = vld [vmem:[%s17255_s5 + $0xa4c] ss:$16 sps:$4 sm:$0xff]  }
 0x27e   :  { %3837 = vmatpush2.bf16.msra.mxu0 %v12493_v45  ;;  %v12561_v45 = vld [vmem:[%s17255_s5 + $0xa44] ss:$16 sps:$4 sm:$0xff]  }
 0x27f   :  { %3878 = vmatpush2.bf16.msra.mxu1 %v12496_v47  ;;  %3838 = vmatprep.subr.bf16.mxu0 %v12501_v48  ;;  %v12559_v47 = vld [vmem:[%s17255_s5 + $0xa40] ss:$16 sps:$4 sm:$0xff]   ;;  %v12562_v48 = vld [vmem:[%s17255_s5 + $0xa48] ss:$16 sps:$4 sm:$0xff]  }
 0x280   :  { %3879 = vmatprep.subr.bf16.mxu1 %v12504_v50  ;;  %v12570_v50 = vld [vmem:[%s17255_s5 + $0xa2c] ss:$16 sps:$4 sm:$0xff]  }
 0x282   :  { %3839 = vmatpush2.bf16.msra.mxu0 %v12499_v49  ;;  %v12567_v49 = vld [vmem:[%s17255_s5 + $0xa24] ss:$16 sps:$4 sm:$0xff]  }
 0x283   :  { %3880 = vmatpush2.bf16.msra.mxu1 %v12502_v51  ;;  %3840 = vmatprep.subr.bf16.mxu0 %v12507_v52  ;;  %v12565_v51 = vld [vmem:[%s17255_s5 + $0xa20] ss:$16 sps:$4 sm:$0xff]   ;;  %v12568_v52 = vld [vmem:[%s17255_s5 + $0xa28] ss:$16 sps:$4 sm:$0xff]  }
 0x284   :  { %3881 = vmatprep.subr.bf16.mxu1 %v12510_v55  ;;  %v12576_v55 = vld [vmem:[%s17255_s5 + $0xa0c] ss:$16 sps:$4 sm:$0xff]  }
 0x286   :  { %3841 = vmatpush2.bf16.msra.mxu0 %v12505_v54  ;;  %v12573_v54 = vld [vmem:[%s17255_s5 + $0xa04] ss:$16 sps:$4 sm:$0xff]  }
 0x287   :  { %3882 = vmatpush2.bf16.msra.mxu1 %v12508_v56  ;;  %3842 = vmatprep.subr.bf16.mxu0 %v12513_v61  ;;  %v12571_v56 = vld [vmem:[%s17255_s5 + $0xa00] ss:$16 sps:$4 sm:$0xff]   ;;  %v12574_v61 = vld [vmem:[%s17255_s5 + $0xa08] ss:$16 sps:$4 sm:$0xff]  }
 0x288   :  { %3883 = vmatprep.subr.bf16.mxu1 %v12516_v5  ;;  %v12579_v5 = vld [vmem:[%s17255_s5 + $0xbe4] ss:$16 sps:$4 sm:$0xff]  }
 0x28a   :  { %3843 = vmatpush2.bf16.msra.mxu0 %v12511_v9  ;;  %v12582_v9 = vld [vmem:[%s17255_s5 + $0xbec] ss:$16 sps:$4 sm:$0xff]  }
 0x28b   :  { %3884 = vmatpush2.bf16.msra.mxu1 %v12514_v10  ;;  %3844 = vmatprep.subr.bf16.mxu0 %v12519_v11  ;;  %v12577_v10 = vld [vmem:[%s17255_s5 + $0xbe0] ss:$16 sps:$4 sm:$0xff]   ;;  %v12580_v11 = vld [vmem:[%s17255_s5 + $0xbe8] ss:$16 sps:$4 sm:$0xff]  }
 0x28c   :  { %3885 = vmatprep.subr.bf16.mxu1 %v12522_v14  ;;  %v12585_v14 = vld [vmem:[%s17255_s5 + $0xbc4] ss:$16 sps:$4 sm:$0xff]  }
 0x28e   :  { %3845 = vmatpush2.bf16.msra.mxu0 %v12517_v53  ;;  %v12588_v53 = vld [vmem:[%s17255_s5 + $0xbcc] ss:$16 sps:$4 sm:$0xff]  }
 0x28f   :  { %3886 = vmatpush2.bf16.msra.mxu1 %v12520_v58  ;;  %3846 = vmatprep.subr.bf16.mxu0 %v12525_v57  ;;  %v12583_v58 = vld [vmem:[%s17255_s5 + $0xbc0] ss:$16 sps:$4 sm:$0xff]   ;;  %v12586_v57 = vld [vmem:[%s17255_s5 + $0xbc8] ss:$16 sps:$4 sm:$0xff]  }
 0x290   :  { %3887 = vmatprep.subr.bf16.mxu1 %v12528_v60  ;;  %v12591_v60 = vld [vmem:[%s17255_s5 + $0xba4] ss:$16 sps:$4 sm:$0xff]  }
 0x292   :  { %3847 = vmatpush2.bf16.msra.mxu0 %v12523_v62  ;;  %v12594_v62 = vld [vmem:[%s17255_s5 + $0xbac] ss:$16 sps:$4 sm:$0xff]  }
 0x293   :  { %3888 = vmatpush2.bf16.msra.mxu1 %v12526_v0  ;;  %4291 = vmatprep.subr.bf16.mxu0 %v12531_v3  ;;  %v12589_v0 = vld [vmem:[%s17255_s5 + $0xba0] ss:$16 sps:$4 sm:$0xff]   ;;  %v12592_v3 = vld [vmem:[%s17255_s5 + $0xba8] ss:$16 sps:$4 sm:$0xff]  }
 0x294   :  { %4332 = vmatprep.subr.bf16.mxu1 %v12534_v6  ;;  %v12597_v6 = vld [vmem:[%s17255_s5 + $0xb84] ss:$16 sps:$4 sm:$0xff]  }
 0x295   :  { %v2429_v19 = vpop.f32.mrf.mxu0  ;;  %v2470_v20 = vpop.f32.mrf.mxu1  ;;  %3849 = vmatmul.mubr.bf16.vlgmr.msra.gmra.mxu0 %v3492_v16 }
 0x296   :  { %v14877_v23 = vadd.f32 %v2429_v19, %v14673_v7  ;;  %v14880_v24 = vadd.f32 %v2470_v20, %v14675_v8  ;;  %3890 = vmatmul.mubr.bf16.vlgmr.msra.gmra.mxu1 %v3492_v16  ;;  %4292 = vmatpush1.bf16.msra.mxu0 %v12529_v15  ;;  %v12543_v7 = vld [vmem:[%s17255_s5 + $0xaa4] ss:$16 sps:$4 sm:$0xff]   ;;  %v12600_v15 = vld [vmem:[%s17255_s5 + $0xb8c] ss:$16 sps:$4 sm:$0xff]   ;;  %v12595_v16 = vld [vmem:[%s17255_s5 + $0xb80] ss:$16 sps:$4 sm:$0xff]  }
 0x297   :  { %4323 = vmatprep.mubr.bf16.mxu0 %v3968_v21  ;;  %4333 = vmatpush1.bf16.msra.mxu1 %v12532_v17  ;;  %v2431_v26 = vpop.f32.mrf.mxu0  ;;  %v2472_v27 = vpop.f32.mrf.mxu1  ;;  %v12598_v17 = vld [vmem:[%s17255_s5 + $0xb88] ss:$16 sps:$4 sm:$0xff]   ;;  %v12606_v19 = vld [vmem:[%s17255_s5 + $0xb6c] ss:$16 sps:$4 sm:$0xff]   ;;  %v12601_v20 = vld [vmem:[%s17255_s5 + $0xb60] ss:$16 sps:$4 sm:$0xff]  }
 0x298   :  { %4364 = vmatprep.mubr.bf16.mxu1 %v3968_v21  ;;  %v14892_v8 = vadd.f32 %v2431_v26, %v14684_v12  ;;  %v14895_v29 = vadd.f32 %v2472_v27, %v14686_v13  ;;  %4293 = vmatprep.subr.bf16.mxu0 %v12537_v18  ;;  %v12544_v13 = vld [vmem:[%s17255_s5 + $0xaa8] ss:$16 sps:$4 sm:$0xff]   ;;  %v12603_v18 = vld [vmem:[%s17255_s5 + $0xb64] ss:$16 sps:$4 sm:$0xff]   ;;  %v12607_v26 = vld [vmem:[%s17255_s5 + $0xb40] ss:$16 sps:$4 sm:$0xff]  }
 0x299   :  { %v2433_v31 = vpop.f32.mrf.mxu0  ;;  %v2474_v32 = vpop.f32.mrf.mxu1  ;;  %4334 = vmatprep.subr.bf16.mxu1 %v12540_v22  ;;  %v12604_v21 = vld [vmem:[%s17255_s5 + $0xb68] ss:$16 sps:$4 sm:$0xff]   ;;  %v12609_v22 = vld [vmem:[%s17255_s5 + $0xb44] ss:$16 sps:$4 sm:$0xff]  }
 0x29a   :  { %4294 = vmatpush1.bf16.msra.mxu0 %v12535_v25  ;;  %v12612_v25 = vld [vmem:[%s17255_s5 + $0xb4c] ss:$16 sps:$4 sm:$0xff]   ;;  %v12610_v27 = vld [vmem:[%s17255_s5 + $0xb48] ss:$16 sps:$4 sm:$0xff]   ;;  %v12621_v32 = vld [vmem:[%s17255_s5 + $0xb04] ss:$16 sps:$4 sm:$0xff]  }
 0x29b   :  { %4335 = vmatpush1.bf16.msra.mxu1 %v12538_v28  ;;  %v2434_v34 = vpop.f32.mrf.mxu0  ;;  %v2475_v12 = vpop.f32.mrf.mxu1  ;;  %4295 = vmatprep.subr.bf16.mxu0 %v12543_v7  ;;  %v12615_v28 = vld [vmem:[%s17255_s5 + $0xb24] ss:$16 sps:$4 sm:$0xff]   ;;  %v12618_v7 = vld [vmem:[%s17255_s5 + $0xb2c] ss:$16 sps:$4 sm:$0xff]   ;;  %v12616_v31 = vld [vmem:[%s17255_s5 + $0xb28] ss:$16 sps:$4 sm:$0xff]  }
 0x29c   :  { %4336 = vmatprep.subr.bf16.mxu1 %v12546_v30  ;;  %v12613_v30 = vld [vmem:[%s17255_s5 + $0xb20] ss:$16 sps:$4 sm:$0xff]   ;;  %v12622_v12 = vld [vmem:[%s17255_s5 + $0xb08] ss:$16 sps:$4 sm:$0xff]  }
 0x29d   :  { %v12619_v34 = vld [vmem:[%s17255_s5 + $0xb00] ss:$16 sps:$4 sm:$0xff]  }
 0x29e   :  { %4296 = vmatpush1.bf16.msra.mxu0 %v12541_v33  ;;  %v12624_v33 = vld [vmem:[%s17255_s5 + $0xb0c] ss:$16 sps:$4 sm:$0xff]  }
 0x29f   :  { %4337 = vmatpush1.bf16.msra.mxu1 %v12544_v13  ;;  %4297 = vmatprep.subr.bf16.mxu0 %v12549_v37  ;;  %v12627_v13 = vld [vmem:[%s17255_s5 + $0xce4] ss:$16 sps:$4 sm:$0xff]   ;;  %v12630_v37 = vld [vmem:[%s17255_s5 + $0xcec] ss:$16 sps:$4 sm:$0xff]  }
 0x2a0   :  { %4338 = vmatprep.subr.bf16.mxu1 %v12552_v38  ;;  %v12625_v38 = vld [vmem:[%s17255_s5 + $0xce0] ss:$16 sps:$4 sm:$0xff]  }
 0x2a2   :  { %4298 = vmatpush1.bf16.msra.mxu0 %v12547_v39  ;;  %v3967_v39 = vrot.slane %v14067_v2, 5 }
 0x2a3   :  { %4339 = vmatpush1.bf16.msra.mxu1 %v12550_v40  ;;  %4299 = vmatprep.subr.bf16.mxu0 %v12555_v41  ;;  %v12628_v40 = vld [vmem:[%s17255_s5 + $0xce8] ss:$16 sps:$4 sm:$0xff]   ;;  %v12633_v41 = vld [vmem:[%s17255_s5 + $0xcc4] ss:$16 sps:$4 sm:$0xff]  }
 0x2a4   :  { %4340 = vmatprep.subr.bf16.mxu1 %v12558_v42 }
 0x2a6   :  { %4300 = vmatpush1.bf16.msra.mxu0 %v12553_v43  ;;  %v4443_v43 = vrot.slane %v14069_v4, 6 }
 0x2a7   :  { %4341 = vmatpush1.bf16.msra.mxu1 %v12556_v44  ;;  %4301 = vmatprep.subr.bf16.mxu0 %v12561_v45  ;;  %v12636_v44 = vld [vmem:[%s17255_s5 + $0xccc] ss:$16 sps:$4 sm:$0xff]  }
 0x2a8   :  { %4342 = vmatprep.subr.bf16.mxu1 %v12564_v46 }
 0x2aa   :  { %4302 = vmatpush1.bf16.msra.mxu0 %v12559_v47  ;;  %v12631_v47 = vld [vmem:[%s17255_s5 + $0xcc0] ss:$16 sps:$4 sm:$0xff]  }
 0x2ab   :  { %4343 = vmatpush1.bf16.msra.mxu1 %v12562_v48  ;;  %4303 = vmatprep.subr.bf16.mxu0 %v12567_v49 }
 0x2ac   :  { %4344 = vmatprep.subr.bf16.mxu1 %v12570_v50  ;;  %v12634_v50 = vld [vmem:[%s17255_s5 + $0xcc8] ss:$16 sps:$4 sm:$0xff]  }
 0x2ae   :  { %4304 = vmatpush1.bf16.msra.mxu0 %v12565_v51 }
 0x2af   :  { %4345 = vmatpush1.bf16.msra.mxu1 %v12568_v52  ;;  %4305 = vmatprep.subr.bf16.mxu0 %v12573_v54 }
 0x2b0   :  { %4346 = vmatprep.subr.bf16.mxu1 %v12576_v55 }
 0x2b2   :  { %4306 = vmatpush1.bf16.msra.mxu0 %v12571_v56 }
 0x2b3   :  { %4347 = vmatpush1.bf16.msra.mxu1 %v12574_v61  ;;  %4307 = vmatprep.subr.bf16.mxu0 %v12579_v5  ;;  %v12637_v61 = vld [vmem:[%s17255_s5 + $0xca0] ss:$16 sps:$4 sm:$0xff]   ;;  %v12640_v5 = vld [vmem:[%s17255_s5 + $0xca8] ss:$16 sps:$4 sm:$0xff]  }
 0x2b4   :  { %4348 = vmatprep.subr.bf16.mxu1 %v12582_v9 }
 0x2b6   :  { %4308 = vmatpush2.bf16.msra.mxu0 %v12577_v10  ;;  %v12648_v10 = vld [vmem:[%s17255_s5 + $0xc8c] ss:$16 sps:$4 sm:$0xff]  }
 0x2b7   :  { %4349 = vmatpush2.bf16.msra.mxu1 %v12580_v11  ;;  %4309 = vmatprep.subr.bf16.mxu0 %v12585_v14  ;;  %v12643_v11 = vld [vmem:[%s17255_s5 + $0xc80] ss:$16 sps:$4 sm:$0xff]   ;;  %v12646_v14 = vld [vmem:[%s17255_s5 + $0xc88] ss:$16 sps:$4 sm:$0xff]  }
 0x2b8   :  { %4350 = vmatprep.subr.bf16.mxu1 %v12588_v53  ;;  %v12651_v53 = vld [vmem:[%s17255_s5 + $0xc64] ss:$16 sps:$4 sm:$0xff]  }
 0x2ba   :  { %4310 = vmatpush2.bf16.msra.mxu0 %v12583_v58  ;;  %v12654_v58 = vld [vmem:[%s17255_s5 + $0xc6c] ss:$16 sps:$4 sm:$0xff]  }
 0x2bb   :  { %4351 = vmatpush2.bf16.msra.mxu1 %v12586_v57  ;;  %4311 = vmatprep.subr.bf16.mxu0 %v12591_v60  ;;  %v12649_v57 = vld [vmem:[%s17255_s5 + $0xc60] ss:$16 sps:$4 sm:$0xff]   ;;  %v12652_v60 = vld [vmem:[%s17255_s5 + $0xc68] ss:$16 sps:$4 sm:$0xff]  }
 0x2bc   :  { %4352 = vmatprep.subr.bf16.mxu1 %v12594_v62  ;;  %v12657_v62 = vld [vmem:[%s17255_s5 + $0xc44] ss:$16 sps:$4 sm:$0xff]  }
 0x2be   :  { %4312 = vmatpush2.bf16.msra.mxu0 %v12589_v0  ;;  %v12660_v0 = vld [vmem:[%s17255_s5 + $0xc4c] ss:$16 sps:$4 sm:$0xff]  }
 0x2bf   :  { %4353 = vmatpush2.bf16.msra.mxu1 %v12592_v3  ;;  %4313 = vmatprep.subr.bf16.mxu0 %v12597_v6  ;;  %v12655_v3 = vld [vmem:[%s17255_s5 + $0xc40] ss:$16 sps:$4 sm:$0xff]   ;;  %v12658_v6 = vld [vmem:[%s17255_s5 + $0xc48] ss:$16 sps:$4 sm:$0xff]  }
 0x2c0   :  { %4354 = vmatprep.subr.bf16.mxu1 %v12600_v15  ;;  %v12663_v15 = vld [vmem:[%s17255_s5 + $0xc24] ss:$16 sps:$4 sm:$0xff]  }
 0x2c2   :  { %4314 = vmatpush2.bf16.msra.mxu0 %v12595_v16  ;;  %v12666_v16 = vld [vmem:[%s17255_s5 + $0xc2c] ss:$16 sps:$4 sm:$0xff]  }
 0x2c3   :  { %4355 = vmatpush2.bf16.msra.mxu1 %v12598_v17  ;;  %4315 = vmatprep.subr.bf16.mxu0 %v12603_v18  ;;  %v12661_v17 = vld [vmem:[%s17255_s5 + $0xc20] ss:$16 sps:$4 sm:$0xff]   ;;  %v12664_v18 = vld [vmem:[%s17255_s5 + $0xc28] ss:$16 sps:$4 sm:$0xff]  }
 0x2c4   :  { %4356 = vmatprep.subr.bf16.mxu1 %v12606_v19  ;;  %v12669_v19 = vld [vmem:[%s17255_s5 + $0xc04] ss:$16 sps:$4 sm:$0xff]  }
 0x2c6   :  { %4316 = vmatpush2.bf16.msra.mxu0 %v12601_v20  ;;  %v12672_v20 = vld [vmem:[%s17255_s5 + $0xc0c] ss:$16 sps:$4 sm:$0xff]  }
 0x2c7   :  { %4357 = vmatpush2.bf16.msra.mxu1 %v12604_v21  ;;  %4317 = vmatprep.subr.bf16.mxu0 %v12609_v22  ;;  %v12667_v21 = vld [vmem:[%s17255_s5 + $0xc00] ss:$16 sps:$4 sm:$0xff]   ;;  %v12670_v22 = vld [vmem:[%s17255_s5 + $0xc08] ss:$16 sps:$4 sm:$0xff]  }
 0x2c8   :  { %4358 = vmatprep.subr.bf16.mxu1 %v12612_v25  ;;  %v12675_v25 = vld [vmem:[%s17255_s5 + $0xde4] ss:$16 sps:$4 sm:$0xff]  }
 0x2ca   :  { %4318 = vmatpush2.bf16.msra.mxu0 %v12607_v26  ;;  %v12678_v26 = vld [vmem:[%s17255_s5 + $0xdec] ss:$16 sps:$4 sm:$0xff]  }
 0x2cb   :  { %4359 = vmatpush2.bf16.msra.mxu1 %v12610_v27  ;;  %4319 = vmatprep.subr.bf16.mxu0 %v12615_v28  ;;  %v12673_v27 = vld [vmem:[%s17255_s5 + $0xde0] ss:$16 sps:$4 sm:$0xff]   ;;  %v12676_v28 = vld [vmem:[%s17255_s5 + $0xde8] ss:$16 sps:$4 sm:$0xff]  }
 0x2cc   :  { %4360 = vmatprep.subr.bf16.mxu1 %v12618_v7  ;;  %v12681_v7 = vld [vmem:[%s17255_s5 + $0xdc4] ss:$16 sps:$4 sm:$0xff]  }
 0x2ce   :  { %4320 = vmatpush2.bf16.msra.mxu0 %v12613_v30  ;;  %v12684_v30 = vld [vmem:[%s17255_s5 + $0xdcc] ss:$16 sps:$4 sm:$0xff]  }
 0x2cf   :  { %4361 = vmatpush2.bf16.msra.mxu1 %v12616_v31  ;;  %4321 = vmatprep.subr.bf16.mxu0 %v12621_v32  ;;  %v12679_v31 = vld [vmem:[%s17255_s5 + $0xdc0] ss:$16 sps:$4 sm:$0xff]   ;;  %v12682_v32 = vld [vmem:[%s17255_s5 + $0xdc8] ss:$16 sps:$4 sm:$0xff]  }
 0x2d0   :  { %4362 = vmatprep.subr.bf16.mxu1 %v12624_v33  ;;  %v12687_v33 = vld [vmem:[%s17255_s5 + $0xda4] ss:$16 sps:$4 sm:$0xff]  }
 0x2d2   :  { %4322 = vmatpush2.bf16.msra.mxu0 %v12619_v34  ;;  %v12690_v34 = vld [vmem:[%s17255_s5 + $0xdac] ss:$16 sps:$4 sm:$0xff]  }
 0x2d3   :  { %4363 = vmatpush2.bf16.msra.mxu1 %v12622_v12  ;;  %4766 = vmatprep.subr.bf16.mxu0 %v12627_v13  ;;  %v12685_v12 = vld [vmem:[%s17255_s5 + $0xda0] ss:$16 sps:$4 sm:$0xff]   ;;  %v12688_v13 = vld [vmem:[%s17255_s5 + $0xda8] ss:$16 sps:$4 sm:$0xff]  }
 0x2d4   :  { %4807 = vmatprep.subr.bf16.mxu1 %v12630_v37  ;;  %v12693_v37 = vld [vmem:[%s17255_s5 + $0xd84] ss:$16 sps:$4 sm:$0xff]  }
 0x2d5   :  { %v2900_v42 = vpop.f32.mrf.mxu0  ;;  %4324 = vmatmul.mubr.bf16.vlgmr.msra.gmra.mxu0 %v3967_v39 }
 0x2d6   :  { %v15083_v45 = vadd.f32 %v2900_v42, %v14877_v23  ;;  %v2941_v46 = vpop.f32.mrf.mxu1  ;;  %4365 = vmatmul.mubr.bf16.vlgmr.msra.gmra.mxu1 %v3967_v39  ;;  %4767 = vmatpush1.bf16.msra.mxu0 %v12625_v38  ;;  %v12639_v23 = vld [vmem:[%s17255_s5 + $0xca4] ss:$16 sps:$4 sm:$0xff]   ;;  %v12696_v38 = vld [vmem:[%s17255_s5 + $0xd8c] ss:$16 sps:$4 sm:$0xff]   ;;  %v12691_v39 = vld [vmem:[%s17255_s5 + $0xd80] ss:$16 sps:$4 sm:$0xff]  }
 0x2d7   :  { %v15089_v48 = vadd.f32 %v2941_v46, %v14880_v24  ;;  %4798 = vmatprep.mubr.bf16.mxu0 %v4443_v43  ;;  %4808 = vmatpush1.bf16.msra.mxu1 %v12628_v40  ;;  %v2902_v49 = vpop.f32.mrf.mxu0  ;;  %v12642_v24 = vld [vmem:[%s17255_s5 + $0xcac] ss:$16 sps:$4 sm:$0xff]   ;;  %v12694_v40 = vld [vmem:[%s17255_s5 + $0xd88] ss:$16 sps:$4 sm:$0xff]   ;;  %v12705_v46 = vld [vmem:[%s17255_s5 + $0xd44] ss:$16 sps:$4 sm:$0xff]  }
 0x2d8   :  { %4839 = vmatprep.mubr.bf16.mxu1 %v4443_v43  ;;  %v15098_v51 = vadd.f32 %v2902_v49, %v14892_v8  ;;  %v2943_v52 = vpop.f32.mrf.mxu1  ;;  %4768 = vmatprep.subr.bf16.mxu0 %v12633_v41  ;;  %v12699_v41 = vld [vmem:[%s17255_s5 + $0xd64] ss:$16 sps:$4 sm:$0xff]   ;;  %v12702_v42 = vld [vmem:[%s17255_s5 + $0xd6c] ss:$16 sps:$4 sm:$0xff]   ;;  %v12697_v43 = vld [vmem:[%s17255_s5 + $0xd60] ss:$16 sps:$4 sm:$0xff]  }
 0x2d9   :  { %v15104_v54 = vadd.f32 %v2943_v52, %v14895_v29  ;;  %v2904_v55 = vpop.f32.mrf.mxu0  ;;  %4809 = vmatprep.subr.bf16.mxu1 %v12636_v44  ;;  %v12645_v29 = vld [vmem:[%s17255_s5 + $0xc84] ss:$16 sps:$4 sm:$0xff]   ;;  %v12700_v44 = vld [vmem:[%s17255_s5 + $0xd68] ss:$16 sps:$4 sm:$0xff]   ;;  %v12703_v49 = vld [vmem:[%s17255_s5 + $0xd40] ss:$16 sps:$4 sm:$0xff]  }
 0x2da   :  { %v2945_v56 = vpop.f32.mrf.mxu1  ;;  %4769 = vmatpush1.bf16.msra.mxu0 %v12631_v47  ;;  %v12708_v47 = vld [vmem:[%s17255_s5 + $0xd4c] ss:$16 sps:$4 sm:$0xff]   ;;  %v12712_v55 = vld [vmem:[%s17255_s5 + $0xd28] ss:$16 sps:$4 sm:$0xff]  }
 0x2db   :  { %4810 = vmatpush1.bf16.msra.mxu1 %v12634_v50  ;;  %v2905_v8 = vpop.f32.mrf.mxu0  ;;  %4770 = vmatprep.subr.bf16.mxu0 %v12639_v23  ;;  %v12706_v50 = vld [vmem:[%s17255_s5 + $0xd48] ss:$16 sps:$4 sm:$0xff]   ;;  %v12711_v23 = vld [vmem:[%s17255_s5 + $0xd24] ss:$16 sps:$4 sm:$0xff]   ;;  %v12714_v52 = vld [vmem:[%s17255_s5 + $0xd2c] ss:$16 sps:$4 sm:$0xff]  }
 0x2dc   :  { %v2946_v9 = vpop.f32.mrf.mxu1  ;;  %4811 = vmatprep.subr.bf16.mxu1 %v12642_v24  ;;  %v12709_v24 = vld [vmem:[%s17255_s5 + $0xd20] ss:$16 sps:$4 sm:$0xff]   ;;  %v12717_v56 = vld [vmem:[%s17255_s5 + $0xd04] ss:$16 sps:$4 sm:$0xff]  }
 0x2dd   :  { %v12715_v8 = vld [vmem:[%s17255_s5 + $0xd00] ss:$16 sps:$4 sm:$0xff]   ;;  %v12726_v9 = vld [vmem:[%s17255_s5 + $0xeec] ss:$16 sps:$4 sm:$0xff]  }
 0x2de   :  { %4771 = vmatpush1.bf16.msra.mxu0 %v12637_v61  ;;  %v12720_v61 = vld [vmem:[%s17255_s5 + $0xd0c] ss:$16 sps:$4 sm:$0xff]  }
 0x2df   :  { %4812 = vmatpush1.bf16.msra.mxu1 %v12640_v5  ;;  %4772 = vmatprep.subr.bf16.mxu0 %v12645_v29  ;;  %v12718_v5 = vld [vmem:[%s17255_s5 + $0xd08] ss:$16 sps:$4 sm:$0xff]   ;;  %v12723_v29 = vld [vmem:[%s17255_s5 + $0xee4] ss:$16 sps:$4 sm:$0xff]  }
 0x2e0   :  { %4813 = vmatprep.subr.bf16.mxu1 %v12648_v10  ;;  %v12721_v10 = vld [vmem:[%s17255_s5 + $0xee0] ss:$16 sps:$4 sm:$0xff]  }
 0x2e2   :  { %4773 = vmatpush1.bf16.msra.mxu0 %v12643_v11  ;;  %v4442_v11 = vrot.slane %v14067_v2, 6 }
 0x2e3   :  { %4814 = vmatpush1.bf16.msra.mxu1 %v12646_v14  ;;  %4774 = vmatprep.subr.bf16.mxu0 %v12651_v53  ;;  %v12724_v14 = vld [vmem:[%s17255_s5 + $0xee8] ss:$16 sps:$4 sm:$0xff]   ;;  %v12729_v53 = vld [vmem:[%s17255_s5 + $0xec4] ss:$16 sps:$4 sm:$0xff]  }
 0x2e4   :  { %4815 = vmatprep.subr.bf16.mxu1 %v12654_v58 }
 0x2e6   :  { %4775 = vmatpush1.bf16.msra.mxu0 %v12649_v57  ;;  %v4918_v57 = vrot.slane %v14069_v4, 7 }
 0x2e7   :  { %4816 = vmatpush1.bf16.msra.mxu1 %v12652_v60  ;;  %4776 = vmatprep.subr.bf16.mxu0 %v12657_v62  ;;  %v12732_v60 = vld [vmem:[%s17255_s5 + $0xecc] ss:$16 sps:$4 sm:$0xff]  }
 0x2e8   :  { %4817 = vmatprep.subr.bf16.mxu1 %v12660_v0 }
 0x2ea   :  { %4777 = vmatpush1.bf16.msra.mxu0 %v12655_v3  ;;  %v12727_v3 = vld [vmem:[%s17255_s5 + $0xec0] ss:$16 sps:$4 sm:$0xff]  }
 0x2eb   :  { %4818 = vmatpush1.bf16.msra.mxu1 %v12658_v6  ;;  %4778 = vmatprep.subr.bf16.mxu0 %v12663_v15  ;;  %v12730_v15 = vld [vmem:[%s17255_s5 + $0xec8] ss:$16 sps:$4 sm:$0xff]  }
 0x2ec   :  { %4819 = vmatprep.subr.bf16.mxu1 %v12666_v16 }
 0x2ee   :  { %4779 = vmatpush1.bf16.msra.mxu0 %v12661_v17 }
 0x2ef   :  { %4820 = vmatpush1.bf16.msra.mxu1 %v12664_v18  ;;  %4780 = vmatprep.subr.bf16.mxu0 %v12669_v19 }
 0x2f0   :  { %4821 = vmatprep.subr.bf16.mxu1 %v12672_v20 }
 0x2f2   :  { %4781 = vmatpush1.bf16.msra.mxu0 %v12667_v21  ;;  %v12733_v21 = vld [vmem:[%s17255_s5 + $0xea0] ss:$16 sps:$4 sm:$0xff]  }
 0x2f3   :  { %4822 = vmatpush1.bf16.msra.mxu1 %v12670_v22  ;;  %4782 = vmatprep.subr.bf16.mxu0 %v12675_v25  ;;  %v12736_v22 = vld [vmem:[%s17255_s5 + $0xea8] ss:$16 sps:$4 sm:$0xff]  }
 0x2f4   :  { %4823 = vmatprep.subr.bf16.mxu1 %v12678_v26  ;;  %v12744_v26 = vld [vmem:[%s17255_s5 + $0xe8c] ss:$16 sps:$4 sm:$0xff]  }
 0x2f6   :  { %4783 = vmatpush2.bf16.msra.mxu0 %v12673_v27  ;;  %v12739_v27 = vld [vmem:[%s17255_s5 + $0xe80] ss:$16 sps:$4 sm:$0xff]  }
 0x2f7   :  { %4824 = vmatpush2.bf16.msra.mxu1 %v12676_v28  ;;  %4784 = vmatprep.subr.bf16.mxu0 %v12681_v7  ;;  %v12742_v28 = vld [vmem:[%s17255_s5 + $0xe88] ss:$16 sps:$4 sm:$0xff]   ;;  %v12747_v7 = vld [vmem:[%s17255_s5 + $0xe64] ss:$16 sps:$4 sm:$0xff]  }
 0x2f8   :  { %4825 = vmatprep.subr.bf16.mxu1 %v12684_v30  ;;  %v12750_v30 = vld [vmem:[%s17255_s5 + $0xe6c] ss:$16 sps:$4 sm:$0xff]  }
 0x2fa   :  { %4785 = vmatpush2.bf16.msra.mxu0 %v12679_v31  ;;  %v12745_v31 = vld [vmem:[%s17255_s5 + $0xe60] ss:$16 sps:$4 sm:$0xff]  }
 0x2fb   :  { %4826 = vmatpush2.bf16.msra.mxu1 %v12682_v32  ;;  %4786 = vmatprep.subr.bf16.mxu0 %v12687_v33  ;;  %v12748_v32 = vld [vmem:[%s17255_s5 + $0xe68] ss:$16 sps:$4 sm:$0xff]   ;;  %v12753_v33 = vld [vmem:[%s17255_s5 + $0xe44] ss:$16 sps:$4 sm:$0xff]  }
 0x2fc   :  { %4827 = vmatprep.subr.bf16.mxu1 %v12690_v34  ;;  %v12756_v34 = vld [vmem:[%s17255_s5 + $0xe4c] ss:$16 sps:$4 sm:$0xff]  }
 0x2fe   :  { %4787 = vmatpush2.bf16.msra.mxu0 %v12685_v12  ;;  %v12751_v12 = vld [vmem:[%s17255_s5 + $0xe40] ss:$16 sps:$4 sm:$0xff]  }
 0x2ff   :  { %4828 = vmatpush2.bf16.msra.mxu1 %v12688_v13  ;;  %4788 = vmatprep.subr.bf16.mxu0 %v12693_v37  ;;  %v12754_v13 = vld [vmem:[%s17255_s5 + $0xe48] ss:$16 sps:$4 sm:$0xff]   ;;  %v12759_v37 = vld [vmem:[%s17255_s5 + $0xe24] ss:$16 sps:$4 sm:$0xff]  }
 0x300   :  { %4829 = vmatprep.subr.bf16.mxu1 %v12696_v38  ;;  %v12762_v38 = vld [vmem:[%s17255_s5 + $0xe2c] ss:$16 sps:$4 sm:$0xff]  }
 0x302   :  { %4789 = vmatpush2.bf16.msra.mxu0 %v12691_v39  ;;  %v12757_v39 = vld [vmem:[%s17255_s5 + $0xe20] ss:$16 sps:$4 sm:$0xff]  }
 0x303   :  { %4830 = vmatpush2.bf16.msra.mxu1 %v12694_v40  ;;  %4790 = vmatprep.subr.bf16.mxu0 %v12699_v41  ;;  %v12760_v40 = vld [vmem:[%s17255_s5 + $0xe28] ss:$16 sps:$4 sm:$0xff]   ;;  %v12765_v41 = vld [vmem:[%s17255_s5 + $0xe04] ss:$16 sps:$4 sm:$0xff]  }
 0x304   :  { %4831 = vmatprep.subr.bf16.mxu1 %v12702_v42  ;;  %v12768_v42 = vld [vmem:[%s17255_s5 + $0xe0c] ss:$16 sps:$4 sm:$0xff]  }
 0x306   :  { %4791 = vmatpush2.bf16.msra.mxu0 %v12697_v43  ;;  %v12763_v43 = vld [vmem:[%s17255_s5 + $0xe00] ss:$16 sps:$4 sm:$0xff]  }
 0x307   :  { %4832 = vmatpush2.bf16.msra.mxu1 %v12700_v44  ;;  %4792 = vmatprep.subr.bf16.mxu0 %v12705_v46  ;;  %v12766_v44 = vld [vmem:[%s17255_s5 + $0xe08] ss:$16 sps:$4 sm:$0xff]   ;;  %v12771_v46 = vld [vmem:[%s17255_s5 + $0xfe4] ss:$16 sps:$4 sm:$0xff]  }
 0x308   :  { %4833 = vmatprep.subr.bf16.mxu1 %v12708_v47  ;;  %v12774_v47 = vld [vmem:[%s17255_s5 + $0xfec] ss:$16 sps:$4 sm:$0xff]  }
 0x30a   :  { %4793 = vmatpush2.bf16.msra.mxu0 %v12703_v49  ;;  %v12769_v49 = vld [vmem:[%s17255_s5 + $0xfe0] ss:$16 sps:$4 sm:$0xff]  }
 0x30b   :  { %4834 = vmatpush2.bf16.msra.mxu1 %v12706_v50  ;;  %4794 = vmatprep.subr.bf16.mxu0 %v12711_v23  ;;  %v12772_v50 = vld [vmem:[%s17255_s5 + $0xfe8] ss:$16 sps:$4 sm:$0xff]   ;;  %v12777_v23 = vld [vmem:[%s17255_s5 + $0xfc4] ss:$16 sps:$4 sm:$0xff]  }
 0x30c   :  { %4835 = vmatprep.subr.bf16.mxu1 %v12714_v52  ;;  %v12780_v52 = vld [vmem:[%s17255_s5 + $0xfcc] ss:$16 sps:$4 sm:$0xff]  }
 0x30e   :  { %4795 = vmatpush2.bf16.msra.mxu0 %v12709_v24  ;;  %v12775_v24 = vld [vmem:[%s17255_s5 + $0xfc0] ss:$16 sps:$4 sm:$0xff]  }
 0x30f   :  { %4836 = vmatpush2.bf16.msra.mxu1 %v12712_v55  ;;  %4796 = vmatprep.subr.bf16.mxu0 %v12717_v56  ;;  %v12778_v55 = vld [vmem:[%s17255_s5 + $0xfc8] ss:$16 sps:$4 sm:$0xff]   ;;  %v12783_v56 = vld [vmem:[%s17255_s5 + $0xfa4] ss:$16 sps:$4 sm:$0xff]  }
 0x310   :  { %4837 = vmatprep.subr.bf16.mxu1 %v12720_v61  ;;  %v12786_v61 = vld [vmem:[%s17255_s5 + $0xfac] ss:$16 sps:$4 sm:$0xff]  }
 0x312   :  { %4797 = vmatpush2.bf16.msra.mxu0 %v12715_v8  ;;  %v12781_v8 = vld [vmem:[%s17255_s5 + $0xfa0] ss:$16 sps:$4 sm:$0xff]  }
 0x313   :  { %4838 = vmatpush2.bf16.msra.mxu1 %v12718_v5  ;;  %5241 = vmatprep.subr.bf16.mxu0 %v12723_v29  ;;  %v12784_v5 = vld [vmem:[%s17255_s5 + $0xfa8] ss:$16 sps:$4 sm:$0xff]   ;;  %v12789_v29 = vld [vmem:[%s17255_s5 + $0xf84] ss:$16 sps:$4 sm:$0xff]  }
 0x314   :  { %5282 = vmatprep.subr.bf16.mxu1 %v12726_v9  ;;  %v12792_v9 = vld [vmem:[%s17255_s5 + $0xf8c] ss:$16 sps:$4 sm:$0xff]  }
 0x315   :  { %v3375_v58 = vpop.f32.mrf.mxu0  ;;  %4799 = vmatmul.mubr.bf16.vlgmr.msra.gmra.mxu0 %v4442_v11 }
 0x316   :  { %v15289_v62 = vadd.f32 %v3375_v58, %v15083_v45  ;;  %v3416_v0 = vpop.f32.mrf.mxu1  ;;  %4840 = vmatmul.mubr.bf16.vlgmr.msra.gmra.mxu1 %v4442_v11  ;;  %5242 = vmatpush1.bf16.msra.mxu0 %v12721_v10  ;;  %v12735_v45 = vld [vmem:[%s17255_s5 + $0xea4] ss:$16 sps:$4 sm:$0xff]   ;;  %v12787_v10 = vld [vmem:[%s17255_s5 + $0xf80] ss:$16 sps:$4 sm:$0xff]   ;;  %v12790_v11 = vld [vmem:[%s17255_s5 + $0xf88] ss:$16 sps:$4 sm:$0xff]  }
 0x317   :  { %v15295_v6 = vadd.f32 %v3416_v0, %v15089_v48  ;;  %5273 = vmatprep.mubr.bf16.mxu0 %v4918_v57  ;;  %5283 = vmatpush1.bf16.msra.mxu1 %v12724_v14  ;;  %v3377_v4 = vpop.f32.mrf.mxu0  ;;  %v12738_v48 = vld [vmem:[%s17255_s5 + $0xeac] ss:$16 sps:$4 sm:$0xff]   ;;  %v12795_v14 = vld [vmem:[%s17255_s5 + $0xf64] ss:$16 sps:$4 sm:$0xff]   ;;  %v12793_v58 = vld [vmem:[%s17255_s5 + $0xf60] ss:$16 sps:$4 sm:$0xff]  }
 0x318   :  { %5314 = vmatprep.mubr.bf16.mxu1 %v4918_v57  ;;  %v15304_v16 = vadd.f32 %v3377_v4, %v15098_v51  ;;  %v3418_v17 = vpop.f32.mrf.mxu1  ;;  %5243 = vmatprep.subr.bf16.mxu0 %v12729_v53  ;;  %v12798_v53 = vld [vmem:[%s17255_s5 + $0xf6c] ss:$16 sps:$4 sm:$0xff]   ;;  %v12796_v57 = vld [vmem:[%s17255_s5 + $0xf68] ss:$16 sps:$4 sm:$0xff]  }
 0x319   :  { %v15310_v18 = vadd.f32 %v3418_v17, %v15104_v54  ;;  %v3379_v19 = vpop.f32.mrf.mxu0  ;;  %5284 = vmatprep.subr.bf16.mxu1 %v12732_v60  ;;  %v12741_v54 = vld [vmem:[%s17255_s5 + $0xe84] ss:$16 sps:$4 sm:$0xff]   ;;  %v12804_v0 = vld [vmem:[%s17255_s5 + $0xf4c] ss:$16 sps:$4 sm:$0xff]   ;;  %v12802_v4 = vld [vmem:[%s17255_s5 + $0xf48] ss:$16 sps:$4 sm:$0xff]  }
 0x31a   :  { %v3420_v20 = vpop.f32.mrf.mxu1  ;;  %5244 = vmatpush1.bf16.msra.mxu0 %v12727_v3  ;;  %v12801_v60 = vld [vmem:[%s17255_s5 + $0xf44] ss:$16 sps:$4 sm:$0xff]   ;;  %v12799_v3 = vld [vmem:[%s17255_s5 + $0xf40] ss:$16 sps:$4 sm:$0xff]  }
 0x31b   :  { %5285 = vmatpush1.bf16.msra.mxu1 %v12730_v15  ;;  %v3380_v51 = vpop.f32.mrf.mxu0  ;;  %5245 = vmatprep.subr.bf16.mxu0 %v12735_v45  ;;  %v12807_v15 = vld [vmem:[%s17255_s5 + $0xf24] ss:$16 sps:$4 sm:$0xff]   ;;  %v12810_v45 = vld [vmem:[%s17255_s5 + $0xf2c] ss:$16 sps:$4 sm:$0xff]   ;;  %v12805_v17 = vld [vmem:[%s17255_s5 + $0xf20] ss:$16 sps:$4 sm:$0xff]  }
 0x31c   :  { %v3421_v25 = vpop.f32.mrf.mxu1  ;;  %5286 = vmatprep.subr.bf16.mxu1 %v12738_v48  ;;  %v12808_v48 = vld [vmem:[%s17255_s5 + $0xf28] ss:$16 sps:$4 sm:$0xff]   ;;  %v12813_v19 = vld [vmem:[%s17255_s5 + $0xf04] ss:$16 sps:$4 sm:$0xff]   ;;  %v12816_v20 = vld [vmem:[%s17255_s5 + $0xf0c] ss:$16 sps:$4 sm:$0xff]  }
 0x31d   :  { %v12814_v51 = vld [vmem:[%s17255_s5 + $0xf08] ss:$16 sps:$4 sm:$0xff]   ;;  %v12817_v25 = vld [vmem:[%s17255_s5 + $0x10e0] ss:$16 sps:$4 sm:$0xff]  }
 0x31e   :  { %5246 = vmatpush1.bf16.msra.mxu0 %v12733_v21  ;;  %v12811_v21 = vld [vmem:[%s17255_s5 + $0xf00] ss:$16 sps:$4 sm:$0xff]  }
 0x31f   :  { %5287 = vmatpush1.bf16.msra.mxu1 %v12736_v22  ;;  %5247 = vmatprep.subr.bf16.mxu0 %v12741_v54  ;;  %v12819_v22 = vld [vmem:[%s17255_s5 + $0x10e4] ss:$16 sps:$4 sm:$0xff]   ;;  %v12822_v54 = vld [vmem:[%s17255_s5 + $0x10ec] ss:$16 sps:$4 sm:$0xff]  }
 0x320   :  { %5288 = vmatprep.subr.bf16.mxu1 %v12744_v26  ;;  %v4917_v26 = vrot.slane %v14067_v2, 7 }
 0x322   :  { %5248 = vmatpush1.bf16.msra.mxu0 %v12739_v27  ;;  %v12820_v27 = vld [vmem:[%s17255_s5 + $0x10e8] ss:$16 sps:$4 sm:$0xff]  }
 0x323   :  { %5289 = vmatpush1.bf16.msra.mxu1 %v12742_v28  ;;  %5249 = vmatprep.subr.bf16.mxu0 %v12747_v7  ;;  %v12825_v28 = vld [vmem:[%s17255_s5 + $0x10c4] ss:$16 sps:$4 sm:$0xff]  }
 0x324   :  { %5290 = vmatprep.subr.bf16.mxu1 %v12750_v30  ;;  %v12828_v30 = vld [vmem:[%s17255_s5 + $0x10cc] ss:$16 sps:$4 sm:$0xff]  }
 0x326   :  { %5250 = vmatpush1.bf16.msra.mxu0 %v12745_v31 }
 0x327   :  { %5291 = vmatpush1.bf16.msra.mxu1 %v12748_v32  ;;  %5251 = vmatprep.subr.bf16.mxu0 %v12753_v33  ;;  %v12823_v32 = vld [vmem:[%s17255_s5 + $0x10c0] ss:$16 sps:$4 sm:$0xff]  }
 0x328   :  { %5292 = vmatprep.subr.bf16.mxu1 %v12756_v34 }
 0x32a   :  { %5252 = vmatpush1.bf16.msra.mxu0 %v12751_v12  ;;  %v12826_v12 = vld [vmem:[%s17255_s5 + $0x10c8] ss:$16 sps:$4 sm:$0xff]  }
 0x32b   :  { %5293 = vmatpush1.bf16.msra.mxu1 %v12754_v13  ;;  %5253 = vmatprep.subr.bf16.mxu0 %v12759_v37 }
 0x32c   :  { %5294 = vmatprep.subr.bf16.mxu1 %v12762_v38 }
 0x32e   :  { %5254 = vmatpush1.bf16.msra.mxu0 %v12757_v39 }
 0x32f   :  { %5295 = vmatpush1.bf16.msra.mxu1 %v12760_v40  ;;  %5255 = vmatprep.subr.bf16.mxu0 %v12765_v41  ;;  %v12829_v41 = vld [vmem:[%s17255_s5 + $0x10a0] ss:$16 sps:$4 sm:$0xff]  }
 0x330   :  { %5296 = vmatprep.subr.bf16.mxu1 %v12768_v42  ;;  %v12832_v42 = vld [vmem:[%s17255_s5 + $0x10a8] ss:$16 sps:$4 sm:$0xff]  }
 0x332   :  { %5256 = vmatpush1.bf16.msra.mxu0 %v12763_v43 }
 0x333   :  { %5297 = vmatpush1.bf16.msra.mxu1 %v12766_v44  ;;  %5257 = vmatprep.subr.bf16.mxu0 %v12771_v46  ;;  %v12840_v44 = vld [vmem:[%s17255_s5 + $0x108c] ss:$16 sps:$4 sm:$0xff]   ;;  %v12835_v46 = vld [vmem:[%s17255_s5 + $0x1080] ss:$16 sps:$4 sm:$0xff]  }
 0x334   :  { %5298 = vmatprep.subr.bf16.mxu1 %v12774_v47  ;;  %v12838_v47 = vld [vmem:[%s17255_s5 + $0x1088] ss:$16 sps:$4 sm:$0xff]  }
 0x336   :  { %5258 = vmatpush2.bf16.msra.mxu0 %v12769_v49  ;;  %v12843_v49 = vld [vmem:[%s17255_s5 + $0x1064] ss:$16 sps:$4 sm:$0xff]  }
 0x337   :  { %5299 = vmatpush2.bf16.msra.mxu1 %v12772_v50  ;;  %5259 = vmatprep.subr.bf16.mxu0 %v12777_v23  ;;  %v12846_v50 = vld [vmem:[%s17255_s5 + $0x106c] ss:$16 sps:$4 sm:$0xff]   ;;  %v12841_v23 = vld [vmem:[%s17255_s5 + $0x1060] ss:$16 sps:$4 sm:$0xff]  }
 0x338   :  { %5300 = vmatprep.subr.bf16.mxu1 %v12780_v52  ;;  %v12844_v52 = vld [vmem:[%s17255_s5 + $0x1068] ss:$16 sps:$4 sm:$0xff]  }
 0x33a   :  { %5260 = vmatpush2.bf16.msra.mxu0 %v12775_v24  ;;  %v12849_v24 = vld [vmem:[%s17255_s5 + $0x1044] ss:$16 sps:$4 sm:$0xff]  }
 0x33b   :  { %5301 = vmatpush2.bf16.msra.mxu1 %v12778_v55  ;;  %5261 = vmatprep.subr.bf16.mxu0 %v12783_v56  ;;  %v12852_v55 = vld [vmem:[%s17255_s5 + $0x104c] ss:$16 sps:$4 sm:$0xff]   ;;  %v12847_v56 = vld [vmem:[%s17255_s5 + $0x1040] ss:$16 sps:$4 sm:$0xff]  }
 0x33c   :  { %5302 = vmatprep.subr.bf16.mxu1 %v12786_v61  ;;  %v12850_v61 = vld [vmem:[%s17255_s5 + $0x1048] ss:$16 sps:$4 sm:$0xff]  }
 0x33e   :  { %5262 = vmatpush2.bf16.msra.mxu0 %v12781_v8  ;;  %v12855_v8 = vld [vmem:[%s17255_s5 + $0x1024] ss:$16 sps:$4 sm:$0xff]  }
 0x33f   :  { %5303 = vmatpush2.bf16.msra.mxu1 %v12784_v5  ;;  %5263 = vmatprep.subr.bf16.mxu0 %v12789_v29  ;;  %v12858_v5 = vld [vmem:[%s17255_s5 + $0x102c] ss:$16 sps:$4 sm:$0xff]   ;;  %v12853_v29 = vld [vmem:[%s17255_s5 + $0x1020] ss:$16 sps:$4 sm:$0xff]  }
 0x340   :  { %5304 = vmatprep.subr.bf16.mxu1 %v12792_v9  ;;  %v12856_v9 = vld [vmem:[%s17255_s5 + $0x1028] ss:$16 sps:$4 sm:$0xff]  }
 0x342   :  { %5264 = vmatpush2.bf16.msra.mxu0 %v12787_v10  ;;  %v12861_v10 = vld [vmem:[%s17255_s5 + $0x1004] ss:$16 sps:$4 sm:$0xff]  }
 0x343   :  { %5305 = vmatpush2.bf16.msra.mxu1 %v12790_v11  ;;  %5265 = vmatprep.subr.bf16.mxu0 %v12795_v14  ;;  %v12864_v11 = vld [vmem:[%s17255_s5 + $0x100c] ss:$16 sps:$4 sm:$0xff]   ;;  %v12859_v14 = vld [vmem:[%s17255_s5 + $0x1000] ss:$16 sps:$4 sm:$0xff]  }
 0x344   :  { %5306 = vmatprep.subr.bf16.mxu1 %v12798_v53  ;;  %v12862_v53 = vld [vmem:[%s17255_s5 + $0x1008] ss:$16 sps:$4 sm:$0xff]  }
 0x346   :  { %5266 = vmatpush2.bf16.msra.mxu0 %v12793_v58  ;;  %v12867_v58 = vld [vmem:[%s17255_s5 + $0x11e4] ss:$16 sps:$4 sm:$0xff]  }
 0x347   :  { %5307 = vmatpush2.bf16.msra.mxu1 %v12796_v57  ;;  %5267 = vmatprep.subr.bf16.mxu0 %v12801_v60  ;;  %v12870_v57 = vld [vmem:[%s17255_s5 + $0x11ec] ss:$16 sps:$4 sm:$0xff]   ;;  %v12865_v60 = vld [vmem:[%s17255_s5 + $0x11e0] ss:$16 sps:$4 sm:$0xff]  }
 0x348   :  { %5308 = vmatprep.subr.bf16.mxu1 %v12804_v0  ;;  %v12868_v0 = vld [vmem:[%s17255_s5 + $0x11e8] ss:$16 sps:$4 sm:$0xff]  }
 0x34a   :  { %5268 = vmatpush2.bf16.msra.mxu0 %v12799_v3  ;;  %v12873_v3 = vld [vmem:[%s17255_s5 + $0x11c4] ss:$16 sps:$4 sm:$0xff]  }
 0x34b   :  { %5309 = vmatpush2.bf16.msra.mxu1 %v12802_v4  ;;  %5269 = vmatprep.subr.bf16.mxu0 %v12807_v15  ;;  %v12876_v4 = vld [vmem:[%s17255_s5 + $0x11cc] ss:$16 sps:$4 sm:$0xff]   ;;  %v12871_v15 = vld [vmem:[%s17255_s5 + $0x11c0] ss:$16 sps:$4 sm:$0xff]  }
 0x34c   :  { %5310 = vmatprep.subr.bf16.mxu1 %v12810_v45  ;;  %v12874_v45 = vld [vmem:[%s17255_s5 + $0x11c8] ss:$16 sps:$4 sm:$0xff]  }
 0x34e   :  { %5270 = vmatpush2.bf16.msra.mxu0 %v12805_v17  ;;  %v12879_v17 = vld [vmem:[%s17255_s5 + $0x11a4] ss:$16 sps:$4 sm:$0xff]  }
 0x34f   :  { %5311 = vmatpush2.bf16.msra.mxu1 %v12808_v48  ;;  %5271 = vmatprep.subr.bf16.mxu0 %v12813_v19  ;;  %v12882_v48 = vld [vmem:[%s17255_s5 + $0x11ac] ss:$16 sps:$4 sm:$0xff]   ;;  %v12877_v19 = vld [vmem:[%s17255_s5 + $0x11a0] ss:$16 sps:$4 sm:$0xff]  }
 0x350   :  { %5312 = vmatprep.subr.bf16.mxu1 %v12816_v20  ;;  %v12880_v20 = vld [vmem:[%s17255_s5 + $0x11a8] ss:$16 sps:$4 sm:$0xff]  }
 0x352   :  { %5272 = vmatpush2.bf16.msra.mxu0 %v12811_v21  ;;  %v12885_v21 = vld [vmem:[%s17255_s5 + $0x1184] ss:$16 sps:$4 sm:$0xff]  }
 0x353   :  { %5313 = vmatpush2.bf16.msra.mxu1 %v12814_v51  ;;  %5712 = vmatprep.subr.bf16.mxu0 %v12819_v22  ;;  %v12888_v51 = vld [vmem:[%s17255_s5 + $0x118c] ss:$16 sps:$4 sm:$0xff]   ;;  %v12883_v22 = vld [vmem:[%s17255_s5 + $0x1180] ss:$16 sps:$4 sm:$0xff]  }
 0x354   :  { %5753 = vmatprep.subr.bf16.mxu1 %v12822_v54  ;;  %v12886_v54 = vld [vmem:[%s17255_s5 + $0x1188] ss:$16 sps:$4 sm:$0xff]  }
 0x355   :  { %v3850_v7 = vpop.f32.mrf.mxu0  ;;  %5274 = vmatmul.mubr.bf16.vlgmr.msra.gmra.mxu0 %v4917_v26 }
 0x356   :  { %v15494_v31 = vadd.f32 %v3850_v7, %v15289_v62  ;;  %v3891_v2 = vpop.f32.mrf.mxu1  ;;  %5315 = vmatmul.mubr.bf16.vlgmr.msra.gmra.mxu1 %v4917_v26  ;;  %5713 = vmatpush1.bf16.msra.mxu0 %v12817_v25  ;;  %v12831_v62 = vld [vmem:[%s17255_s5 + $0x10a4] ss:$16 sps:$4 sm:$0xff]   ;;  %v12894_v26 = vld [vmem:[%s17255_s5 + $0x116c] ss:$16 sps:$4 sm:$0xff]  }
 0x357   :  { %v15500_v33 = vadd.f32 %v3891_v2, %v15295_v6  ;;  %5744 = vmatprep.mubr.bf16.mxu0 %v14101_v36  ;;  %5754 = vmatpush1.bf16.msra.mxu1 %v12820_v27  ;;  %v3852_v34 = vpop.f32.mrf.mxu0  ;;  %v12834_v6 = vld [vmem:[%s17255_s5 + $0x10ac] ss:$16 sps:$4 sm:$0xff]   ;;  %v12891_v25 = vld [vmem:[%s17255_s5 + $0x1164] ss:$16 sps:$4 sm:$0xff]   ;;  %v12889_v27 = vld [vmem:[%s17255_s5 + $0x1160] ss:$16 sps:$4 sm:$0xff]  }
 0x358   :  { %5785 = vmatprep.mubr.bf16.mxu1 %v14101_v36  ;;  %v15511_v13 = vadd.f32 %v3852_v34, %v15304_v16  ;;  %v3893_v37 = vpop.f32.mrf.mxu1  ;;  %5714 = vmatprep.subr.bf16.mxu0 %v12825_v28  ;;  %v12892_v28 = vld [vmem:[%s17255_s5 + $0x1168] ss:$16 sps:$4 sm:$0xff]   ;;  %v12897_v7 = vld [vmem:[%s17255_s5 + $0x1144] ss:$16 sps:$4 sm:$0xff]   ;;  %v12895_v2 = vld [vmem:[%s17255_s5 + $0x1140] ss:$16 sps:$4 sm:$0xff]  }
 0x359   :  { %v15517_v38 = vadd.f32 %v3893_v37, %v15310_v18  ;;  %v3854_v39 = vpop.f32.mrf.mxu0  ;;  %5755 = vmatprep.subr.bf16.mxu1 %v12828_v30  ;;  %v12837_v18 = vld [vmem:[%s17255_s5 + $0x1084] ss:$16 sps:$4 sm:$0xff]   ;;  %v12900_v30 = vld [vmem:[%s17255_s5 + $0x114c] ss:$16 sps:$4 sm:$0xff]   ;;  %v12904_v37 = vld [vmem:[%s17255_s5 + $0x1128] ss:$16 sps:$4 sm:$0xff]  }
 0x35a   :  { %v3895_v40 = vpop.f32.mrf.mxu1  ;;  %5715 = vmatpush1.bf16.msra.mxu0 %v12823_v32  ;;  %v12898_v32 = vld [vmem:[%s17255_s5 + $0x1148] ss:$16 sps:$4 sm:$0xff]   ;;  %v12903_v34 = vld [vmem:[%s17255_s5 + $0x1124] ss:$16 sps:$4 sm:$0xff]   ;;  %v12912_v39 = vld [vmem:[%s17255_s5 + $0x110c] ss:$16 sps:$4 sm:$0xff]  }
 0x35b   :  { %5756 = vmatpush1.bf16.msra.mxu1 %v12826_v12  ;;  %v3855_v16 = vpop.f32.mrf.mxu0  ;;  %5716 = vmatprep.subr.bf16.mxu0 %v12831_v62  ;;  %v12906_v12 = vld [vmem:[%s17255_s5 + $0x112c] ss:$16 sps:$4 sm:$0xff]   ;;  %v12901_v62 = vld [vmem:[%s17255_s5 + $0x1120] ss:$16 sps:$4 sm:$0xff]  }
 0x35c   :  { %v3896_v43 = vpop.f32.mrf.mxu1  ;;  %5757 = vmatprep.subr.bf16.mxu1 %v12834_v6  ;;  %v12909_v6 = vld [vmem:[%s17255_s5 + $0x1104] ss:$16 sps:$4 sm:$0xff]   ;;  %v12907_v40 = vld [vmem:[%s17255_s5 + $0x1100] ss:$16 sps:$4 sm:$0xff]  }
 0x35d   :  { %v12915_v16 = vld [vmem:[%s17255_s5 + $0x12e4] ss:$16 sps:$4 sm:$0xff]   ;;  %v12916_v43 = vld [vmem:[%s17255_s5 + $0x12e8] ss:$16 sps:$4 sm:$0xff]  }
 0x35e   :  { %5717 = vmatpush1.bf16.msra.mxu0 %v12829_v41  ;;  %v12910_v41 = vld [vmem:[%s17255_s5 + $0x1108] ss:$16 sps:$4 sm:$0xff]  }
 0x35f   :  { %5758 = vmatpush1.bf16.msra.mxu1 %v12832_v42  ;;  %5718 = vmatprep.subr.bf16.mxu0 %v12837_v18  ;;  %v12918_v42 = vld [vmem:[%s17255_s5 + $0x12ec] ss:$16 sps:$4 sm:$0xff]   ;;  %v12913_v18 = vld [vmem:[%s17255_s5 + $0x12e0] ss:$16 sps:$4 sm:$0xff]  }
 0x360   :  { %5759 = vmatprep.subr.bf16.mxu1 %v12840_v44  ;;  %v12921_v44 = vld [vmem:[%s17255_s5 + $0x12c4] ss:$16 sps:$4 sm:$0xff]  }
 0x362   :  { %5719 = vmatpush1.bf16.msra.mxu0 %v12835_v46 }
 0x363   :  { %5760 = vmatpush1.bf16.msra.mxu1 %v12838_v47  ;;  %5720 = vmatprep.subr.bf16.mxu0 %v12843_v49  ;;  %v5866_v47 = vrot.slane %v14101_v36, 1  ;;  %v12924_v49 = vld [vmem:[%s17255_s5 + $0x12cc] ss:$16 sps:$4 sm:$0xff]  }
 0x364   :  { %5761 = vmatprep.subr.bf16.mxu1 %v12846_v50 }
 0x366   :  { %5721 = vmatpush1.bf16.msra.mxu0 %v12841_v23 }
 0x367   :  { %5762 = vmatpush1.bf16.msra.mxu1 %v12844_v52  ;;  %5722 = vmatprep.subr.bf16.mxu0 %v12849_v24  ;;  %v12919_v52 = vld [vmem:[%s17255_s5 + $0x12c0] ss:$16 sps:$4 sm:$0xff]  }
 0x368   :  { %5763 = vmatprep.subr.bf16.mxu1 %v12852_v55 }
 0x36a   :  { %5723 = vmatpush1.bf16.msra.mxu0 %v12847_v56  ;;  %v12922_v56 = vld [vmem:[%s17255_s5 + $0x12c8] ss:$16 sps:$4 sm:$0xff]  }
 0x36b   :  { %5764 = vmatpush1.bf16.msra.mxu1 %v12850_v61  ;;  %5724 = vmatprep.subr.bf16.mxu0 %v12855_v8 }
 0x36c   :  { %5765 = vmatprep.subr.bf16.mxu1 %v12858_v5 }
 0x36e   :  { %5725 = vmatpush1.bf16.msra.mxu0 %v12853_v29 }
 0x36f   :  { %5766 = vmatpush1.bf16.msra.mxu1 %v12856_v9  ;;  %5726 = vmatprep.subr.bf16.mxu0 %v12861_v10  ;;  %v12925_v10 = vld [vmem:[%s17255_s5 + $0x12a0] ss:$16 sps:$4 sm:$0xff]  }
 0x370   :  { %5767 = vmatprep.subr.bf16.mxu1 %v12864_v11  ;;  %v12928_v11 = vld [vmem:[%s17255_s5 + $0x12a8] ss:$16 sps:$4 sm:$0xff]  }
 0x372   :  { %5727 = vmatpush1.bf16.msra.mxu0 %v12859_v14 }
 0x373   :  { %5768 = vmatpush1.bf16.msra.mxu1 %v12862_v53  ;;  %5728 = vmatprep.subr.bf16.mxu0 %v12867_v58  ;;  %v12936_v53 = vld [vmem:[%s17255_s5 + $0x128c] ss:$16 sps:$4 sm:$0xff]   ;;  %v12931_v58 = vld [vmem:[%s17255_s5 + $0x1280] ss:$16 sps:$4 sm:$0xff]  }
 0x374   :  { %5769 = vmatprep.subr.bf16.mxu1 %v12870_v57  ;;  %v12934_v57 = vld [vmem:[%s17255_s5 + $0x1288] ss:$16 sps:$4 sm:$0xff]  }
 0x376   :  { %5729 = vmatpush2.bf16.msra.mxu0 %v12865_v60  ;;  %v12939_v60 = vld [vmem:[%s17255_s5 + $0x1264] ss:$16 sps:$4 sm:$0xff]  }
 0x377   :  { %5770 = vmatpush2.bf16.msra.mxu1 %v12868_v0  ;;  %5730 = vmatprep.subr.bf16.mxu0 %v12873_v3  ;;  %v12942_v0 = vld [vmem:[%s17255_s5 + $0x126c] ss:$16 sps:$4 sm:$0xff]   ;;  %v12937_v3 = vld [vmem:[%s17255_s5 + $0x1260] ss:$16 sps:$4 sm:$0xff]  }
 0x378   :  { %5771 = vmatprep.subr.bf16.mxu1 %v12876_v4  ;;  %v12940_v4 = vld [vmem:[%s17255_s5 + $0x1268] ss:$16 sps:$4 sm:$0xff]  }
 0x37a   :  { %5731 = vmatpush2.bf16.msra.mxu0 %v12871_v15  ;;  %v12945_v15 = vld [vmem:[%s17255_s5 + $0x1244] ss:$16 sps:$4 sm:$0xff]  }
 0x37b   :  { %5772 = vmatpush2.bf16.msra.mxu1 %v12874_v45  ;;  %5732 = vmatprep.subr.bf16.mxu0 %v12879_v17  ;;  %v12948_v45 = vld [vmem:[%s17255_s5 + $0x124c] ss:$16 sps:$4 sm:$0xff]   ;;  %v12943_v17 = vld [vmem:[%s17255_s5 + $0x1240] ss:$16 sps:$4 sm:$0xff]  }
 0x37c   :  { %5773 = vmatprep.subr.bf16.mxu1 %v12882_v48  ;;  %v12946_v48 = vld [vmem:[%s17255_s5 + $0x1248] ss:$16 sps:$4 sm:$0xff]  }
 0x37e   :  { %5733 = vmatpush2.bf16.msra.mxu0 %v12877_v19  ;;  %v12951_v19 = vld [vmem:[%s17255_s5 + $0x1224] ss:$16 sps:$4 sm:$0xff]  }
 0x37f   :  { %5774 = vmatpush2.bf16.msra.mxu1 %v12880_v20  ;;  %5734 = vmatprep.subr.bf16.mxu0 %v12885_v21  ;;  %v12954_v20 = vld [vmem:[%s17255_s5 + $0x122c] ss:$16 sps:$4 sm:$0xff]   ;;  %v12949_v21 = vld [vmem:[%s17255_s5 + $0x1220] ss:$16 sps:$4 sm:$0xff]  }
 0x380   :  { %5775 = vmatprep.subr.bf16.mxu1 %v12888_v51  ;;  %v12952_v51 = vld [vmem:[%s17255_s5 + $0x1228] ss:$16 sps:$4 sm:$0xff]  }
 0x382   :  { %5735 = vmatpush2.bf16.msra.mxu0 %v12883_v22  ;;  %v12957_v22 = vld [vmem:[%s17255_s5 + $0x1204] ss:$16 sps:$4 sm:$0xff]  }
 0x383   :  { %5776 = vmatpush2.bf16.msra.mxu1 %v12886_v54  ;;  %5736 = vmatprep.subr.bf16.mxu0 %v12891_v25  ;;  %v12960_v54 = vld [vmem:[%s17255_s5 + $0x120c] ss:$16 sps:$4 sm:$0xff]   ;;  %v12955_v25 = vld [vmem:[%s17255_s5 + $0x1200] ss:$16 sps:$4 sm:$0xff]  }
 0x384   :  { %5777 = vmatprep.subr.bf16.mxu1 %v12894_v26  ;;  %v12958_v26 = vld [vmem:[%s17255_s5 + $0x1208] ss:$16 sps:$4 sm:$0xff]  }
 0x386   :  { %5737 = vmatpush2.bf16.msra.mxu0 %v12889_v27  ;;  %v12963_v27 = vld [vmem:[%s17255_s5 + $0x13e4] ss:$16 sps:$4 sm:$0xff]  }
 0x387   :  { %5778 = vmatpush2.bf16.msra.mxu1 %v12892_v28  ;;  %5738 = vmatprep.subr.bf16.mxu0 %v12897_v7  ;;  %v12966_v28 = vld [vmem:[%s17255_s5 + $0x13ec] ss:$16 sps:$4 sm:$0xff]   ;;  %v12961_v7 = vld [vmem:[%s17255_s5 + $0x13e0] ss:$16 sps:$4 sm:$0xff]  }
 0x388   :  { %5779 = vmatprep.subr.bf16.mxu1 %v12900_v30  ;;  %v12964_v30 = vld [vmem:[%s17255_s5 + $0x13e8] ss:$16 sps:$4 sm:$0xff]  }
 0x38a   :  { %5739 = vmatpush2.bf16.msra.mxu0 %v12895_v2  ;;  %v12969_v2 = vld [vmem:[%s17255_s5 + $0x13c4] ss:$16 sps:$4 sm:$0xff]  }
 0x38b   :  { %5780 = vmatpush2.bf16.msra.mxu1 %v12898_v32  ;;  %5740 = vmatprep.subr.bf16.mxu0 %v12903_v34  ;;  %v12972_v32 = vld [vmem:[%s17255_s5 + $0x13cc] ss:$16 sps:$4 sm:$0xff]   ;;  %v12967_v34 = vld [vmem:[%s17255_s5 + $0x13c0] ss:$16 sps:$4 sm:$0xff]  }
 0x38c   :  { %5781 = vmatprep.subr.bf16.mxu1 %v12906_v12  ;;  %v12970_v12 = vld [vmem:[%s17255_s5 + $0x13c8] ss:$16 sps:$4 sm:$0xff]  }
 0x38e   :  { %5741 = vmatpush2.bf16.msra.mxu0 %v12901_v62  ;;  %v12975_v62 = vld [vmem:[%s17255_s5 + $0x13a4] ss:$16 sps:$4 sm:$0xff]  }
 0x38f   :  { %5782 = vmatpush2.bf16.msra.mxu1 %v12904_v37  ;;  %5742 = vmatprep.subr.bf16.mxu0 %v12909_v6  ;;  %v12978_v37 = vld [vmem:[%s17255_s5 + $0x13ac] ss:$16 sps:$4 sm:$0xff]   ;;  %v12973_v6 = vld [vmem:[%s17255_s5 + $0x13a0] ss:$16 sps:$4 sm:$0xff]  }
 0x390   :  { %5783 = vmatprep.subr.bf16.mxu1 %v12912_v39  ;;  %v12976_v39 = vld [vmem:[%s17255_s5 + $0x13a8] ss:$16 sps:$4 sm:$0xff]  }
 0x392   :  { %5743 = vmatpush2.bf16.msra.mxu0 %v12907_v40  ;;  %v12981_v40 = vld [vmem:[%s17255_s5 + $0x1384] ss:$16 sps:$4 sm:$0xff]  }
 0x393   :  { %5784 = vmatpush2.bf16.msra.mxu1 %v12910_v41  ;;  %6189 = vmatprep.subr.bf16.mxu0 %v12915_v16  ;;  %v12984_v41 = vld [vmem:[%s17255_s5 + $0x138c] ss:$16 sps:$4 sm:$0xff]   ;;  %v12979_v16 = vld [vmem:[%s17255_s5 + $0x1380] ss:$16 sps:$4 sm:$0xff]  }
 0x394   :  { %6230 = vmatprep.subr.bf16.mxu1 %v12918_v42  ;;  %v12982_v42 = vld [vmem:[%s17255_s5 + $0x1388] ss:$16 sps:$4 sm:$0xff]  }
 0x395   :  { %v4325_v46 = vpop.f32.mrf.mxu0  ;;  %5745 = vmatmul.mubr.bf16.vlgmr.msra.gmra.mxu0 %v14097_v35 }
 0x396   :  { %v15702_v50 = vadd.f32 %v4325_v46, %v15494_v31  ;;  %v4366_v23 = vpop.f32.mrf.mxu1  ;;  %5786 = vmatmul.mubr.bf16.vlgmr.msra.gmra.mxu1 %v14097_v35  ;;  %6190 = vmatpush1.bf16.msra.mxu0 %v12913_v18  ;;  %v12927_v31 = vld [vmem:[%s17255_s5 + $0x12a4] ss:$16 sps:$4 sm:$0xff]   ;;  %v12988_v46 = vld [vmem:[%s17255_s5 + $0x1368] ss:$16 sps:$4 sm:$0xff]  }
 0x397   :  { %v15709_v24 = vadd.f32 %v4366_v23, %v15500_v33  ;;  %6221 = vmatprep.mubr.bf16.mxu0 %v5866_v47  ;;  %6231 = vmatpush1.bf16.msra.mxu1 %v12916_v43  ;;  %v4327_v55 = vpop.f32.mrf.mxu0  ;;  %v12930_v33 = vld [vmem:[%s17255_s5 + $0x12ac] ss:$16 sps:$4 sm:$0xff]   ;;  %v12987_v18 = vld [vmem:[%s17255_s5 + $0x1364] ss:$16 sps:$4 sm:$0xff]   ;;  %v12991_v23 = vld [vmem:[%s17255_s5 + $0x1340] ss:$16 sps:$4 sm:$0xff]  }
 0x398   :  { %6262 = vmatprep.mubr.bf16.mxu1 %v5866_v47  ;;  %v15718_v61 = vadd.f32 %v4327_v55, %v15511_v13  ;;  %v4368_v8 = vpop.f32.mrf.mxu1  ;;  %6191 = vmatprep.subr.bf16.mxu0 %v12921_v44  ;;  %v12990_v43 = vld [vmem:[%s17255_s5 + $0x136c] ss:$16 sps:$4 sm:$0xff]   ;;  %v12985_v44 = vld [vmem:[%s17255_s5 + $0x1360] ss:$16 sps:$4 sm:$0xff]   ;;  %v12993_v47 = vld [vmem:[%s17255_s5 + $0x1344] ss:$16 sps:$4 sm:$0xff]  }
 0x399   :  { %v15724_v5 = vadd.f32 %v4368_v8, %v15517_v38  ;;  %v4329_v29 = vpop.f32.mrf.mxu0  ;;  %6232 = vmatprep.subr.bf16.mxu1 %v12924_v49  ;;  %v12933_v38 = vld [vmem:[%s17255_s5 + $0x1284] ss:$16 sps:$4 sm:$0xff]   ;;  %v12996_v49 = vld [vmem:[%s17255_s5 + $0x134c] ss:$16 sps:$4 sm:$0xff]   ;;  %v13000_v8 = vld [vmem:[%s17255_s5 + $0x1328] ss:$16 sps:$4 sm:$0xff]  }
 0x39a   :  { %v4370_v9 = vpop.f32.mrf.mxu1  ;;  %6192 = vmatpush1.bf16.msra.mxu0 %v12919_v52  ;;  %v12994_v52 = vld [vmem:[%s17255_s5 + $0x1348] ss:$16 sps:$4 sm:$0xff]   ;;  %v12999_v55 = vld [vmem:[%s17255_s5 + $0x1324] ss:$16 sps:$4 sm:$0xff]   ;;  %v13008_v29 = vld [vmem:[%s17255_s5 + $0x130c] ss:$16 sps:$4 sm:$0xff]  }
 0x39b   :  { %6233 = vmatpush1.bf16.msra.mxu1 %v12922_v56  ;;  %v4330_v13 = vpop.f32.mrf.mxu0  ;;  %6193 = vmatprep.subr.bf16.mxu0 %v12927_v31  ;;  %v13002_v56 = vld [vmem:[%s17255_s5 + $0x132c] ss:$16 sps:$4 sm:$0xff]   ;;  %v12997_v31 = vld [vmem:[%s17255_s5 + $0x1320] ss:$16 sps:$4 sm:$0xff]  }
 0x39c   :  { %v4371_v14 = vpop.f32.mrf.mxu1  ;;  %6234 = vmatprep.subr.bf16.mxu1 %v12930_v33  ;;  %v13005_v33 = vld [vmem:[%s17255_s5 + $0x1304] ss:$16 sps:$4 sm:$0xff]   ;;  %v13003_v9 = vld [vmem:[%s17255_s5 + $0x1300] ss:$16 sps:$4 sm:$0xff]  }
 0x39d   :  { %v13011_v13 = vld [vmem:[%s17255_s5 + $0x14e4] ss:$16 sps:$4 sm:$0xff]   ;;  %v5865_v14 = vrot.slane %v14097_v35, 1 }
 0x39e   :  { %6194 = vmatpush1.bf16.msra.mxu0 %v12925_v10  ;;  %v13006_v10 = vld [vmem:[%s17255_s5 + $0x1308] ss:$16 sps:$4 sm:$0xff]  }
 0x39f   :  { %6235 = vmatpush1.bf16.msra.mxu1 %v12928_v11  ;;  %6195 = vmatprep.subr.bf16.mxu0 %v12933_v38  ;;  %v13014_v11 = vld [vmem:[%s17255_s5 + $0x14ec] ss:$16 sps:$4 sm:$0xff]   ;;  %v13009_v38 = vld [vmem:[%s17255_s5 + $0x14e0] ss:$16 sps:$4 sm:$0xff]  }
 0x3a0   :  { %6236 = vmatprep.subr.bf16.mxu1 %v12936_v53  ;;  %v13012_v53 = vld [vmem:[%s17255_s5 + $0x14e8] ss:$16 sps:$4 sm:$0xff]  }
 0x3a2   :  { %6196 = vmatpush1.bf16.msra.mxu0 %v12931_v58  ;;  %v13017_v58 = vld [vmem:[%s17255_s5 + $0x14c4] ss:$16 sps:$4 sm:$0xff]  }
 0x3a3   :  { %6237 = vmatpush1.bf16.msra.mxu1 %v12934_v57  ;;  %6197 = vmatprep.subr.bf16.mxu0 %v12939_v60  ;;  %v6341_v60 = vrot.slane %v14101_v36, 2 }
 0x3a4   :  { %6238 = vmatprep.subr.bf16.mxu1 %v12942_v0  ;;  %v13020_v0 = vld [vmem:[%s17255_s5 + $0x14cc] ss:$16 sps:$4 sm:$0xff]  }
 0x3a6   :  { %6198 = vmatpush1.bf16.msra.mxu0 %v12937_v3 }
 0x3a7   :  { %6239 = vmatpush1.bf16.msra.mxu1 %v12940_v4  ;;  %6199 = vmatprep.subr.bf16.mxu0 %v12945_v15  ;;  %v13015_v15 = vld [vmem:[%s17255_s5 + $0x14c0] ss:$16 sps:$4 sm:$0xff]  }
 0x3a8   :  { %6240 = vmatprep.subr.bf16.mxu1 %v12948_v45 }
 0x3aa   :  { %6200 = vmatpush1.bf16.msra.mxu0 %v12943_v17 }
 0x3ab   :  { %6241 = vmatpush1.bf16.msra.mxu1 %v12946_v48  ;;  %6201 = vmatprep.subr.bf16.mxu0 %v12951_v19  ;;  %v13018_v48 = vld [vmem:[%s17255_s5 + $0x14c8] ss:$16 sps:$4 sm:$0xff]  }
 0x3ac   :  { %6242 = vmatprep.subr.bf16.mxu1 %v12954_v20 }
 0x3ae   :  { %6202 = vmatpush1.bf16.msra.mxu0 %v12949_v21 }
 0x3af   :  { %6243 = vmatpush1.bf16.msra.mxu1 %v12952_v51  ;;  %6203 = vmatprep.subr.bf16.mxu0 %v12957_v22 }
 0x3b0   :  { %6244 = vmatprep.subr.bf16.mxu1 %v12960_v54  ;;  %v13021_v54 = vld [vmem:[%s17255_s5 + $0x14a0] ss:$16 sps:$4 sm:$0xff]  }
 0x3b2   :  { %6204 = vmatpush1.bf16.msra.mxu0 %v12955_v25  ;;  %v13024_v25 = vld [vmem:[%s17255_s5 + $0x14a8] ss:$16 sps:$4 sm:$0xff]  }
 0x3b3   :  { %6245 = vmatpush1.bf16.msra.mxu1 %v12958_v26  ;;  %6205 = vmatprep.subr.bf16.mxu0 %v12963_v27  ;;  %v13032_v27 = vld [vmem:[%s17255_s5 + $0x148c] ss:$16 sps:$4 sm:$0xff]  }
 0x3b4   :  { %6246 = vmatprep.subr.bf16.mxu1 %v12966_v28  ;;  %v13027_v28 = vld [vmem:[%s17255_s5 + $0x1480] ss:$16 sps:$4 sm:$0xff]  }
 0x3b6   :  { %6206 = vmatpush2.bf16.msra.mxu0 %v12961_v7  ;;  %v13030_v7 = vld [vmem:[%s17255_s5 + $0x1488] ss:$16 sps:$4 sm:$0xff]  }
 0x3b7   :  { %6247 = vmatpush2.bf16.msra.mxu1 %v12964_v30  ;;  %6207 = vmatprep.subr.bf16.mxu0 %v12969_v2  ;;  %v13035_v30 = vld [vmem:[%s17255_s5 + $0x1464] ss:$16 sps:$4 sm:$0xff]   ;;  %v13038_v2 = vld [vmem:[%s17255_s5 + $0x146c] ss:$16 sps:$4 sm:$0xff]  }
 0x3b8   :  { %6248 = vmatprep.subr.bf16.mxu1 %v12972_v32  ;;  %v13033_v32 = vld [vmem:[%s17255_s5 + $0x1460] ss:$16 sps:$4 sm:$0xff]  }
 0x3ba   :  { %6208 = vmatpush2.bf16.msra.mxu0 %v12967_v34  ;;  %v13036_v34 = vld [vmem:[%s17255_s5 + $0x1468] ss:$16 sps:$4 sm:$0xff]  }
 0x3bb   :  { %6249 = vmatpush2.bf16.msra.mxu1 %v12970_v12  ;;  %6209 = vmatprep.subr.bf16.mxu0 %v12975_v62  ;;  %v13041_v12 = vld [vmem:[%s17255_s5 + $0x1444] ss:$16 sps:$4 sm:$0xff]   ;;  %v13044_v62 = vld [vmem:[%s17255_s5 + $0x144c] ss:$16 sps:$4 sm:$0xff]  }
 0x3bc   :  { %6250 = vmatprep.subr.bf16.mxu1 %v12978_v37  ;;  %v13039_v37 = vld [vmem:[%s17255_s5 + $0x1440] ss:$16 sps:$4 sm:$0xff]  }
 0x3be   :  { %6210 = vmatpush2.bf16.msra.mxu0 %v12973_v6  ;;  %v13042_v6 = vld [vmem:[%s17255_s5 + $0x1448] ss:$16 sps:$4 sm:$0xff]  }
 0x3bf   :  { %6251 = vmatpush2.bf16.msra.mxu1 %v12976_v39  ;;  %6211 = vmatprep.subr.bf16.mxu0 %v12981_v40  ;;  %v13047_v39 = vld [vmem:[%s17255_s5 + $0x1424] ss:$16 sps:$4 sm:$0xff]   ;;  %v13050_v40 = vld [vmem:[%s17255_s5 + $0x142c] ss:$16 sps:$4 sm:$0xff]  }
 0x3c0   :  { %6252 = vmatprep.subr.bf16.mxu1 %v12984_v41  ;;  %v13045_v41 = vld [vmem:[%s17255_s5 + $0x1420] ss:$16 sps:$4 sm:$0xff]  }
 0x3c2   :  { %6212 = vmatpush2.bf16.msra.mxu0 %v12979_v16  ;;  %v13048_v16 = vld [vmem:[%s17255_s5 + $0x1428] ss:$16 sps:$4 sm:$0xff]  }
 0x3c3   :  { %6253 = vmatpush2.bf16.msra.mxu1 %v12982_v42  ;;  %6213 = vmatprep.subr.bf16.mxu0 %v12987_v18  ;;  %v13053_v42 = vld [vmem:[%s17255_s5 + $0x1404] ss:$16 sps:$4 sm:$0xff]   ;;  %v13056_v18 = vld [vmem:[%s17255_s5 + $0x140c] ss:$16 sps:$4 sm:$0xff]  }
 0x3c4   :  { %6254 = vmatprep.subr.bf16.mxu1 %v12990_v43  ;;  %v13051_v43 = vld [vmem:[%s17255_s5 + $0x1400] ss:$16 sps:$4 sm:$0xff]  }
 0x3c6   :  { %6214 = vmatpush2.bf16.msra.mxu0 %v12985_v44  ;;  %v13054_v44 = vld [vmem:[%s17255_s5 + $0x1408] ss:$16 sps:$4 sm:$0xff]  }
 0x3c7   :  { %6255 = vmatpush2.bf16.msra.mxu1 %v12988_v46  ;;  %6215 = vmatprep.subr.bf16.mxu0 %v12993_v47  ;;  %v13059_v46 = vld [vmem:[%s17255_s5 + $0x15e4] ss:$16 sps:$4 sm:$0xff]   ;;  %v13062_v47 = vld [vmem:[%s17255_s5 + $0x15ec] ss:$16 sps:$4 sm:$0xff]  }
 0x3c8   :  { %6256 = vmatprep.subr.bf16.mxu1 %v12996_v49  ;;  %v13057_v49 = vld [vmem:[%s17255_s5 + $0x15e0] ss:$16 sps:$4 sm:$0xff]  }
 0x3ca   :  { %6216 = vmatpush2.bf16.msra.mxu0 %v12991_v23  ;;  %v13060_v23 = vld [vmem:[%s17255_s5 + $0x15e8] ss:$16 sps:$4 sm:$0xff]  }
 0x3cb   :  { %6257 = vmatpush2.bf16.msra.mxu1 %v12994_v52  ;;  %6217 = vmatprep.subr.bf16.mxu0 %v12999_v55  ;;  %v13065_v52 = vld [vmem:[%s17255_s5 + $0x15c4] ss:$16 sps:$4 sm:$0xff]   ;;  %v13068_v55 = vld [vmem:[%s17255_s5 + $0x15cc] ss:$16 sps:$4 sm:$0xff]  }
 0x3cc   :  { %6258 = vmatprep.subr.bf16.mxu1 %v13002_v56  ;;  %v13063_v56 = vld [vmem:[%s17255_s5 + $0x15c0] ss:$16 sps:$4 sm:$0xff]  }
 0x3ce   :  { %6218 = vmatpush2.bf16.msra.mxu0 %v12997_v31  ;;  %v13066_v31 = vld [vmem:[%s17255_s5 + $0x15c8] ss:$16 sps:$4 sm:$0xff]  }
 0x3cf   :  { %6259 = vmatpush2.bf16.msra.mxu1 %v13000_v8  ;;  %6219 = vmatprep.subr.bf16.mxu0 %v13005_v33  ;;  %v13071_v8 = vld [vmem:[%s17255_s5 + $0x15a4] ss:$16 sps:$4 sm:$0xff]   ;;  %v13074_v33 = vld [vmem:[%s17255_s5 + $0x15ac] ss:$16 sps:$4 sm:$0xff]  }
 0x3d0   :  { %6260 = vmatprep.subr.bf16.mxu1 %v13008_v29  ;;  %v13069_v29 = vld [vmem:[%s17255_s5 + $0x15a0] ss:$16 sps:$4 sm:$0xff]  }
 0x3d2   :  { %6220 = vmatpush2.bf16.msra.mxu0 %v13003_v9  ;;  %v13072_v9 = vld [vmem:[%s17255_s5 + $0x15a8] ss:$16 sps:$4 sm:$0xff]  }
 0x3d3   :  { %6261 = vmatpush2.bf16.msra.mxu1 %v13006_v10  ;;  %6664 = vmatprep.subr.bf16.mxu0 %v13011_v13  ;;  %v13077_v10 = vld [vmem:[%s17255_s5 + $0x1584] ss:$16 sps:$4 sm:$0xff]   ;;  %v13080_v13 = vld [vmem:[%s17255_s5 + $0x158c] ss:$16 sps:$4 sm:$0xff]  }
 0x3d4   :  { %6705 = vmatprep.subr.bf16.mxu1 %v13014_v11  ;;  %v13075_v11 = vld [vmem:[%s17255_s5 + $0x1580] ss:$16 sps:$4 sm:$0xff]  }
 0x3d5   :  { %v4800_v57 = vpop.f32.mrf.mxu0  ;;  %6222 = vmatmul.mubr.bf16.vlgmr.msra.gmra.mxu0 %v5865_v14 }
 0x3d6   :  { %v15909_v3 = vadd.f32 %v4800_v57, %v15702_v50  ;;  %v4841_v4 = vpop.f32.mrf.mxu1  ;;  %6263 = vmatmul.mubr.bf16.vlgmr.msra.gmra.mxu1 %v5865_v14  ;;  %6665 = vmatpush1.bf16.msra.mxu0 %v13009_v38  ;;  %v13023_v50 = vld [vmem:[%s17255_s5 + $0x14a4] ss:$16 sps:$4 sm:$0xff]   ;;  %v13078_v38 = vld [vmem:[%s17255_s5 + $0x1588] ss:$16 sps:$4 sm:$0xff]  }
 0x3d7   :  { %v15915_v45 = vadd.f32 %v4841_v4, %v15709_v24  ;;  %6696 = vmatprep.mubr.bf16.mxu0 %v6341_v60  ;;  %6706 = vmatpush1.bf16.msra.mxu1 %v13012_v53  ;;  %v4802_v17 = vpop.f32.mrf.mxu0  ;;  %v13026_v24 = vld [vmem:[%s17255_s5 + $0x14ac] ss:$16 sps:$4 sm:$0xff]   ;;  %v13083_v14 = vld [vmem:[%s17255_s5 + $0x1564] ss:$16 sps:$4 sm:$0xff]   ;;  %v13084_v57 = vld [vmem:[%s17255_s5 + $0x1568] ss:$16 sps:$4 sm:$0xff]  }
 0x3d8   :  { %6737 = vmatprep.mubr.bf16.mxu1 %v6341_v60  ;;  %v15924_v19 = vadd.f32 %v4802_v17, %v15718_v61  ;;  %v4843_v20 = vpop.f32.mrf.mxu1  ;;  %6666 = vmatprep.subr.bf16.mxu0 %v13017_v58  ;;  %v13086_v53 = vld [vmem:[%s17255_s5 + $0x156c] ss:$16 sps:$4 sm:$0xff]   ;;  %v13081_v58 = vld [vmem:[%s17255_s5 + $0x1560] ss:$16 sps:$4 sm:$0xff]   ;;  %v13089_v60 = vld [vmem:[%s17255_s5 + $0x1544] ss:$16 sps:$4 sm:$0xff]  }
 0x3d9   :  { %v15930_v21 = vadd.f32 %v4843_v20, %v15724_v5  ;;  %v4804_v51 = vpop.f32.mrf.mxu0  ;;  %6707 = vmatprep.subr.bf16.mxu1 %v13020_v0  ;;  %v13029_v5 = vld [vmem:[%s17255_s5 + $0x1484] ss:$16 sps:$4 sm:$0xff]   ;;  %v13092_v0 = vld [vmem:[%s17255_s5 + $0x154c] ss:$16 sps:$4 sm:$0xff]   ;;  %v13087_v4 = vld [vmem:[%s17255_s5 + $0x1540] ss:$16 sps:$4 sm:$0xff]  }
 0x3da   :  { %v4845_v22 = vpop.f32.mrf.mxu1  ;;  %6667 = vmatpush1.bf16.msra.mxu0 %v13015_v15  ;;  %v13090_v15 = vld [vmem:[%s17255_s5 + $0x1548] ss:$16 sps:$4 sm:$0xff]   ;;  %v13095_v17 = vld [vmem:[%s17255_s5 + $0x1524] ss:$16 sps:$4 sm:$0xff]   ;;  %v13104_v51 = vld [vmem:[%s17255_s5 + $0x150c] ss:$16 sps:$4 sm:$0xff]  }
 0x3db   :  { %6708 = vmatpush1.bf16.msra.mxu1 %v13018_v48  ;;  %v4805_v61 = vpop.f32.mrf.mxu0  ;;  %6668 = vmatprep.subr.bf16.mxu0 %v13023_v50  ;;  %v13098_v48 = vld [vmem:[%s17255_s5 + $0x152c] ss:$16 sps:$4 sm:$0xff]   ;;  %v13093_v50 = vld [vmem:[%s17255_s5 + $0x1520] ss:$16 sps:$4 sm:$0xff]   ;;  %v13096_v20 = vld [vmem:[%s17255_s5 + $0x1528] ss:$16 sps:$4 sm:$0xff]  }
 0x3dc   :  { %v4846_v26 = vpop.f32.mrf.mxu1  ;;  %6709 = vmatprep.subr.bf16.mxu1 %v13026_v24  ;;  %v13101_v24 = vld [vmem:[%s17255_s5 + $0x1504] ss:$16 sps:$4 sm:$0xff]   ;;  %v13099_v22 = vld [vmem:[%s17255_s5 + $0x1500] ss:$16 sps:$4 sm:$0xff]  }
 0x3dd   :  { %v13107_v61 = vld [vmem:[%s17255_s5 + $0x16e4] ss:$16 sps:$4 sm:$0xff]   ;;  %v6340_v26 = vrot.slane %v14097_v35, 2 }
 0x3de   :  { %6669 = vmatpush1.bf16.msra.mxu0 %v13021_v54  ;;  %v13102_v54 = vld [vmem:[%s17255_s5 + $0x1508] ss:$16 sps:$4 sm:$0xff]  }
 0x3df   :  { %6710 = vmatpush1.bf16.msra.mxu1 %v13024_v25  ;;  %6670 = vmatprep.subr.bf16.mxu0 %v13029_v5  ;;  %v13110_v25 = vld [vmem:[%s17255_s5 + $0x16ec] ss:$16 sps:$4 sm:$0xff]   ;;  %v13105_v5 = vld [vmem:[%s17255_s5 + $0x16e0] ss:$16 sps:$4 sm:$0xff]  }
 0x3e0   :  { %6711 = vmatprep.subr.bf16.mxu1 %v13032_v27  ;;  %v13108_v27 = vld [vmem:[%s17255_s5 + $0x16e8] ss:$16 sps:$4 sm:$0xff]  }
 0x3e2   :  { %6671 = vmatpush1.bf16.msra.mxu0 %v13027_v28  ;;  %v13113_v28 = vld [vmem:[%s17255_s5 + $0x16c4] ss:$16 sps:$4 sm:$0xff]  }
 0x3e3   :  { %6712 = vmatpush1.bf16.msra.mxu1 %v13030_v7  ;;  %6672 = vmatprep.subr.bf16.mxu0 %v13035_v30  ;;  %v6816_v30 = vrot.slane %v14101_v36, 3 }
 0x3e4   :  { %6713 = vmatprep.subr.bf16.mxu1 %v13038_v2  ;;  %v13116_v2 = vld [vmem:[%s17255_s5 + $0x16cc] ss:$16 sps:$4 sm:$0xff]  }
 0x3e6   :  { %6673 = vmatpush1.bf16.msra.mxu0 %v13033_v32 }
 0x3e7   :  { %6714 = vmatpush1.bf16.msra.mxu1 %v13036_v34  ;;  %6674 = vmatprep.subr.bf16.mxu0 %v13041_v12  ;;  %v13111_v12 = vld [vmem:[%s17255_s5 + $0x16c0] ss:$16 sps:$4 sm:$0xff]  }
 0x3e8   :  { %6715 = vmatprep.subr.bf16.mxu1 %v13044_v62 }
 0x3ea   :  { %6675 = vmatpush1.bf16.msra.mxu0 %v13039_v37 }
 0x3eb   :  { %6716 = vmatpush1.bf16.msra.mxu1 %v13042_v6  ;;  %6676 = vmatprep.subr.bf16.mxu0 %v13047_v39  ;;  %v13114_v6 = vld [vmem:[%s17255_s5 + $0x16c8] ss:$16 sps:$4 sm:$0xff]  }
 0x3ec   :  { %6717 = vmatprep.subr.bf16.mxu1 %v13050_v40 }
 0x3ee   :  { %6677 = vmatpush1.bf16.msra.mxu0 %v13045_v41 }
 0x3ef   :  { %6718 = vmatpush1.bf16.msra.mxu1 %v13048_v16  ;;  %6678 = vmatprep.subr.bf16.mxu0 %v13053_v42 }
 0x3f0   :  { %6719 = vmatprep.subr.bf16.mxu1 %v13056_v18  ;;  %v13117_v18 = vld [vmem:[%s17255_s5 + $0x16a0] ss:$16 sps:$4 sm:$0xff]  }
 0x3f2   :  { %6679 = vmatpush1.bf16.msra.mxu0 %v13051_v43  ;;  %v13120_v43 = vld [vmem:[%s17255_s5 + $0x16a8] ss:$16 sps:$4 sm:$0xff]  }
 0x3f3   :  { %6720 = vmatpush1.bf16.msra.mxu1 %v13054_v44  ;;  %6680 = vmatprep.subr.bf16.mxu0 %v13059_v46  ;;  %v13128_v46 = vld [vmem:[%s17255_s5 + $0x168c] ss:$16 sps:$4 sm:$0xff]  }
 0x3f4   :  { %6721 = vmatprep.subr.bf16.mxu1 %v13062_v47  ;;  %v13123_v47 = vld [vmem:[%s17255_s5 + $0x1680] ss:$16 sps:$4 sm:$0xff]  }
 0x3f6   :  { %6681 = vmatpush2.bf16.msra.mxu0 %v13057_v49  ;;  %v13126_v49 = vld [vmem:[%s17255_s5 + $0x1688] ss:$16 sps:$4 sm:$0xff]  }
 0x3f7   :  { %6722 = vmatpush2.bf16.msra.mxu1 %v13060_v23  ;;  %6682 = vmatprep.subr.bf16.mxu0 %v13065_v52  ;;  %v13131_v23 = vld [vmem:[%s17255_s5 + $0x1664] ss:$16 sps:$4 sm:$0xff]   ;;  %v13134_v52 = vld [vmem:[%s17255_s5 + $0x166c] ss:$16 sps:$4 sm:$0xff]  }
 0x3f8   :  { %6723 = vmatprep.subr.bf16.mxu1 %v13068_v55  ;;  %v13129_v55 = vld [vmem:[%s17255_s5 + $0x1660] ss:$16 sps:$4 sm:$0xff]  }
 0x3fa   :  { %6683 = vmatpush2.bf16.msra.mxu0 %v13063_v56  ;;  %v13132_v56 = vld [vmem:[%s17255_s5 + $0x1668] ss:$16 sps:$4 sm:$0xff]  }
 0x3fb   :  { %6724 = vmatpush2.bf16.msra.mxu1 %v13066_v31  ;;  %6684 = vmatprep.subr.bf16.mxu0 %v13071_v8  ;;  %v13137_v31 = vld [vmem:[%s17255_s5 + $0x1644] ss:$16 sps:$4 sm:$0xff]   ;;  %v13140_v8 = vld [vmem:[%s17255_s5 + $0x164c] ss:$16 sps:$4 sm:$0xff]  }
 0x3fc   :  { %6725 = vmatprep.subr.bf16.mxu1 %v13074_v33  ;;  %v13135_v33 = vld [vmem:[%s17255_s5 + $0x1640] ss:$16 sps:$4 sm:$0xff]  }
 0x3fe   :  { %6685 = vmatpush2.bf16.msra.mxu0 %v13069_v29  ;;  %v13138_v29 = vld [vmem:[%s17255_s5 + $0x1648] ss:$16 sps:$4 sm:$0xff]  }
 0x3ff   :  { %6726 = vmatpush2.bf16.msra.mxu1 %v13072_v9  ;;  %6686 = vmatprep.subr.bf16.mxu0 %v13077_v10  ;;  %v13143_v9 = vld [vmem:[%s17255_s5 + $0x1624] ss:$16 sps:$4 sm:$0xff]   ;;  %v13146_v10 = vld [vmem:[%s17255_s5 + $0x162c] ss:$16 sps:$4 sm:$0xff]  }
 0x400   :  { %6727 = vmatprep.subr.bf16.mxu1 %v13080_v13  ;;  %v13141_v13 = vld [vmem:[%s17255_s5 + $0x1620] ss:$16 sps:$4 sm:$0xff]  }
 0x402   :  { %6687 = vmatpush2.bf16.msra.mxu0 %v13075_v11  ;;  %v13144_v11 = vld [vmem:[%s17255_s5 + $0x1628] ss:$16 sps:$4 sm:$0xff]  }
 0x403   :  { %6728 = vmatpush2.bf16.msra.mxu1 %v13078_v38  ;;  %6688 = vmatprep.subr.bf16.mxu0 %v13083_v14  ;;  %v13149_v38 = vld [vmem:[%s17255_s5 + $0x1604] ss:$16 sps:$4 sm:$0xff]   ;;  %v13152_v14 = vld [vmem:[%s17255_s5 + $0x160c] ss:$16 sps:$4 sm:$0xff]  }
 0x404   :  { %6729 = vmatprep.subr.bf16.mxu1 %v13086_v53  ;;  %v13147_v53 = vld [vmem:[%s17255_s5 + $0x1600] ss:$16 sps:$4 sm:$0xff]  }
 0x406   :  { %6689 = vmatpush2.bf16.msra.mxu0 %v13081_v58  ;;  %v13150_v58 = vld [vmem:[%s17255_s5 + $0x1608] ss:$16 sps:$4 sm:$0xff]  }
 0x407   :  { %6730 = vmatpush2.bf16.msra.mxu1 %v13084_v57  ;;  %6690 = vmatprep.subr.bf16.mxu0 %v13089_v60  ;;  %v13155_v57 = vld [vmem:[%s17255_s5 + $0x17e4] ss:$16 sps:$4 sm:$0xff]   ;;  %v13158_v60 = vld [vmem:[%s17255_s5 + $0x17ec] ss:$16 sps:$4 sm:$0xff]  }
 0x408   :  { %6731 = vmatprep.subr.bf16.mxu1 %v13092_v0  ;;  %v13153_v0 = vld [vmem:[%s17255_s5 + $0x17e0] ss:$16 sps:$4 sm:$0xff]  }
 0x40a   :  { %6691 = vmatpush2.bf16.msra.mxu0 %v13087_v4  ;;  %v13156_v4 = vld [vmem:[%s17255_s5 + $0x17e8] ss:$16 sps:$4 sm:$0xff]  }
 0x40b   :  { %6732 = vmatpush2.bf16.msra.mxu1 %v13090_v15  ;;  %6692 = vmatprep.subr.bf16.mxu0 %v13095_v17  ;;  %v13161_v15 = vld [vmem:[%s17255_s5 + $0x17c4] ss:$16 sps:$4 sm:$0xff]   ;;  %v13164_v17 = vld [vmem:[%s17255_s5 + $0x17cc] ss:$16 sps:$4 sm:$0xff]  }
 0x40c   :  { %6733 = vmatprep.subr.bf16.mxu1 %v13098_v48  ;;  %v13159_v48 = vld [vmem:[%s17255_s5 + $0x17c0] ss:$16 sps:$4 sm:$0xff]  }
 0x40e   :  { %6693 = vmatpush2.bf16.msra.mxu0 %v13093_v50  ;;  %v13162_v50 = vld [vmem:[%s17255_s5 + $0x17c8] ss:$16 sps:$4 sm:$0xff]  }
 0x40f   :  { %6734 = vmatpush2.bf16.msra.mxu1 %v13096_v20  ;;  %6694 = vmatprep.subr.bf16.mxu0 %v13101_v24  ;;  %v13167_v20 = vld [vmem:[%s17255_s5 + $0x17a4] ss:$16 sps:$4 sm:$0xff]   ;;  %v13170_v24 = vld [vmem:[%s17255_s5 + $0x17ac] ss:$16 sps:$4 sm:$0xff]  }
 0x410   :  { %6735 = vmatprep.subr.bf16.mxu1 %v13104_v51  ;;  %v13165_v51 = vld [vmem:[%s17255_s5 + $0x17a0] ss:$16 sps:$4 sm:$0xff]  }
 0x412   :  { %6695 = vmatpush2.bf16.msra.mxu0 %v13099_v22  ;;  %v13168_v22 = vld [vmem:[%s17255_s5 + $0x17a8] ss:$16 sps:$4 sm:$0xff]  }
 0x413   :  { %6736 = vmatpush2.bf16.msra.mxu1 %v13102_v54  ;;  %7139 = vmatprep.subr.bf16.mxu0 %v13107_v61  ;;  %v13173_v54 = vld [vmem:[%s17255_s5 + $0x1784] ss:$16 sps:$4 sm:$0xff]   ;;  %v13176_v61 = vld [vmem:[%s17255_s5 + $0x178c] ss:$16 sps:$4 sm:$0xff]  }
 0x414   :  { %7180 = vmatprep.subr.bf16.mxu1 %v13110_v25  ;;  %v13171_v25 = vld [vmem:[%s17255_s5 + $0x1780] ss:$16 sps:$4 sm:$0xff]  }
 0x415   :  { %v5275_v7 = vpop.f32.mrf.mxu0  ;;  %6697 = vmatmul.mubr.bf16.vlgmr.msra.gmra.mxu0 %v6340_v26 }
 0x416   :  { %v16115_v32 = vadd.f32 %v5275_v7, %v15909_v3  ;;  %v5316_v34 = vpop.f32.mrf.mxu1  ;;  %6738 = vmatmul.mubr.bf16.vlgmr.msra.gmra.mxu1 %v6340_v26  ;;  %7140 = vmatpush1.bf16.msra.mxu0 %v13105_v5  ;;  %v13119_v3 = vld [vmem:[%s17255_s5 + $0x16a4] ss:$16 sps:$4 sm:$0xff]   ;;  %v13174_v5 = vld [vmem:[%s17255_s5 + $0x1788] ss:$16 sps:$4 sm:$0xff]  }
 0x417   :  { %v16121_v62 = vadd.f32 %v5316_v34, %v15915_v45  ;;  %7171 = vmatprep.mubr.bf16.mxu0 %v6816_v30  ;;  %7181 = vmatpush1.bf16.msra.mxu1 %v13108_v27  ;;  %v5277_v37 = vpop.f32.mrf.mxu0  ;;  %v13122_v45 = vld [vmem:[%s17255_s5 + $0x16ac] ss:$16 sps:$4 sm:$0xff]   ;;  %v13179_v26 = vld [vmem:[%s17255_s5 + $0x1764] ss:$16 sps:$4 sm:$0xff]   ;;  %v13180_v7 = vld [vmem:[%s17255_s5 + $0x1768] ss:$16 sps:$4 sm:$0xff]  }
 0x418   :  { %7212 = vmatprep.mubr.bf16.mxu1 %v6816_v30  ;;  %v16130_v39 = vadd.f32 %v5277_v37, %v15924_v19  ;;  %v5318_v40 = vpop.f32.mrf.mxu1  ;;  %7141 = vmatprep.subr.bf16.mxu0 %v13113_v28  ;;  %v13182_v27 = vld [vmem:[%s17255_s5 + $0x176c] ss:$16 sps:$4 sm:$0xff]   ;;  %v13177_v28 = vld [vmem:[%s17255_s5 + $0x1760] ss:$16 sps:$4 sm:$0xff]   ;;  %v13185_v30 = vld [vmem:[%s17255_s5 + $0x1744] ss:$16 sps:$4 sm:$0xff]  }
 0x419   :  { %v16136_v41 = vadd.f32 %v5318_v40, %v15930_v21  ;;  %v5279_v16 = vpop.f32.mrf.mxu0  ;;  %7182 = vmatprep.subr.bf16.mxu1 %v13116_v2  ;;  %v13125_v21 = vld [vmem:[%s17255_s5 + $0x1684] ss:$16 sps:$4 sm:$0xff]   ;;  %v13188_v2 = vld [vmem:[%s17255_s5 + $0x174c] ss:$16 sps:$4 sm:$0xff]   ;;  %v13183_v34 = vld [vmem:[%s17255_s5 + $0x1740] ss:$16 sps:$4 sm:$0xff]  }
 0x41a   :  { %v5320_v42 = vpop.f32.mrf.mxu1  ;;  %7142 = vmatpush1.bf16.msra.mxu0 %v13111_v12  ;;  %v13186_v12 = vld [vmem:[%s17255_s5 + $0x1748] ss:$16 sps:$4 sm:$0xff]   ;;  %v13191_v37 = vld [vmem:[%s17255_s5 + $0x1724] ss:$16 sps:$4 sm:$0xff]   ;;  %v13200_v16 = vld [vmem:[%s17255_s5 + $0x170c] ss:$16 sps:$4 sm:$0xff]  }
 0x41b   :  { %7183 = vmatpush1.bf16.msra.mxu1 %v13114_v6  ;;  %v5280_v19 = vpop.f32.mrf.mxu0  ;;  %7143 = vmatprep.subr.bf16.mxu0 %v13119_v3  ;;  %v13194_v6 = vld [vmem:[%s17255_s5 + $0x172c] ss:$16 sps:$4 sm:$0xff]   ;;  %v13189_v3 = vld [vmem:[%s17255_s5 + $0x1720] ss:$16 sps:$4 sm:$0xff]   ;;  %v13192_v40 = vld [vmem:[%s17255_s5 + $0x1728] ss:$16 sps:$4 sm:$0xff]  }
 0x41c   :  { %v5321_v44 = vpop.f32.mrf.mxu1  ;;  %7184 = vmatprep.subr.bf16.mxu1 %v13122_v45  ;;  %v13197_v45 = vld [vmem:[%s17255_s5 + $0x1704] ss:$16 sps:$4 sm:$0xff]   ;;  %v13195_v42 = vld [vmem:[%s17255_s5 + $0x1700] ss:$16 sps:$4 sm:$0xff]  }
 0x41d   :  { %v13203_v19 = vld [vmem:[%s17255_s5 + $0x18e4] ss:$16 sps:$4 sm:$0xff]   ;;  %v6815_v44 = vrot.slane %v14097_v35, 3 }
 0x41e   :  { %7144 = vmatpush1.bf16.msra.mxu0 %v13117_v18  ;;  %v13198_v18 = vld [vmem:[%s17255_s5 + $0x1708] ss:$16 sps:$4 sm:$0xff]  }
 0x41f   :  { %7185 = vmatpush1.bf16.msra.mxu1 %v13120_v43  ;;  %7145 = vmatprep.subr.bf16.mxu0 %v13125_v21  ;;  %v13206_v43 = vld [vmem:[%s17255_s5 + $0x18ec] ss:$16 sps:$4 sm:$0xff]   ;;  %v13201_v21 = vld [vmem:[%s17255_s5 + $0x18e0] ss:$16 sps:$4 sm:$0xff]  }
 0x420   :  { %7186 = vmatprep.subr.bf16.mxu1 %v13128_v46  ;;  %v13204_v46 = vld [vmem:[%s17255_s5 + $0x18e8] ss:$16 sps:$4 sm:$0xff]  }
 0x422   :  { %7146 = vmatpush1.bf16.msra.mxu0 %v13123_v47  ;;  %v13209_v47 = vld [vmem:[%s17255_s5 + $0x18c4] ss:$16 sps:$4 sm:$0xff]  }
 0x423   :  { %7187 = vmatpush1.bf16.msra.mxu1 %v13126_v49  ;;  %7147 = vmatprep.subr.bf16.mxu0 %v13131_v23  ;;  %v7291_v23 = vrot.slane %v14101_v36, 4 }
 0x424   :  { %7188 = vmatprep.subr.bf16.mxu1 %v13134_v52  ;;  %v13212_v52 = vld [vmem:[%s17255_s5 + $0x18cc] ss:$16 sps:$4 sm:$0xff]  }
 0x426   :  { %7148 = vmatpush1.bf16.msra.mxu0 %v13129_v55 }
 0x427   :  { %7189 = vmatpush1.bf16.msra.mxu1 %v13132_v56  ;;  %7149 = vmatprep.subr.bf16.mxu0 %v13137_v31  ;;  %v13207_v31 = vld [vmem:[%s17255_s5 + $0x18c0] ss:$16 sps:$4 sm:$0xff]  }
 0x428   :  { %7190 = vmatprep.subr.bf16.mxu1 %v13140_v8 }
 0x42a   :  { %7150 = vmatpush1.bf16.msra.mxu0 %v13135_v33 }
 0x42b   :  { %7191 = vmatpush1.bf16.msra.mxu1 %v13138_v29  ;;  %7151 = vmatprep.subr.bf16.mxu0 %v13143_v9  ;;  %v13210_v29 = vld [vmem:[%s17255_s5 + $0x18c8] ss:$16 sps:$4 sm:$0xff]  }
 0x42c   :  { %7192 = vmatprep.subr.bf16.mxu1 %v13146_v10 }
 0x42e   :  { %7152 = vmatpush1.bf16.msra.mxu0 %v13141_v13 }
 0x42f   :  { %7193 = vmatpush1.bf16.msra.mxu1 %v13144_v11  ;;  %7153 = vmatprep.subr.bf16.mxu0 %v13149_v38 }
 0x430   :  { %7194 = vmatprep.subr.bf16.mxu1 %v13152_v14  ;;  %v13213_v14 = vld [vmem:[%s17255_s5 + $0x18a0] ss:$16 sps:$4 sm:$0xff]  }
 0x432   :  { %7154 = vmatpush1.bf16.msra.mxu0 %v13147_v53  ;;  %v13216_v53 = vld [vmem:[%s17255_s5 + $0x18a8] ss:$16 sps:$4 sm:$0xff]  }
 0x433   :  { %7195 = vmatpush1.bf16.msra.mxu1 %v13150_v58  ;;  %7155 = vmatprep.subr.bf16.mxu0 %v13155_v57  ;;  %v13224_v57 = vld [vmem:[%s17255_s5 + $0x188c] ss:$16 sps:$4 sm:$0xff]  }
 0x434   :  { %7196 = vmatprep.subr.bf16.mxu1 %v13158_v60  ;;  %v13219_v60 = vld [vmem:[%s17255_s5 + $0x1880] ss:$16 sps:$4 sm:$0xff]  }
 0x436   :  { %7156 = vmatpush2.bf16.msra.mxu0 %v13153_v0  ;;  %v13222_v0 = vld [vmem:[%s17255_s5 + $0x1888] ss:$16 sps:$4 sm:$0xff]  }
 0x437   :  { %7197 = vmatpush2.bf16.msra.mxu1 %v13156_v4  ;;  %7157 = vmatprep.subr.bf16.mxu0 %v13161_v15  ;;  %v13227_v4 = vld [vmem:[%s17255_s5 + $0x1864] ss:$16 sps:$4 sm:$0xff]   ;;  %v13230_v15 = vld [vmem:[%s17255_s5 + $0x186c] ss:$16 sps:$4 sm:$0xff]  }
 0x438   :  { %7198 = vmatprep.subr.bf16.mxu1 %v13164_v17  ;;  %v13225_v17 = vld [vmem:[%s17255_s5 + $0x1860] ss:$16 sps:$4 sm:$0xff]  }
 0x43a   :  { %7158 = vmatpush2.bf16.msra.mxu0 %v13159_v48  ;;  %v13228_v48 = vld [vmem:[%s17255_s5 + $0x1868] ss:$16 sps:$4 sm:$0xff]  }
 0x43b   :  { %7199 = vmatpush2.bf16.msra.mxu1 %v13162_v50  ;;  %7159 = vmatprep.subr.bf16.mxu0 %v13167_v20  ;;  %v13233_v50 = vld [vmem:[%s17255_s5 + $0x1844] ss:$16 sps:$4 sm:$0xff]   ;;  %v13236_v20 = vld [vmem:[%s17255_s5 + $0x184c] ss:$16 sps:$4 sm:$0xff]  }
 0x43c   :  { %7200 = vmatprep.subr.bf16.mxu1 %v13170_v24  ;;  %v13231_v24 = vld [vmem:[%s17255_s5 + $0x1840] ss:$16 sps:$4 sm:$0xff]  }
 0x43e   :  { %7160 = vmatpush2.bf16.msra.mxu0 %v13165_v51  ;;  %v13234_v51 = vld [vmem:[%s17255_s5 + $0x1848] ss:$16 sps:$4 sm:$0xff]  }
 0x43f   :  { %7201 = vmatpush2.bf16.msra.mxu1 %v13168_v22  ;;  %7161 = vmatprep.subr.bf16.mxu0 %v13173_v54  ;;  %v13239_v22 = vld [vmem:[%s17255_s5 + $0x1824] ss:$16 sps:$4 sm:$0xff]   ;;  %v13242_v54 = vld [vmem:[%s17255_s5 + $0x182c] ss:$16 sps:$4 sm:$0xff]  }
 0x440   :  { %7202 = vmatprep.subr.bf16.mxu1 %v13176_v61  ;;  %v13237_v61 = vld [vmem:[%s17255_s5 + $0x1820] ss:$16 sps:$4 sm:$0xff]  }
 0x442   :  { %7162 = vmatpush2.bf16.msra.mxu0 %v13171_v25  ;;  %v13240_v25 = vld [vmem:[%s17255_s5 + $0x1828] ss:$16 sps:$4 sm:$0xff]  }
 0x443   :  { %7203 = vmatpush2.bf16.msra.mxu1 %v13174_v5  ;;  %7163 = vmatprep.subr.bf16.mxu0 %v13179_v26  ;;  %v13245_v5 = vld [vmem:[%s17255_s5 + $0x1804] ss:$16 sps:$4 sm:$0xff]   ;;  %v13248_v26 = vld [vmem:[%s17255_s5 + $0x180c] ss:$16 sps:$4 sm:$0xff]  }
 0x444   :  { %7204 = vmatprep.subr.bf16.mxu1 %v13182_v27  ;;  %v13243_v27 = vld [vmem:[%s17255_s5 + $0x1800] ss:$16 sps:$4 sm:$0xff]  }
 0x446   :  { %7164 = vmatpush2.bf16.msra.mxu0 %v13177_v28  ;;  %v13246_v28 = vld [vmem:[%s17255_s5 + $0x1808] ss:$16 sps:$4 sm:$0xff]  }
 0x447   :  { %7205 = vmatpush2.bf16.msra.mxu1 %v13180_v7  ;;  %7165 = vmatprep.subr.bf16.mxu0 %v13185_v30  ;;  %v13251_v7 = vld [vmem:[%s17255_s5 + $0x19e4] ss:$16 sps:$4 sm:$0xff]   ;;  %v13254_v30 = vld [vmem:[%s17255_s5 + $0x19ec] ss:$16 sps:$4 sm:$0xff]  }
 0x448   :  { %7206 = vmatprep.subr.bf16.mxu1 %v13188_v2  ;;  %v13249_v2 = vld [vmem:[%s17255_s5 + $0x19e0] ss:$16 sps:$4 sm:$0xff]  }
 0x44a   :  { %7166 = vmatpush2.bf16.msra.mxu0 %v13183_v34  ;;  %v13252_v34 = vld [vmem:[%s17255_s5 + $0x19e8] ss:$16 sps:$4 sm:$0xff]  }
 0x44b   :  { %7207 = vmatpush2.bf16.msra.mxu1 %v13186_v12  ;;  %7167 = vmatprep.subr.bf16.mxu0 %v13191_v37  ;;  %v13257_v12 = vld [vmem:[%s17255_s5 + $0x19c4] ss:$16 sps:$4 sm:$0xff]   ;;  %v13260_v37 = vld [vmem:[%s17255_s5 + $0x19cc] ss:$16 sps:$4 sm:$0xff]  }
 0x44c   :  { %7208 = vmatprep.subr.bf16.mxu1 %v13194_v6  ;;  %v13255_v6 = vld [vmem:[%s17255_s5 + $0x19c0] ss:$16 sps:$4 sm:$0xff]  }
 0x44e   :  { %7168 = vmatpush2.bf16.msra.mxu0 %v13189_v3  ;;  %v13258_v3 = vld [vmem:[%s17255_s5 + $0x19c8] ss:$16 sps:$4 sm:$0xff]  }
 0x44f   :  { %7209 = vmatpush2.bf16.msra.mxu1 %v13192_v40  ;;  %7169 = vmatprep.subr.bf16.mxu0 %v13197_v45  ;;  %v13263_v40 = vld [vmem:[%s17255_s5 + $0x19a4] ss:$16 sps:$4 sm:$0xff]   ;;  %v13266_v45 = vld [vmem:[%s17255_s5 + $0x19ac] ss:$16 sps:$4 sm:$0xff]  }
 0x450   :  { %7210 = vmatprep.subr.bf16.mxu1 %v13200_v16  ;;  %v13261_v16 = vld [vmem:[%s17255_s5 + $0x19a0] ss:$16 sps:$4 sm:$0xff]  }
 0x452   :  { %7170 = vmatpush2.bf16.msra.mxu0 %v13195_v42  ;;  %v13264_v42 = vld [vmem:[%s17255_s5 + $0x19a8] ss:$16 sps:$4 sm:$0xff]  }
 0x453   :  { %7211 = vmatpush2.bf16.msra.mxu1 %v13198_v18  ;;  %7614 = vmatprep.subr.bf16.mxu0 %v13203_v19  ;;  %v13269_v18 = vld [vmem:[%s17255_s5 + $0x1984] ss:$16 sps:$4 sm:$0xff]   ;;  %v13272_v19 = vld [vmem:[%s17255_s5 + $0x198c] ss:$16 sps:$4 sm:$0xff]  }
 0x454   :  { %7655 = vmatprep.subr.bf16.mxu1 %v13206_v43  ;;  %v13267_v43 = vld [vmem:[%s17255_s5 + $0x1980] ss:$16 sps:$4 sm:$0xff]  }
 0x455   :  { %v5746_v49 = vpop.f32.mrf.mxu0  ;;  %7172 = vmatmul.mubr.bf16.vlgmr.msra.gmra.mxu0 %v6815_v44 }
 0x456   :  { %v16321_v55 = vadd.f32 %v5746_v49, %v16115_v32  ;;  %v5787_v56 = vpop.f32.mrf.mxu1  ;;  %7213 = vmatmul.mubr.bf16.vlgmr.msra.gmra.mxu1 %v6815_v44  ;;  %7615 = vmatpush1.bf16.msra.mxu0 %v13201_v21  ;;  %v13215_v32 = vld [vmem:[%s17255_s5 + $0x18a4] ss:$16 sps:$4 sm:$0xff]   ;;  %v13270_v21 = vld [vmem:[%s17255_s5 + $0x1988] ss:$16 sps:$4 sm:$0xff]  }
 0x457   :  { %v16327_v8 = vadd.f32 %v5787_v56, %v16121_v62  ;;  %7646 = vmatprep.mubr.bf16.mxu0 %v7291_v23  ;;  %7656 = vmatpush1.bf16.msra.mxu1 %v13204_v46  ;;  %v5748_v33 = vpop.f32.mrf.mxu0  ;;  %v13218_v62 = vld [vmem:[%s17255_s5 + $0x18ac] ss:$16 sps:$4 sm:$0xff]   ;;  %v13275_v44 = vld [vmem:[%s17255_s5 + $0x1964] ss:$16 sps:$4 sm:$0xff]   ;;  %v13276_v49 = vld [vmem:[%s17255_s5 + $0x1968] ss:$16 sps:$4 sm:$0xff]  }
 0x458   :  { %7687 = vmatprep.mubr.bf16.mxu1 %v7291_v23  ;;  %v16336_v9 = vadd.f32 %v5748_v33, %v16130_v39  ;;  %v5789_v10 = vpop.f32.mrf.mxu1  ;;  %7616 = vmatprep.subr.bf16.mxu0 %v13209_v47  ;;  %v13278_v46 = vld [vmem:[%s17255_s5 + $0x196c] ss:$16 sps:$4 sm:$0xff]   ;;  %v13273_v47 = vld [vmem:[%s17255_s5 + $0x1960] ss:$16 sps:$4 sm:$0xff]   ;;  %v13281_v23 = vld [vmem:[%s17255_s5 + $0x1944] ss:$16 sps:$4 sm:$0xff]  }
 0x459   :  { %v16342_v13 = vadd.f32 %v5789_v10, %v16136_v41  ;;  %v5750_v11 = vpop.f32.mrf.mxu0  ;;  %7657 = vmatprep.subr.bf16.mxu1 %v13212_v52  ;;  %v13221_v41 = vld [vmem:[%s17255_s5 + $0x1884] ss:$16 sps:$4 sm:$0xff]   ;;  %v13284_v52 = vld [vmem:[%s17255_s5 + $0x194c] ss:$16 sps:$4 sm:$0xff]   ;;  %v13279_v56 = vld [vmem:[%s17255_s5 + $0x1940] ss:$16 sps:$4 sm:$0xff]  }
 0x45a   :  { %v5791_v38 = vpop.f32.mrf.mxu1  ;;  %7617 = vmatpush1.bf16.msra.mxu0 %v13207_v31  ;;  %v13282_v31 = vld [vmem:[%s17255_s5 + $0x1948] ss:$16 sps:$4 sm:$0xff]   ;;  %v13287_v33 = vld [vmem:[%s17255_s5 + $0x1924] ss:$16 sps:$4 sm:$0xff]   ;;  %v13296_v11 = vld [vmem:[%s17255_s5 + $0x190c] ss:$16 sps:$4 sm:$0xff]  }
 0x45b   :  { %7658 = vmatpush1.bf16.msra.mxu1 %v13210_v29  ;;  %v5751_v39 = vpop.f32.mrf.mxu0  ;;  %7618 = vmatprep.subr.bf16.mxu0 %v13215_v32  ;;  %v13290_v29 = vld [vmem:[%s17255_s5 + $0x192c] ss:$16 sps:$4 sm:$0xff]   ;;  %v13285_v32 = vld [vmem:[%s17255_s5 + $0x1920] ss:$16 sps:$4 sm:$0xff]   ;;  %v13288_v10 = vld [vmem:[%s17255_s5 + $0x1928] ss:$16 sps:$4 sm:$0xff]  }
 0x45c   :  { %v5792_v58 = vpop.f32.mrf.mxu1  ;;  %7659 = vmatprep.subr.bf16.mxu1 %v13218_v62  ;;  %v13293_v62 = vld [vmem:[%s17255_s5 + $0x1904] ss:$16 sps:$4 sm:$0xff]   ;;  %v13291_v38 = vld [vmem:[%s17255_s5 + $0x1900] ss:$16 sps:$4 sm:$0xff]  }
 0x45d   :  { %v13299_v39 = vld [vmem:[%s17255_s5 + $0x1ae4] ss:$16 sps:$4 sm:$0xff]   ;;  %v7290_v58 = vrot.slane %v14097_v35, 4 }
 0x45e   :  { %7619 = vmatpush1.bf16.msra.mxu0 %v13213_v14  ;;  %v13294_v14 = vld [vmem:[%s17255_s5 + $0x1908] ss:$16 sps:$4 sm:$0xff]  }
 0x45f   :  { %7660 = vmatpush1.bf16.msra.mxu1 %v13216_v53  ;;  %7620 = vmatprep.subr.bf16.mxu0 %v13221_v41  ;;  %v13302_v53 = vld [vmem:[%s17255_s5 + $0x1aec] ss:$16 sps:$4 sm:$0xff]   ;;  %v13297_v41 = vld [vmem:[%s17255_s5 + $0x1ae0] ss:$16 sps:$4 sm:$0xff]  }
 0x460   :  { %7661 = vmatprep.subr.bf16.mxu1 %v13224_v57  ;;  %v13300_v57 = vld [vmem:[%s17255_s5 + $0x1ae8] ss:$16 sps:$4 sm:$0xff]  }
 0x462   :  { %7621 = vmatpush1.bf16.msra.mxu0 %v13219_v60  ;;  %v13305_v60 = vld [vmem:[%s17255_s5 + $0x1ac4] ss:$16 sps:$4 sm:$0xff]  }
 0x463   :  { %7662 = vmatpush1.bf16.msra.mxu1 %v13222_v0  ;;  %7622 = vmatprep.subr.bf16.mxu0 %v13227_v4  ;;  %v7766_v4 = vrot.slane %v14101_v36, 5 }
 0x464   :  { %7663 = vmatprep.subr.bf16.mxu1 %v13230_v15  ;;  %v13308_v15 = vld [vmem:[%s17255_s5 + $0x1acc] ss:$16 sps:$4 sm:$0xff]  }
 0x466   :  { %7623 = vmatpush1.bf16.msra.mxu0 %v13225_v17 }
 0x467   :  { %7664 = vmatpush1.bf16.msra.mxu1 %v13228_v48  ;;  %7624 = vmatprep.subr.bf16.mxu0 %v13233_v50  ;;  %v13303_v50 = vld [vmem:[%s17255_s5 + $0x1ac0] ss:$16 sps:$4 sm:$0xff]  }
 0x468   :  { %7665 = vmatprep.subr.bf16.mxu1 %v13236_v20 }
 0x46a   :  { %7625 = vmatpush1.bf16.msra.mxu0 %v13231_v24 }
 0x46b   :  { %7666 = vmatpush1.bf16.msra.mxu1 %v13234_v51  ;;  %7626 = vmatprep.subr.bf16.mxu0 %v13239_v22  ;;  %v13306_v51 = vld [vmem:[%s17255_s5 + $0x1ac8] ss:$16 sps:$4 sm:$0xff]  }
 0x46c   :  { %7667 = vmatprep.subr.bf16.mxu1 %v13242_v54 }
 0x46e   :  { %7627 = vmatpush1.bf16.msra.mxu0 %v13237_v61 }
 0x46f   :  { %7668 = vmatpush1.bf16.msra.mxu1 %v13240_v25  ;;  %7628 = vmatprep.subr.bf16.mxu0 %v13245_v5 }
 0x470   :  { %7669 = vmatprep.subr.bf16.mxu1 %v13248_v26  ;;  %v13309_v26 = vld [vmem:[%s17255_s5 + $0x1aa0] ss:$16 sps:$4 sm:$0xff]  }
 0x472   :  { %7629 = vmatpush1.bf16.msra.mxu0 %v13243_v27  ;;  %v13312_v27 = vld [vmem:[%s17255_s5 + $0x1aa8] ss:$16 sps:$4 sm:$0xff]  }
 0x473   :  { %7670 = vmatpush1.bf16.msra.mxu1 %v13246_v28  ;;  %7630 = vmatprep.subr.bf16.mxu0 %v13251_v7  ;;  %v13320_v7 = vld [vmem:[%s17255_s5 + $0x1a8c] ss:$16 sps:$4 sm:$0xff]  }
 0x474   :  { %7671 = vmatprep.subr.bf16.mxu1 %v13254_v30  ;;  %v13315_v30 = vld [vmem:[%s17255_s5 + $0x1a80] ss:$16 sps:$4 sm:$0xff]  }
 0x476   :  { %7631 = vmatpush2.bf16.msra.mxu0 %v13249_v2  ;;  %v13318_v2 = vld [vmem:[%s17255_s5 + $0x1a88] ss:$16 sps:$4 sm:$0xff]  }
 0x477   :  { %7672 = vmatpush2.bf16.msra.mxu1 %v13252_v34  ;;  %7632 = vmatprep.subr.bf16.mxu0 %v13257_v12  ;;  %v13323_v34 = vld [vmem:[%s17255_s5 + $0x1a64] ss:$16 sps:$4 sm:$0xff]   ;;  %v13326_v12 = vld [vmem:[%s17255_s5 + $0x1a6c] ss:$16 sps:$4 sm:$0xff]  }
 0x478   :  { %7673 = vmatprep.subr.bf16.mxu1 %v13260_v37  ;;  %v13321_v37 = vld [vmem:[%s17255_s5 + $0x1a60] ss:$16 sps:$4 sm:$0xff]  }
 0x47a   :  { %7633 = vmatpush2.bf16.msra.mxu0 %v13255_v6  ;;  %v13324_v6 = vld [vmem:[%s17255_s5 + $0x1a68] ss:$16 sps:$4 sm:$0xff]  }
 0x47b   :  { %7674 = vmatpush2.bf16.msra.mxu1 %v13258_v3  ;;  %7634 = vmatprep.subr.bf16.mxu0 %v13263_v40  ;;  %v13329_v3 = vld [vmem:[%s17255_s5 + $0x1a44] ss:$16 sps:$4 sm:$0xff]   ;;  %v13332_v40 = vld [vmem:[%s17255_s5 + $0x1a4c] ss:$16 sps:$4 sm:$0xff]  }
 0x47c   :  { %7675 = vmatprep.subr.bf16.mxu1 %v13266_v45  ;;  %v13327_v45 = vld [vmem:[%s17255_s5 + $0x1a40] ss:$16 sps:$4 sm:$0xff]  }
 0x47e   :  { %7635 = vmatpush2.bf16.msra.mxu0 %v13261_v16  ;;  %v13330_v16 = vld [vmem:[%s17255_s5 + $0x1a48] ss:$16 sps:$4 sm:$0xff]  }
 0x47f   :  { %7676 = vmatpush2.bf16.msra.mxu1 %v13264_v42  ;;  %7636 = vmatprep.subr.bf16.mxu0 %v13269_v18  ;;  %v13335_v42 = vld [vmem:[%s17255_s5 + $0x1a24] ss:$16 sps:$4 sm:$0xff]   ;;  %v13338_v18 = vld [vmem:[%s17255_s5 + $0x1a2c] ss:$16 sps:$4 sm:$0xff]  }
 0x480   :  { %7677 = vmatprep.subr.bf16.mxu1 %v13272_v19  ;;  %v13333_v19 = vld [vmem:[%s17255_s5 + $0x1a20] ss:$16 sps:$4 sm:$0xff]  }
 0x482   :  { %7637 = vmatpush2.bf16.msra.mxu0 %v13267_v43  ;;  %v13336_v43 = vld [vmem:[%s17255_s5 + $0x1a28] ss:$16 sps:$4 sm:$0xff]  }
 0x483   :  { %7678 = vmatpush2.bf16.msra.mxu1 %v13270_v21  ;;  %7638 = vmatprep.subr.bf16.mxu0 %v13275_v44  ;;  %v13341_v21 = vld [vmem:[%s17255_s5 + $0x1a04] ss:$16 sps:$4 sm:$0xff]   ;;  %v13344_v44 = vld [vmem:[%s17255_s5 + $0x1a0c] ss:$16 sps:$4 sm:$0xff]  }
 0x484   :  { %7679 = vmatprep.subr.bf16.mxu1 %v13278_v46  ;;  %v13339_v46 = vld [vmem:[%s17255_s5 + $0x1a00] ss:$16 sps:$4 sm:$0xff]  }
 0x486   :  { %7639 = vmatpush2.bf16.msra.mxu0 %v13273_v47  ;;  %v13342_v47 = vld [vmem:[%s17255_s5 + $0x1a08] ss:$16 sps:$4 sm:$0xff]  }
 0x487   :  { %7680 = vmatpush2.bf16.msra.mxu1 %v13276_v49  ;;  %7640 = vmatprep.subr.bf16.mxu0 %v13281_v23  ;;  %v13347_v49 = vld [vmem:[%s17255_s5 + $0x1be4] ss:$16 sps:$4 sm:$0xff]   ;;  %v13350_v23 = vld [vmem:[%s17255_s5 + $0x1bec] ss:$16 sps:$4 sm:$0xff]  }
 0x488   :  { %7681 = vmatprep.subr.bf16.mxu1 %v13284_v52  ;;  %v13345_v52 = vld [vmem:[%s17255_s5 + $0x1be0] ss:$16 sps:$4 sm:$0xff]  }
 0x48a   :  { %7641 = vmatpush2.bf16.msra.mxu0 %v13279_v56  ;;  %v13348_v56 = vld [vmem:[%s17255_s5 + $0x1be8] ss:$16 sps:$4 sm:$0xff]  }
 0x48b   :  { %7682 = vmatpush2.bf16.msra.mxu1 %v13282_v31  ;;  %7642 = vmatprep.subr.bf16.mxu0 %v13287_v33  ;;  %v13353_v31 = vld [vmem:[%s17255_s5 + $0x1bc4] ss:$16 sps:$4 sm:$0xff]   ;;  %v13356_v33 = vld [vmem:[%s17255_s5 + $0x1bcc] ss:$16 sps:$4 sm:$0xff]  }
 0x48c   :  { %7683 = vmatprep.subr.bf16.mxu1 %v13290_v29  ;;  %v13351_v29 = vld [vmem:[%s17255_s5 + $0x1bc0] ss:$16 sps:$4 sm:$0xff]  }
 0x48e   :  { %7643 = vmatpush2.bf16.msra.mxu0 %v13285_v32  ;;  %v13354_v32 = vld [vmem:[%s17255_s5 + $0x1bc8] ss:$16 sps:$4 sm:$0xff]  }
 0x48f   :  { %7684 = vmatpush2.bf16.msra.mxu1 %v13288_v10  ;;  %7644 = vmatprep.subr.bf16.mxu0 %v13293_v62  ;;  %v13359_v10 = vld [vmem:[%s17255_s5 + $0x1ba4] ss:$16 sps:$4 sm:$0xff]   ;;  %v13362_v62 = vld [vmem:[%s17255_s5 + $0x1bac] ss:$16 sps:$4 sm:$0xff]  }
 0x490   :  { %7685 = vmatprep.subr.bf16.mxu1 %v13296_v11  ;;  %v13357_v11 = vld [vmem:[%s17255_s5 + $0x1ba0] ss:$16 sps:$4 sm:$0xff]  }
 0x492   :  { %7645 = vmatpush2.bf16.msra.mxu0 %v13291_v38  ;;  %v13360_v38 = vld [vmem:[%s17255_s5 + $0x1ba8] ss:$16 sps:$4 sm:$0xff]  }
 0x493   :  { %7686 = vmatpush2.bf16.msra.mxu1 %v13294_v14  ;;  %8089 = vmatprep.subr.bf16.mxu0 %v13299_v39  ;;  %v13365_v14 = vld [vmem:[%s17255_s5 + $0x1b84] ss:$16 sps:$4 sm:$0xff]   ;;  %v13368_v39 = vld [vmem:[%s17255_s5 + $0x1b8c] ss:$16 sps:$4 sm:$0xff]  }
 0x494   :  { %8130 = vmatprep.subr.bf16.mxu1 %v13302_v53  ;;  %v13363_v53 = vld [vmem:[%s17255_s5 + $0x1b80] ss:$16 sps:$4 sm:$0xff]  }
 0x495   :  { %v6223_v0 = vpop.f32.mrf.mxu0  ;;  %7647 = vmatmul.mubr.bf16.vlgmr.msra.gmra.mxu0 %v7290_v58 }
 0x496   :  { %v16527_v17 = vadd.f32 %v6223_v0, %v16321_v55  ;;  %v6264_v48 = vpop.f32.mrf.mxu1  ;;  %7688 = vmatmul.mubr.bf16.vlgmr.msra.gmra.mxu1 %v7290_v58  ;;  %8090 = vmatpush1.bf16.msra.mxu0 %v13297_v41  ;;  %v13311_v55 = vld [vmem:[%s17255_s5 + $0x1aa4] ss:$16 sps:$4 sm:$0xff]   ;;  %v13366_v41 = vld [vmem:[%s17255_s5 + $0x1b88] ss:$16 sps:$4 sm:$0xff]  }
 0x497   :  { %v16533_v20 = vadd.f32 %v6264_v48, %v16327_v8  ;;  %8121 = vmatprep.mubr.bf16.mxu0 %v7766_v4  ;;  %8131 = vmatpush1.bf16.msra.mxu1 %v13300_v57  ;;  %v6225_v24 = vpop.f32.mrf.mxu0  ;;  %v13314_v8 = vld [vmem:[%s17255_s5 + $0x1aac] ss:$16 sps:$4 sm:$0xff]   ;;  %v13371_v58 = vld [vmem:[%s17255_s5 + $0x1b64] ss:$16 sps:$4 sm:$0xff]   ;;  %v13372_v0 = vld [vmem:[%s17255_s5 + $0x1b68] ss:$16 sps:$4 sm:$0xff]  }
 0x498   :  { %8162 = vmatprep.mubr.bf16.mxu1 %v7766_v4  ;;  %v16542_v22 = vadd.f32 %v6225_v24, %v16336_v9  ;;  %v6266_v54 = vpop.f32.mrf.mxu1  ;;  %8091 = vmatprep.subr.bf16.mxu0 %v13305_v60  ;;  %v13374_v57 = vld [vmem:[%s17255_s5 + $0x1b6c] ss:$16 sps:$4 sm:$0xff]   ;;  %v13369_v60 = vld [vmem:[%s17255_s5 + $0x1b60] ss:$16 sps:$4 sm:$0xff]   ;;  %v13377_v4 = vld [vmem:[%s17255_s5 + $0x1b44] ss:$16 sps:$4 sm:$0xff]  }
 0x499   :  { %v16548_v61 = vadd.f32 %v6266_v54, %v16342_v13  ;;  %v6227_v25 = vpop.f32.mrf.mxu0  ;;  %8132 = vmatprep.subr.bf16.mxu1 %v13308_v15  ;;  %v13317_v13 = vld [vmem:[%s17255_s5 + $0x1a84] ss:$16 sps:$4 sm:$0xff]   ;;  %v13380_v15 = vld [vmem:[%s17255_s5 + $0x1b4c] ss:$16 sps:$4 sm:$0xff]   ;;  %v13375_v48 = vld [vmem:[%s17255_s5 + $0x1b40] ss:$16 sps:$4 sm:$0xff]  }
 0x49a   :  { %v6268_v5 = vpop.f32.mrf.mxu1  ;;  %8092 = vmatpush1.bf16.msra.mxu0 %v13303_v50  ;;  %v13378_v50 = vld [vmem:[%s17255_s5 + $0x1b48] ss:$16 sps:$4 sm:$0xff]   ;;  %v13383_v24 = vld [vmem:[%s17255_s5 + $0x1b24] ss:$16 sps:$4 sm:$0xff]   ;;  %v13392_v25 = vld [vmem:[%s17255_s5 + $0x1b0c] ss:$16 sps:$4 sm:$0xff]  }
 0x49b   :  { %8133 = vmatpush1.bf16.msra.mxu1 %v13306_v51  ;;  %v6228_v9 = vpop.f32.mrf.mxu0  ;;  %8093 = vmatprep.subr.bf16.mxu0 %v13311_v55  ;;  %v13386_v51 = vld [vmem:[%s17255_s5 + $0x1b2c] ss:$16 sps:$4 sm:$0xff]   ;;  %v13381_v55 = vld [vmem:[%s17255_s5 + $0x1b20] ss:$16 sps:$4 sm:$0xff]   ;;  %v13384_v54 = vld [vmem:[%s17255_s5 + $0x1b28] ss:$16 sps:$4 sm:$0xff]  }
 0x49c   :  { %v6269_v28 = vpop.f32.mrf.mxu1  ;;  %8134 = vmatprep.subr.bf16.mxu1 %v13314_v8  ;;  %v13389_v8 = vld [vmem:[%s17255_s5 + $0x1b04] ss:$16 sps:$4 sm:$0xff]   ;;  %v13387_v5 = vld [vmem:[%s17255_s5 + $0x1b00] ss:$16 sps:$4 sm:$0xff]  }
 0x49d   :  { %v13395_v9 = vld [vmem:[%s17255_s5 + $0x1ce4] ss:$16 sps:$4 sm:$0xff]   ;;  %v7765_v28 = vrot.slane %v14097_v35, 5 }
 0x49e   :  { %8094 = vmatpush1.bf16.msra.mxu0 %v13309_v26  ;;  %v13390_v26 = vld [vmem:[%s17255_s5 + $0x1b08] ss:$16 sps:$4 sm:$0xff]  }
 0x49f   :  { %8135 = vmatpush1.bf16.msra.mxu1 %v13312_v27  ;;  %8095 = vmatprep.subr.bf16.mxu0 %v13317_v13  ;;  %v13398_v27 = vld [vmem:[%s17255_s5 + $0x1cec] ss:$16 sps:$4 sm:$0xff]   ;;  %v13393_v13 = vld [vmem:[%s17255_s5 + $0x1ce0] ss:$16 sps:$4 sm:$0xff]  }
 0x4a0   :  { %8136 = vmatprep.subr.bf16.mxu1 %v13320_v7  ;;  %v13396_v7 = vld [vmem:[%s17255_s5 + $0x1ce8] ss:$16 sps:$4 sm:$0xff]  }
 0x4a2   :  { %8096 = vmatpush1.bf16.msra.mxu0 %v13315_v30  ;;  %v13401_v30 = vld [vmem:[%s17255_s5 + $0x1cc4] ss:$16 sps:$4 sm:$0xff]  }
 0x4a3   :  { %8137 = vmatpush1.bf16.msra.mxu1 %v13318_v2  ;;  %8097 = vmatprep.subr.bf16.mxu0 %v13323_v34  ;;  %v8241_v34 = vrot.slane %v14101_v36, 6 }
 0x4a4   :  { %8138 = vmatprep.subr.bf16.mxu1 %v13326_v12  ;;  %v13404_v12 = vld [vmem:[%s17255_s5 + $0x1ccc] ss:$16 sps:$4 sm:$0xff]  }
 0x4a6   :  { %8098 = vmatpush1.bf16.msra.mxu0 %v13321_v37 }
 0x4a7   :  { %8139 = vmatpush1.bf16.msra.mxu1 %v13324_v6  ;;  %8099 = vmatprep.subr.bf16.mxu0 %v13329_v3  ;;  %v13399_v3 = vld [vmem:[%s17255_s5 + $0x1cc0] ss:$16 sps:$4 sm:$0xff]  }
 0x4a8   :  { %8140 = vmatprep.subr.bf16.mxu1 %v13332_v40 }
 0x4aa   :  { %8100 = vmatpush1.bf16.msra.mxu0 %v13327_v45 }
 0x4ab   :  { %8141 = vmatpush1.bf16.msra.mxu1 %v13330_v16  ;;  %8101 = vmatprep.subr.bf16.mxu0 %v13335_v42  ;;  %v13402_v16 = vld [vmem:[%s17255_s5 + $0x1cc8] ss:$16 sps:$4 sm:$0xff]  }
 0x4ac   :  { %8142 = vmatprep.subr.bf16.mxu1 %v13338_v18 }
 0x4ae   :  { %8102 = vmatpush1.bf16.msra.mxu0 %v13333_v19 }
 0x4af   :  { %8143 = vmatpush1.bf16.msra.mxu1 %v13336_v43  ;;  %8103 = vmatprep.subr.bf16.mxu0 %v13341_v21 }
 0x4b0   :  { %8144 = vmatprep.subr.bf16.mxu1 %v13344_v44  ;;  %v13405_v44 = vld [vmem:[%s17255_s5 + $0x1ca0] ss:$16 sps:$4 sm:$0xff]  }
 0x4b2   :  { %8104 = vmatpush1.bf16.msra.mxu0 %v13339_v46  ;;  %v13408_v46 = vld [vmem:[%s17255_s5 + $0x1ca8] ss:$16 sps:$4 sm:$0xff]  }
 0x4b3   :  { %8145 = vmatpush1.bf16.msra.mxu1 %v13342_v47  ;;  %8105 = vmatprep.subr.bf16.mxu0 %v13347_v49  ;;  %v13416_v49 = vld [vmem:[%s17255_s5 + $0x1c8c] ss:$16 sps:$4 sm:$0xff]  }
 0x4b4   :  { %8146 = vmatprep.subr.bf16.mxu1 %v13350_v23  ;;  %v13411_v23 = vld [vmem:[%s17255_s5 + $0x1c80] ss:$16 sps:$4 sm:$0xff]  }
 0x4b6   :  { %8106 = vmatpush2.bf16.msra.mxu0 %v13345_v52  ;;  %v13414_v52 = vld [vmem:[%s17255_s5 + $0x1c88] ss:$16 sps:$4 sm:$0xff]  }
 0x4b7   :  { %8147 = vmatpush2.bf16.msra.mxu1 %v13348_v56  ;;  %8107 = vmatprep.subr.bf16.mxu0 %v13353_v31  ;;  %v13419_v56 = vld [vmem:[%s17255_s5 + $0x1c64] ss:$16 sps:$4 sm:$0xff]   ;;  %v13422_v31 = vld [vmem:[%s17255_s5 + $0x1c6c] ss:$16 sps:$4 sm:$0xff]  }
 0x4b8   :  { %8148 = vmatprep.subr.bf16.mxu1 %v13356_v33  ;;  %v13417_v33 = vld [vmem:[%s17255_s5 + $0x1c60] ss:$16 sps:$4 sm:$0xff]  }
 0x4ba   :  { %8108 = vmatpush2.bf16.msra.mxu0 %v13351_v29  ;;  %v13420_v29 = vld [vmem:[%s17255_s5 + $0x1c68] ss:$16 sps:$4 sm:$0xff]  }
 0x4bb   :  { %8149 = vmatpush2.bf16.msra.mxu1 %v13354_v32  ;;  %8109 = vmatprep.subr.bf16.mxu0 %v13359_v10  ;;  %v13425_v32 = vld [vmem:[%s17255_s5 + $0x1c44] ss:$16 sps:$4 sm:$0xff]   ;;  %v13428_v10 = vld [vmem:[%s17255_s5 + $0x1c4c] ss:$16 sps:$4 sm:$0xff]  }
 0x4bc   :  { %8150 = vmatprep.subr.bf16.mxu1 %v13362_v62  ;;  %v13423_v62 = vld [vmem:[%s17255_s5 + $0x1c40] ss:$16 sps:$4 sm:$0xff]  }
 0x4be   :  { %8110 = vmatpush2.bf16.msra.mxu0 %v13357_v11  ;;  %v13426_v11 = vld [vmem:[%s17255_s5 + $0x1c48] ss:$16 sps:$4 sm:$0xff]  }
 0x4bf   :  { %8151 = vmatpush2.bf16.msra.mxu1 %v13360_v38  ;;  %8111 = vmatprep.subr.bf16.mxu0 %v13365_v14  ;;  %v13431_v38 = vld [vmem:[%s17255_s5 + $0x1c24] ss:$16 sps:$4 sm:$0xff]   ;;  %v13434_v14 = vld [vmem:[%s17255_s5 + $0x1c2c] ss:$16 sps:$4 sm:$0xff]  }
 0x4c0   :  { %8152 = vmatprep.subr.bf16.mxu1 %v13368_v39  ;;  %v13429_v39 = vld [vmem:[%s17255_s5 + $0x1c20] ss:$16 sps:$4 sm:$0xff]  }
 0x4c2   :  { %8112 = vmatpush2.bf16.msra.mxu0 %v13363_v53  ;;  %v13432_v53 = vld [vmem:[%s17255_s5 + $0x1c28] ss:$16 sps:$4 sm:$0xff]  }
 0x4c3   :  { %8153 = vmatpush2.bf16.msra.mxu1 %v13366_v41  ;;  %8113 = vmatprep.subr.bf16.mxu0 %v13371_v58  ;;  %v13437_v41 = vld [vmem:[%s17255_s5 + $0x1c04] ss:$16 sps:$4 sm:$0xff]   ;;  %v13440_v58 = vld [vmem:[%s17255_s5 + $0x1c0c] ss:$16 sps:$4 sm:$0xff]  }
 0x4c4   :  { %8154 = vmatprep.subr.bf16.mxu1 %v13374_v57  ;;  %v13435_v57 = vld [vmem:[%s17255_s5 + $0x1c00] ss:$16 sps:$4 sm:$0xff]  }
 0x4c6   :  { %8114 = vmatpush2.bf16.msra.mxu0 %v13369_v60  ;;  %v13438_v60 = vld [vmem:[%s17255_s5 + $0x1c08] ss:$16 sps:$4 sm:$0xff]  }
 0x4c7   :  { %8155 = vmatpush2.bf16.msra.mxu1 %v13372_v0  ;;  %8115 = vmatprep.subr.bf16.mxu0 %v13377_v4  ;;  %v13443_v0 = vld [vmem:[%s17255_s5 + $0x1de4] ss:$16 sps:$4 sm:$0xff]   ;;  %v13446_v4 = vld [vmem:[%s17255_s5 + $0x1dec] ss:$16 sps:$4 sm:$0xff]  }
 0x4c8   :  { %8156 = vmatprep.subr.bf16.mxu1 %v13380_v15  ;;  %v13441_v15 = vld [vmem:[%s17255_s5 + $0x1de0] ss:$16 sps:$4 sm:$0xff]  }
 0x4ca   :  { %8116 = vmatpush2.bf16.msra.mxu0 %v13375_v48  ;;  %v13444_v48 = vld [vmem:[%s17255_s5 + $0x1de8] ss:$16 sps:$4 sm:$0xff]  }
 0x4cb   :  { %8157 = vmatpush2.bf16.msra.mxu1 %v13378_v50  ;;  %8117 = vmatprep.subr.bf16.mxu0 %v13383_v24  ;;  %v13449_v50 = vld [vmem:[%s17255_s5 + $0x1dc4] ss:$16 sps:$4 sm:$0xff]   ;;  %v13452_v24 = vld [vmem:[%s17255_s5 + $0x1dcc] ss:$16 sps:$4 sm:$0xff]  }
 0x4cc   :  { %8158 = vmatprep.subr.bf16.mxu1 %v13386_v51  ;;  %v13447_v51 = vld [vmem:[%s17255_s5 + $0x1dc0] ss:$16 sps:$4 sm:$0xff]  }
 0x4ce   :  { %8118 = vmatpush2.bf16.msra.mxu0 %v13381_v55  ;;  %v13450_v55 = vld [vmem:[%s17255_s5 + $0x1dc8] ss:$16 sps:$4 sm:$0xff]  }
 0x4cf   :  { %8159 = vmatpush2.bf16.msra.mxu1 %v13384_v54  ;;  %8119 = vmatprep.subr.bf16.mxu0 %v13389_v8  ;;  %v13455_v54 = vld [vmem:[%s17255_s5 + $0x1da4] ss:$16 sps:$4 sm:$0xff]   ;;  %v13458_v8 = vld [vmem:[%s17255_s5 + $0x1dac] ss:$16 sps:$4 sm:$0xff]  }
 0x4d0   :  { %8160 = vmatprep.subr.bf16.mxu1 %v13392_v25  ;;  %v13453_v25 = vld [vmem:[%s17255_s5 + $0x1da0] ss:$16 sps:$4 sm:$0xff]  }
 0x4d2   :  { %8120 = vmatpush2.bf16.msra.mxu0 %v13387_v5  ;;  %v13456_v5 = vld [vmem:[%s17255_s5 + $0x1da8] ss:$16 sps:$4 sm:$0xff]  }
 0x4d3   :  { %8161 = vmatpush2.bf16.msra.mxu1 %v13390_v26  ;;  %8564 = vmatprep.subr.bf16.mxu0 %v13395_v9  ;;  %v13461_v26 = vld [vmem:[%s17255_s5 + $0x1d84] ss:$16 sps:$4 sm:$0xff]   ;;  %v13464_v9 = vld [vmem:[%s17255_s5 + $0x1d8c] ss:$16 sps:$4 sm:$0xff]  }
 0x4d4   :  { %8605 = vmatprep.subr.bf16.mxu1 %v13398_v27  ;;  %v13459_v27 = vld [vmem:[%s17255_s5 + $0x1d80] ss:$16 sps:$4 sm:$0xff]  }
 0x4d5   :  { %v6698_v2 = vpop.f32.mrf.mxu0  ;;  %8122 = vmatmul.mubr.bf16.vlgmr.msra.gmra.mxu0 %v7765_v28 }
 0x4d6   :  { %v16733_v37 = vadd.f32 %v6698_v2, %v16527_v17  ;;  %v6739_v6 = vpop.f32.mrf.mxu1  ;;  %8163 = vmatmul.mubr.bf16.vlgmr.msra.gmra.mxu1 %v7765_v28  ;;  %8565 = vmatpush1.bf16.msra.mxu0 %v13393_v13  ;;  %v13407_v17 = vld [vmem:[%s17255_s5 + $0x1ca4] ss:$16 sps:$4 sm:$0xff]   ;;  %v13462_v13 = vld [vmem:[%s17255_s5 + $0x1d88] ss:$16 sps:$4 sm:$0xff]  }
 0x4d7   :  { %v16739_v40 = vadd.f32 %v6739_v6, %v16533_v20  ;;  %8596 = vmatprep.mubr.bf16.mxu0 %v8241_v34  ;;  %8606 = vmatpush1.bf16.msra.mxu1 %v13396_v7  ;;  %v6700_v45 = vpop.f32.mrf.mxu0  ;;  %v13410_v20 = vld [vmem:[%s17255_s5 + $0x1cac] ss:$16 sps:$4 sm:$0xff]   ;;  %v13467_v28 = vld [vmem:[%s17255_s5 + $0x1d64] ss:$16 sps:$4 sm:$0xff]   ;;  %v13468_v2 = vld [vmem:[%s17255_s5 + $0x1d68] ss:$16 sps:$4 sm:$0xff]  }
 0x4d8   :  { %8637 = vmatprep.mubr.bf16.mxu1 %v8241_v34  ;;  %v16748_v42 = vadd.f32 %v6700_v45, %v16542_v22  ;;  %v6741_v18 = vpop.f32.mrf.mxu1  ;;  %8566 = vmatprep.subr.bf16.mxu0 %v13401_v30  ;;  %v13470_v7 = vld [vmem:[%s17255_s5 + $0x1d6c] ss:$16 sps:$4 sm:$0xff]   ;;  %v13465_v30 = vld [vmem:[%s17255_s5 + $0x1d60] ss:$16 sps:$4 sm:$0xff]   ;;  %v13473_v34 = vld [vmem:[%s17255_s5 + $0x1d44] ss:$16 sps:$4 sm:$0xff]  }
 0x4d9   :  { %v16754_v19 = vadd.f32 %v6741_v18, %v16548_v61  ;;  %v6702_v43 = vpop.f32.mrf.mxu0  ;;  %8607 = vmatprep.subr.bf16.mxu1 %v13404_v12  ;;  %v13413_v61 = vld [vmem:[%s17255_s5 + $0x1c84] ss:$16 sps:$4 sm:$0xff]   ;;  %v13476_v12 = vld [vmem:[%s17255_s5 + $0x1d4c] ss:$16 sps:$4 sm:$0xff]   ;;  %v13471_v6 = vld [vmem:[%s17255_s5 + $0x1d40] ss:$16 sps:$4 sm:$0xff]  }
 0x4da   :  { %v6743_v21 = vpop.f32.mrf.mxu1  ;;  %8567 = vmatpush1.bf16.msra.mxu0 %v13399_v3  ;;  %v13474_v3 = vld [vmem:[%s17255_s5 + $0x1d48] ss:$16 sps:$4 sm:$0xff]   ;;  %v13479_v45 = vld [vmem:[%s17255_s5 + $0x1d24] ss:$16 sps:$4 sm:$0xff]   ;;  %v13488_v43 = vld [vmem:[%s17255_s5 + $0x1d0c] ss:$16 sps:$4 sm:$0xff]  }
 0x4db   :  { %8608 = vmatpush1.bf16.msra.mxu1 %v13402_v16  ;;  %v6703_v22 = vpop.f32.mrf.mxu0  ;;  %8568 = vmatprep.subr.bf16.mxu0 %v13407_v17  ;;  %v13482_v16 = vld [vmem:[%s17255_s5 + $0x1d2c] ss:$16 sps:$4 sm:$0xff]   ;;  %v13477_v17 = vld [vmem:[%s17255_s5 + $0x1d20] ss:$16 sps:$4 sm:$0xff]   ;;  %v13480_v18 = vld [vmem:[%s17255_s5 + $0x1d28] ss:$16 sps:$4 sm:$0xff]  }
 0x4dc   :  { %v6744_v47 = vpop.f32.mrf.mxu1  ;;  %8609 = vmatprep.subr.bf16.mxu1 %v13410_v20  ;;  %v13485_v20 = vld [vmem:[%s17255_s5 + $0x1d04] ss:$16 sps:$4 sm:$0xff]   ;;  %v13483_v21 = vld [vmem:[%s17255_s5 + $0x1d00] ss:$16 sps:$4 sm:$0xff]  }
 0x4dd   :  { %v13491_v22 = vld [vmem:[%s17255_s5 + $0x1ee4] ss:$16 sps:$4 sm:$0xff]   ;;  %v8240_v47 = vrot.slane %v14097_v35, 6 }
 0x4de   :  { %8569 = vmatpush1.bf16.msra.mxu0 %v13405_v44  ;;  %v13486_v44 = vld [vmem:[%s17255_s5 + $0x1d08] ss:$16 sps:$4 sm:$0xff]  }
 0x4df   :  { %8610 = vmatpush1.bf16.msra.mxu1 %v13408_v46  ;;  %8570 = vmatprep.subr.bf16.mxu0 %v13413_v61  ;;  %v13494_v46 = vld [vmem:[%s17255_s5 + $0x1eec] ss:$16 sps:$4 sm:$0xff]   ;;  %v13489_v61 = vld [vmem:[%s17255_s5 + $0x1ee0] ss:$16 sps:$4 sm:$0xff]  }
 0x4e0   :  { %8611 = vmatprep.subr.bf16.mxu1 %v13416_v49  ;;  %v13492_v49 = vld [vmem:[%s17255_s5 + $0x1ee8] ss:$16 sps:$4 sm:$0xff]  }
 0x4e2   :  { %8571 = vmatpush1.bf16.msra.mxu0 %v13411_v23  ;;  %v13497_v23 = vld [vmem:[%s17255_s5 + $0x1ec4] ss:$16 sps:$4 sm:$0xff]  }
 0x4e3   :  { %8612 = vmatpush1.bf16.msra.mxu1 %v13414_v52  ;;  %8572 = vmatprep.subr.bf16.mxu0 %v13419_v56  ;;  %v8716_v56 = vrot.slane %v14101_v36, 7 }
 0x4e4   :  { %8613 = vmatprep.subr.bf16.mxu1 %v13422_v31  ;;  %v13500_v31 = vld [vmem:[%s17255_s5 + $0x1ecc] ss:$16 sps:$4 sm:$0xff]  }
 0x4e6   :  { %8573 = vmatpush1.bf16.msra.mxu0 %v13417_v33 }
 0x4e7   :  { %8614 = vmatpush1.bf16.msra.mxu1 %v13420_v29  ;;  %8574 = vmatprep.subr.bf16.mxu0 %v13425_v32  ;;  %v13495_v32 = vld [vmem:[%s17255_s5 + $0x1ec0] ss:$16 sps:$4 sm:$0xff]  }
 0x4e8   :  { %8615 = vmatprep.subr.bf16.mxu1 %v13428_v10 }
 0x4ea   :  { %8575 = vmatpush1.bf16.msra.mxu0 %v13423_v62  ;;  %v13498_v62 = vld [vmem:[%s17255_s5 + $0x1ec8] ss:$16 sps:$4 sm:$0xff]  }
 0x4eb   :  { %8616 = vmatpush1.bf16.msra.mxu1 %v13426_v11  ;;  %8576 = vmatprep.subr.bf16.mxu0 %v13431_v38 }
 0x4ec   :  { %8617 = vmatprep.subr.bf16.mxu1 %v13434_v14 }
 0x4ee   :  { %8577 = vmatpush1.bf16.msra.mxu0 %v13429_v39 }
 0x4ef   :  { %8618 = vmatpush1.bf16.msra.mxu1 %v13432_v53  ;;  %8578 = vmatprep.subr.bf16.mxu0 %v13437_v41  ;;  %v13501_v41 = vld [vmem:[%s17255_s5 + $0x1ea0] ss:$16 sps:$4 sm:$0xff]  }
 0x4f0   :  { %8619 = vmatprep.subr.bf16.mxu1 %v13440_v58  ;;  %v13504_v58 = vld [vmem:[%s17255_s5 + $0x1ea8] ss:$16 sps:$4 sm:$0xff]  }
 0x4f2   :  { %8579 = vmatpush1.bf16.msra.mxu0 %v13435_v57 }
 0x4f3   :  { %8620 = vmatpush1.bf16.msra.mxu1 %v13438_v60  ;;  %8580 = vmatprep.subr.bf16.mxu0 %v13443_v0  ;;  %v13512_v60 = vld [vmem:[%s17255_s5 + $0x1e8c] ss:$16 sps:$4 sm:$0xff]   ;;  %v13507_v0 = vld [vmem:[%s17255_s5 + $0x1e80] ss:$16 sps:$4 sm:$0xff]  }
 0x4f4   :  { %8621 = vmatprep.subr.bf16.mxu1 %v13446_v4  ;;  %v13510_v4 = vld [vmem:[%s17255_s5 + $0x1e88] ss:$16 sps:$4 sm:$0xff]  }
 0x4f6   :  { %8581 = vmatpush2.bf16.msra.mxu0 %v13441_v15  ;;  %v13515_v15 = vld [vmem:[%s17255_s5 + $0x1e64] ss:$16 sps:$4 sm:$0xff]  }
 0x4f7   :  { %8622 = vmatpush2.bf16.msra.mxu1 %v13444_v48  ;;  %8582 = vmatprep.subr.bf16.mxu0 %v13449_v50  ;;  %v13518_v48 = vld [vmem:[%s17255_s5 + $0x1e6c] ss:$16 sps:$4 sm:$0xff]   ;;  %v13513_v50 = vld [vmem:[%s17255_s5 + $0x1e60] ss:$16 sps:$4 sm:$0xff]  }
 0x4f8   :  { %8623 = vmatprep.subr.bf16.mxu1 %v13452_v24  ;;  %v13516_v24 = vld [vmem:[%s17255_s5 + $0x1e68] ss:$16 sps:$4 sm:$0xff]  }
 0x4fa   :  { %8583 = vmatpush2.bf16.msra.mxu0 %v13447_v51  ;;  %v13521_v51 = vld [vmem:[%s17255_s5 + $0x1e44] ss:$16 sps:$4 sm:$0xff]  }
 0x4fb   :  { %8624 = vmatpush2.bf16.msra.mxu1 %v13450_v55  ;;  %8584 = vmatprep.subr.bf16.mxu0 %v13455_v54  ;;  %v13524_v55 = vld [vmem:[%s17255_s5 + $0x1e4c] ss:$16 sps:$4 sm:$0xff]   ;;  %v13519_v54 = vld [vmem:[%s17255_s5 + $0x1e40] ss:$16 sps:$4 sm:$0xff]  }
 0x4fc   :  { %8625 = vmatprep.subr.bf16.mxu1 %v13458_v8  ;;  %v13522_v8 = vld [vmem:[%s17255_s5 + $0x1e48] ss:$16 sps:$4 sm:$0xff]  }
 0x4fe   :  { %8585 = vmatpush2.bf16.msra.mxu0 %v13453_v25  ;;  %v13527_v25 = vld [vmem:[%s17255_s5 + $0x1e24] ss:$16 sps:$4 sm:$0xff]  }
 0x4ff   :  { %8626 = vmatpush2.bf16.msra.mxu1 %v13456_v5  ;;  %8586 = vmatprep.subr.bf16.mxu0 %v13461_v26  ;;  %v13530_v5 = vld [vmem:[%s17255_s5 + $0x1e2c] ss:$16 sps:$4 sm:$0xff]   ;;  %v13525_v26 = vld [vmem:[%s17255_s5 + $0x1e20] ss:$16 sps:$4 sm:$0xff]  }
 0x500   :  { %8627 = vmatprep.subr.bf16.mxu1 %v13464_v9  ;;  %v13528_v9 = vld [vmem:[%s17255_s5 + $0x1e28] ss:$16 sps:$4 sm:$0xff]  }
 0x502   :  { %8587 = vmatpush2.bf16.msra.mxu0 %v13459_v27  ;;  %v13533_v27 = vld [vmem:[%s17255_s5 + $0x1e04] ss:$16 sps:$4 sm:$0xff]  }
 0x503   :  { %8628 = vmatpush2.bf16.msra.mxu1 %v13462_v13  ;;  %8588 = vmatprep.subr.bf16.mxu0 %v13467_v28  ;;  %v13536_v13 = vld [vmem:[%s17255_s5 + $0x1e0c] ss:$16 sps:$4 sm:$0xff]   ;;  %v13531_v28 = vld [vmem:[%s17255_s5 + $0x1e00] ss:$16 sps:$4 sm:$0xff]  }
 0x504   :  { %8629 = vmatprep.subr.bf16.mxu1 %v13470_v7  ;;  %v13534_v7 = vld [vmem:[%s17255_s5 + $0x1e08] ss:$16 sps:$4 sm:$0xff]  }
 0x506   :  { %8589 = vmatpush2.bf16.msra.mxu0 %v13465_v30  ;;  %v13539_v30 = vld [vmem:[%s17255_s5 + $0x1fe4] ss:$16 sps:$4 sm:$0xff]  }
 0x507   :  { %8630 = vmatpush2.bf16.msra.mxu1 %v13468_v2  ;;  %8590 = vmatprep.subr.bf16.mxu0 %v13473_v34  ;;  %v13542_v2 = vld [vmem:[%s17255_s5 + $0x1fec] ss:$16 sps:$4 sm:$0xff]   ;;  %v13537_v34 = vld [vmem:[%s17255_s5 + $0x1fe0] ss:$16 sps:$4 sm:$0xff]  }
 0x508   :  { %8631 = vmatprep.subr.bf16.mxu1 %v13476_v12  ;;  %v13540_v12 = vld [vmem:[%s17255_s5 + $0x1fe8] ss:$16 sps:$4 sm:$0xff]  }
 0x50a   :  { %8591 = vmatpush2.bf16.msra.mxu0 %v13471_v6  ;;  %v13545_v6 = vld [vmem:[%s17255_s5 + $0x1fc4] ss:$16 sps:$4 sm:$0xff]  }
 0x50b   :  { %8632 = vmatpush2.bf16.msra.mxu1 %v13474_v3  ;;  %8592 = vmatprep.subr.bf16.mxu0 %v13479_v45  ;;  %v13548_v3 = vld [vmem:[%s17255_s5 + $0x1fcc] ss:$16 sps:$4 sm:$0xff]   ;;  %v13543_v45 = vld [vmem:[%s17255_s5 + $0x1fc0] ss:$16 sps:$4 sm:$0xff]  }
 0x50c   :  { %8633 = vmatprep.subr.bf16.mxu1 %v13482_v16  ;;  %v13546_v16 = vld [vmem:[%s17255_s5 + $0x1fc8] ss:$16 sps:$4 sm:$0xff]  }
 0x50e   :  { %8593 = vmatpush2.bf16.msra.mxu0 %v13477_v17  ;;  %v13551_v17 = vld [vmem:[%s17255_s5 + $0x1fa4] ss:$16 sps:$4 sm:$0xff]  }
 0x50f   :  { %8634 = vmatpush2.bf16.msra.mxu1 %v13480_v18  ;;  %8594 = vmatprep.subr.bf16.mxu0 %v13485_v20  ;;  %v13554_v18 = vld [vmem:[%s17255_s5 + $0x1fac] ss:$16 sps:$4 sm:$0xff]   ;;  %v13549_v20 = vld [vmem:[%s17255_s5 + $0x1fa0] ss:$16 sps:$4 sm:$0xff]  }
 0x510   :  { %8635 = vmatprep.subr.bf16.mxu1 %v13488_v43  ;;  %v13552_v43 = vld [vmem:[%s17255_s5 + $0x1fa8] ss:$16 sps:$4 sm:$0xff]  }
 0x512   :  { %8595 = vmatpush2.bf16.msra.mxu0 %v13483_v21  ;;  %v13557_v21 = vld [vmem:[%s17255_s5 + $0x1f84] ss:$16 sps:$4 sm:$0xff]  }
 0x513   :  { %8636 = vmatpush2.bf16.msra.mxu1 %v13486_v44  ;;  %9039 = vmatprep.subr.bf16.mxu0 %v13491_v22  ;;  %v13560_v44 = vld [vmem:[%s17255_s5 + $0x1f8c] ss:$16 sps:$4 sm:$0xff]   ;;  %v13555_v22 = vld [vmem:[%s17255_s5 + $0x1f80] ss:$16 sps:$4 sm:$0xff]  }
 0x514   :  { %9080 = vmatprep.subr.bf16.mxu1 %v13494_v46  ;;  %v13558_v46 = vld [vmem:[%s17255_s5 + $0x1f88] ss:$16 sps:$4 sm:$0xff]  }
 0x515   :  { %v7173_v52 = vpop.f32.mrf.mxu0  ;;  %8597 = vmatmul.mubr.bf16.vlgmr.msra.gmra.mxu0 %v8240_v47 }
 0x516   :  { %v16939_v33 = vadd.f32 %v7173_v52, %v16733_v37  ;;  %v7214_v29 = vpop.f32.mrf.mxu1  ;;  %8638 = vmatmul.mubr.bf16.vlgmr.msra.gmra.mxu1 %v8240_v47  ;;  %9040 = vmatpush1.bf16.msra.mxu0 %v13489_v61  ;;  %v13503_v37 = vld [vmem:[%s17255_s5 + $0x1ea4] ss:$16 sps:$4 sm:$0xff]   ;;  %v13566_v47 = vld [vmem:[%s17255_s5 + $0x1f6c] ss:$16 sps:$4 sm:$0xff]  }
 0x517   :  { %v16945_v10 = vadd.f32 %v7214_v29, %v16739_v40  ;;  %9071 = vmatprep.mubr.bf16.mxu0 %v8716_v56  ;;  %9081 = vmatpush1.bf16.msra.mxu1 %v13492_v49  ;;  %v7175_v36 = vpop.f32.mrf.mxu0  ;;  %v13506_v40 = vld [vmem:[%s17255_s5 + $0x1eac] ss:$16 sps:$4 sm:$0xff]   ;;  %v13563_v61 = vld [vmem:[%s17255_s5 + $0x1f64] ss:$16 sps:$4 sm:$0xff]   ;;  %v13561_v49 = vld [vmem:[%s17255_s5 + $0x1f60] ss:$16 sps:$4 sm:$0xff]  }
 0x518   :  { %9112 = vmatprep.mubr.bf16.mxu1 %v8716_v56  ;;  %v16954_v11 = vadd.f32 %v7175_v36, %v16748_v42  ;;  %v7216_v38 = vpop.f32.mrf.mxu1  ;;  %9041 = vmatprep.subr.bf16.mxu0 %v13497_v23  ;;  %v13564_v23 = vld [vmem:[%s17255_s5 + $0x1f68] ss:$16 sps:$4 sm:$0xff]   ;;  %v13569_v52 = vld [vmem:[%s17255_s5 + $0x1f44] ss:$16 sps:$4 sm:$0xff]   ;;  %v13572_v56 = vld [vmem:[%s17255_s5 + $0x1f4c] ss:$16 sps:$4 sm:$0xff]  }
 0x519   :  { %v16960_v14 = vadd.f32 %v7216_v38, %v16754_v19  ;;  %v7177_v39 = vpop.f32.mrf.mxu0  ;;  %9082 = vmatprep.subr.bf16.mxu1 %v13500_v31  ;;  %v13509_v19 = vld [vmem:[%s17255_s5 + $0x1e84] ss:$16 sps:$4 sm:$0xff]   ;;  %v13567_v31 = vld [vmem:[%s17255_s5 + $0x1f40] ss:$16 sps:$4 sm:$0xff]   ;;  %v13570_v29 = vld [vmem:[%s17255_s5 + $0x1f48] ss:$16 sps:$4 sm:$0xff]  }
 0x51a   :  { %v7218_v53 = vpop.f32.mrf.mxu1  ;;  %9042 = vmatpush1.bf16.msra.mxu0 %v13495_v32  ;;  %v13575_v32 = vld [vmem:[%s17255_s5 + $0x1f24] ss:$16 sps:$4 sm:$0xff]   ;;  %v13578_v36 = vld [vmem:[%s17255_s5 + $0x1f2c] ss:$16 sps:$4 sm:$0xff]   ;;  %v13579_v39 = vld [vmem:[%s17255_s5 + $0x1f00] ss:$16 sps:$4 sm:$0xff]  }
 0x51b   :  { %9083 = vmatpush1.bf16.msra.mxu1 %v13498_v62  ;;  %v7178_v42 = vpop.f32.mrf.mxu0  ;;  %9043 = vmatprep.subr.bf16.mxu0 %v13503_v37  ;;  %v13573_v62 = vld [vmem:[%s17255_s5 + $0x1f20] ss:$16 sps:$4 sm:$0xff]   ;;  %v13576_v37 = vld [vmem:[%s17255_s5 + $0x1f28] ss:$16 sps:$4 sm:$0xff]   ;;  %v13581_v38 = vld [vmem:[%s17255_s5 + $0x1f04] ss:$16 sps:$4 sm:$0xff]  }
 0x51c   :  { %v7219_v57 = vpop.f32.mrf.mxu1  ;;  %9084 = vmatprep.subr.bf16.mxu1 %v13506_v40  ;;  %v13584_v40 = vld [vmem:[%s17255_s5 + $0x1f0c] ss:$16 sps:$4 sm:$0xff]   ;;  %v13582_v53 = vld [vmem:[%s17255_s5 + $0x1f08] ss:$16 sps:$4 sm:$0xff]  }
 0x51e   :  { %9044 = vmatpush1.bf16.msra.mxu0 %v13501_v41  ;;  %v8715_v41 = vrot.slane %v14097_v35, 7  ;;  %v13585_v35 = vld [vmem:[%s17257_s7 + $0x78] sm:$0xff]  }
 0x51f   :  { %9085 = vmatpush1.bf16.msra.mxu1 %v13504_v58  ;;  %9045 = vmatprep.subr.bf16.mxu0 %v13509_v19 }
 0x520   :  { %9086 = vmatprep.subr.bf16.mxu1 %v13512_v60 }
 0x522   :  { %9046 = vmatpush1.bf16.msra.mxu0 %v13507_v0 }
 0x523   :  { %9087 = vmatpush1.bf16.msra.mxu1 %v13510_v4  ;;  %9047 = vmatprep.subr.bf16.mxu0 %v13515_v15 }
 0x524   :  { %9088 = vmatprep.subr.bf16.mxu1 %v13518_v48 }
 0x526   :  { %9048 = vmatpush1.bf16.msra.mxu0 %v13513_v50 }
 0x527   :  { %9089 = vmatpush1.bf16.msra.mxu1 %v13516_v24  ;;  %9049 = vmatprep.subr.bf16.mxu0 %v13521_v51 }
 0x528   :  { %9090 = vmatprep.subr.bf16.mxu1 %v13524_v55 }
 0x52a   :  { %9050 = vmatpush1.bf16.msra.mxu0 %v13519_v54 }
 0x52b   :  { %9091 = vmatpush1.bf16.msra.mxu1 %v13522_v8  ;;  %9051 = vmatprep.subr.bf16.mxu0 %v13527_v25 }
 0x52c   :  { %9092 = vmatprep.subr.bf16.mxu1 %v13530_v5 }
 0x52e   :  { %9052 = vmatpush1.bf16.msra.mxu0 %v13525_v26 }
 0x52f   :  { %9093 = vmatpush1.bf16.msra.mxu1 %v13528_v9  ;;  %9053 = vmatprep.subr.bf16.mxu0 %v13533_v27 }
 0x530   :  { %9094 = vmatprep.subr.bf16.mxu1 %v13536_v13 }
 0x532   :  { %9054 = vmatpush1.bf16.msra.mxu0 %v13531_v28 }
 0x533   :  { %9095 = vmatpush1.bf16.msra.mxu1 %v13534_v7  ;;  %9055 = vmatprep.subr.bf16.mxu0 %v13539_v30  ;;  %v13589_v30 = vld [vmem:[%s17257_s7 + $0x70] sm:$0xff]  }
 0x534   :  { %9096 = vmatprep.subr.bf16.mxu1 %v13542_v2  ;;  %v13590_v2 = vld [vmem:[%s17257_s7 + $0xf0] sm:$0xff]  }
 0x536   :  { %9056 = vmatpush2.bf16.msra.mxu0 %v13537_v34  ;;  %v13591_v34 = vld [vmem:[%s17257_s7 + $0x30] sm:$0xff]  }
 0x537   :  { %9097 = vmatpush2.bf16.msra.mxu1 %v13540_v12  ;;  %9057 = vmatprep.subr.bf16.mxu0 %v13545_v6  ;;  %v13592_v12 = vld [vmem:[%s17257_s7 + $0xb0] sm:$0xff]   ;;  %v13593_v6 = vld [vmem:[%s17257_s7 + $0x68] sm:$0xff]  }
 0x538   :  { %9098 = vmatprep.subr.bf16.mxu1 %v13548_v3  ;;  %v13594_v3 = vld [vmem:[%s17257_s7 + $0xe8] sm:$0xff]  }
 0x53a   :  { %9058 = vmatpush2.bf16.msra.mxu0 %v13543_v45  ;;  %v13595_v45 = vld [vmem:[%s17257_s7 + $0x28] sm:$0xff]  }
 0x53b   :  { %9099 = vmatpush2.bf16.msra.mxu1 %v13546_v16  ;;  %9059 = vmatprep.subr.bf16.mxu0 %v13551_v17  ;;  %v13596_v16 = vld [vmem:[%s17257_s7 + $0xa8] sm:$0xff]   ;;  %v13597_v17 = vld [vmem:[%s17257_s7 + $0x60] sm:$0xff]  }
 0x53c   :  { %9100 = vmatprep.subr.bf16.mxu1 %v13554_v18  ;;  %v13598_v18 = vld [vmem:[%s17257_s7 + $0xe0] sm:$0xff]  }
 0x53e   :  { %9060 = vmatpush2.bf16.msra.mxu0 %v13549_v20  ;;  %v13599_v20 = vld [vmem:[%s17257_s7 + $0x20] sm:$0xff]  }
 0x53f   :  { %9101 = vmatpush2.bf16.msra.mxu1 %v13552_v43  ;;  %9061 = vmatprep.subr.bf16.mxu0 %v13557_v21  ;;  %v13600_v43 = vld [vmem:[%s17257_s7 + $0xa0] sm:$0xff]   ;;  %v13601_v21 = vld [vmem:[%s17257_s7 + $0x58] sm:$0xff]  }
 0x540   :  { %9102 = vmatprep.subr.bf16.mxu1 %v13560_v44  ;;  %v13602_v44 = vld [vmem:[%s17257_s7 + $0xd8] sm:$0xff]  }
 0x542   :  { %9062 = vmatpush2.bf16.msra.mxu0 %v13555_v22  ;;  %v13603_v22 = vld [vmem:[%s17257_s7 + $0x18] sm:$0xff]  }
 0x543   :  { %9103 = vmatpush2.bf16.msra.mxu1 %v13558_v46  ;;  %9063 = vmatprep.subr.bf16.mxu0 %v13563_v61  ;;  %v13604_v46 = vld [vmem:[%s17257_s7 + $0x98] sm:$0xff]   ;;  %v13605_v61 = vld [vmem:[%s17257_s7 + $0x50] sm:$0xff]  }
 0x544   :  { %9104 = vmatprep.subr.bf16.mxu1 %v13566_v47  ;;  %v13606_v47 = vld [vmem:[%s17257_s7 + $0xd0] sm:$0xff]  }
 0x546   :  { %9064 = vmatpush2.bf16.msra.mxu0 %v13561_v49  ;;  %v13607_v49 = vld [vmem:[%s17257_s7 + $0x10] sm:$0xff]  }
 0x547   :  { %9105 = vmatpush2.bf16.msra.mxu1 %v13564_v23  ;;  %9065 = vmatprep.subr.bf16.mxu0 %v13569_v52  ;;  %v13608_v23 = vld [vmem:[%s17257_s7 + $0x90] sm:$0xff]   ;;  %v13609_v52 = vld [vmem:[%s17257_s7 + $0x48] sm:$0xff]  }
 0x548   :  { %9106 = vmatprep.subr.bf16.mxu1 %v13572_v56  ;;  %v13610_v56 = vld [vmem:[%s17257_s7 + $0xc8] sm:$0xff]  }
 0x54a   :  { %9066 = vmatpush2.bf16.msra.mxu0 %v13567_v31  ;;  %v13611_v31 = vld [vmem:[%s17257_s7 + $0x8] sm:$0xff]  }
 0x54b   :  { %9107 = vmatpush2.bf16.msra.mxu1 %v13570_v29  ;;  %9067 = vmatprep.subr.bf16.mxu0 %v13575_v32  ;;  %v13612_v29 = vld [vmem:[%s17257_s7 + $0x88] sm:$0xff]   ;;  %v13613_v32 = vld [vmem:[%s17257_s7 + $0x40] sm:$0xff]  }
 0x54c   :  { %9108 = vmatprep.subr.bf16.mxu1 %v13578_v36  ;;  %v13614_v36 = vld [vmem:[%s17257_s7 + $0xc0] sm:$0xff]  }
 0x54e   :  { %9068 = vmatpush2.bf16.msra.mxu0 %v13573_v62  ;;  %v13615_v62 = vld [vmem:[%s17257_s7] sm:$0xff]  }
 0x54f   :  { %9109 = vmatpush2.bf16.msra.mxu1 %v13576_v37  ;;  %9069 = vmatprep.subr.bf16.mxu0 %v13581_v38  ;;  %v13616_v37 = vld [vmem:[%s17257_s7 + $0x80] sm:$0xff]  }
 0x550   :  { %9110 = vmatprep.subr.bf16.mxu1 %v13584_v40 }
 0x552   :  { %9070 = vmatpush2.bf16.msra.mxu0 %v13579_v39 }
 0x553   :  { %9111 = vmatpush2.bf16.msra.mxu1 %v13582_v53  ;;  %11732 = vmatprep.subr.bf16.mxu0 %v13585_v35 }
 0x555   :  { %v7648_v42 = vpop.f32.mrf.mxu0  ;;  %9072 = vmatmul.mubr.bf16.vlgmr.msra.gmra.mxu0 %v8715_v41 }
 0x556   :  { %v7696_v58 = vadd.f32 %v7648_v42, %v16939_v33  ;;  %v7689_v19 = vpop.f32.mrf.mxu1  ;;  %9113 = vmatmul.mubr.bf16.vlgmr.msra.gmra.mxu1 %v8715_v41  ;;  %v13586_v33 = vld [vmem:[%s17257_s7 + $0xf8] sm:$0xff]  }
 0x557   :  { %v7698_v57 = vadd.f32 %v7689_v19, %v16945_v10  ;;  %v7650_v60 = vpop.f32.mrf.mxu0  ;;  %v13587_v10 = vld [vmem:[%s17257_s7 + $0x38] sm:$0xff]   ;;  %11754 = vmatprep.subr.bf16.mxu1 %v13586_v33 }
 0x558   :  { %v7697_v0 = vadd.f32 %v7650_v60, %v16954_v11  ;;  %v7691_v4 = vpop.f32.mrf.mxu1  ;;  %v13588_v11 = vld [vmem:[%s17257_s7 + $0xb8] sm:$0xff]   ;;  %11733 = vmatpush3.bf16.msra.mxu0 %v13587_v10 }
 0x559   :  { %v7699_v15 = vadd.f32 %v7691_v4, %v16960_v14  ;;  %v7652_v48 = vpop.f32.mrf.mxu0  ;;  %11755 = vmatpush3.bf16.msra.mxu1 %v13588_v11  ;;  %11734 = vmatprep.subr.bf16.mxu0 %v13589_v30  ;;  %v9137_v4 = vsub.s32 2, %v14049_v59 }
 0x55a   :  { %v7693_v50 = vpop.f32.mrf.mxu1  ;;  %11756 = vmatprep.subr.bf16.mxu1 %v13590_v2 }
 0x55b   :  { %v7653_v24 = vpop.f32.mrf.mxu0 }
 0x55c   :  { %v7694_v51 = vpop.f32.mrf.mxu1  ;;  %11735 = vmatpush3.bf16.msra.mxu0 %v13591_v34 }
 0x55d   :  { %11757 = vmatpush3.bf16.msra.mxu1 %v13592_v12  ;;  %11736 = vmatprep.subr.bf16.mxu0 %v13593_v6 }
 0x55e   :  { %11758 = vmatprep.subr.bf16.mxu1 %v13594_v3 }
 0x560   :  { %11737 = vmatpush3.bf16.msra.mxu0 %v13595_v45 }
 0x561   :  { %11759 = vmatpush3.bf16.msra.mxu1 %v13596_v16  ;;  %11738 = vmatprep.subr.bf16.mxu0 %v13597_v17 }
 0x562   :  { %11760 = vmatprep.subr.bf16.mxu1 %v13598_v18 }
 0x564   :  { %11739 = vmatpush3.bf16.msra.mxu0 %v13599_v20 }
 0x565   :  { %11761 = vmatpush3.bf16.msra.mxu1 %v13600_v43  ;;  %11740 = vmatprep.subr.bf16.mxu0 %v13601_v21 }
 0x566   :  { %11762 = vmatprep.subr.bf16.mxu1 %v13602_v44 }
 0x568   :  { %11741 = vmatpush3.bf16.msra.mxu0 %v13603_v22 }
 0x569   :  { %11763 = vmatpush3.bf16.msra.mxu1 %v13604_v46  ;;  %11742 = vmatprep.subr.bf16.mxu0 %v13605_v61 }
 0x56a   :  { %11764 = vmatprep.subr.bf16.mxu1 %v13606_v47 }
 0x56c   :  { %11743 = vmatpush3.bf16.msra.mxu0 %v13607_v49 }
 0x56d   :  { %11765 = vmatpush3.bf16.msra.mxu1 %v13608_v23  ;;  %11744 = vmatprep.subr.bf16.mxu0 %v13609_v52 }
 0x56e   :  { %11766 = vmatprep.subr.bf16.mxu1 %v13610_v56 }
 0x570   :  { %11745 = vmatpush3.bf16.msra.mxu0 %v13611_v31 }
 0x571   :  { %11767 = vmatpush3.bf16.msra.mxu1 %v13612_v29  ;;  %11746 = vmatprep.subr.bf16.mxu0 %v13613_v32 }
 0x572   :  { %11768 = vmatprep.subr.bf16.mxu1 %v13614_v36  ;;  %v11699_v36 = vld [vmem:[%s17258_s8] ss:$0 sm:$0xff] }
 0x574   :  { %11747 = vmatpush3.bf16.msra.mxu0 %v13615_v62 }
 0x575   :  { %11769 = vmatpush3.bf16.msra.mxu1 %v13616_v37 }
 0x595   :  { %v8123_v14 = vpop.f32.mrf.mxu0 }
 0x596   :  { %v17141_v55 = vadd.f32 %v8123_v14, %v7696_v58  ;;  %v8164_v54 = vpop.f32.mrf.mxu1 }
 0x597   :  { %v17143_v8 = vadd.f32 %v8164_v54, %v7698_v57  ;;  %v8125_v25 = vpop.f32.mrf.mxu0 }
 0x598   :  { %v17145_v5 = vadd.f32 %v8125_v25, %v7697_v0  ;;  %v8166_v26 = vpop.f32.mrf.mxu1  ;;  %v9125_v0 = vld [vmem:[%s17256_s6] sm:$0xf] }
 0x599   :  { %v17147_v9 = vadd.f32 %v8166_v26, %v7699_v15  ;;  %v8127_v27 = vpop.f32.mrf.mxu0  ;;  %v9141_v15 = vsub.s32 3, %v14049_v59  ;;  %v9130_v48 = vrot.slane %v9125_v0, %v14055_v63  ;;  %v9138_v24 = vrot.slane %v9125_v0, %v9137_v4 }
 0x59a   :  { %v8168_v13 = vpop.f32.mrf.mxu1  ;;  %v9134_v10 = vrot.slane %v9125_v0, %v14058_v1 }
 0x59b   :  { %v8128_v28 = vpop.f32.mrf.mxu0  ;;  %v9142_v54 = vrot.slane %v9125_v0, %v9141_v15 }
 0x59c   :  { %v8169_v7 = vpop.f32.mrf.mxu1 }
 0x5d5   :  { %v8598_v38 = vpop.f32.mrf.mxu0 }
 0x5d6   :  { %v8646_v40 = vadd.f32 %v8598_v38, %v17141_v55  ;;  %v8639_v39 = vpop.f32.mrf.mxu1 }
 0x5d7   :  { %v8648_v53 = vadd.f32 %v8639_v39, %v17143_v8  ;;  %v8600_v41 = vpop.f32.mrf.mxu0 }
 0x5d8   :  { %v8641_v42 = vpop.f32.mrf.mxu1  ;;  %v8647_v51 = vadd.f32 %v8600_v41, %v17145_v5 }
 0x5d9   :  { %v8602_v58 = vpop.f32.mrf.mxu0  ;;  %v8649_v11 = vadd.f32 %v8641_v42, %v17147_v9 }
 0x5da   :  { %v8643_v19 = vpop.f32.mrf.mxu1 }
 0x5db   :  { %v8603_v57 = vpop.f32.mrf.mxu0 }
 0x5dc   :  { %v8644_v60 = vpop.f32.mrf.mxu1 }
 0x615   :  { %v9073_v50 = vpop.f32.mrf.mxu0 }
 0x616   :  { %v9121_v35 = vadd.f32 %v9073_v50, %v8646_v40  ;;  %v9114_v33 = vpop.f32.mrf.mxu1 }
 0x617   :  { %v9123_v14 = vadd.f32 %v9114_v33, %v8648_v53  ;;  %v9075_v55 = vpop.f32.mrf.mxu0 }
 0x618   :  { %v9147_v8 = vadd.f32 %v9130_v48, %v9121_v35  ;;  %v9122_v25 = vadd.f32 %v9075_v55, %v8647_v51  ;;  %v9116_v26 = vpop.f32.mrf.mxu1 }
 0x619   :  { %v9149_v27 = vadd.f32 %v9138_v24, %v9123_v14  ;;  %v9124_v59 = vadd.f32 %v9116_v26, %v8649_v11  ;;  %v9077_v13 = vpop.f32.mrf.mxu0 }
 0x61a   :  { %v9155_v63 = vmul.f32 0.70710677, %v9147_v8  ;;  %v9148_v28 = vadd.f32 %v9134_v10, %v9122_v25  ;;  %v9118_v7 = vpop.f32.mrf.mxu1  ;;  %v9151_v16 = vmul.f32 0.5, %v9147_v8 }
 0x61b   :  { %v9157_v30 = vmul.f32 0.70710677, %v9149_v27  ;;  %v9150_v5 = vadd.f32 %v9142_v54, %v9124_v59  ;;  %v9078_v2 = vpop.f32.mrf.mxu0  ;;  %v9153_v20 = vmul.f32 0.5, %v9149_v27 }
 0x61c   :  { %13633 = verf.f32 %v9155_v63  ;;  %v9156_v34 = vmul.f32 0.70710677, %v9148_v28  ;;  %v9119_v1 = vpop.f32.mrf.mxu1  ;;  %v9152_v43 = vmul.f32 0.5, %v9148_v28 }
 0x61d   :  { %13635 = verf.f32 %v9157_v30  ;;  %v9158_v9 = vmul.f32 0.70710677, %v9150_v5  ;;  %v9154_v22 = vmul.f32 0.5, %v9150_v5 }
 0x61e   :  { %13637 = verf.f32 %v9156_v34 }
 0x61f   :  { %13639 = verf.f32 %v9158_v9 }
 0x629   :  { %v13634_v12 = vpop.eup %13633 }
 0x62a   :  { %v13636_v6 = vpop.eup %13635  ;;  %v9163_v3 = vadd.f32 1.0, %v13634_v12 }
 0x62b   :  { %v13638_v45 = vpop.eup %13637  ;;  %v9165_v17 = vadd.f32 1.0, %v13636_v6 }
 0x62c   :  { %v13640_v18 = vpop.eup %13639  ;;  %v9164_v21 = vadd.f32 1.0, %v13638_v45  ;;  %v9167_v44 = vmul.f32 %v9163_v3, %v9151_v16 }
 0x62d   :  { %v9166_v46 = vadd.f32 1.0, %v13640_v18  ;;  %v9169_v61 = vmul.f32 %v9165_v17, %v9153_v20 }
 0x62e   :  { %v9168_v47 = vmul.f32 %v9164_v21, %v9152_v43  ;;  %v9171_v52 = vpack.c.bf16 %v9167_v44, %v9167_v44 }
 0x62f   :  { %v9170_v49 = vmul.f32 %v9166_v46, %v9154_v22  ;;  %v9173_v31 = vpack.c.bf16 %v9169_v61, %v9169_v61 }
 0x630   :  { %v9172_v23 = vpack.c.bf16 %v9168_v47, %v9168_v47 }
 0x631   :  { %v9174_v56 = vpack.c.bf16 %v9170_v49, %v9170_v49 }
 0x632   :  { %9470 = vmatprep.mubr.bf16.mxu0 %v9172_v23 }
 0x633   :  { %9510 = vmatprep.mubr.bf16.mxu1 %v9174_v56  ;;  %9471 = vmatmul.mubr.bf16.vlgmr.msra.gmra.mxu0 %v9171_v52 }
 0x634   :  { %9511 = vmatmul.mubr.bf16.vlgmr.msra.gmra.mxu1 %v9173_v31 }
 0x6f3   :  { %v11748_v29 = vpop.f32.mrf.mxu0 }
 0x6f4   :  { %v11770_v32 = vpop.f32.mrf.mxu1 }
 0x6f5   :  { %v11749_v62 = vpop.f32.mrf.mxu0 }
 0x6f6   :  { %v11750_v37 = vadd.f32 %v11749_v62, %v11748_v29  ;;  %v11771_v38 = vpop.f32.mrf.mxu1 }
 0x6f7   :  { %v11751_v40 = vpop.f32.mrf.mxu0  ;;  %v11772_v53 = vadd.f32 %v11771_v38, %v11770_v32 }
 0x6f8   :  { %v9473_v39 = vadd.f32 %v11750_v37, %v11699_v36  ;;  %v11773_v41 = vpop.f32.mrf.mxu1 }
 0x6f9   :  { %v11752_v42 = vpop.f32.mrf.mxu0 }
 0x6fa   :  { %v9513_v58 = vadd.f32 %v11772_v53, %v9473_v39  ;;  %v11774_v19 = vpop.f32.mrf.mxu1 }
 0x6fc   :  { %9519 = vst.msk [vmem:[#allocation5] sm:$0x3] %vm9518_vm0, %v9513_v58 }
 0x6fd   :  { %13672 = shalt.err (!%p13669_p9)
}
 0x6fe   :  { %9529 = dma.vmem_to_hbm [thread:$0]  %s9527_s1, 32, %s17259_s9, [#allocation4]  }
 0x6ff   :  { %13683 = dma.done.wait [#allocation4], 32  }
 0x700   :  { %13684 = vsyncadd [#allocation4], 4294967264 }
 0x701   :  { %9533 = vsyncpa [#allocation3], 1 }
 0x702   :  { %9534 = vsyncpa [#allocation4], 1 }

</bundles_post_ra>
